<compile_context>
chip_gen: v7x
topology: tpu7x:2x2x1
jax: 0.10.0
libtpu: 0.0.40
codegen_flags: <defaults>
</compile_context>

<pallas_src>
import numpy as np
import jax
import jax.numpy as jnp
from jax import lax
from jax.experimental import pallas as pl
from jax.experimental.pallas import tpu as pltpu

# ---------------------------------------------------------------------------
# Static geometry of the PyTorch module (28x28 input implied by fc1 = 64*7*7)
# ---------------------------------------------------------------------------
IMG = 28                       # conv input spatial size
P1 = IMG // 2                  # 14: spatial size after pool1 (= conv2 input)
P2 = P1 // 2                   # 7 : spatial size after pool2
C1, C2 = 32, 64                # conv channel counts
N2 = P2 * P2                   # 49 pixels of the final pooled map
ROWS1 = 16 * P1                # 224: 14 rows x 16 (14 data + 2 zero) columns
K1 = 4 * 9 + 1                 # 37 : 4 pool positions x 9 taps + sentinel lane
SENT = -30000.0                # sentinel weight -> pad rows are 0 after ReLU
BB = 8                         # images per conv grid step (batch blocking)
DSTART = 24                    # per-band data start (>=17 top margin, 8-aligned)
BAND = 272                     # per-image shift-buffer band rows
TAP0 = DSTART - 17             # 7: tap-slice base offset
SHIFTS = tuple(ky * 16 + kx for ky in range(3) for kx in range(3))
GS = 56                        # pool-selection group row stride (49 -> 56)
RS = 4 * GS                    # 224 pool-selection rows


# ---------------------------------------------------------------------------
# Pallas kernels
# ---------------------------------------------------------------------------
def _fused_conv_kernel(p_ref, w1_ref, b1_ref, w2_ref, b2_ref, sel_ref,
                       out_ref, buf_ref):
    """conv1 -> ReLU -> pool -> conv2 -> ReLU -> pool for BB batch elements."""
    # ---- conv1: one stacked matmul for all BB images / 4 pool positions ----
    y = jnp.dot(p_ref[...], w1_ref[...],
                preferred_element_type=jnp.float32)                  # (BB*224,128)
    m1 = jnp.maximum(jnp.maximum(y[:, 0:C1], y[:, C1:2 * C1]),
                     jnp.maximum(y[:, 2 * C1:3 * C1], y[:, 3 * C1:4 * C1]))
    a1 = jnp.maximum(m1 + b1_ref[...], 0.0).astype(jnp.bfloat16)     # (BB*224,32)

    # ---- stage each image into its zero-margined shift-buffer band ---------
    zmargin = jnp.zeros((DSTART, C1), jnp.bfloat16)
    for b in range(BB):                                              # static
        buf_ref[b, 0:DSTART, :] = zmargin                            # top margin
        buf_ref[b, DSTART:DSTART + ROWS1, :] = a1[b * ROWS1:(b + 1) * ROWS1, :]
        buf_ref[b, DSTART + ROWS1:BAND, :] = zmargin                 # bottom margin

    # ---- per image: conv2 (9 shifted taps) then pool (selection matmul) ----
    @pl.loop(0, BB)
    def _(b):
        acc = jnp.zeros((ROWS1, C2), jnp.float32)
        for t, s in enumerate(SHIFTS):                               # static unroll
            acc = acc + jnp.dot(buf_ref[b, TAP0 + s:TAP0 + s + ROWS1, :],
                                w2_ref[t], preferred_element_type=jnp.float32)
        pooled = jnp.dot(sel_ref[...], acc.astype(jnp.bfloat16),
                         preferred_element_type=jnp.float32)         # (224,64)
        m2 = jnp.maximum(
            jnp.maximum(pooled[0 * GS:0 * GS + N2], pooled[1 * GS:1 * GS + N2]),
            jnp.maximum(pooled[2 * GS:2 * GS + N2], pooled[3 * GS:3 * GS + N2]))
        out_ref[b] = jnp.maximum(m2 + b2_ref[...], 0.0).astype(out_ref.dtype)


def _mlp_kernel(x_ref, w1_ref, b1_ref, w2_ref, b2_ref, o_ref):
    # fc1 + ReLU + fc2 fused; bf16 operands, f32 accumulation.
    # TODO(synk): nn.Dropout layers are treated as inference-mode identities.
    h = jnp.dot(x_ref[...], w1_ref[...],
                preferred_element_type=jnp.float32) + b1_ref[...]
    h = jnp.maximum(h, 0.0)
    o_ref[...] = jnp.dot(h.astype(jnp.bfloat16), w2_ref[...],
                         preferred_element_type=jnp.float32) + b2_ref[...]


# ---------------------------------------------------------------------------
# pallas_call wrappers
# ---------------------------------------------------------------------------
def fused_convs(p2d, packed, Bp):
    return pl.pallas_call(
        _fused_conv_kernel,
        out_shape=jax.ShapeDtypeStruct((Bp, N2, C2), jnp.bfloat16),
        grid_spec=pltpu.PrefetchScalarGridSpec(
            num_scalar_prefetch=0,
            grid=(Bp // BB,),                                        # BB images / step
            in_specs=[
                pl.BlockSpec((BB * ROWS1, K1), lambda i: (i, 0)),    # im2col block
                pl.BlockSpec((K1, 4 * C1), lambda i: (0, 0)),        # block-diag w1
                pl.BlockSpec((1, C1), lambda i: (0, 0)),
                pl.BlockSpec((9, C1, C2), lambda i: (0, 0, 0)),
                pl.BlockSpec((1, C2), lambda i: (0, 0)),
                pl.BlockSpec((RS, ROWS1), lambda i: (0, 0)),         # bf16 pool selector
            ],
            out_specs=pl.BlockSpec((BB, N2, C2), lambda i: (i, 0, 0)),
            scratch_shapes=[pltpu.VMEM((BB, BAND, C1), jnp.bfloat16)],
        ),
        compiler_params=pltpu.CompilerParams(
            dimension_semantics=("parallel",)),
    )(p2d, packed["w1blk"], packed["b1"], packed["w2"], packed["b2"],
      packed["pool_sel"])


def mlp_head(x_flat, packed):
    B, F = x_flat.shape
    Hd = packed["fc1_w"].shape[1]
    C = packed["fc2_w"].shape[1]
    tb = 256 if B >= 256 else max(8, ((B + 7) // 8) * 8)
    Bp = ((B + tb - 1) // tb) * tb
    xp = jnp.pad(x_flat, ((0, Bp - B), (0, 0))) if Bp != B else x_flat
    out = pl.pallas_call(
        _mlp_kernel,
        out_shape=jax.ShapeDtypeStruct((Bp, C), jnp.float32),
        grid_spec=pltpu.PrefetchScalarGridSpec(
            num_scalar_prefetch=0,
            grid=(Bp // tb,),
            in_specs=[
                pl.BlockSpec((tb, F), lambda i: (i, 0)),
                pl.BlockSpec((F, Hd), lambda i: (0, 0)),
                pl.BlockSpec((1, Hd), lambda i: (0, 0)),
                pl.BlockSpec((Hd, C), lambda i: (0, 0)),
                pl.BlockSpec((1, C), lambda i: (0, 0)),
            ],
            out_specs=pl.BlockSpec((tb, C), lambda i: (i, 0)),
        ),
        compiler_params=pltpu.CompilerParams(
            dimension_semantics=("parallel",)),
    )(xp, packed["fc1_w"], packed["fc1_b"], packed["fc2_w"], packed["fc2_b"])
    return out[:B]


# ---------------------------------------------------------------------------
# Parameter construction / one-time packing (outside jit)
# ---------------------------------------------------------------------------
def init_params(key, num_classes=5):
    # PyTorch-style uniform(-1/sqrt(fan_in), 1/sqrt(fan_in)) init, deterministic.
    ks = jax.random.split(key, 8)

    def u(k, shape, fan_in):
        bound = 1.0 / float(fan_in) ** 0.5
        return jax.random.uniform(k, shape, jnp.float32, -bound, bound)

    return {
        "conv1_w": u(ks[0], (C1, 1, 3, 3), 1 * 9),
        "conv1_b": u(ks[1], (C1,), 1 * 9),
        "conv2_w": u(ks[2], (C2, C1, 3, 3), C1 * 9),
        "conv2_b": u(ks[3], (C2,), C1 * 9),
        "fc1_w":   u(ks[4], (128, C2 * P2 * P2), C2 * P2 * P2),
        "fc1_b":   u(ks[5], (128,), C2 * P2 * P2),
        "fc2_w":   u(ks[6], (num_classes, 128), 128),
        "fc2_b":   u(ks[7], (num_classes,), 128),
    }


def _pool_sel_constant():
    # 0/1 row-selection matrix implementing the 2x2 max-pool over the 16-stride
    # conv2 output row layout; 4 groups of 49 (padded to 56) rows, max'd later.
    sel = np.zeros((RS, ROWS1), np.float32)
    for g in range(4):
        dy, dx = g // 2, g % 2
        for ph in range(P2):
            for pw in range(P2):
                sel[g * GS + ph * P2 + pw, (2 * ph + dy) * 16 + (2 * pw + dx)] = 1.0
    return jnp.asarray(sel, jnp.bfloat16)


def pack_params(params):
    """Pre-pack torch-layout weights into kernel layouts (runs once, outside jit)."""
    # conv1: block-diagonal (37,128) = 4 lane-group copies of the (9,32) kernel
    # plus a sentinel row that pushes interleaved pad rows to -3e4 (ReLU -> 0).
    w1 = jnp.transpose(params["conv1_w"], (2, 3, 1, 0)).reshape(9, C1)   # [tap, c]
    w1blk = jnp.zeros((K1, 4 * C1), jnp.float32)
    for g in range(4):
        w1blk = w1blk.at[g * 9:(g + 1) * 9, g * C1:(g + 1) * C1].set(w1)
    w1blk = w1blk.at[K1 - 1, :].set(SENT)
    # torch fc1 input features are NCHW-flattened (c,h,w); re-order to (h,w,c)
    fc1 = params["fc1_w"].reshape(128, C2, P2, P2)
    fc1 = jnp.transpose(fc1, (2, 3, 1, 0)).reshape(N2 * C2, 128)
    return {
        "w1blk": w1blk.astype(jnp.bfloat16),
        "b1": params["conv1_b"].reshape(1, C1).astype(jnp.float32),
        "w2": jnp.transpose(params["conv2_w"], (2, 3, 1, 0)).reshape(9, C1, C2).astype(jnp.bfloat16),
        "b2": params["conv2_b"].reshape(1, C2).astype(jnp.float32),
        "fc1_w": fc1.astype(jnp.bfloat16),
        "fc1_b": params["fc1_b"].reshape(1, -1).astype(jnp.float32),
        "fc2_w": jnp.transpose(params["fc2_w"], (1, 0)).astype(jnp.bfloat16),
        "fc2_b": params["fc2_b"].reshape(1, -1).astype(jnp.float32),
        "pool_sel": _pool_sel_constant(),
    }


# ---------------------------------------------------------------------------
# Forward pass
# ---------------------------------------------------------------------------
@jax.jit
def forward(packed, x_nchw):
    B = x_nchw.shape[0]
    assert x_nchw.shape[1:] == (1, IMG, IMG)
    # conv1 im2col on the raw input (cheap XLA glue): pool-grouped, packed along
    # lanes as [pool_pos(4) x tap(9)] + a sentinel lane marking the 2 zero
    # columns interleaved per 14-row run (16-stride row layout).
    x = x_nchw.reshape(B, IMG, IMG)
    xp = jnp.pad(x, ((0, 0), (1, 1), (1, 1)))
    taps = jnp.stack([xp[:, ky:ky + IMG, kx:kx + IMG]
                      for ky in range(3) for kx in range(3)], axis=-1)   # (B,28,28,9)
    t = taps.reshape(B, P1, 2, P1, 2, 9).transpose(0, 1, 3, 2, 4, 5)
    t = t.reshape(B, P1, P1, 36)                                         # lane = g*9+tap
    t = jnp.pad(t, ((0, 0), (0, 0), (0, 2), (0, 0)))                     # (B,14,16,36)
    sent = jnp.zeros((B, P1, 16, 1), t.dtype).at[:, :, P1:, :].set(1.0)
    p = jnp.concatenate([t, sent], axis=-1).reshape(B, ROWS1, K1).astype(jnp.bfloat16)

    Bp = ((B + BB - 1) // BB) * BB                                       # batch blocking
    if Bp != B:
        p = jnp.pad(p, ((0, Bp - B), (0, 0), (0, 0)))
    p2d = p.reshape(Bp * ROWS1, K1)

    a2 = fused_convs(p2d, packed, Bp)[:B]                                # (B,49,64) bf16
    x_flat = a2.reshape(B, N2 * C2)     # free flatten (fc1 weights pre-permuted)
    return mlp_head(x_flat, packed)


# ---------------------------------------------------------------------------
# pure-JAX reference for correctness check
# ---------------------------------------------------------------------------
def forward_ref(params, x_nchw):
    def conv(x, w, b):
        y = lax.conv_general_dilated(x, w, (1, 1), "SAME",
                                     dimension_numbers=("NCHW", "OIHW", "NCHW"))
        return jax.nn.relu(y + b[None, :, None, None])

    def pool(x):
        return lax.reduce_window(x, -jnp.inf, lax.max, (1, 1, 2, 2), (1, 1, 2, 2), "VALID")

    x = pool(conv(x_nchw, params["conv1_w"], params["conv1_b"]))
    x = pool(conv(x, params["conv2_w"], params["conv2_b"]))
    x = x.reshape(x.shape[0], -1)
    x = jax.nn.relu(x @ params["fc1_w"].T + params["fc1_b"])
    return x @ params["fc2_w"].T + params["fc2_b"]


if __name__ == "__main__":
    key = jax.random.PRNGKey(0)
    k_params, k_x = jax.random.split(key)
    params = init_params(k_params, num_classes=5)
    packed = pack_params(params)                      # once, outside jit
    x = jax.random.normal(k_x, (2, 1, IMG, IMG), jnp.float32)

    out = jax.block_until_ready(forward(packed, x))
    assert out.shape == (2, 5), out.shape
    assert bool(jnp.all(jnp.isfinite(out)))

    ref = forward_ref(params, x)
    # bf16 matmul operands and bf16 inter-kernel activations vs f32 reference.
    assert jnp.allclose(out, ref, rtol=2e-2, atol=2e-2), (out, ref)
    print("KERNEL_OK")
</pallas_src>

<mosaic_0001>
module attributes {stable_mosaic.version = 11 : i64} {
  func.func @_fused_conv_kernel(%arg0: i32, %arg1: memref<1792x37xbf16, #tpu.memory_space<vmem>>, %arg2: memref<37x128xbf16, #tpu.memory_space<vmem>>, %arg3: memref<1x32xf32, #tpu.memory_space<vmem>>, %arg4: memref<9x32x64xbf16, #tpu.memory_space<vmem>>, %arg5: memref<1x64xf32, #tpu.memory_space<vmem>>, %arg6: memref<224x224xbf16, #tpu.memory_space<vmem>>, %arg7: memref<8x49x64xbf16, #tpu.memory_space<vmem>>, %arg8: memref<8x272x32xbf16, #tpu.memory_space<vmem>>) attributes {dimension_semantics = [#tpu.dimension_semantics<parallel>], iteration_bounds = array<i64: 1>, scalar_prefetch = 0 : i64, scratch_operands = 1 : i64, tpu.core_type = #tpu.core_type<tc>, window_params = [{transform_indices = @transform_0, window_bounds = array<i64: 1792, 37>}, {pipeline_mode = #tpu.pipeline_mode<synchronous>, transform_indices = @transform_1, window_bounds = array<i64: 37, 128>}, {pipeline_mode = #tpu.pipeline_mode<synchronous>, transform_indices = @transform_2, window_bounds = array<i64: 1, 32>}, {pipeline_mode = #tpu.pipeline_mode<synchronous>, transform_indices = @transform_3, window_bounds = array<i64: 9, 32, 64>}, {pipeline_mode = #tpu.pipeline_mode<synchronous>, transform_indices = @transform_4, window_bounds = array<i64: 1, 64>}, {pipeline_mode = #tpu.pipeline_mode<synchronous>, transform_indices = @transform_5, window_bounds = array<i64: 224, 224>}, {transform_indices = @transform_6, window_bounds = array<i64: 8, 49, 64>}]} {
    %c0 = arith.constant 0 : index
    %c0_0 = arith.constant 0 : index
    %0 = vector.load %arg1[%c0, %c0_0] : memref<1792x37xbf16, #tpu.memory_space<vmem>>, vector<1792x37xbf16>
    %c0_1 = arith.constant 0 : index
    %c0_2 = arith.constant 0 : index
    %1 = vector.load %arg2[%c0_1, %c0_2] : memref<37x128xbf16, #tpu.memory_space<vmem>>, vector<37x128xbf16>
    %cst = arith.constant dense<0.000000e+00> : vector<1792x128xf32>
    %2 = tpu.matmul %0, %1, %cst {dimension_numbers = #tpu.dot_dimension_numbers<[1], [0], [0], [1], [0, 0, 1, 1], [], []>} : vector<1792x37xbf16>, vector<37x128xbf16>, vector<1792x128xf32> -> vector<1792x128xf32>
    %3 = vector.extract_strided_slice %2 {offsets = [0, 0], sizes = [1792, 32], strides = [1, 1]} : vector<1792x128xf32> to vector<1792x32xf32>
    %4 = vector.extract_strided_slice %2 {offsets = [0, 32], sizes = [1792, 32], strides = [1, 1]} : vector<1792x128xf32> to vector<1792x32xf32>
    %5 = arith.maximumf %3, %4 : vector<1792x32xf32>
    %6 = vector.extract_strided_slice %2 {offsets = [0, 64], sizes = [1792, 32], strides = [1, 1]} : vector<1792x128xf32> to vector<1792x32xf32>
    %7 = vector.extract_strided_slice %2 {offsets = [0, 96], sizes = [1792, 32], strides = [1, 1]} : vector<1792x128xf32> to vector<1792x32xf32>
    %8 = arith.maximumf %6, %7 : vector<1792x32xf32>
    %9 = arith.maximumf %5, %8 : vector<1792x32xf32>
    %c0_3 = arith.constant 0 : index
    %c0_4 = arith.constant 0 : index
    %10 = vector.load %arg3[%c0_3, %c0_4] : memref<1x32xf32, #tpu.memory_space<vmem>>, vector<1x32xf32>
    %11 = vector.broadcast %10 : vector<1x32xf32> to vector<1792x32xf32>
    %12 = arith.addf %9, %11 : vector<1792x32xf32>
    %cst_5 = arith.constant 0.000000e+00 : f32
    %13 = vector.broadcast %cst_5 : f32 to vector<1792x32xf32>
    %14 = arith.maximumf %12, %13 : vector<1792x32xf32>
    %15 = arith.truncf %14 : vector<1792x32xf32> to vector<1792x32xbf16>
    %cst_6 = arith.constant 0.000000e+00 : bf16
    %16 = vector.broadcast %cst_6 : bf16 to vector<24x32xbf16>
    %c0_7 = arith.constant 0 : index
    %c0_8 = arith.constant 0 : index
    %c0_9 = arith.constant 0 : index
    %17 = vector.load %arg8[%c0_7, %c0_8, %c0_9] : memref<8x272x32xbf16, #tpu.memory_space<vmem>>, vector<1x24x32xbf16>
    %18 = vector.shape_cast %17 : vector<1x24x32xbf16> to vector<24x32xbf16>
    %19 = vector.shape_cast %16 : vector<24x32xbf16> to vector<1x24x32xbf16>
    tpu.vector_store %arg8[%c0_7, %c0_8, %c0_9], %19 {strides = array<i32>} : memref<8x272x32xbf16, #tpu.memory_space<vmem>>, vector<1x24x32xbf16>,
    %20 = vector.extract_strided_slice %15 {offsets = [0, 0], sizes = [224, 32], strides = [1, 1]} : vector<1792x32xbf16> to vector<224x32xbf16>
    %c0_10 = arith.constant 0 : index
    %c24 = arith.constant 24 : index
    %c0_11 = arith.constant 0 : index
    %21 = vector.load %arg8[%c0_10, %c24, %c0_11] : memref<8x272x32xbf16, #tpu.memory_space<vmem>>, vector<1x224x32xbf16>
    %22 = vector.shape_cast %21 : vector<1x224x32xbf16> to vector<224x32xbf16>
    %23 = vector.shape_cast %20 : vector<224x32xbf16> to vector<1x224x32xbf16>
    tpu.vector_store %arg8[%c0_10, %c24, %c0_11], %23 {strides = array<i32>} : memref<8x272x32xbf16, #tpu.memory_space<vmem>>, vector<1x224x32xbf16>,
    %c0_12 = arith.constant 0 : index
    %c248 = arith.constant 248 : index
    %c0_13 = arith.constant 0 : index
    %24 = vector.load %arg8[%c0_12, %c248, %c0_13] : memref<8x272x32xbf16, #tpu.memory_space<vmem>>, vector<1x24x32xbf16>
    %25 = vector.shape_cast %24 : vector<1x24x32xbf16> to vector<24x32xbf16>
    %26 = vector.shape_cast %16 : vector<24x32xbf16> to vector<1x24x32xbf16>
    tpu.vector_store %arg8[%c0_12, %c248, %c0_13], %26 {strides = array<i32>} : memref<8x272x32xbf16, #tpu.memory_space<vmem>>, vector<1x24x32xbf16>,
    %c1 = arith.constant 1 : index
    %c0_14 = arith.constant 0 : index
    %c0_15 = arith.constant 0 : index
    %27 = vector.load %arg8[%c1, %c0_14, %c0_15] : memref<8x272x32xbf16, #tpu.memory_space<vmem>>, vector<1x24x32xbf16>
    %28 = vector.shape_cast %27 : vector<1x24x32xbf16> to vector<24x32xbf16>
    %29 = vector.shape_cast %16 : vector<24x32xbf16> to vector<1x24x32xbf16>
    tpu.vector_store %arg8[%c1, %c0_14, %c0_15], %29 {strides = array<i32>} : memref<8x272x32xbf16, #tpu.memory_space<vmem>>, vector<1x24x32xbf16>,
    %30 = vector.extract_strided_slice %15 {offsets = [224, 0], sizes = [224, 32], strides = [1, 1]} : vector<1792x32xbf16> to vector<224x32xbf16>
    %c1_16 = arith.constant 1 : index
    %c24_17 = arith.constant 24 : index
    %c0_18 = arith.constant 0 : index
    %31 = vector.load %arg8[%c1_16, %c24_17, %c0_18] : memref<8x272x32xbf16, #tpu.memory_space<vmem>>, vector<1x224x32xbf16>
    %32 = vector.shape_cast %31 : vector<1x224x32xbf16> to vector<224x32xbf16>
    %33 = vector.shape_cast %30 : vector<224x32xbf16> to vector<1x224x32xbf16>
    tpu.vector_store %arg8[%c1_16, %c24_17, %c0_18], %33 {strides = array<i32>} : memref<8x272x32xbf16, #tpu.memory_space<vmem>>, vector<1x224x32xbf16>,
    %c1_19 = arith.constant 1 : index
    %c248_20 = arith.constant 248 : index
    %c0_21 = arith.constant 0 : index
    %34 = vector.load %arg8[%c1_19, %c248_20, %c0_21] : memref<8x272x32xbf16, #tpu.memory_space<vmem>>, vector<1x24x32xbf16>
    %35 = vector.shape_cast %34 : vector<1x24x32xbf16> to vector<24x32xbf16>
    %36 = vector.shape_cast %16 : vector<24x32xbf16> to vector<1x24x32xbf16>
    tpu.vector_store %arg8[%c1_19, %c248_20, %c0_21], %36 {strides = array<i32>} : memref<8x272x32xbf16, #tpu.memory_space<vmem>>, vector<1x24x32xbf16>,
    %c2 = arith.constant 2 : index
    %c0_22 = arith.constant 0 : index
    %c0_23 = arith.constant 0 : index
    %37 = vector.load %arg8[%c2, %c0_22, %c0_23] : memref<8x272x32xbf16, #tpu.memory_space<vmem>>, vector<1x24x32xbf16>
    %38 = vector.shape_cast %37 : vector<1x24x32xbf16> to vector<24x32xbf16>
    %39 = vector.shape_cast %16 : vector<24x32xbf16> to vector<1x24x32xbf16>
    tpu.vector_store %arg8[%c2, %c0_22, %c0_23], %39 {strides = array<i32>} : memref<8x272x32xbf16, #tpu.memory_space<vmem>>, vector<1x24x32xbf16>,
    %40 = vector.extract_strided_slice %15 {offsets = [448, 0], sizes = [224, 32], strides = [1, 1]} : vector<1792x32xbf16> to vector<224x32xbf16>
    %c2_24 = arith.constant 2 : index
    %c24_25 = arith.constant 24 : index
    %c0_26 = arith.constant 0 : index
    %41 = vector.load %arg8[%c2_24, %c24_25, %c0_26] : memref<8x272x32xbf16, #tpu.memory_space<vmem>>, vector<1x224x32xbf16>
    %42 = vector.shape_cast %41 : vector<1x224x32xbf16> to vector<224x32xbf16>
    %43 = vector.shape_cast %40 : vector<224x32xbf16> to vector<1x224x32xbf16>
    tpu.vector_store %arg8[%c2_24, %c24_25, %c0_26], %43 {strides = array<i32>} : memref<8x272x32xbf16, #tpu.memory_space<vmem>>, vector<1x224x32xbf16>,
    %c2_27 = arith.constant 2 : index
    %c248_28 = arith.constant 248 : index
    %c0_29 = arith.constant 0 : index
    %44 = vector.load %arg8[%c2_27, %c248_28, %c0_29] : memref<8x272x32xbf16, #tpu.memory_space<vmem>>, vector<1x24x32xbf16>
    %45 = vector.shape_cast %44 : vector<1x24x32xbf16> to vector<24x32xbf16>
    %46 = vector.shape_cast %16 : vector<24x32xbf16> to vector<1x24x32xbf16>
    tpu.vector_store %arg8[%c2_27, %c248_28, %c0_29], %46 {strides = array<i32>} : memref<8x272x32xbf16, #tpu.memory_space<vmem>>, vector<1x24x32xbf16>,
    %c3 = arith.constant 3 : index
    %c0_30 = arith.constant 0 : index
    %c0_31 = arith.constant 0 : index
    %47 = vector.load %arg8[%c3, %c0_30, %c0_31] : memref<8x272x32xbf16, #tpu.memory_space<vmem>>, vector<1x24x32xbf16>
    %48 = vector.shape_cast %47 : vector<1x24x32xbf16> to vector<24x32xbf16>
    %49 = vector.shape_cast %16 : vector<24x32xbf16> to vector<1x24x32xbf16>
    tpu.vector_store %arg8[%c3, %c0_30, %c0_31], %49 {strides = array<i32>} : memref<8x272x32xbf16, #tpu.memory_space<vmem>>, vector<1x24x32xbf16>,
    %50 = vector.extract_strided_slice %15 {offsets = [672, 0], sizes = [224, 32], strides = [1, 1]} : vector<1792x32xbf16> to vector<224x32xbf16>
    %c3_32 = arith.constant 3 : index
    %c24_33 = arith.constant 24 : index
    %c0_34 = arith.constant 0 : index
    %51 = vector.load %arg8[%c3_32, %c24_33, %c0_34] : memref<8x272x32xbf16, #tpu.memory_space<vmem>>, vector<1x224x32xbf16>
    %52 = vector.shape_cast %51 : vector<1x224x32xbf16> to vector<224x32xbf16>
    %53 = vector.shape_cast %50 : vector<224x32xbf16> to vector<1x224x32xbf16>
    tpu.vector_store %arg8[%c3_32, %c24_33, %c0_34], %53 {strides = array<i32>} : memref<8x272x32xbf16, #tpu.memory_space<vmem>>, vector<1x224x32xbf16>,
    %c3_35 = arith.constant 3 : index
    %c248_36 = arith.constant 248 : index
    %c0_37 = arith.constant 0 : index
    %54 = vector.load %arg8[%c3_35, %c248_36, %c0_37] : memref<8x272x32xbf16, #tpu.memory_space<vmem>>, vector<1x24x32xbf16>
    %55 = vector.shape_cast %54 : vector<1x24x32xbf16> to vector<24x32xbf16>
    %56 = vector.shape_cast %16 : vector<24x32xbf16> to vector<1x24x32xbf16>
    tpu.vector_store %arg8[%c3_35, %c248_36, %c0_37], %56 {strides = array<i32>} : memref<8x272x32xbf16, #tpu.memory_space<vmem>>, vector<1x24x32xbf16>,
    %c4 = arith.constant 4 : index
    %c0_38 = arith.constant 0 : index
    %c0_39 = arith.constant 0 : index
    %57 = vector.load %arg8[%c4, %c0_38, %c0_39] : memref<8x272x32xbf16, #tpu.memory_space<vmem>>, vector<1x24x32xbf16>
    %58 = vector.shape_cast %57 : vector<1x24x32xbf16> to vector<24x32xbf16>
    %59 = vector.shape_cast %16 : vector<24x32xbf16> to vector<1x24x32xbf16>
    tpu.vector_store %arg8[%c4, %c0_38, %c0_39], %59 {strides = array<i32>} : memref<8x272x32xbf16, #tpu.memory_space<vmem>>, vector<1x24x32xbf16>,
    %60 = vector.extract_strided_slice %15 {offsets = [896, 0], sizes = [224, 32], strides = [1, 1]} : vector<1792x32xbf16> to vector<224x32xbf16>
    %c4_40 = arith.constant 4 : index
    %c24_41 = arith.constant 24 : index
    %c0_42 = arith.constant 0 : index
    %61 = vector.load %arg8[%c4_40, %c24_41, %c0_42] : memref<8x272x32xbf16, #tpu.memory_space<vmem>>, vector<1x224x32xbf16>
    %62 = vector.shape_cast %61 : vector<1x224x32xbf16> to vector<224x32xbf16>
    %63 = vector.shape_cast %60 : vector<224x32xbf16> to vector<1x224x32xbf16>
    tpu.vector_store %arg8[%c4_40, %c24_41, %c0_42], %63 {strides = array<i32>} : memref<8x272x32xbf16, #tpu.memory_space<vmem>>, vector<1x224x32xbf16>,
    %c4_43 = arith.constant 4 : index
    %c248_44 = arith.constant 248 : index
    %c0_45 = arith.constant 0 : index
    %64 = vector.load %arg8[%c4_43, %c248_44, %c0_45] : memref<8x272x32xbf16, #tpu.memory_space<vmem>>, vector<1x24x32xbf16>
    %65 = vector.shape_cast %64 : vector<1x24x32xbf16> to vector<24x32xbf16>
    %66 = vector.shape_cast %16 : vector<24x32xbf16> to vector<1x24x32xbf16>
    tpu.vector_store %arg8[%c4_43, %c248_44, %c0_45], %66 {strides = array<i32>} : memref<8x272x32xbf16, #tpu.memory_space<vmem>>, vector<1x24x32xbf16>,
    %c5 = arith.constant 5 : index
    %c0_46 = arith.constant 0 : index
    %c0_47 = arith.constant 0 : index
    %67 = vector.load %arg8[%c5, %c0_46, %c0_47] : memref<8x272x32xbf16, #tpu.memory_space<vmem>>, vector<1x24x32xbf16>
    %68 = vector.shape_cast %67 : vector<1x24x32xbf16> to vector<24x32xbf16>
    %69 = vector.shape_cast %16 : vector<24x32xbf16> to vector<1x24x32xbf16>
    tpu.vector_store %arg8[%c5, %c0_46, %c0_47], %69 {strides = array<i32>} : memref<8x272x32xbf16, #tpu.memory_space<vmem>>, vector<1x24x32xbf16>,
    %70 = vector.extract_strided_slice %15 {offsets = [1120, 0], sizes = [224, 32], strides = [1, 1]} : vector<1792x32xbf16> to vector<224x32xbf16>
    %c5_48 = arith.constant 5 : index
    %c24_49 = arith.constant 24 : index
    %c0_50 = arith.constant 0 : index
    %71 = vector.load %arg8[%c5_48, %c24_49, %c0_50] : memref<8x272x32xbf16, #tpu.memory_space<vmem>>, vector<1x224x32xbf16>
    %72 = vector.shape_cast %71 : vector<1x224x32xbf16> to vector<224x32xbf16>
    %73 = vector.shape_cast %70 : vector<224x32xbf16> to vector<1x224x32xbf16>
    tpu.vector_store %arg8[%c5_48, %c24_49, %c0_50], %73 {strides = array<i32>} : memref<8x272x32xbf16, #tpu.memory_space<vmem>>, vector<1x224x32xbf16>,
    %c5_51 = arith.constant 5 : index
    %c248_52 = arith.constant 248 : index
    %c0_53 = arith.constant 0 : index
    %74 = vector.load %arg8[%c5_51, %c248_52, %c0_53] : memref<8x272x32xbf16, #tpu.memory_space<vmem>>, vector<1x24x32xbf16>
    %75 = vector.shape_cast %74 : vector<1x24x32xbf16> to vector<24x32xbf16>
    %76 = vector.shape_cast %16 : vector<24x32xbf16> to vector<1x24x32xbf16>
    tpu.vector_store %arg8[%c5_51, %c248_52, %c0_53], %76 {strides = array<i32>} : memref<8x272x32xbf16, #tpu.memory_space<vmem>>, vector<1x24x32xbf16>,
    %c6 = arith.constant 6 : index
    %c0_54 = arith.constant 0 : index
    %c0_55 = arith.constant 0 : index
    %77 = vector.load %arg8[%c6, %c0_54, %c0_55] : memref<8x272x32xbf16, #tpu.memory_space<vmem>>, vector<1x24x32xbf16>
    %78 = vector.shape_cast %77 : vector<1x24x32xbf16> to vector<24x32xbf16>
    %79 = vector.shape_cast %16 : vector<24x32xbf16> to vector<1x24x32xbf16>
    tpu.vector_store %arg8[%c6, %c0_54, %c0_55], %79 {strides = array<i32>} : memref<8x272x32xbf16, #tpu.memory_space<vmem>>, vector<1x24x32xbf16>,
    %80 = vector.extract_strided_slice %15 {offsets = [1344, 0], sizes = [224, 32], strides = [1, 1]} : vector<1792x32xbf16> to vector<224x32xbf16>
    %c6_56 = arith.constant 6 : index
    %c24_57 = arith.constant 24 : index
    %c0_58 = arith.constant 0 : index
    %81 = vector.load %arg8[%c6_56, %c24_57, %c0_58] : memref<8x272x32xbf16, #tpu.memory_space<vmem>>, vector<1x224x32xbf16>
    %82 = vector.shape_cast %81 : vector<1x224x32xbf16> to vector<224x32xbf16>
    %83 = vector.shape_cast %80 : vector<224x32xbf16> to vector<1x224x32xbf16>
    tpu.vector_store %arg8[%c6_56, %c24_57, %c0_58], %83 {strides = array<i32>} : memref<8x272x32xbf16, #tpu.memory_space<vmem>>, vector<1x224x32xbf16>,
    %c6_59 = arith.constant 6 : index
    %c248_60 = arith.constant 248 : index
    %c0_61 = arith.constant 0 : index
    %84 = vector.load %arg8[%c6_59, %c248_60, %c0_61] : memref<8x272x32xbf16, #tpu.memory_space<vmem>>, vector<1x24x32xbf16>
    %85 = vector.shape_cast %84 : vector<1x24x32xbf16> to vector<24x32xbf16>
    %86 = vector.shape_cast %16 : vector<24x32xbf16> to vector<1x24x32xbf16>
    tpu.vector_store %arg8[%c6_59, %c248_60, %c0_61], %86 {strides = array<i32>} : memref<8x272x32xbf16, #tpu.memory_space<vmem>>, vector<1x24x32xbf16>,
    %c7 = arith.constant 7 : index
    %c0_62 = arith.constant 0 : index
    %c0_63 = arith.constant 0 : index
    %87 = vector.load %arg8[%c7, %c0_62, %c0_63] : memref<8x272x32xbf16, #tpu.memory_space<vmem>>, vector<1x24x32xbf16>
    %88 = vector.shape_cast %87 : vector<1x24x32xbf16> to vector<24x32xbf16>
    %89 = vector.shape_cast %16 : vector<24x32xbf16> to vector<1x24x32xbf16>
    tpu.vector_store %arg8[%c7, %c0_62, %c0_63], %89 {strides = array<i32>} : memref<8x272x32xbf16, #tpu.memory_space<vmem>>, vector<1x24x32xbf16>,
    %90 = vector.extract_strided_slice %15 {offsets = [1568, 0], sizes = [224, 32], strides = [1, 1]} : vector<1792x32xbf16> to vector<224x32xbf16>
    %c7_64 = arith.constant 7 : index
    %c24_65 = arith.constant 24 : index
    %c0_66 = arith.constant 0 : index
    %91 = vector.load %arg8[%c7_64, %c24_65, %c0_66] : memref<8x272x32xbf16, #tpu.memory_space<vmem>>, vector<1x224x32xbf16>
    %92 = vector.shape_cast %91 : vector<1x224x32xbf16> to vector<224x32xbf16>
    %93 = vector.shape_cast %90 : vector<224x32xbf16> to vector<1x224x32xbf16>
    tpu.vector_store %arg8[%c7_64, %c24_65, %c0_66], %93 {strides = array<i32>} : memref<8x272x32xbf16, #tpu.memory_space<vmem>>, vector<1x224x32xbf16>,
    %c7_67 = arith.constant 7 : index
    %c248_68 = arith.constant 248 : index
    %c0_69 = arith.constant 0 : index
    %94 = vector.load %arg8[%c7_67, %c248_68, %c0_69] : memref<8x272x32xbf16, #tpu.memory_space<vmem>>, vector<1x24x32xbf16>
    %95 = vector.shape_cast %94 : vector<1x24x32xbf16> to vector<24x32xbf16>
    %96 = vector.shape_cast %16 : vector<24x32xbf16> to vector<1x24x32xbf16>
    tpu.vector_store %arg8[%c7_67, %c248_68, %c0_69], %96 {strides = array<i32>} : memref<8x272x32xbf16, #tpu.memory_space<vmem>>, vector<1x24x32xbf16>,
    %c0_i32 = arith.constant 0 : i32
    %c8_i32 = arith.constant 8 : i32
    %97 = arith.addi %c0_i32, %c8_i32 : i32
    %c1_i32 = arith.constant 1 : i32
    scf.for %arg9 = %c0_i32 to %97 step %c1_i32  : i32 {
      %c1_i32_71 = arith.constant 1 : i32
      %98 = arith.muli %arg9, %c1_i32_71 : i32
      %c0_i32_72 = arith.constant 0 : i32
      %99 = arith.addi %c0_i32_72, %98 : i32
      %cst_73 = arith.constant 0.000000e+00 : f32
      %100 = vector.broadcast %cst_73 : f32 to vector<224x64xf32>
      %101 = arith.index_cast %99 : i32 to index
      %c7_74 = arith.constant 7 : index
      %c0_75 = arith.constant 0 : index
      %102 = vector.load %arg8[%101, %c7_74, %c0_75] : memref<8x272x32xbf16, #tpu.memory_space<vmem>>, vector<1x224x32xbf16>
      %103 = vector.shape_cast %102 : vector<1x224x32xbf16> to vector<224x32xbf16>
      %c0_76 = arith.constant 0 : index
      %c0_77 = arith.constant 0 : index
      %c0_78 = arith.constant 0 : index
      %104 = vector.load %arg4[%c0_76, %c0_77, %c0_78] : memref<9x32x64xbf16, #tpu.memory_space<vmem>>, vector<1x32x64xbf16>
      %105 = vector.shape_cast %104 : vector<1x32x64xbf16> to vector<32x64xbf16>
      %cst_79 = arith.constant dense<0.000000e+00> : vector<224x64xf32>
      %106 = tpu.matmul %103, %105, %cst_79 {dimension_numbers = #tpu.dot_dimension_numbers<[1], [0], [0], [1], [0, 0, 1, 1], [], []>} : vector<224x32xbf16>, vector<32x64xbf16>, vector<224x64xf32> -> vector<224x64xf32>
      %107 = arith.addf %100, %106 : vector<224x64xf32>
      %108 = arith.index_cast %99 : i32 to index
      %c8 = arith.constant 8 : index
      %c0_80 = arith.constant 0 : index
      %109 = vector.load %arg8[%108, %c8, %c0_80] : memref<8x272x32xbf16, #tpu.memory_space<vmem>>, vector<1x224x32xbf16>
      %110 = vector.shape_cast %109 : vector<1x224x32xbf16> to vector<224x32xbf16>
      %c1_81 = arith.constant 1 : index
      %c0_82 = arith.constant 0 : index
      %c0_83 = arith.constant 0 : index
      %111 = vector.load %arg4[%c1_81, %c0_82, %c0_83] : memref<9x32x64xbf16, #tpu.memory_space<vmem>>, vector<1x32x64xbf16>
      %112 = vector.shape_cast %111 : vector<1x32x64xbf16> to vector<32x64xbf16>
      %cst_84 = arith.constant dense<0.000000e+00> : vector<224x64xf32>
      %113 = tpu.matmul %110, %112, %cst_84 {dimension_numbers = #tpu.dot_dimension_numbers<[1], [0], [0], [1], [0, 0, 1, 1], [], []>} : vector<224x32xbf16>, vector<32x64xbf16>, vector<224x64xf32> -> vector<224x64xf32>
      %114 = arith.addf %107, %113 : vector<224x64xf32>
      %115 = arith.index_cast %99 : i32 to index
      %c9 = arith.constant 9 : index
      %c0_85 = arith.constant 0 : index
      %116 = vector.load %arg8[%115, %c9, %c0_85] : memref<8x272x32xbf16, #tpu.memory_space<vmem>>, vector<1x224x32xbf16>
      %117 = vector.shape_cast %116 : vector<1x224x32xbf16> to vector<224x32xbf16>
      %c2_86 = arith.constant 2 : index
      %c0_87 = arith.constant 0 : index
      %c0_88 = arith.constant 0 : index
      %118 = vector.load %arg4[%c2_86, %c0_87, %c0_88] : memref<9x32x64xbf16, #tpu.memory_space<vmem>>, vector<1x32x64xbf16>
      %119 = vector.shape_cast %118 : vector<1x32x64xbf16> to vector<32x64xbf16>
      %cst_89 = arith.constant dense<0.000000e+00> : vector<224x64xf32>
      %120 = tpu.matmul %117, %119, %cst_89 {dimension_numbers = #tpu.dot_dimension_numbers<[1], [0], [0], [1], [0, 0, 1, 1], [], []>} : vector<224x32xbf16>, vector<32x64xbf16>, vector<224x64xf32> -> vector<224x64xf32>
      %121 = arith.addf %114, %120 : vector<224x64xf32>
      %122 = arith.index_cast %99 : i32 to index
      %c23 = arith.constant 23 : index
      %c0_90 = arith.constant 0 : index
      %123 = vector.load %arg8[%122, %c23, %c0_90] : memref<8x272x32xbf16, #tpu.memory_space<vmem>>, vector<1x224x32xbf16>
      %124 = vector.shape_cast %123 : vector<1x224x32xbf16> to vector<224x32xbf16>
      %c3_91 = arith.constant 3 : index
      %c0_92 = arith.constant 0 : index
      %c0_93 = arith.constant 0 : index
      %125 = vector.load %arg4[%c3_91, %c0_92, %c0_93] : memref<9x32x64xbf16, #tpu.memory_space<vmem>>, vector<1x32x64xbf16>
      %126 = vector.shape_cast %125 : vector<1x32x64xbf16> to vector<32x64xbf16>
      %cst_94 = arith.constant dense<0.000000e+00> : vector<224x64xf32>
      %127 = tpu.matmul %124, %126, %cst_94 {dimension_numbers = #tpu.dot_dimension_numbers<[1], [0], [0], [1], [0, 0, 1, 1], [], []>} : vector<224x32xbf16>, vector<32x64xbf16>, vector<224x64xf32> -> vector<224x64xf32>
      %128 = arith.addf %121, %127 : vector<224x64xf32>
      %129 = arith.index_cast %99 : i32 to index
      %c24_95 = arith.constant 24 : index
      %c0_96 = arith.constant 0 : index
      %130 = vector.load %arg8[%129, %c24_95, %c0_96] : memref<8x272x32xbf16, #tpu.memory_space<vmem>>, vector<1x224x32xbf16>
      %131 = vector.shape_cast %130 : vector<1x224x32xbf16> to vector<224x32xbf16>
      %c4_97 = arith.constant 4 : index
      %c0_98 = arith.constant 0 : index
      %c0_99 = arith.constant 0 : index
      %132 = vector.load %arg4[%c4_97, %c0_98, %c0_99] : memref<9x32x64xbf16, #tpu.memory_space<vmem>>, vector<1x32x64xbf16>
      %133 = vector.shape_cast %132 : vector<1x32x64xbf16> to vector<32x64xbf16>
      %cst_100 = arith.constant dense<0.000000e+00> : vector<224x64xf32>
      %134 = tpu.matmul %131, %133, %cst_100 {dimension_numbers = #tpu.dot_dimension_numbers<[1], [0], [0], [1], [0, 0, 1, 1], [], []>} : vector<224x32xbf16>, vector<32x64xbf16>, vector<224x64xf32> -> vector<224x64xf32>
      %135 = arith.addf %128, %134 : vector<224x64xf32>
      %136 = arith.index_cast %99 : i32 to index
      %c25 = arith.constant 25 : index
      %c0_101 = arith.constant 0 : index
      %137 = vector.load %arg8[%136, %c25, %c0_101] : memref<8x272x32xbf16, #tpu.memory_space<vmem>>, vector<1x224x32xbf16>
      %138 = vector.shape_cast %137 : vector<1x224x32xbf16> to vector<224x32xbf16>
      %c5_102 = arith.constant 5 : index
      %c0_103 = arith.constant 0 : index
      %c0_104 = arith.constant 0 : index
      %139 = vector.load %arg4[%c5_102, %c0_103, %c0_104] : memref<9x32x64xbf16, #tpu.memory_space<vmem>>, vector<1x32x64xbf16>
      %140 = vector.shape_cast %139 : vector<1x32x64xbf16> to vector<32x64xbf16>
      %cst_105 = arith.constant dense<0.000000e+00> : vector<224x64xf32>
      %141 = tpu.matmul %138, %140, %cst_105 {dimension_numbers = #tpu.dot_dimension_numbers<[1], [0], [0], [1], [0, 0, 1, 1], [], []>} : vector<224x32xbf16>, vector<32x64xbf16>, vector<224x64xf32> -> vector<224x64xf32>
      %142 = arith.addf %135, %141 : vector<224x64xf32>
      %143 = arith.index_cast %99 : i32 to index
      %c39 = arith.constant 39 : index
      %c0_106 = arith.constant 0 : index
      %144 = vector.load %arg8[%143, %c39, %c0_106] : memref<8x272x32xbf16, #tpu.memory_space<vmem>>, vector<1x224x32xbf16>
      %145 = vector.shape_cast %144 : vector<1x224x32xbf16> to vector<224x32xbf16>
      %c6_107 = arith.constant 6 : index
      %c0_108 = arith.constant 0 : index
      %c0_109 = arith.constant 0 : index
      %146 = vector.load %arg4[%c6_107, %c0_108, %c0_109] : memref<9x32x64xbf16, #tpu.memory_space<vmem>>, vector<1x32x64xbf16>
      %147 = vector.shape_cast %146 : vector<1x32x64xbf16> to vector<32x64xbf16>
      %cst_110 = arith.constant dense<0.000000e+00> : vector<224x64xf32>
      %148 = tpu.matmul %145, %147, %cst_110 {dimension_numbers = #tpu.dot_dimension_numbers<[1], [0], [0], [1], [0, 0, 1, 1], [], []>} : vector<224x32xbf16>, vector<32x64xbf16>, vector<224x64xf32> -> vector<224x64xf32>
      %149 = arith.addf %142, %148 : vector<224x64xf32>
      %150 = arith.index_cast %99 : i32 to index
      %c40 = arith.constant 40 : index
      %c0_111 = arith.constant 0 : index
      %151 = vector.load %arg8[%150, %c40, %c0_111] : memref<8x272x32xbf16, #tpu.memory_space<vmem>>, vector<1x224x32xbf16>
      %152 = vector.shape_cast %151 : vector<1x224x32xbf16> to vector<224x32xbf16>
      %c7_112 = arith.constant 7 : index
      %c0_113 = arith.constant 0 : index
      %c0_114 = arith.constant 0 : index
      %153 = vector.load %arg4[%c7_112, %c0_113, %c0_114] : memref<9x32x64xbf16, #tpu.memory_space<vmem>>, vector<1x32x64xbf16>
      %154 = vector.shape_cast %153 : vector<1x32x64xbf16> to vector<32x64xbf16>
      %cst_115 = arith.constant dense<0.000000e+00> : vector<224x64xf32>
      %155 = tpu.matmul %152, %154, %cst_115 {dimension_numbers = #tpu.dot_dimension_numbers<[1], [0], [0], [1], [0, 0, 1, 1], [], []>} : vector<224x32xbf16>, vector<32x64xbf16>, vector<224x64xf32> -> vector<224x64xf32>
      %156 = arith.addf %149, %155 : vector<224x64xf32>
      %157 = arith.index_cast %99 : i32 to index
      %c41 = arith.constant 41 : index
      %c0_116 = arith.constant 0 : index
      %158 = vector.load %arg8[%157, %c41, %c0_116] : memref<8x272x32xbf16, #tpu.memory_space<vmem>>, vector<1x224x32xbf16>
      %159 = vector.shape_cast %158 : vector<1x224x32xbf16> to vector<224x32xbf16>
      %c8_117 = arith.constant 8 : index
      %c0_118 = arith.constant 0 : index
      %c0_119 = arith.constant 0 : index
      %160 = vector.load %arg4[%c8_117, %c0_118, %c0_119] : memref<9x32x64xbf16, #tpu.memory_space<vmem>>, vector<1x32x64xbf16>
      %161 = vector.shape_cast %160 : vector<1x32x64xbf16> to vector<32x64xbf16>
      %cst_120 = arith.constant dense<0.000000e+00> : vector<224x64xf32>
      %162 = tpu.matmul %159, %161, %cst_120 {dimension_numbers = #tpu.dot_dimension_numbers<[1], [0], [0], [1], [0, 0, 1, 1], [], []>} : vector<224x32xbf16>, vector<32x64xbf16>, vector<224x64xf32> -> vector<224x64xf32>
      %163 = arith.addf %156, %162 : vector<224x64xf32>
      %c0_121 = arith.constant 0 : index
      %c0_122 = arith.constant 0 : index
      %164 = vector.load %arg6[%c0_121, %c0_122] : memref<224x224xbf16, #tpu.memory_space<vmem>>, vector<224x224xbf16>
      %165 = arith.truncf %163 : vector<224x64xf32> to vector<224x64xbf16>
      %cst_123 = arith.constant dense<0.000000e+00> : vector<224x64xf32>
      %166 = tpu.matmul %164, %165, %cst_123 {dimension_numbers = #tpu.dot_dimension_numbers<[1], [0], [0], [1], [0, 0, 1, 1], [], []>} : vector<224x224xbf16>, vector<224x64xbf16>, vector<224x64xf32> -> vector<224x64xf32>
      %167 = vector.extract_strided_slice %166 {offsets = [0, 0], sizes = [49, 64], strides = [1, 1]} : vector<224x64xf32> to vector<49x64xf32>
      %168 = vector.extract_strided_slice %166 {offsets = [56, 0], sizes = [49, 64], strides = [1, 1]} : vector<224x64xf32> to vector<49x64xf32>
      %169 = arith.maximumf %167, %168 : vector<49x64xf32>
      %170 = vector.extract_strided_slice %166 {offsets = [112, 0], sizes = [49, 64], strides = [1, 1]} : vector<224x64xf32> to vector<49x64xf32>
      %171 = vector.extract_strided_slice %166 {offsets = [168, 0], sizes = [49, 64], strides = [1, 1]} : vector<224x64xf32> to vector<49x64xf32>
      %172 = arith.maximumf %170, %171 : vector<49x64xf32>
      %173 = arith.maximumf %169, %172 : vector<49x64xf32>
      %c0_124 = arith.constant 0 : index
      %c0_125 = arith.constant 0 : index
      %174 = vector.load %arg5[%c0_124, %c0_125] : memref<1x64xf32, #tpu.memory_space<vmem>>, vector<1x64xf32>
      %175 = vector.broadcast %174 : vector<1x64xf32> to vector<49x64xf32>
      %176 = arith.addf %173, %175 : vector<49x64xf32>
      %cst_126 = arith.constant 0.000000e+00 : f32
      %177 = vector.broadcast %cst_126 : f32 to vector<49x64xf32>
      %178 = arith.maximumf %176, %177 : vector<49x64xf32>
      %179 = arith.truncf %178 : vector<49x64xf32> to vector<49x64xbf16>
      %180 = arith.index_cast %99 : i32 to index
      %c0_127 = arith.constant 0 : index
      %c0_128 = arith.constant 0 : index
      %181 = vector.load %arg7[%180, %c0_127, %c0_128] : memref<8x49x64xbf16, #tpu.memory_space<vmem>>, vector<1x49x64xbf16>
      %182 = vector.shape_cast %181 : vector<1x49x64xbf16> to vector<49x64xbf16>
      %183 = vector.shape_cast %179 : vector<49x64xbf16> to vector<1x49x64xbf16>
      tpu.vector_store %arg7[%180, %c0_127, %c0_128], %183 {strides = array<i32>} : memref<8x49x64xbf16, #tpu.memory_space<vmem>>, vector<1x49x64xbf16>,
    }
    %c8_i32_70 = arith.constant 8 : i32
    return
  }
  func.func @transform_0(%arg0: i32) -> (i32, i32) {
    %c0_i32 = arith.constant 0 : i32
    %c0_i32_0 = arith.constant 0 : i32
    return %arg0, %c0_i32 : i32, i32
  }
  func.func @transform_1(%arg0: i32) -> (i32, i32) {
    %c0_i32 = arith.constant 0 : i32
    %c0_i32_0 = arith.constant 0 : i32
    %c0_i32_1 = arith.constant 0 : i32
    return %c0_i32, %c0_i32_0 : i32, i32
  }
  func.func @transform_2(%arg0: i32) -> (i32, i32) {
    %c0_i32 = arith.constant 0 : i32
    %c0_i32_0 = arith.constant 0 : i32
    %c0_i32_1 = arith.constant 0 : i32
    return %c0_i32, %c0_i32_0 : i32, i32
  }
  func.func @transform_3(%arg0: i32) -> (i32, i32, i32) {
    %c0_i32 = arith.constant 0 : i32
    %c0_i32_0 = arith.constant 0 : i32
    %c0_i32_1 = arith.constant 0 : i32
    %c0_i32_2 = arith.constant 0 : i32
    return %c0_i32, %c0_i32_0, %c0_i32_1 : i32, i32, i32
  }
  func.func @transform_4(%arg0: i32) -> (i32, i32) {
    %c0_i32 = arith.constant 0 : i32
    %c0_i32_0 = arith.constant 0 : i32
    %c0_i32_1 = arith.constant 0 : i32
    return %c0_i32, %c0_i32_0 : i32, i32
  }
  func.func @transform_5(%arg0: i32) -> (i32, i32) {
    %c0_i32 = arith.constant 0 : i32
    %c0_i32_0 = arith.constant 0 : i32
    %c0_i32_1 = arith.constant 0 : i32
    return %c0_i32, %c0_i32_0 : i32, i32
  }
  func.func @transform_6(%arg0: i32) -> (i32, i32, i32) {
    %c0_i32 = arith.constant 0 : i32
    %c0_i32_0 = arith.constant 0 : i32
    %c0_i32_1 = arith.constant 0 : i32
    return %arg0, %c0_i32, %c0_i32_0 : i32, i32, i32
  }
}

module attributes {stable_mosaic.version = 11 : i64} {
  func.func @_mlp_kernel(%arg0: i32, %arg1: memref<8x3136xbf16, #tpu.memory_space<vmem>>, %arg2: memref<3136x128xbf16, #tpu.memory_space<vmem>>, %arg3: memref<1x128xf32, #tpu.memory_space<vmem>>, %arg4: memref<128x5xbf16, #tpu.memory_space<vmem>>, %arg5: memref<1x5xf32, #tpu.memory_space<vmem>>, %arg6: memref<8x5xf32, #tpu.memory_space<vmem>>) attributes {dimension_semantics = [#tpu.dimension_semantics<parallel>], iteration_bounds = array<i64: 1>, scalar_prefetch = 0 : i64, scratch_operands = 0 : i64, tpu.core_type = #tpu.core_type<tc>, window_params = [{transform_indices = @transform_0, window_bounds = array<i64: 8, 3136>}, {pipeline_mode = #tpu.pipeline_mode<synchronous>, transform_indices = @transform_1, window_bounds = array<i64: 3136, 128>}, {pipeline_mode = #tpu.pipeline_mode<synchronous>, transform_indices = @transform_2, window_bounds = array<i64: 1, 128>}, {pipeline_mode = #tpu.pipeline_mode<synchronous>, transform_indices = @transform_3, window_bounds = array<i64: 128, 5>}, {pipeline_mode = #tpu.pipeline_mode<synchronous>, transform_indices = @transform_4, window_bounds = array<i64: 1, 5>}, {transform_indices = @transform_5, window_bounds = array<i64: 8, 5>}]} {
    %c0 = arith.constant 0 : index
    %c0_0 = arith.constant 0 : index
    %0 = vector.load %arg1[%c0, %c0_0] : memref<8x3136xbf16, #tpu.memory_space<vmem>>, vector<8x3136xbf16>
    %c0_1 = arith.constant 0 : index
    %c0_2 = arith.constant 0 : index
    %1 = vector.load %arg2[%c0_1, %c0_2] : memref<3136x128xbf16, #tpu.memory_space<vmem>>, vector<3136x128xbf16>
    %cst = arith.constant dense<0.000000e+00> : vector<8x128xf32>
    %2 = tpu.matmul %0, %1, %cst {dimension_numbers = #tpu.dot_dimension_numbers<[1], [0], [0], [1], [0, 0, 1, 1], [], []>} : vector<8x3136xbf16>, vector<3136x128xbf16>, vector<8x128xf32> -> vector<8x128xf32>
    %c0_3 = arith.constant 0 : index
    %c0_4 = arith.constant 0 : index
    %3 = vector.load %arg3[%c0_3, %c0_4] : memref<1x128xf32, #tpu.memory_space<vmem>>, vector<1x128xf32>
    %4 = vector.broadcast %3 : vector<1x128xf32> to vector<8x128xf32>
    %5 = arith.addf %2, %4 : vector<8x128xf32>
    %cst_5 = arith.constant 0.000000e+00 : f32
    %6 = vector.broadcast %cst_5 : f32 to vector<8x128xf32>
    %7 = arith.maximumf %5, %6 : vector<8x128xf32>
    %8 = arith.truncf %7 : vector<8x128xf32> to vector<8x128xbf16>
    %c0_6 = arith.constant 0 : index
    %c0_7 = arith.constant 0 : index
    %9 = vector.load %arg4[%c0_6, %c0_7] : memref<128x5xbf16, #tpu.memory_space<vmem>>, vector<128x5xbf16>
    %cst_8 = arith.constant dense<0.000000e+00> : vector<8x5xf32>
    %10 = tpu.matmul %8, %9, %cst_8 {dimension_numbers = #tpu.dot_dimension_numbers<[1], [0], [0], [1], [0, 0, 1, 1], [], []>} : vector<8x128xbf16>, vector<128x5xbf16>, vector<8x5xf32> -> vector<8x5xf32>
    %c0_9 = arith.constant 0 : index
    %c0_10 = arith.constant 0 : index
    %11 = vector.load %arg5[%c0_9, %c0_10] : memref<1x5xf32, #tpu.memory_space<vmem>>, vector<1x5xf32>
    %12 = vector.broadcast %11 : vector<1x5xf32> to vector<8x5xf32>
    %13 = arith.addf %10, %12 : vector<8x5xf32>
    %c0_11 = arith.constant 0 : index
    %c0_12 = arith.constant 0 : index
    %14 = vector.load %arg6[%c0_11, %c0_12] : memref<8x5xf32, #tpu.memory_space<vmem>>, vector<8x5xf32>
    tpu.vector_store %arg6[%c0_11, %c0_12], %13 {strides = array<i32>} : memref<8x5xf32, #tpu.memory_space<vmem>>, vector<8x5xf32>,
    return
  }
  func.func @transform_0(%arg0: i32) -> (i32, i32) {
    %c0_i32 = arith.constant 0 : i32
    %c0_i32_0 = arith.constant 0 : i32
    return %arg0, %c0_i32 : i32, i32
  }
  func.func @transform_1(%arg0: i32) -> (i32, i32) {
    %c0_i32 = arith.constant 0 : i32
    %c0_i32_0 = arith.constant 0 : i32
    %c0_i32_1 = arith.constant 0 : i32
    return %c0_i32, %c0_i32_0 : i32, i32
  }
  func.func @transform_2(%arg0: i32) -> (i32, i32) {
    %c0_i32 = arith.constant 0 : i32
    %c0_i32_0 = arith.constant 0 : i32
    %c0_i32_1 = arith.constant 0 : i32
    return %c0_i32, %c0_i32_0 : i32, i32
  }
  func.func @transform_3(%arg0: i32) -> (i32, i32) {
    %c0_i32 = arith.constant 0 : i32
    %c0_i32_0 = arith.constant 0 : i32
    %c0_i32_1 = arith.constant 0 : i32
    return %c0_i32, %c0_i32_0 : i32, i32
  }
  func.func @transform_4(%arg0: i32) -> (i32, i32) {
    %c0_i32 = arith.constant 0 : i32
    %c0_i32_0 = arith.constant 0 : i32
    %c0_i32_1 = arith.constant 0 : i32
    return %c0_i32, %c0_i32_0 : i32, i32
  }
  func.func @transform_5(%arg0: i32) -> (i32, i32) {
    %c0_i32 = arith.constant 0 : i32
    %c0_i32_0 = arith.constant 0 : i32
    return %arg0, %c0_i32 : i32, i32
  }
}

</mosaic_0001>

<bundles_post_ra>
// kernel: forward.3
= control target key start
LH: loop header
LB: loop body
LE: loop exit
PB: predicated region body
PF: predicated region fallthrough
CT: control target
= control target key end

     0   :  { %vm3113_vm0 = vmmov 0   ;;  %vm1696_vm1 = vcmask 523264   ;;  %vm2333_vm2 = vcmask 39936   ;;  %s3818_s1 = inlined_call_operand.vmem [shape: bf16[3136,128], index: 1, kind: input, shape index: {}]   ;;  %s3819_s0 = inlined_call_operand.vmem [shape: bf16[8,3136], index: 0, kind: input, shape index: {}]   ;;  %s3820_s2 = inlined_call_operand.vmem [shape: f32[1,128], index: 2, kind: input, shape index: {}]   ;;  %s3821_s3 = inlined_call_operand.vmem [shape: bf16[128,5], index: 3, kind: input, shape index: {}]   ;;  %s3822_s4 = inlined_call_operand.vmem [shape: f32[1,5], index: 4, kind: input, shape index: {}]   ;;  %s3823_s5 = inlined_call_operand.vmem [shape: f32[8,5], index: 5, kind: output, shape index: {}]  }
   0x1   :  { %v2883_v0 = vld [vmem:[%s3818_s1 + $0x40] sm:$0xff]   ;;  %v2887_v4 = vld [vmem:[%s3818_s1 + $0x48] sm:$0xff]   ;;  %v2891_v8 = vld [vmem:[%s3818_s1 + $0x50] sm:$0xff]  }
   0x2   :  { %v2884_v1 = vld [vmem:[%s3818_s1] sm:$0xff]   ;;  %2571 = vmatprep.subr.bf16.mxu0 %v2883_v0  ;;  %v2888_v5 = vld [vmem:[%s3818_s1 + $0x8] sm:$0xff]   ;;  %v2892_v9 = vld [vmem:[%s3818_s1 + $0x10] sm:$0xff]  }
   0x3   :  { %v2885_v2 = vld [vmem:[%s3818_s1 + $0xc0] sm:$0xff]   ;;  %2572 = vmatpush3.bf16.msra.mxu0 %v2884_v1  ;;  %v2889_v6 = vld [vmem:[%s3818_s1 + $0xc8] sm:$0xff]   ;;  %v2893_v10 = vld [vmem:[%s3818_s1 + $0xd0] sm:$0xff]  }
   0x4   :  { %v2886_v3 = vld [vmem:[%s3818_s1 + $0x80] sm:$0xff]   ;;  %2593 = vmatprep.subr.bf16.mxu1 %v2885_v2  ;;  %2573 = vmatprep.subr.bf16.mxu0 %v2887_v4  ;;  %v2890_v7 = vld [vmem:[%s3818_s1 + $0x88] sm:$0xff]   ;;  %v2894_v11 = vld [vmem:[%s3818_s1 + $0x90] sm:$0xff]  }
   0x5   :  { %2594 = vmatpush3.bf16.msra.mxu1 %v2886_v3  ;;  %v2895_v12 = vld [vmem:[%s3818_s1 + $0x58] sm:$0xff]   ;;  %v2899_v16 = vld [vmem:[%s3818_s1 + $0x60] sm:$0xff]   ;;  %v2903_v20 = vld [vmem:[%s3818_s1 + $0x68] sm:$0xff]  }
   0x6   :  { %2595 = vmatprep.subr.bf16.mxu1 %v2889_v6  ;;  %v2896_v13 = vld [vmem:[%s3818_s1 + $0x18] sm:$0xff]   ;;  %v2900_v17 = vld [vmem:[%s3818_s1 + $0x20] sm:$0xff]   ;;  %v2904_v21 = vld [vmem:[%s3818_s1 + $0x28] sm:$0xff]  }
   0x7   :  { %2574 = vmatpush3.bf16.msra.mxu0 %v2888_v5  ;;  %v2897_v14 = vld [vmem:[%s3818_s1 + $0xd8] sm:$0xff]   ;;  %v2901_v18 = vld [vmem:[%s3818_s1 + $0xe0] sm:$0xff]   ;;  %v2905_v22 = vld [vmem:[%s3818_s1 + $0xe8] sm:$0xff]  }
   0x8   :  { %2575 = vmatprep.subr.bf16.mxu0 %v2891_v8  ;;  %v2898_v15 = vld [vmem:[%s3818_s1 + $0x98] sm:$0xff]   ;;  %v2902_v19 = vld [vmem:[%s3818_s1 + $0xa0] sm:$0xff]   ;;  %v2906_v23 = vld [vmem:[%s3818_s1 + $0xa8] sm:$0xff]  }
   0x9   :  { %2596 = vmatpush3.bf16.msra.mxu1 %v2890_v7  ;;  %v2907_v24 = vld [vmem:[%s3818_s1 + $0x70] sm:$0xff]   ;;  %v2911_v28 = vld [vmem:[%s3818_s1 + $0x78] sm:$0xff]   ;;  %v21_v31 = vld [vmem:[%s3819_s0] sm:$0xff] }
   0xa   :  { %2597 = vmatprep.subr.bf16.mxu1 %v2893_v10  ;;  %v2908_v25 = vld [vmem:[%s3818_s1 + $0x30] sm:$0xff]   ;;  %v2912_v29 = vld [vmem:[%s3818_s1 + $0x38] sm:$0xff]   ;;  %v2340_v32 = vcombine.low %v21_v31, %v21_v31  ;;  %v2341_v33 = vcombine.high %v21_v31, %v21_v31  ;;  %v2917_v35 = vld [vmem:[%s3818_s1 + $0x140] sm:$0xff]  }
   0xb   :  { %2576 = vmatpush3.bf16.msra.mxu0 %v2892_v9  ;;  %v2909_v26 = vld [vmem:[%s3818_s1 + $0xf0] sm:$0xff]   ;;  %v2913_v30 = vld [vmem:[%s3818_s1 + $0xf8] sm:$0xff]   ;;  %v22_v36 = vld [vmem:[%s3819_s0 + $0x8] sm:$0xff] }
   0xc   :  { %2577 = vmatprep.subr.bf16.mxu0 %v2895_v12  ;;  %v2910_v27 = vld [vmem:[%s3818_s1 + $0xb0] sm:$0xff]   ;;  %v2916_v34 = vld [vmem:[%s3818_s1 + $0xb8] sm:$0xff]   ;;  %1732 = vmatprep.mubr.bf16.mxu0 %v2341_v33  ;;  %v2342_v37 = vcombine.low %v22_v36, %v22_v36  ;;  %v2343_v38 = vcombine.high %v22_v36, %v22_v36  ;;  %v2920_v39 = vld [vmem:[%s3818_s1 + $0x100] sm:$0xff]  }
   0xd   :  { %2598 = vmatpush3.bf16.msra.mxu1 %v2894_v11  ;;  %v2921_v40 = vld [vmem:[%s3818_s1 + $0x1c0] sm:$0xff]   ;;  %v2923_v42 = vld [vmem:[%s3818_s1 + $0x148] sm:$0xff]   ;;  %v2927_v46 = vld [vmem:[%s3818_s1 + $0x150] sm:$0xff]  }
   0xe   :  { %2599 = vmatprep.subr.bf16.mxu1 %v2897_v14  ;;  %1772 = vmatprep.mubr.bf16.mxu1 %v2343_v38  ;;  %v2922_v41 = vld [vmem:[%s3818_s1 + $0x180] sm:$0xff]   ;;  %v2924_v43 = vld [vmem:[%s3818_s1 + $0x108] sm:$0xff]   ;;  %v2928_v47 = vld [vmem:[%s3818_s1 + $0x110] sm:$0xff]  }
   0xf   :  { %2578 = vmatpush3.bf16.msra.mxu0 %v2896_v13  ;;  %v2925_v44 = vld [vmem:[%s3818_s1 + $0x1c8] sm:$0xff]   ;;  %v2929_v48 = vld [vmem:[%s3818_s1 + $0x1d0] sm:$0xff]   ;;  %v2931_v50 = vld [vmem:[%s3818_s1 + $0x158] sm:$0xff]  }
  0x10   :  { %2579 = vmatprep.subr.bf16.mxu0 %v2899_v16  ;;  %v2926_v45 = vld [vmem:[%s3818_s1 + $0x188] sm:$0xff]   ;;  %v2930_v49 = vld [vmem:[%s3818_s1 + $0x190] sm:$0xff]   ;;  %v2932_v51 = vld [vmem:[%s3818_s1 + $0x118] sm:$0xff]  }
  0x11   :  { %2600 = vmatpush3.bf16.msra.mxu1 %v2898_v15  ;;  %v2933_v52 = vld [vmem:[%s3818_s1 + $0x1d8] sm:$0xff]   ;;  %v2935_v54 = vld [vmem:[%s3818_s1 + $0x160] sm:$0xff]   ;;  %v2939_v58 = vld [vmem:[%s3818_s1 + $0x168] sm:$0xff]  }
  0x12   :  { %2601 = vmatprep.subr.bf16.mxu1 %v2901_v18  ;;  %v2934_v53 = vld [vmem:[%s3818_s1 + $0x198] sm:$0xff]   ;;  %v2936_v55 = vld [vmem:[%s3818_s1 + $0x120] sm:$0xff]   ;;  %v2940_v59 = vld [vmem:[%s3818_s1 + $0x128] sm:$0xff]  }
  0x13   :  { %2580 = vmatpush3.bf16.msra.mxu0 %v2900_v17  ;;  %v2937_v56 = vld [vmem:[%s3818_s1 + $0x1e0] sm:$0xff]   ;;  %v2941_v60 = vld [vmem:[%s3818_s1 + $0x1e8] sm:$0xff]   ;;  %v2943_v62 = vld [vmem:[%s3818_s1 + $0x170] sm:$0xff]  }
  0x14   :  { %2581 = vmatprep.subr.bf16.mxu0 %v2903_v20  ;;  %v2938_v57 = vld [vmem:[%s3818_s1 + $0x1a0] sm:$0xff]   ;;  %v2942_v61 = vld [vmem:[%s3818_s1 + $0x1a8] sm:$0xff]   ;;  %v2944_v63 = vld [vmem:[%s3818_s1 + $0x130] sm:$0xff]  }
  0x15   :  { %2602 = vmatpush3.bf16.msra.mxu1 %v2902_v19  ;;  %v2945_v0 = vld [vmem:[%s3818_s1 + $0x1f0] sm:$0xff]   ;;  %v2947_v2 = vld [vmem:[%s3818_s1 + $0x178] sm:$0xff]   ;;  %v2953_v9 = vld [vmem:[%s3818_s1 + $0x240] sm:$0xff]  }
  0x16   :  { %2603 = vmatprep.subr.bf16.mxu1 %v2905_v22  ;;  %v2946_v1 = vld [vmem:[%s3818_s1 + $0x1b0] sm:$0xff]   ;;  %v2948_v3 = vld [vmem:[%s3818_s1 + $0x138] sm:$0xff]   ;;  %v2956_v13 = vld [vmem:[%s3818_s1 + $0x200] sm:$0xff]  }
  0x17   :  { %2582 = vmatpush3.bf16.msra.mxu0 %v2904_v21  ;;  %v2949_v4 = vld [vmem:[%s3818_s1 + $0x1f8] sm:$0xff]   ;;  %v23_v5 = vld [vmem:[%s3819_s0 + $0x10] sm:$0xff]  ;;  %v2957_v14 = vld [vmem:[%s3818_s1 + $0x2c0] sm:$0xff]  }
  0x18   :  { %2583 = vmatprep.subr.bf16.mxu0 %v2907_v24  ;;  %v2344_v6 = vcombine.low %v23_v5, %v23_v5  ;;  %v2345_v7 = vcombine.high %v23_v5, %v23_v5  ;;  %v2952_v8 = vld [vmem:[%s3818_s1 + $0x1b8] sm:$0xff]   ;;  %v2958_v15 = vld [vmem:[%s3818_s1 + $0x280] sm:$0xff]   ;;  %v2959_v16 = vld [vmem:[%s3818_s1 + $0x248] sm:$0xff]  }
  0x19   :  { %2604 = vmatpush3.bf16.msra.mxu1 %v2906_v23  ;;  %v24_v10 = vld [vmem:[%s3819_s0 + $0x18] sm:$0xff]  ;;  %v2960_v17 = vld [vmem:[%s3818_s1 + $0x208] sm:$0xff]   ;;  %v2963_v20 = vld [vmem:[%s3818_s1 + $0x250] sm:$0xff]  }
  0x1a   :  { %2605 = vmatprep.subr.bf16.mxu1 %v2909_v26  ;;  %v2346_v11 = vcombine.low %v24_v10, %v24_v10  ;;  %v2347_v12 = vcombine.high %v24_v10, %v24_v10  ;;  %v2961_v18 = vld [vmem:[%s3818_s1 + $0x2c8] sm:$0xff]   ;;  %v2964_v21 = vld [vmem:[%s3818_s1 + $0x210] sm:$0xff]   ;;  %v2967_v24 = vld [vmem:[%s3818_s1 + $0x258] sm:$0xff]  }
  0x1b   :  { %2584 = vmatpush3.bf16.msra.mxu0 %v2908_v25  ;;  %v2962_v19 = vld [vmem:[%s3818_s1 + $0x288] sm:$0xff]   ;;  %v2965_v22 = vld [vmem:[%s3818_s1 + $0x2d0] sm:$0xff]   ;;  %v2968_v25 = vld [vmem:[%s3818_s1 + $0x218] sm:$0xff]  }
  0x1c   :  { %2585 = vmatprep.subr.bf16.mxu0 %v2911_v28  ;;  %v2966_v23 = vld [vmem:[%s3818_s1 + $0x290] sm:$0xff]   ;;  %v2969_v26 = vld [vmem:[%s3818_s1 + $0x2d8] sm:$0xff]   ;;  %v2971_v28 = vld [vmem:[%s3818_s1 + $0x260] sm:$0xff]  }
  0x1d   :  { %2606 = vmatpush3.bf16.msra.mxu1 %v2910_v27  ;;  %v2970_v27 = vld [vmem:[%s3818_s1 + $0x298] sm:$0xff]   ;;  %v2974_v31 = vld [vmem:[%s3818_s1 + $0x2a0] sm:$0xff]   ;;  %v2976_v33 = vld [vmem:[%s3818_s1 + $0x228] sm:$0xff]  }
  0x1e   :  { %2607 = vmatprep.subr.bf16.mxu1 %v2913_v30  ;;  %v2973_v30 = vld [vmem:[%s3818_s1 + $0x2e0] sm:$0xff]   ;;  %v2979_v36 = vld [vmem:[%s3818_s1 + $0x270] sm:$0xff]  }
  0x1f   :  { %2586 = vmatpush3.bf16.msra.mxu0 %v2912_v29  ;;  %v2972_v29 = vld [vmem:[%s3818_s1 + $0x220] sm:$0xff]   ;;  %v2981_v38 = vld [vmem:[%s3818_s1 + $0x2f0] sm:$0xff]  }
  0x20   :  { %2615 = vmatprep.subr.bf16.mxu0 %v2917_v35  ;;  %v2978_v35 = vld [vmem:[%s3818_s1 + $0x2a8] sm:$0xff]   ;;  %v3010_v5 = vld [vmem:[%s3818_s1 + $0x3a0] sm:$0xff]   ;;  %v3015_v10 = vld [vmem:[%s3818_s1 + $0x370] sm:$0xff]  }
  0x21   :  { %2608 = vmatpush3.bf16.msra.mxu1 %v2916_v34  ;;  %v2977_v34 = vld [vmem:[%s3818_s1 + $0x2e8] sm:$0xff]  }
  0x22   :  { %1733 = vmatmul.mubr.bf16.vlgmr.msra.gmra.mrb[0].mxu0 %v2340_v32  ;;  %2637 = vmatprep.subr.bf16.mxu1 %v2921_v40  ;;  %v2975_v32 = vld [vmem:[%s3818_s1 + $0x268] sm:$0xff]   ;;  %v2983_v40 = vld [vmem:[%s3818_s1 + $0x278] sm:$0xff]  }
  0x23   :  { %2616 = vmatpush3.bf16.msra.mxu0 %v2920_v39  ;;  %1812 = vmatprep.mubr.bf16.mxu0 %v2345_v7  ;;  %v2982_v39 = vld [vmem:[%s3818_s1 + $0x2b0] sm:$0xff]   ;;  %v3012_v7 = vld [vmem:[%s3818_s1 + $0x328] sm:$0xff]  }
  0x24   :  { %1773 = vmatmul.mubr.bf16.vlgmr.msra.gmra.mrb[0].mxu1 %v2342_v37  ;;  %2617 = vmatprep.subr.bf16.mxu0 %v2923_v42  ;;  %v2980_v37 = vld [vmem:[%s3818_s1 + $0x230] sm:$0xff]   ;;  %v2985_v42 = vld [vmem:[%s3818_s1 + $0x2f8] sm:$0xff]  }
  0x25   :  { %2638 = vmatpush3.bf16.msra.mxu1 %v2922_v41  ;;  %1852 = vmatprep.mubr.bf16.mxu1 %v2347_v12  ;;  %v2984_v41 = vld [vmem:[%s3818_s1 + $0x238] sm:$0xff]   ;;  %v3017_v12 = vld [vmem:[%s3818_s1 + $0x3f0] sm:$0xff]  }
  0x26   :  { %2639 = vmatprep.subr.bf16.mxu1 %v2925_v44 }
  0x27   :  { %2618 = vmatpush3.bf16.msra.mxu0 %v2924_v43  ;;  %v25_v43 = vld [vmem:[%s3819_s0 + $0x20] sm:$0xff] }
  0x28   :  { %2619 = vmatprep.subr.bf16.mxu0 %v2927_v46  ;;  %v2348_v44 = vcombine.low %v25_v43, %v25_v43  ;;  %v2988_v46 = vld [vmem:[%s3818_s1 + $0x2b8] sm:$0xff]  }
  0x29   :  { %2640 = vmatpush3.bf16.msra.mxu1 %v2926_v45  ;;  %v2349_v45 = vcombine.high %v25_v43, %v25_v43  ;;  %v3046_v43 = vld [vmem:[%s3818_s1 + $0x4a0] sm:$0xff]  }
  0x2a   :  { %2641 = vmatprep.subr.bf16.mxu1 %v2929_v48  ;;  %v26_v48 = vld [vmem:[%s3819_s0 + $0x28] sm:$0xff] }
  0x2b   :  { %2620 = vmatpush3.bf16.msra.mxu0 %v2928_v47  ;;  %v2989_v47 = vld [vmem:[%s3818_s1 + $0x340] sm:$0xff]  }
  0x2c   :  { %2621 = vmatprep.subr.bf16.mxu0 %v2931_v50  ;;  %v2351_v50 = vcombine.high %v26_v48, %v26_v48 }
  0x2d   :  { %2642 = vmatpush3.bf16.msra.mxu1 %v2930_v49  ;;  %v2350_v49 = vcombine.low %v26_v48, %v26_v48  ;;  %v3051_v48 = vld [vmem:[%s3818_s1 + $0x470] sm:$0xff]  }
  0x2e   :  { %2643 = vmatprep.subr.bf16.mxu1 %v2933_v52  ;;  %v2993_v52 = vld [vmem:[%s3818_s1 + $0x3c0] sm:$0xff]  }
  0x2f   :  { %2622 = vmatpush3.bf16.msra.mxu0 %v2932_v51  ;;  %v2992_v51 = vld [vmem:[%s3818_s1 + $0x300] sm:$0xff]  }
  0x30   :  { %2623 = vmatprep.subr.bf16.mxu0 %v2935_v54  ;;  %v2995_v54 = vld [vmem:[%s3818_s1 + $0x348] sm:$0xff]  }
  0x31   :  { %2644 = vmatpush3.bf16.msra.mxu1 %v2934_v53  ;;  %v2994_v53 = vld [vmem:[%s3818_s1 + $0x380] sm:$0xff]  }
  0x32   :  { %2645 = vmatprep.subr.bf16.mxu1 %v2937_v56  ;;  %v2997_v56 = vld [vmem:[%s3818_s1 + $0x3c8] sm:$0xff]  }
  0x33   :  { %2624 = vmatpush3.bf16.msra.mxu0 %v2936_v55  ;;  %v2996_v55 = vld [vmem:[%s3818_s1 + $0x308] sm:$0xff]  }
  0x34   :  { %2625 = vmatprep.subr.bf16.mxu0 %v2939_v58  ;;  %v2999_v58 = vld [vmem:[%s3818_s1 + $0x350] sm:$0xff]  }
  0x35   :  { %2646 = vmatpush3.bf16.msra.mxu1 %v2938_v57  ;;  %v2998_v57 = vld [vmem:[%s3818_s1 + $0x388] sm:$0xff]  }
  0x36   :  { %2647 = vmatprep.subr.bf16.mxu1 %v2941_v60  ;;  %v3001_v60 = vld [vmem:[%s3818_s1 + $0x3d0] sm:$0xff]  }
  0x37   :  { %2626 = vmatpush3.bf16.msra.mxu0 %v2940_v59  ;;  %v3000_v59 = vld [vmem:[%s3818_s1 + $0x310] sm:$0xff]  }
  0x38   :  { %2627 = vmatprep.subr.bf16.mxu0 %v2943_v62  ;;  %v3003_v62 = vld [vmem:[%s3818_s1 + $0x358] sm:$0xff]  }
  0x39   :  { %2648 = vmatpush3.bf16.msra.mxu1 %v2942_v61  ;;  %v3002_v61 = vld [vmem:[%s3818_s1 + $0x390] sm:$0xff]  }
  0x3a   :  { %2649 = vmatprep.subr.bf16.mxu1 %v2945_v0  ;;  %v3005_v0 = vld [vmem:[%s3818_s1 + $0x3d8] sm:$0xff]  }
  0x3b   :  { %2628 = vmatpush3.bf16.msra.mxu0 %v2944_v63  ;;  %v3004_v63 = vld [vmem:[%s3818_s1 + $0x318] sm:$0xff]  }
  0x3c   :  { %2629 = vmatprep.subr.bf16.mxu0 %v2947_v2  ;;  %v3007_v2 = vld [vmem:[%s3818_s1 + $0x360] sm:$0xff]  }
  0x3d   :  { %2650 = vmatpush3.bf16.msra.mxu1 %v2946_v1  ;;  %v3006_v1 = vld [vmem:[%s3818_s1 + $0x398] sm:$0xff]  }
  0x3e   :  { %2651 = vmatprep.subr.bf16.mxu1 %v2949_v4  ;;  %v3009_v4 = vld [vmem:[%s3818_s1 + $0x3e0] sm:$0xff]  }
  0x3f   :  { %2630 = vmatpush3.bf16.msra.mxu0 %v2948_v3  ;;  %v3008_v3 = vld [vmem:[%s3818_s1 + $0x320] sm:$0xff]  }
  0x40   :  { %2659 = vmatprep.subr.bf16.mxu0 %v2953_v9  ;;  %v3014_v9 = vld [vmem:[%s3818_s1 + $0x3a8] sm:$0xff]  }
  0x41   :  { %2652 = vmatpush3.bf16.msra.mxu1 %v2952_v8  ;;  %v3013_v8 = vld [vmem:[%s3818_s1 + $0x3e8] sm:$0xff]  }
  0x42   :  { %1813 = vmatmul.mubr.bf16.vlgmr.msra.gmra.mrb[4].mxu0 %v2344_v6  ;;  %2681 = vmatprep.subr.bf16.mxu1 %v2957_v14  ;;  %v3011_v6 = vld [vmem:[%s3818_s1 + $0x368] sm:$0xff]   ;;  %v3019_v14 = vld [vmem:[%s3818_s1 + $0x378] sm:$0xff]  }
  0x43   :  { %2660 = vmatpush3.bf16.msra.mxu0 %v2956_v13  ;;  %1892 = vmatprep.mubr.bf16.mxu0 %v2349_v45  ;;  %v3018_v13 = vld [vmem:[%s3818_s1 + $0x3b0] sm:$0xff]   ;;  %v3048_v45 = vld [vmem:[%s3818_s1 + $0x428] sm:$0xff]  }
  0x44   :  { %1853 = vmatmul.mubr.bf16.vlgmr.msra.gmra.mrb[4].mxu1 %v2346_v11  ;;  %2661 = vmatprep.subr.bf16.mxu0 %v2959_v16  ;;  %v3016_v11 = vld [vmem:[%s3818_s1 + $0x330] sm:$0xff]   ;;  %v3021_v16 = vld [vmem:[%s3818_s1 + $0x3f8] sm:$0xff]  }
  0x45   :  { %2682 = vmatpush3.bf16.msra.mxu1 %v2958_v15  ;;  %1932 = vmatprep.mubr.bf16.mxu1 %v2351_v50  ;;  %v3020_v15 = vld [vmem:[%s3818_s1 + $0x338] sm:$0xff]   ;;  %v3053_v50 = vld [vmem:[%s3818_s1 + $0x4f0] sm:$0xff]  }
  0x46   :  { %2683 = vmatprep.subr.bf16.mxu1 %v2961_v18 }
  0x47   :  { %2662 = vmatpush3.bf16.msra.mxu0 %v2960_v17  ;;  %v27_v17 = vld [vmem:[%s3819_s0 + $0x30] sm:$0xff] }
  0x48   :  { %2663 = vmatprep.subr.bf16.mxu0 %v2963_v20  ;;  %v2352_v18 = vcombine.low %v27_v17, %v27_v17  ;;  %v3024_v20 = vld [vmem:[%s3818_s1 + $0x3b8] sm:$0xff]  }
  0x49   :  { %2684 = vmatpush3.bf16.msra.mxu1 %v2962_v19  ;;  %v2353_v19 = vcombine.high %v27_v17, %v27_v17  ;;  %v3082_v17 = vld [vmem:[%s3818_s1 + $0x5a0] sm:$0xff]  }
  0x4a   :  { %2685 = vmatprep.subr.bf16.mxu1 %v2965_v22  ;;  %v28_v22 = vld [vmem:[%s3819_s0 + $0x38] sm:$0xff] }
  0x4b   :  { %2664 = vmatpush3.bf16.msra.mxu0 %v2964_v21  ;;  %v3025_v21 = vld [vmem:[%s3818_s1 + $0x440] sm:$0xff]  }
  0x4c   :  { %2665 = vmatprep.subr.bf16.mxu0 %v2967_v24  ;;  %v2355_v24 = vcombine.high %v28_v22, %v28_v22 }
  0x4d   :  { %2686 = vmatpush3.bf16.msra.mxu1 %v2966_v23  ;;  %v2354_v23 = vcombine.low %v28_v22, %v28_v22  ;;  %v3087_v22 = vld [vmem:[%s3818_s1 + $0x570] sm:$0xff]  }
  0x4e   :  { %2687 = vmatprep.subr.bf16.mxu1 %v2969_v26  ;;  %v3029_v26 = vld [vmem:[%s3818_s1 + $0x4c0] sm:$0xff]  }
  0x4f   :  { %2666 = vmatpush3.bf16.msra.mxu0 %v2968_v25  ;;  %v3028_v25 = vld [vmem:[%s3818_s1 + $0x400] sm:$0xff]  }
  0x50   :  { %2667 = vmatprep.subr.bf16.mxu0 %v2971_v28  ;;  %v3031_v28 = vld [vmem:[%s3818_s1 + $0x448] sm:$0xff]  }
  0x51   :  { %2688 = vmatpush3.bf16.msra.mxu1 %v2970_v27  ;;  %v3030_v27 = vld [vmem:[%s3818_s1 + $0x480] sm:$0xff]  }
  0x52   :  { %2689 = vmatprep.subr.bf16.mxu1 %v2973_v30  ;;  %v3033_v30 = vld [vmem:[%s3818_s1 + $0x4c8] sm:$0xff]  }
  0x53   :  { %2668 = vmatpush3.bf16.msra.mxu0 %v2972_v29  ;;  %v3032_v29 = vld [vmem:[%s3818_s1 + $0x408] sm:$0xff]  }
  0x54   :  { %2669 = vmatprep.subr.bf16.mxu0 %v2975_v32  ;;  %v3035_v32 = vld [vmem:[%s3818_s1 + $0x450] sm:$0xff]  }
  0x55   :  { %2690 = vmatpush3.bf16.msra.mxu1 %v2974_v31  ;;  %v3034_v31 = vld [vmem:[%s3818_s1 + $0x488] sm:$0xff]  }
  0x56   :  { %2691 = vmatprep.subr.bf16.mxu1 %v2977_v34  ;;  %v3037_v34 = vld [vmem:[%s3818_s1 + $0x4d0] sm:$0xff]  }
  0x57   :  { %2670 = vmatpush3.bf16.msra.mxu0 %v2976_v33  ;;  %v3036_v33 = vld [vmem:[%s3818_s1 + $0x410] sm:$0xff]  }
  0x58   :  { %2671 = vmatprep.subr.bf16.mxu0 %v2979_v36  ;;  %v3039_v36 = vld [vmem:[%s3818_s1 + $0x458] sm:$0xff]  }
  0x59   :  { %2692 = vmatpush3.bf16.msra.mxu1 %v2978_v35  ;;  %v3038_v35 = vld [vmem:[%s3818_s1 + $0x490] sm:$0xff]  }
  0x5a   :  { %2693 = vmatprep.subr.bf16.mxu1 %v2981_v38  ;;  %v3041_v38 = vld [vmem:[%s3818_s1 + $0x4d8] sm:$0xff]  }
  0x5b   :  { %2672 = vmatpush3.bf16.msra.mxu0 %v2980_v37  ;;  %v3040_v37 = vld [vmem:[%s3818_s1 + $0x418] sm:$0xff]  }
  0x5c   :  { %2673 = vmatprep.subr.bf16.mxu0 %v2983_v40  ;;  %v3043_v40 = vld [vmem:[%s3818_s1 + $0x460] sm:$0xff]  }
  0x5d   :  { %2694 = vmatpush3.bf16.msra.mxu1 %v2982_v39  ;;  %v3042_v39 = vld [vmem:[%s3818_s1 + $0x498] sm:$0xff]  }
  0x5e   :  { %2695 = vmatprep.subr.bf16.mxu1 %v2985_v42  ;;  %v3045_v42 = vld [vmem:[%s3818_s1 + $0x4e0] sm:$0xff]  }
  0x5f   :  { %2674 = vmatpush3.bf16.msra.mxu0 %v2984_v41  ;;  %v3044_v41 = vld [vmem:[%s3818_s1 + $0x420] sm:$0xff]  }
  0x60   :  { %2703 = vmatprep.subr.bf16.mxu0 %v2989_v47  ;;  %v3050_v47 = vld [vmem:[%s3818_s1 + $0x4a8] sm:$0xff]  }
  0x61   :  { %2696 = vmatpush3.bf16.msra.mxu1 %v2988_v46  ;;  %v3049_v46 = vld [vmem:[%s3818_s1 + $0x4e8] sm:$0xff]  }
  0x62   :  { %1893 = vmatmul.mubr.bf16.vlgmr.msra.gmra.mrb[8].mxu0 %v2348_v44  ;;  %2725 = vmatprep.subr.bf16.mxu1 %v2993_v52  ;;  %v3047_v44 = vld [vmem:[%s3818_s1 + $0x468] sm:$0xff]   ;;  %v3055_v52 = vld [vmem:[%s3818_s1 + $0x478] sm:$0xff]  }
  0x63   :  { %2704 = vmatpush3.bf16.msra.mxu0 %v2992_v51  ;;  %1972 = vmatprep.mubr.bf16.mxu0 %v2353_v19  ;;  %v3054_v51 = vld [vmem:[%s3818_s1 + $0x4b0] sm:$0xff]   ;;  %v3084_v19 = vld [vmem:[%s3818_s1 + $0x528] sm:$0xff]  }
  0x64   :  { %1933 = vmatmul.mubr.bf16.vlgmr.msra.gmra.mrb[8].mxu1 %v2350_v49  ;;  %2705 = vmatprep.subr.bf16.mxu0 %v2995_v54  ;;  %v3052_v49 = vld [vmem:[%s3818_s1 + $0x430] sm:$0xff]   ;;  %v3057_v54 = vld [vmem:[%s3818_s1 + $0x4f8] sm:$0xff]  }
  0x65   :  { %2726 = vmatpush3.bf16.msra.mxu1 %v2994_v53  ;;  %2012 = vmatprep.mubr.bf16.mxu1 %v2355_v24  ;;  %v3056_v53 = vld [vmem:[%s3818_s1 + $0x438] sm:$0xff]   ;;  %v3089_v24 = vld [vmem:[%s3818_s1 + $0x5f0] sm:$0xff]  }
  0x66   :  { %2727 = vmatprep.subr.bf16.mxu1 %v2997_v56 }
  0x67   :  { %2706 = vmatpush3.bf16.msra.mxu0 %v2996_v55  ;;  %v29_v55 = vld [vmem:[%s3819_s0 + $0x40] sm:$0xff] }
  0x68   :  { %2707 = vmatprep.subr.bf16.mxu0 %v2999_v58  ;;  %v2356_v56 = vcombine.low %v29_v55, %v29_v55  ;;  %v3060_v58 = vld [vmem:[%s3818_s1 + $0x4b8] sm:$0xff]  }
  0x69   :  { %2728 = vmatpush3.bf16.msra.mxu1 %v2998_v57  ;;  %v2357_v57 = vcombine.high %v29_v55, %v29_v55  ;;  %v3104_v55 = vld [vmem:[%s3821_s3] sm:$0xff]  }
  0x6a   :  { %2729 = vmatprep.subr.bf16.mxu1 %v3001_v60  ;;  %v30_v60 = vld [vmem:[%s3819_s0 + $0x48] sm:$0xff] }
  0x6b   :  { %2708 = vmatpush3.bf16.msra.mxu0 %v3000_v59  ;;  %v3061_v59 = vld [vmem:[%s3818_s1 + $0x540] sm:$0xff]  }
  0x6c   :  { %2709 = vmatprep.subr.bf16.mxu0 %v3003_v62  ;;  %v2359_v62 = vcombine.high %v30_v60, %v30_v60 }
  0x6d   :  { %2730 = vmatpush3.bf16.msra.mxu1 %v3002_v61  ;;  %v2358_v61 = vcombine.low %v30_v60, %v30_v60 }
  0x6e   :  { %2731 = vmatprep.subr.bf16.mxu1 %v3005_v0  ;;  %v3065_v0 = vld [vmem:[%s3818_s1 + $0x5c0] sm:$0xff]  }
  0x6f   :  { %2710 = vmatpush3.bf16.msra.mxu0 %v3004_v63  ;;  %v3064_v63 = vld [vmem:[%s3818_s1 + $0x500] sm:$0xff]  }
  0x70   :  { %2711 = vmatprep.subr.bf16.mxu0 %v3007_v2  ;;  %v3067_v2 = vld [vmem:[%s3818_s1 + $0x548] sm:$0xff]  }
  0x71   :  { %2732 = vmatpush3.bf16.msra.mxu1 %v3006_v1  ;;  %v3066_v1 = vld [vmem:[%s3818_s1 + $0x580] sm:$0xff]  }
  0x72   :  { %2733 = vmatprep.subr.bf16.mxu1 %v3009_v4  ;;  %v3069_v4 = vld [vmem:[%s3818_s1 + $0x5c8] sm:$0xff]  }
  0x73   :  { %2712 = vmatpush3.bf16.msra.mxu0 %v3008_v3  ;;  %v3068_v3 = vld [vmem:[%s3818_s1 + $0x508] sm:$0xff]  }
  0x74   :  { %2713 = vmatprep.subr.bf16.mxu0 %v3011_v6  ;;  %v3071_v6 = vld [vmem:[%s3818_s1 + $0x550] sm:$0xff]  }
  0x75   :  { %2734 = vmatpush3.bf16.msra.mxu1 %v3010_v5  ;;  %v3070_v5 = vld [vmem:[%s3818_s1 + $0x588] sm:$0xff]  }
  0x76   :  { %2735 = vmatprep.subr.bf16.mxu1 %v3013_v8  ;;  %v3073_v8 = vld [vmem:[%s3818_s1 + $0x5d0] sm:$0xff]  }
  0x77   :  { %2714 = vmatpush3.bf16.msra.mxu0 %v3012_v7  ;;  %v3072_v7 = vld [vmem:[%s3818_s1 + $0x510] sm:$0xff]  }
  0x78   :  { %2715 = vmatprep.subr.bf16.mxu0 %v3015_v10  ;;  %v3075_v10 = vld [vmem:[%s3818_s1 + $0x558] sm:$0xff]  }
  0x79   :  { %2736 = vmatpush3.bf16.msra.mxu1 %v3014_v9  ;;  %v3074_v9 = vld [vmem:[%s3818_s1 + $0x590] sm:$0xff]  }
  0x7a   :  { %2737 = vmatprep.subr.bf16.mxu1 %v3017_v12  ;;  %v3077_v12 = vld [vmem:[%s3818_s1 + $0x5d8] sm:$0xff]  }
  0x7b   :  { %2716 = vmatpush3.bf16.msra.mxu0 %v3016_v11  ;;  %v3076_v11 = vld [vmem:[%s3818_s1 + $0x518] sm:$0xff]  }
  0x7c   :  { %2717 = vmatprep.subr.bf16.mxu0 %v3019_v14  ;;  %v3079_v14 = vld [vmem:[%s3818_s1 + $0x560] sm:$0xff]  }
  0x7d   :  { %2738 = vmatpush3.bf16.msra.mxu1 %v3018_v13  ;;  %v3078_v13 = vld [vmem:[%s3818_s1 + $0x598] sm:$0xff]  }
  0x7e   :  { %2739 = vmatprep.subr.bf16.mxu1 %v3021_v16  ;;  %v3081_v16 = vld [vmem:[%s3818_s1 + $0x5e0] sm:$0xff]  }
  0x7f   :  { %2718 = vmatpush3.bf16.msra.mxu0 %v3020_v15  ;;  %v3080_v15 = vld [vmem:[%s3818_s1 + $0x520] sm:$0xff]  }
  0x80   :  { %2747 = vmatprep.subr.bf16.mxu0 %v3025_v21  ;;  %v3086_v21 = vld [vmem:[%s3818_s1 + $0x5a8] sm:$0xff]  }
  0x81   :  { %2740 = vmatpush3.bf16.msra.mxu1 %v3024_v20  ;;  %v3085_v20 = vld [vmem:[%s3818_s1 + $0x5e8] sm:$0xff]  }
  0x82   :  { %1973 = vmatmul.mubr.bf16.vlgmr.msra.gmra.mrb[12].mxu0 %v2352_v18  ;;  %2769 = vmatprep.subr.bf16.mxu1 %v3029_v26  ;;  %v3083_v18 = vld [vmem:[%s3818_s1 + $0x568] sm:$0xff]   ;;  %v3091_v26 = vld [vmem:[%s3818_s1 + $0x578] sm:$0xff]  }
  0x83   :  { %2748 = vmatpush3.bf16.msra.mxu0 %v3028_v25  ;;  %2052 = vmatprep.mubr.bf16.mxu0 %v2357_v57  ;;  %v3090_v25 = vld [vmem:[%s3818_s1 + $0x5b0] sm:$0xff]  }
  0x84   :  { %2013 = vmatmul.mubr.bf16.vlgmr.msra.gmra.mrb[12].mxu1 %v2354_v23  ;;  %2749 = vmatprep.subr.bf16.mxu0 %v3031_v28  ;;  %v3088_v23 = vld [vmem:[%s3818_s1 + $0x530] sm:$0xff]   ;;  %v3093_v28 = vld [vmem:[%s3818_s1 + $0x5f8] sm:$0xff]  }
  0x85   :  { %2770 = vmatpush3.bf16.msra.mxu1 %v3030_v27  ;;  %2092 = vmatprep.mubr.bf16.mxu1 %v2359_v62  ;;  %v3092_v27 = vld [vmem:[%s3818_s1 + $0x538] sm:$0xff]  }
  0x86   :  { %2771 = vmatprep.subr.bf16.mxu1 %v3033_v30 }
  0x87   :  { %2750 = vmatpush3.bf16.msra.mxu0 %v3032_v29  ;;  %v31_v29 = vld [vmem:[%s3819_s0 + $0x50] sm:$0xff] }
  0x88   :  { %2751 = vmatprep.subr.bf16.mxu0 %v3035_v32  ;;  %v2360_v30 = vcombine.low %v31_v29, %v31_v29  ;;  %v3096_v32 = vld [vmem:[%s3818_s1 + $0x5b8] sm:$0xff]  }
  0x89   :  { %2772 = vmatpush3.bf16.msra.mxu1 %v3034_v31  ;;  %v2361_v31 = vcombine.high %v31_v29, %v31_v29 }
  0x8a   :  { %2773 = vmatprep.subr.bf16.mxu1 %v3037_v34  ;;  %v3112_v34 = vmov 0.0  }
  0x8b   :  { %2752 = vmatpush3.bf16.msra.mxu0 %v3036_v33  ;;  %v32_v33 = vld [vmem:[%s3819_s0 + $0x58] sm:$0xff] }
  0x8c   :  { %2753 = vmatprep.subr.bf16.mxu0 %v3039_v36  ;;  %v2363_v36 = vcombine.high %v32_v33, %v32_v33 }
  0x8d   :  { %2774 = vmatpush3.bf16.msra.mxu1 %v3038_v35  ;;  %v2362_v35 = vcombine.low %v32_v33, %v32_v33 }
  0x8e   :  { %2775 = vmatprep.subr.bf16.mxu1 %v3041_v38  ;;  %v3100_v38 = vld [vmem:[%s3818_s1 + $0x608] sm:$0xff]  }
  0x8f   :  { %2754 = vmatpush3.bf16.msra.mxu0 %v3040_v37  ;;  %v3099_v37 = vld [vmem:[%s3818_s1 + $0x600] sm:$0xff]  }
  0x90   :  { %2755 = vmatprep.subr.bf16.mxu0 %v3043_v40  ;;  %v3102_v40 = vld [vmem:[%s3818_s1 + $0x618] sm:$0xff]  }
  0x91   :  { %2776 = vmatpush3.bf16.msra.mxu1 %v3042_v39  ;;  %v3101_v39 = vld [vmem:[%s3818_s1 + $0x610] sm:$0xff]  }
  0x92   :  { %2777 = vmatprep.subr.bf16.mxu1 %v3045_v42 }
  0x93   :  { %2756 = vmatpush3.bf16.msra.mxu0 %v3044_v41  ;;  %v3103_v41 = vld [vmem:[%s3819_s0 + $0x60] ss:$0 sps:$4 sm:$0xff]  }
  0x94   :  { %2757 = vmatprep.subr.bf16.mxu0 %v3047_v44 }
  0x95   :  { %2778 = vmatpush3.bf16.msra.mxu1 %v3046_v43  ;;  %v2339_v43 = vld [vmem:[%s3820_s2] ss:$0 sm:$0xff] }
  0x96   :  { %2779 = vmatprep.subr.bf16.mxu1 %v3049_v46 }
  0x97   :  { %2758 = vmatpush3.bf16.msra.mxu0 %v3048_v45 }
  0x98   :  { %2759 = vmatprep.subr.bf16.mxu0 %v3051_v48 }
  0x99   :  { %2780 = vmatpush3.bf16.msra.mxu1 %v3050_v47 }
  0x9a   :  { %2781 = vmatprep.subr.bf16.mxu1 %v3053_v50 }
  0x9b   :  { %2760 = vmatpush3.bf16.msra.mxu0 %v3052_v49 }
  0x9c   :  { %2761 = vmatprep.subr.bf16.mxu0 %v3055_v52 }
  0x9d   :  { %2782 = vmatpush3.bf16.msra.mxu1 %v3054_v51 }
  0x9e   :  { %2783 = vmatprep.subr.bf16.mxu1 %v3057_v54 }
  0x9f   :  { %2762 = vmatpush3.bf16.msra.mxu0 %v3056_v53 }
  0xa0   :  { %2791 = vmatprep.subr.bf16.mxu0 %v3061_v59  ;;  %v3106_v59 = vld [vmem:[%s3821_s3 + $0x10] sm:$0xff]  }
  0xa1   :  { %2784 = vmatpush3.bf16.msra.mxu1 %v3060_v58 }
  0xa2   :  { %2053 = vmatmul.mubr.bf16.vlgmr.msra.gmra.mrb[16].mxu0 %v2356_v56  ;;  %2813 = vmatprep.subr.bf16.mxu1 %v3065_v0  ;;  %v3105_v56 = vld [vmem:[%s3821_s3 + $0x8] sm:$0xff]  }
  0xa3   :  { %2792 = vmatpush3.bf16.msra.mxu0 %v3064_v63  ;;  %2132 = vmatprep.mubr.bf16.mxu0 %v2361_v31 }
  0xa4   :  { %2093 = vmatmul.mubr.bf16.vlgmr.msra.gmra.mrb[16].mxu1 %v2358_v61  ;;  %2793 = vmatprep.subr.bf16.mxu0 %v3067_v2 }
  0xa5   :  { %2814 = vmatpush3.bf16.msra.mxu1 %v3066_v1  ;;  %2172 = vmatprep.mubr.bf16.mxu1 %v2363_v36 }
  0xa6   :  { %2815 = vmatprep.subr.bf16.mxu1 %v3069_v4  ;;  %v3107_v4 = vld [vmem:[%s3821_s3 + $0x18] sm:$0xff]  }
  0xa7   :  { %2794 = vmatpush3.bf16.msra.mxu0 %v3068_v3 }
  0xa8   :  { %2795 = vmatprep.subr.bf16.mxu0 %v3071_v6 }
  0xa9   :  { %2816 = vmatpush3.bf16.msra.mxu1 %v3070_v5 }
  0xaa   :  { %2817 = vmatprep.subr.bf16.mxu1 %v3073_v8  ;;  %v3109_v8 = vld [vmem:[%s3821_s3 + $0x28] sm:$0xff]  }
  0xab   :  { %2796 = vmatpush3.bf16.msra.mxu0 %v3072_v7  ;;  %v3108_v7 = vld [vmem:[%s3821_s3 + $0x20] sm:$0xff]  }
  0xac   :  { %2797 = vmatprep.subr.bf16.mxu0 %v3075_v10  ;;  %v3111_v10 = vld [vmem:[%s3821_s3 + $0x38] sm:$0xff]  }
  0xad   :  { %2818 = vmatpush3.bf16.msra.mxu1 %v3074_v9  ;;  %v3110_v9 = vld [vmem:[%s3821_s3 + $0x30] sm:$0xff]  }
  0xae   :  { %2819 = vmatprep.subr.bf16.mxu1 %v3077_v12 }
  0xaf   :  { %2798 = vmatpush3.bf16.msra.mxu0 %v3076_v11 }
  0xb0   :  { %2799 = vmatprep.subr.bf16.mxu0 %v3079_v14 }
  0xb1   :  { %2820 = vmatpush3.bf16.msra.mxu1 %v3078_v13 }
  0xb2   :  { %2821 = vmatprep.subr.bf16.mxu1 %v3081_v16 }
  0xb3   :  { %2800 = vmatpush3.bf16.msra.mxu0 %v3080_v15 }
  0xb4   :  { %2801 = vmatprep.subr.bf16.mxu0 %v3083_v18 }
  0xb5   :  { %2822 = vmatpush3.bf16.msra.mxu1 %v3082_v17 }
  0xb6   :  { %2823 = vmatprep.subr.bf16.mxu1 %v3085_v20 }
  0xb7   :  { %2802 = vmatpush3.bf16.msra.mxu0 %v3084_v19 }
  0xb8   :  { %2803 = vmatprep.subr.bf16.mxu0 %v3087_v22 }
  0xb9   :  { %2824 = vmatpush3.bf16.msra.mxu1 %v3086_v21 }
  0xba   :  { %2825 = vmatprep.subr.bf16.mxu1 %v3089_v24 }
  0xbb   :  { %2804 = vmatpush3.bf16.msra.mxu0 %v3088_v23 }
  0xbc   :  { %2805 = vmatprep.subr.bf16.mxu0 %v3091_v26 }
  0xbd   :  { %2826 = vmatpush3.bf16.msra.mxu1 %v3090_v25 }
  0xbe   :  { %2827 = vmatprep.subr.bf16.mxu1 %v3093_v28 }
  0xbf   :  { %2806 = vmatpush3.bf16.msra.mxu0 %v3092_v27 }
  0xc0   :  { %2849 = vmatprep.subr.bf16.mxu0 %v3112_v34 }
  0xc1   :  { %2828 = vmatpush3.bf16.msra.mxu1 %v3096_v32 }
  0xc2   :  { %2133 = vmatmul.mubr.bf16.vlgmr.msra.gmra.mrb[20].mxu0 %v2360_v30  ;;  %2861 = vmatprep.subr.bf16.mxu1 %v3112_v34 }
  0xc3   :  { %2850 = vmatpush3.bf16.msra.mxu0 %v3099_v37  ;;  %2857 = vmatprep.mubr.msk.bf16.mxu0 %vm3113_vm0, %v3112_v34 }
  0xc4   :  { %2173 = vmatmul.mubr.bf16.vlgmr.msra.gmra.mrb[20].mxu1 %v2362_v35  ;;  %2851 = vmatprep.subr.bf16.mxu0 %v3112_v34 }
  0xc5   :  { %2877 = vmatprep.mubr.msk.bf16.mxu1 %vm3113_vm0, %v3112_v34  ;;  %2862 = vmatpush3.bf16.msra.mxu1 %v3104_v55 }
  0xc6   :  { %2863 = vmatprep.subr.bf16.mxu1 %v3112_v34 }
  0xc7   :  { %2852 = vmatpush3.bf16.msra.mxu0 %v3100_v38 }
  0xc8   :  { %2853 = vmatprep.subr.bf16.mxu0 %v3112_v34 }
  0xc9   :  { %2864 = vmatpush3.bf16.msra.mxu1 %v3105_v56 }
  0xca   :  { %2865 = vmatprep.subr.bf16.mxu1 %v3112_v34 }
  0xcb   :  { %2854 = vmatpush3.bf16.msra.mxu0 %v3101_v39 }
  0xcc   :  { %2855 = vmatprep.subr.bf16.mxu0 %v3112_v34 }
  0xcd   :  { %2866 = vmatpush3.bf16.msra.mxu1 %v3106_v59 }
  0xce   :  { %2867 = vmatprep.subr.bf16.mxu1 %v3112_v34 }
  0xcf   :  { %2856 = vmatpush3.bf16.msra.mxu0 %v3102_v40 }
  0xd1   :  { %2868 = vmatpush3.bf16.msra.mxu1 %v3107_v4 }
  0xd2   :  { %2858 = vmatmul.mubr.msk.bf16.vlgmr.msra.gmra.mrb[24].mxu0 %vm1696_vm1, %v3103_v41  ;;  %2869 = vmatprep.subr.bf16.mxu1 %v3112_v34 }
  0xd5   :  { %2870 = vmatpush3.bf16.msra.mxu1 %v3108_v7 }
  0xd6   :  { %2871 = vmatprep.subr.bf16.mxu1 %v3112_v34 }
  0xd9   :  { %2872 = vmatpush3.bf16.msra.mxu1 %v3109_v8 }
  0xda   :  { %2873 = vmatprep.subr.bf16.mxu1 %v3112_v34 }
  0xdd   :  { %2874 = vmatpush3.bf16.msra.mxu1 %v3110_v9 }
  0xde   :  { %2875 = vmatprep.subr.bf16.mxu1 %v3112_v34 }
  0xe1   :  { %2876 = vmatpush3.bf16.msra.mxu1 %v3111_v10 }
  0xf5   :  { %v2587_v42 = vpop.f32.mrb[0].mxu0 }
  0xf6   :  { %v2588_v44 = vpop.f32.mrb[1].mxu0 }
  0xf7   :  { %v2589_v45 = vadd.f32 %v2588_v44, %v2587_v42  ;;  %v2590_v46 = vpop.f32.mrb[2].mxu0  ;;  %v2609_v47 = vpop.f32.mrb[0].mxu1 }
  0xf8   :  { %v2591_v48 = vpop.f32.mrb[3].mxu0  ;;  %v2610_v49 = vpop.f32.mrb[1].mxu1 }
  0xf9   :  { %v1735_v50 = vadd.f32 %v2589_v45, %v2339_v43  ;;  %v2611_v51 = vadd.f32 %v2610_v49, %v2609_v47  ;;  %v2612_v52 = vpop.f32.mrb[2].mxu1 }
  0xfa   :  { %v2613_v53 = vpop.f32.mrb[3].mxu1 }
  0xfb   :  { %v1775_v54 = vadd.f32 %v2611_v51, %v1735_v50 }
 0x115   :  { %v2631_v57 = vpop.f32.mrb[4].mxu0 }
 0x116   :  { %v2632_v58 = vpop.f32.mrb[5].mxu0 }
 0x117   :  { %v2633_v60 = vadd.f32 %v2632_v58, %v2631_v57  ;;  %v2634_v61 = vpop.f32.mrb[6].mxu0  ;;  %v2653_v62 = vpop.f32.mrb[4].mxu1 }
 0x118   :  { %v2635_v63 = vpop.f32.mrb[7].mxu0  ;;  %v2654_v1 = vpop.f32.mrb[5].mxu1 }
 0x119   :  { %v1815_v0 = vadd.f32 %v2633_v60, %v1775_v54  ;;  %v2655_v2 = vadd.f32 %v2654_v1, %v2653_v62  ;;  %v2656_v3 = vpop.f32.mrb[6].mxu1 }
 0x11a   :  { %v2657_v5 = vpop.f32.mrb[7].mxu1 }
 0x11b   :  { %v1855_v6 = vadd.f32 %v2655_v2, %v1815_v0  ;;  %v2562_v2 = vld [vmem:[%s3822_s4] ss:$0 sm:$0xff] }
 0x135   :  { %v2675_v11 = vpop.f32.mrb[8].mxu0 }
 0x136   :  { %v2676_v12 = vpop.f32.mrb[9].mxu0 }
 0x137   :  { %v2677_v13 = vadd.f32 %v2676_v12, %v2675_v11  ;;  %v2678_v14 = vpop.f32.mrb[10].mxu0  ;;  %v2697_v15 = vpop.f32.mrb[8].mxu1 }
 0x138   :  { %v2679_v16 = vpop.f32.mrb[11].mxu0  ;;  %v2698_v17 = vpop.f32.mrb[9].mxu1 }
 0x139   :  { %v1895_v18 = vadd.f32 %v2677_v13, %v1855_v6  ;;  %v2699_v19 = vadd.f32 %v2698_v17, %v2697_v15  ;;  %v2700_v20 = vpop.f32.mrb[10].mxu1 }
 0x13a   :  { %v2701_v21 = vpop.f32.mrb[11].mxu1 }
 0x13b   :  { %v1935_v22 = vadd.f32 %v2699_v19, %v1895_v18 }
 0x155   :  { %v2719_v23 = vpop.f32.mrb[12].mxu0 }
 0x156   :  { %v2720_v24 = vpop.f32.mrb[13].mxu0 }
 0x157   :  { %v2721_v25 = vadd.f32 %v2720_v24, %v2719_v23  ;;  %v2722_v26 = vpop.f32.mrb[14].mxu0  ;;  %v2741_v27 = vpop.f32.mrb[12].mxu1 }
 0x158   :  { %v2723_v28 = vpop.f32.mrb[15].mxu0  ;;  %v2742_v29 = vpop.f32.mrb[13].mxu1 }
 0x159   :  { %v1975_v30 = vadd.f32 %v2721_v25, %v1935_v22  ;;  %v2743_v31 = vadd.f32 %v2742_v29, %v2741_v27  ;;  %v2744_v32 = vpop.f32.mrb[14].mxu1 }
 0x15a   :  { %v2745_v33 = vpop.f32.mrb[15].mxu1 }
 0x15b   :  { %v2015_v34 = vadd.f32 %v2743_v31, %v1975_v30 }
 0x175   :  { %v2763_v35 = vpop.f32.mrb[16].mxu0 }
 0x176   :  { %v2764_v36 = vpop.f32.mrb[17].mxu0 }
 0x177   :  { %v2765_v37 = vadd.f32 %v2764_v36, %v2763_v35  ;;  %v2766_v38 = vpop.f32.mrb[18].mxu0  ;;  %v2785_v39 = vpop.f32.mrb[16].mxu1 }
 0x178   :  { %v2767_v40 = vpop.f32.mrb[19].mxu0  ;;  %v2786_v42 = vpop.f32.mrb[17].mxu1 }
 0x179   :  { %v2055_v41 = vadd.f32 %v2765_v37, %v2015_v34  ;;  %v2787_v43 = vadd.f32 %v2786_v42, %v2785_v39  ;;  %v2788_v44 = vpop.f32.mrb[18].mxu1 }
 0x17a   :  { %v2789_v45 = vpop.f32.mrb[19].mxu1 }
 0x17b   :  { %v2095_v46 = vadd.f32 %v2787_v43, %v2055_v41 }
 0x195   :  { %v2807_v47 = vpop.f32.mrb[20].mxu0 }
 0x196   :  { %v2808_v48 = vpop.f32.mrb[21].mxu0 }
 0x197   :  { %v2809_v49 = vadd.f32 %v2808_v48, %v2807_v47  ;;  %v2810_v50 = vpop.f32.mrb[22].mxu0  ;;  %v2829_v51 = vpop.f32.mrb[20].mxu1 }
 0x198   :  { %v2811_v52 = vpop.f32.mrb[23].mxu0  ;;  %v2830_v53 = vpop.f32.mrb[21].mxu1 }
 0x199   :  { %v2135_v54 = vadd.f32 %v2809_v49, %v2095_v46  ;;  %v2831_v55 = vadd.f32 %v2830_v53, %v2829_v51  ;;  %v2832_v56 = vpop.f32.mrb[22].mxu1 }
 0x19a   :  { %v2833_v57 = vpop.f32.mrb[23].mxu1 }
 0x19b   :  { %v2175_v58 = vadd.f32 %v2831_v55, %v2135_v54 }
 0x1a5   :  { %v2214_v59 = vpop.f32.mrb[24].mxu0 }
 0x1a6   :  { %v2215_v60 = vadd.f32 %v2214_v59, %v2175_v58  ;;  %v2859_v61 = vpop.f32.mrb[25].mxu0 }
 0x1a7   :  { %v2217_v62 = vpop.f32.mrb[26].mxu0 }
 0x1a8   :  { %v2220_v63 = vmax.f32 %v2215_v60, 0.0  ;;  %v2860_v0 = vpop.f32.mrb[27].mxu0 }
 0x1aa   :  { %v2221_v1 = vpack.c.bf16 %v2220_v63, %v2220_v63 }
 0x1ac   :  { %2878 = vmatmul.mubr.bf16.vlgmr.msra.gmra.mrb[24].mxu1 %v2221_v1 }
 0x27f   :  { %v2327_v3 = vpop.f32.mrb[24].mxu1 }
 0x280   :  { %v2328_v4 = vadd.f32 %v2562_v2, %v2327_v3  ;;  %v2879_v5 = vpop.f32.mrb[25].mxu1 }
 0x281   :  { %v2330_v6 = vpop.f32.mrb[26].mxu1 }
 0x282   :  { %2334 = vst.msk [vmem:[%s3823_s5] sm:$0xff] %vm2333_vm2, %v2328_v4  ;;  %v2880_v7 = vpop.f32.mrb[27].mxu1 }

// kernel: forward.2
= control target key start
LH: loop header
LB: loop body
LE: loop exit
PB: predicated region body
PF: predicated region fallthrough
CT: control target
= control target key end

     0   :  { %vm1165_vm0 = vcmask 1041408   ;;  %vm1166_vm1 = vcmask 1042432   ;;  %vm828_vm2 = vcmask 302080   ;;  %v10480_v1 = vmov 65535   ;;  %s10481_s28 = smov 96   ;;  %s15393_s1 = inlined_call_operand.vmem [shape: bf16[37,128], index: 1, kind: input, shape index: {}]   ;;  %s15394_s3 = inlined_call_operand.vmem [shape: bf16[9,32,64], index: 3, kind: input, shape index: {}]   ;;  %s15395_s4 = inlined_call_operand.vmem [shape: f32[1,64], index: 4, kind: input, shape index: {}]   ;;  %s15396_s5 = inlined_call_operand.vmem [shape: bf16[224,224], index: 5, kind: input, shape index: {}]   ;;  %s15397_s6 = inlined_call_operand.vmem [shape: bf16[8,49,64], index: 6, kind: output, shape index: {}]   ;;  %s15398_s0 = inlined_call_operand.vmem [shape: bf16[1792,37], index: 0, kind: input, shape index: {}]   ;;  %s15399_s2 = inlined_call_operand.vmem [shape: f32[1,32], index: 2, kind: input, shape index: {}]  }
   0x1   :  { %v10294_v0 = vld [vmem:[%s15393_s1] sm:$0xff]   ;;  %v1167_v2 = vsel %vm1165_vm0, 4294967295, %v10480_v1  ;;  %v10295_v3 = vld [vmem:[%s15393_s1 + $0x8] sm:$0xff]   ;;  %v10296_v5 = vld [vmem:[%s15393_s1 + $0x10] ss:$0 sps:$4 sm:$0x77]  }
   0x2   :  { %v1168_v4 = vsel %vm1166_vm1, %v1167_v2, 0  ;;  %9533 = vmatprep.subr.bf16.mxu0 %v10294_v0  ;;  %10051 = vmatprep.subr.bf16.mxu1 %v10294_v0  ;;  %v10297_v6 = vld [vmem:[%s15398_s0] sm:$0xff]   ;;  %v10299_v9 = vld [vmem:[%s15398_s0 + $0x8] sm:$0xff]   ;;  %v10301_v11 = vld [vmem:[%s15398_s0 + $0x10] sm:$0xff]   ;;  %vm4908_vm3 = vcmask 261120   ;;  %vm4969_vm4 = vcmask 261124  }
   0x3   :  { %9534 = vmatpush3.bf16.msra.mxu0 %v10294_v0  ;;  %10054 = vmatpush3.bf16.msra.mxu1 %v10294_v0  ;;  %v1170_v7 = vand.u32 %v10296_v5, %v1168_v4  ;;  %v10298_v8 = vld [vmem:[%s15398_s0 + $0x1c0] sm:$0xff]   ;;  %v10300_v10 = vld [vmem:[%s15398_s0 + $0x1c8] sm:$0xff]   ;;  %v10303_v12 = vld [vmem:[%s15398_s0 + $0x1d0] sm:$0xff]   ;;  %vm4910_vm5 = vcmask 257024   ;;  %vm4926_vm6 = vcmask 1043456  }
   0x4   :  { %9535 = vmatprep.subr.bf16.mxu0 %v10295_v3  ;;  %10052 = vmatprep.subr.bf16.mxu1 %v10295_v3  ;;  %v10302_v13 = vld [vmem:[%s15398_s0 + $0x18] sm:$0xff]   ;;  %v10305_v15 = vld [vmem:[%s15398_s0 + $0x20] sm:$0xff]   ;;  %v10306_v17 = vld [vmem:[%s15398_s0 + $0x28] sm:$0xff]  }
   0x5   :  { %9539 = vmatprep.mubr.msk.bf16.mxu0 %vm828_vm2, %v10297_v6  ;;  %9651 = vmatprep.mubr.msk.bf16.mxu1 %vm828_vm2, %v10298_v8  ;;  %v10304_v14 = vld [vmem:[%s15398_s0 + $0x1d8] sm:$0xff]   ;;  %v10307_v16 = vld [vmem:[%s15398_s0 + $0x1e0] sm:$0xff]   ;;  %v10308_v18 = vld [vmem:[%s15398_s0 + $0x1e8] sm:$0xff]  }
   0x6   :  { %v10309_v19 = vld [vmem:[%s15398_s0 + $0x30] sm:$0xff]   ;;  %v10310_v21 = vld [vmem:[%s15398_s0 + $0x38] sm:$0xff]   ;;  %v10313_v23 = vld [vmem:[%s15398_s0 + $0x40] sm:$0xff]  }
   0x7   :  { %9536 = vmatpush3.bf16.msra.mxu0 %v10295_v3  ;;  %10055 = vmatpush3.bf16.msra.mxu1 %v10295_v3  ;;  %v10311_v20 = vld [vmem:[%s15398_s0 + $0x1f0] sm:$0xff]   ;;  %v10312_v22 = vld [vmem:[%s15398_s0 + $0x1f8] sm:$0xff]   ;;  %v10315_v24 = vld [vmem:[%s15398_s0 + $0x200] sm:$0xff]  }
   0x8   :  { %9537 = vmatprep.subr.bf16.mxu0 %v1170_v7  ;;  %10053 = vmatprep.subr.bf16.mxu1 %v1170_v7  ;;  %v10314_v25 = vld [vmem:[%s15398_s0 + $0x48] sm:$0xff]   ;;  %v10317_v27 = vld [vmem:[%s15398_s0 + $0x50] sm:$0xff]   ;;  %v10318_v29 = vld [vmem:[%s15398_s0 + $0x58] sm:$0xff]  }
   0x9   :  { %v10316_v26 = vld [vmem:[%s15398_s0 + $0x208] sm:$0xff]   ;;  %v10319_v28 = vld [vmem:[%s15398_s0 + $0x210] sm:$0xff]   ;;  %v10320_v30 = vld [vmem:[%s15398_s0 + $0x218] sm:$0xff]  }
   0xa   :  { %v10321_v31 = vld [vmem:[%s15398_s0 + $0x60] sm:$0xff]   ;;  %v10322_v33 = vld [vmem:[%s15398_s0 + $0x68] sm:$0xff]   ;;  %v10325_v35 = vld [vmem:[%s15398_s0 + $0x70] sm:$0xff]  }
   0xb   :  { %9538 = vmatpush3.bf16.msra.mxu0 %v1170_v7  ;;  %10056 = vmatpush3.bf16.msra.mxu1 %v1170_v7  ;;  %v10323_v32 = vld [vmem:[%s15398_s0 + $0x220] sm:$0xff]   ;;  %v10324_v34 = vld [vmem:[%s15398_s0 + $0x228] sm:$0xff]   ;;  %v10327_v36 = vld [vmem:[%s15398_s0 + $0x230] sm:$0xff]  }
   0xc   :  { %v10326_v37 = vld [vmem:[%s15398_s0 + $0x78] sm:$0xff]   ;;  %v10329_v39 = vld [vmem:[%s15398_s0 + $0x80] sm:$0xff]   ;;  %v10330_v41 = vld [vmem:[%s15398_s0 + $0x88] sm:$0xff]  }
   0xd   :  { %v10328_v38 = vld [vmem:[%s15398_s0 + $0x238] sm:$0xff]   ;;  %v10331_v40 = vld [vmem:[%s15398_s0 + $0x240] sm:$0xff]   ;;  %v10332_v42 = vld [vmem:[%s15398_s0 + $0x248] sm:$0xff]  }
   0xe   :  { %9540 = vmatmul.mubr.msk.bf16.vlgmr.msra.gmra.mrb[0].mxu0 %vm828_vm2, %v10299_v9  ;;  %9652 = vmatmul.mubr.msk.bf16.vlgmr.msra.gmra.mrb[0].mxu1 %vm828_vm2, %v10300_v10  ;;  %v10333_v43 = vld [vmem:[%s15398_s0 + $0x90] sm:$0xff]   ;;  %v10334_v45 = vld [vmem:[%s15398_s0 + $0x98] sm:$0xff]   ;;  %v10337_v47 = vld [vmem:[%s15398_s0 + $0xa0] sm:$0xff]  }
   0xf   :  { %9543 = vmatprep.mubr.msk.bf16.mxu0 %vm828_vm2, %v10301_v11  ;;  %9655 = vmatprep.mubr.msk.bf16.mxu1 %vm828_vm2, %v10303_v12  ;;  %v10335_v44 = vld [vmem:[%s15398_s0 + $0x250] sm:$0xff]   ;;  %v10336_v46 = vld [vmem:[%s15398_s0 + $0x258] sm:$0xff]   ;;  %v10339_v48 = vld [vmem:[%s15398_s0 + $0x260] sm:$0xff]  }
  0x10   :  { %v10338_v49 = vld [vmem:[%s15398_s0 + $0xa8] sm:$0xff]   ;;  %v10341_v51 = vld [vmem:[%s15398_s0 + $0xb0] sm:$0xff]   ;;  %v10342_v53 = vld [vmem:[%s15398_s0 + $0xb8] sm:$0xff]  }
  0x11   :  { %v10340_v50 = vld [vmem:[%s15398_s0 + $0x268] sm:$0xff]   ;;  %v10343_v52 = vld [vmem:[%s15398_s0 + $0x270] sm:$0xff]   ;;  %v10344_v54 = vld [vmem:[%s15398_s0 + $0x278] sm:$0xff]  }
  0x12   :  { %v10345_v55 = vld [vmem:[%s15398_s0 + $0xc0] sm:$0xff]   ;;  %v10346_v57 = vld [vmem:[%s15398_s0 + $0xc8] sm:$0xff]   ;;  %v10349_v59 = vld [vmem:[%s15398_s0 + $0xd0] sm:$0xff]  }
  0x13   :  { %v10347_v56 = vld [vmem:[%s15398_s0 + $0x280] sm:$0xff]   ;;  %v10348_v58 = vld [vmem:[%s15398_s0 + $0x288] sm:$0xff]   ;;  %v10351_v60 = vld [vmem:[%s15398_s0 + $0x290] sm:$0xff]  }
  0x14   :  { %v10350_v61 = vld [vmem:[%s15398_s0 + $0xd8] sm:$0xff]   ;;  %v10353_v63 = vld [vmem:[%s15398_s0 + $0xe0] sm:$0xff]   ;;  %v10354_v1 = vld [vmem:[%s15398_s0 + $0xe8] sm:$0xff]  }
  0x15   :  { %v10352_v62 = vld [vmem:[%s15398_s0 + $0x298] sm:$0xff]   ;;  %v10355_v0 = vld [vmem:[%s15398_s0 + $0x2a0] sm:$0xff]   ;;  %v10356_v2 = vld [vmem:[%s15398_s0 + $0x2a8] sm:$0xff]  }
  0x16   :  { %9544 = vmatmul.mubr.msk.bf16.gmra.mrb[4].mxu0 %vm828_vm2, %v10302_v13  ;;  %9656 = vmatmul.mubr.msk.bf16.gmra.mrb[4].mxu1 %vm828_vm2, %v10304_v14  ;;  %v10357_v3 = vld [vmem:[%s15398_s0 + $0xf0] sm:$0xff]   ;;  %v10358_v5 = vld [vmem:[%s15398_s0 + $0xf8] sm:$0xff]   ;;  %v10361_v7 = vld [vmem:[%s15398_s0 + $0x100] sm:$0xff]  }
  0x17   :  { %9547 = vmatprep.mubr.msk.bf16.mxu0 %vm828_vm2, %v10305_v15  ;;  %9659 = vmatprep.mubr.msk.bf16.mxu1 %vm828_vm2, %v10307_v16  ;;  %v10359_v4 = vld [vmem:[%s15398_s0 + $0x2b0] sm:$0xff]   ;;  %v10360_v6 = vld [vmem:[%s15398_s0 + $0x2b8] sm:$0xff]   ;;  %v10362_v8 = vld [vmem:[%s15398_s0 + $0x108] sm:$0xff]  }
  0x18   :  { %v10363_v9 = vld [vmem:[%s15398_s0 + $0x2c0] sm:$0xff]   ;;  %v10364_v10 = vld [vmem:[%s15398_s0 + $0x2c8] sm:$0xff]   ;;  %v10365_v11 = vld [vmem:[%s15398_s0 + $0x110] sm:$0xff]  }
  0x19   :  { %v10366_v12 = vld [vmem:[%s15398_s0 + $0x118] sm:$0xff]   ;;  %v10367_v13 = vld [vmem:[%s15398_s0 + $0x2d0] sm:$0xff]   ;;  %v10369_v15 = vld [vmem:[%s15398_s0 + $0x120] sm:$0xff]  }
  0x1a   :  { %v10368_v14 = vld [vmem:[%s15398_s0 + $0x2d8] sm:$0xff]   ;;  %v10370_v16 = vld [vmem:[%s15398_s0 + $0x128] sm:$0xff]  }
  0x1e   :  { %9548 = vmatmul.mubr.msk.bf16.gmra.mrb[8].mxu0 %vm828_vm2, %v10306_v17  ;;  %9660 = vmatmul.mubr.msk.bf16.gmra.mrb[8].mxu1 %vm828_vm2, %v10308_v18  ;;  %v10371_v17 = vld [vmem:[%s15398_s0 + $0x2e0] sm:$0xff]   ;;  %v10372_v18 = vld [vmem:[%s15398_s0 + $0x2e8] sm:$0xff]  }
  0x1f   :  { %9551 = vmatprep.mubr.msk.bf16.mxu0 %vm828_vm2, %v10309_v19  ;;  %9663 = vmatprep.mubr.msk.bf16.mxu1 %vm828_vm2, %v10311_v20  ;;  %v10373_v19 = vld [vmem:[%s15398_s0 + $0x130] sm:$0xff]   ;;  %v10374_v20 = vld [vmem:[%s15398_s0 + $0x138] sm:$0xff]  }
  0x26   :  { %9552 = vmatmul.mubr.msk.bf16.gmra.mrb[12].mxu0 %vm828_vm2, %v10310_v21  ;;  %9664 = vmatmul.mubr.msk.bf16.gmra.mrb[12].mxu1 %vm828_vm2, %v10312_v22  ;;  %v10375_v21 = vld [vmem:[%s15398_s0 + $0x2f0] sm:$0xff]   ;;  %v10376_v22 = vld [vmem:[%s15398_s0 + $0x2f8] sm:$0xff]  }
  0x27   :  { %9555 = vmatprep.mubr.msk.bf16.mxu0 %vm828_vm2, %v10313_v23  ;;  %9667 = vmatprep.mubr.msk.bf16.mxu1 %vm828_vm2, %v10315_v24  ;;  %v10377_v23 = vld [vmem:[%s15398_s0 + $0x140] sm:$0xff]   ;;  %v10378_v24 = vld [vmem:[%s15398_s0 + $0x148] sm:$0xff]  }
  0x2e   :  { %9556 = vmatmul.mubr.msk.bf16.gmra.mrb[16].mxu0 %vm828_vm2, %v10314_v25  ;;  %9668 = vmatmul.mubr.msk.bf16.gmra.mrb[16].mxu1 %vm828_vm2, %v10316_v26  ;;  %v10379_v25 = vld [vmem:[%s15398_s0 + $0x300] sm:$0xff]   ;;  %v10380_v26 = vld [vmem:[%s15398_s0 + $0x308] sm:$0xff]  }
  0x2f   :  { %9559 = vmatprep.mubr.msk.bf16.mxu0 %vm828_vm2, %v10317_v27  ;;  %9671 = vmatprep.mubr.msk.bf16.mxu1 %vm828_vm2, %v10319_v28  ;;  %v10381_v27 = vld [vmem:[%s15398_s0 + $0x150] sm:$0xff]   ;;  %v10382_v28 = vld [vmem:[%s15398_s0 + $0x158] sm:$0xff]  }
  0x36   :  { %9560 = vmatmul.mubr.msk.bf16.gmra.mrb[20].mxu0 %vm828_vm2, %v10318_v29  ;;  %9672 = vmatmul.mubr.msk.bf16.gmra.mrb[20].mxu1 %vm828_vm2, %v10320_v30  ;;  %v10383_v29 = vld [vmem:[%s15398_s0 + $0x310] sm:$0xff]   ;;  %v10384_v30 = vld [vmem:[%s15398_s0 + $0x318] sm:$0xff]  }
  0x37   :  { %9563 = vmatprep.mubr.msk.bf16.mxu0 %vm828_vm2, %v10321_v31  ;;  %9675 = vmatprep.mubr.msk.bf16.mxu1 %vm828_vm2, %v10323_v32 }
  0x3e   :  { %9564 = vmatmul.mubr.msk.bf16.gmra.mrb[24].mxu0 %vm828_vm2, %v10322_v33  ;;  %9676 = vmatmul.mubr.msk.bf16.gmra.mrb[24].mxu1 %vm828_vm2, %v10324_v34 }
  0x3f   :  { %9567 = vmatprep.mubr.msk.bf16.mxu0 %vm828_vm2, %v10325_v35  ;;  %9679 = vmatprep.mubr.msk.bf16.mxu1 %vm828_vm2, %v10327_v36 }
  0x46   :  { %9568 = vmatmul.mubr.msk.bf16.gmra.mrb[28].mxu0 %vm828_vm2, %v10326_v37  ;;  %9680 = vmatmul.mubr.msk.bf16.gmra.mrb[28].mxu1 %vm828_vm2, %v10328_v38 }
  0x47   :  { %9571 = vmatprep.mubr.msk.bf16.mxu0 %vm828_vm2, %v10329_v39  ;;  %9683 = vmatprep.mubr.msk.bf16.mxu1 %vm828_vm2, %v10331_v40  ;;  %v10385_v39 = vld [vmem:[%s15398_s0 + $0x160] sm:$0xff]   ;;  %v10386_v40 = vld [vmem:[%s15398_s0 + $0x168] sm:$0xff]  }
  0x4e   :  { %9572 = vmatmul.mubr.msk.bf16.gmra.mrb[32].mxu0 %vm828_vm2, %v10330_v41  ;;  %9684 = vmatmul.mubr.msk.bf16.gmra.mrb[32].mxu1 %vm828_vm2, %v10332_v42 }
  0x4f   :  { %9575 = vmatprep.mubr.msk.bf16.mxu0 %vm828_vm2, %v10333_v43  ;;  %9687 = vmatprep.mubr.msk.bf16.mxu1 %vm828_vm2, %v10335_v44 }
  0x56   :  { %9576 = vmatmul.mubr.msk.bf16.gmra.mrb[36].mxu0 %vm828_vm2, %v10334_v45  ;;  %9688 = vmatmul.mubr.msk.bf16.gmra.mrb[36].mxu1 %vm828_vm2, %v10336_v46  ;;  %v10387_v45 = vld [vmem:[%s15398_s0 + $0x320] sm:$0xff]  }
  0x57   :  { %9579 = vmatprep.mubr.msk.bf16.mxu0 %vm828_vm2, %v10337_v47  ;;  %9691 = vmatprep.mubr.msk.bf16.mxu1 %vm828_vm2, %v10339_v48  ;;  %v10388_v48 = vld [vmem:[%s15398_s0 + $0x328] sm:$0xff]  }
  0x5e   :  { %9580 = vmatmul.mubr.msk.bf16.gmra.mrb[40].mxu0 %vm828_vm2, %v10338_v49  ;;  %9692 = vmatmul.mubr.msk.bf16.gmra.mrb[40].mxu1 %vm828_vm2, %v10340_v50 }
  0x5f   :  { %9583 = vmatprep.mubr.msk.bf16.mxu0 %vm828_vm2, %v10341_v51  ;;  %9695 = vmatprep.mubr.msk.bf16.mxu1 %vm828_vm2, %v10343_v52 }
  0x66   :  { %9584 = vmatmul.mubr.msk.bf16.gmra.mrb[44].mxu0 %vm828_vm2, %v10342_v53  ;;  %9696 = vmatmul.mubr.msk.bf16.gmra.mrb[44].mxu1 %vm828_vm2, %v10344_v54 }
  0x67   :  { %9587 = vmatprep.mubr.msk.bf16.mxu0 %vm828_vm2, %v10345_v55  ;;  %9699 = vmatprep.mubr.msk.bf16.mxu1 %vm828_vm2, %v10347_v56 }
  0x6e   :  { %9588 = vmatmul.mubr.msk.bf16.gmra.mrb[48].mxu0 %vm828_vm2, %v10346_v57  ;;  %9700 = vmatmul.mubr.msk.bf16.gmra.mrb[48].mxu1 %vm828_vm2, %v10348_v58 }
  0x6f   :  { %9591 = vmatprep.mubr.msk.bf16.mxu0 %vm828_vm2, %v10349_v59  ;;  %9703 = vmatprep.mubr.msk.bf16.mxu1 %vm828_vm2, %v10351_v60  ;;  %v10389_v59 = vld [vmem:[%s15398_s0 + $0x170] sm:$0xff]   ;;  %v10390_v60 = vld [vmem:[%s15398_s0 + $0x178] sm:$0xff]  }
  0x76   :  { %9592 = vmatmul.mubr.msk.bf16.gmra.mrb[52].mxu0 %vm828_vm2, %v10350_v61  ;;  %9704 = vmatmul.mubr.msk.bf16.gmra.mrb[52].mxu1 %vm828_vm2, %v10352_v62 }
  0x77   :  { %9595 = vmatprep.mubr.msk.bf16.mxu0 %vm828_vm2, %v10353_v63  ;;  %9707 = vmatprep.mubr.msk.bf16.mxu1 %vm828_vm2, %v10355_v0 }
  0x7e   :  { %9596 = vmatmul.mubr.msk.bf16.gmra.mrb[56].mxu0 %vm828_vm2, %v10354_v1  ;;  %9708 = vmatmul.mubr.msk.bf16.gmra.mrb[56].mxu1 %vm828_vm2, %v10356_v2  ;;  %v10391_v1 = vld [vmem:[%s15398_s0 + $0x330] sm:$0xff]  }
  0x7f   :  { %9599 = vmatprep.mubr.msk.bf16.mxu0 %vm828_vm2, %v10357_v3  ;;  %9711 = vmatprep.mubr.msk.bf16.mxu1 %vm828_vm2, %v10359_v4  ;;  %v10392_v4 = vld [vmem:[%s15398_s0 + $0x338] sm:$0xff]  }
  0x86   :  { %9600 = vmatmul.mubr.msk.bf16.gmra.mrb[60].mxu0 %vm828_vm2, %v10358_v5  ;;  %9712 = vmatmul.mubr.msk.bf16.gmra.mrb[60].mxu1 %vm828_vm2, %v10360_v6 }
  0x87   :  { %9603 = vmatprep.mubr.msk.bf16.mxu0 %vm828_vm2, %v10361_v7  ;;  %9715 = vmatprep.mubr.msk.bf16.mxu1 %vm828_vm2, %v10363_v9 }
  0x8e   :  { %9604 = vmatmul.mubr.msk.bf16.gmra.mrb[64].mxu0 %vm828_vm2, %v10362_v8  ;;  %9716 = vmatmul.mubr.msk.bf16.gmra.mrb[64].mxu1 %vm828_vm2, %v10364_v10 }
  0x8f   :  { %9607 = vmatprep.mubr.msk.bf16.mxu0 %vm828_vm2, %v10365_v11  ;;  %9719 = vmatprep.mubr.msk.bf16.mxu1 %vm828_vm2, %v10367_v13 }
  0x96   :  { %9608 = vmatmul.mubr.msk.bf16.gmra.mrb[68].mxu0 %vm828_vm2, %v10366_v12  ;;  %9720 = vmatmul.mubr.msk.bf16.gmra.mrb[68].mxu1 %vm828_vm2, %v10368_v14 }
  0x97   :  { %9611 = vmatprep.mubr.msk.bf16.mxu0 %vm828_vm2, %v10369_v15  ;;  %9723 = vmatprep.mubr.msk.bf16.mxu1 %vm828_vm2, %v10371_v17  ;;  %v10393_v15 = vld [vmem:[%s15398_s0 + $0x180] sm:$0xff]  }
  0x9e   :  { %9612 = vmatmul.mubr.msk.bf16.gmra.mrb[72].mxu0 %vm828_vm2, %v10370_v16  ;;  %9724 = vmatmul.mubr.msk.bf16.gmra.mrb[72].mxu1 %vm828_vm2, %v10372_v18  ;;  %v10394_v16 = vld [vmem:[%s15398_s0 + $0x188] sm:$0xff]  }
  0x9f   :  { %9615 = vmatprep.mubr.msk.bf16.mxu0 %vm828_vm2, %v10373_v19  ;;  %9727 = vmatprep.mubr.msk.bf16.mxu1 %vm828_vm2, %v10375_v21  ;;  %v10395_v21 = vld [vmem:[%s15398_s0 + $0x340] sm:$0xff]  }
  0xa6   :  { %9616 = vmatmul.mubr.msk.bf16.gmra.mrb[76].mxu0 %vm828_vm2, %v10374_v20  ;;  %9728 = vmatmul.mubr.msk.bf16.gmra.mrb[76].mxu1 %vm828_vm2, %v10376_v22 }
  0xa7   :  { %9619 = vmatprep.mubr.msk.bf16.mxu0 %vm828_vm2, %v10377_v23  ;;  %9731 = vmatprep.mubr.msk.bf16.mxu1 %vm828_vm2, %v10379_v25 }
  0xae   :  { %9620 = vmatmul.mubr.msk.bf16.gmra.mrb[80].mxu0 %vm828_vm2, %v10378_v24  ;;  %9732 = vmatmul.mubr.msk.bf16.gmra.mrb[80].mxu1 %vm828_vm2, %v10380_v26  ;;  %v10396_v24 = vld [vmem:[%s15398_s0 + $0x348] sm:$0xff]  }
  0xaf   :  { %9623 = vmatprep.mubr.msk.bf16.mxu0 %vm828_vm2, %v10381_v27  ;;  %9735 = vmatprep.mubr.msk.bf16.mxu1 %vm828_vm2, %v10383_v29 }
  0xb6   :  { %9624 = vmatmul.mubr.msk.bf16.gmra.mrb[84].mxu0 %vm828_vm2, %v10382_v28  ;;  %9736 = vmatmul.mubr.msk.bf16.gmra.mrb[84].mxu1 %vm828_vm2, %v10384_v30 }
  0xb7   :  { %9627 = vmatprep.mubr.msk.bf16.mxu0 %vm828_vm2, %v10385_v39  ;;  %9739 = vmatprep.mubr.msk.bf16.mxu1 %vm828_vm2, %v10387_v45 }
  0xbe   :  { %9628 = vmatmul.mubr.msk.bf16.gmra.mrb[88].mxu0 %vm828_vm2, %v10386_v40  ;;  %9740 = vmatmul.mubr.msk.bf16.gmra.mrb[88].mxu1 %vm828_vm2, %v10388_v48 }
  0xbf   :  { %9631 = vmatprep.mubr.msk.bf16.mxu0 %vm828_vm2, %v10389_v59  ;;  %9743 = vmatprep.mubr.msk.bf16.mxu1 %vm828_vm2, %v10391_v1  ;;  %v10397_v59 = vld [vmem:[%s15398_s0 + $0x190] sm:$0xff]  }
  0xc6   :  { %9632 = vmatmul.mubr.msk.bf16.gmra.mrb[92].mxu0 %vm828_vm2, %v10390_v60  ;;  %9744 = vmatmul.mubr.msk.bf16.gmra.mrb[92].mxu1 %vm828_vm2, %v10392_v4  ;;  %v10398_v60 = vld [vmem:[%s15398_s0 + $0x198] sm:$0xff]  }
  0xc7   :  { %9635 = vmatprep.mubr.msk.bf16.mxu0 %vm828_vm2, %v10393_v15  ;;  %9747 = vmatprep.mubr.msk.bf16.mxu1 %vm828_vm2, %v10395_v21  ;;  %v10399_v21 = vld [vmem:[%s15398_s0 + $0x350] sm:$0xff]  }
  0xce   :  { %9636 = vmatmul.mubr.msk.bf16.gmra.mrb[96].mxu0 %vm828_vm2, %v10394_v16  ;;  %9748 = vmatmul.mubr.msk.bf16.gmra.mrb[96].mxu1 %vm828_vm2, %v10396_v24 }
  0xcf   :  { %9639 = vmatprep.mubr.msk.bf16.mxu0 %vm828_vm2, %v10397_v59  ;;  %9751 = vmatprep.mubr.msk.bf16.mxu1 %vm828_vm2, %v10399_v21 }
  0xd6   :  { %9640 = vmatmul.mubr.msk.bf16.gmra.mrb[100].mxu0 %vm828_vm2, %v10398_v60  ;;  %v10400_v60 = vld [vmem:[%s15398_s0 + $0x358] sm:$0xff]  }
  0xd7   :  { %9752 = vmatmul.mubr.msk.bf16.gmra.mrb[100].mxu1 %vm828_vm2, %v10400_v60 }
  0xe1   :  { %v10881_v31 = vpop.f32.mrb[0].mxu0  ;;  %v10883_v32 = vpop.f32.mrb[0].mxu1 }
  0xe2   :  { %15711 = vst [vmem:[#allocation3_spill] sm:$0xff] %v10881_v31  ;;  %15712 = vst [vmem:[#allocation4_spill] sm:$0xff] %v10883_v32  ;;  %2553 = vrot.lane.b32.xlu0 %v10883_v32, %s10481_s28  ;;  %v10887_v33 = vpop.f32.mrb[1].mxu1  ;;  %2329 = vrot.lane.b32.xlu1 %v10881_v31, %s10481_s28  ;;  %v10891_v34 = vpop.f32.mrb[1].mxu0 }
  0xe3   :  { %15713 = vst [vmem:[#allocation5_spill] sm:$0xff] %v10887_v33  ;;  %15714 = vst [vmem:[#allocation6_spill] sm:$0xff] %v10891_v34  ;;  %v10893_v35 = vpop.f32.mrb[2].mxu0  ;;  %v10895_v36 = vpop.f32.mrb[2].mxu1 }
  0xe4   :  { %15715 = vst [vmem:[#allocation7_spill] sm:$0xff] %v10893_v35  ;;  %15716 = vst [vmem:[#allocation8_spill] sm:$0xff] %v10895_v36  ;;  %v10897_v37 = vpop.f32.mrb[3].mxu0  ;;  %v10899_v38 = vpop.f32.mrb[3].mxu1 }
  0xe5   :  { %15717 = vst [vmem:[#allocation9_spill] sm:$0xff] %v10897_v37  ;;  %15718 = vst [vmem:[#allocation10_spill] sm:$0xff] %v10899_v38 }
  0xe6   :  { %2325 = vrot.lane.b32.xlu0 %v10891_v34, %s10481_s28  ;;  %2331 = vrot.lane.b32.xlu1 %v10893_v35, %s10481_s28 }
  0xe9   :  { %v10912_v41 = vpop.f32.mrb[4].mxu0  ;;  %v10914_v42 = vpop.f32.mrb[4].mxu1 }
  0xea   :  { %15719 = vst [vmem:[#allocation11_spill] sm:$0xff] %v10912_v41  ;;  %15720 = vst [vmem:[#allocation12_spill] sm:$0xff] %v10914_v42  ;;  %2549 = vrot.lane.b32.xlu0 %v10887_v33, %s10481_s28  ;;  %2555 = vrot.lane.b32.xlu1 %v10895_v36, %s10481_s28  ;;  %v10921_v43 = vpop.f32.mrb[5].mxu0  ;;  %v10923_v44 = vpop.f32.mrb[5].mxu1 }
  0xeb   :  { %15721 = vst [vmem:[#allocation13_spill] sm:$0xff] %v10921_v43  ;;  %15722 = vst [vmem:[#allocation14_spill] sm:$0xff] %v10923_v44  ;;  %v10928_v46 = vpop.f32.mrb[6].mxu0  ;;  %v10930_v47 = vpop.f32.mrb[6].mxu1 }
  0xec   :  { %15723 = vst [vmem:[#allocation15_spill] sm:$0xff] %v10928_v46  ;;  %15724 = vst [vmem:[#allocation16_spill] sm:$0xff] %v10930_v47  ;;  %v10935_v49 = vpop.f32.mrb[7].mxu0  ;;  %v10937_v50 = vpop.f32.mrb[7].mxu1 }
  0xed   :  { %15725 = vst [vmem:[#allocation17_spill] sm:$0xff] %v10935_v49  ;;  %15726 = vst [vmem:[#allocation18_spill] sm:$0xff] %v10937_v50 }
  0xee   :  { %2551 = vrot.lane.b32.xlu1 %v10899_v38, %s10481_s28  ;;  %2327 = vrot.lane.b32.xlu0 %v10897_v37, %s10481_s28 }
  0xf1   :  { %v10945_v51 = vpop.f32.mrb[8].mxu0  ;;  %v10947_v52 = vpop.f32.mrb[8].mxu1 }
  0xf2   :  { %15727 = vst [vmem:[#allocation19_spill] sm:$0xff] %v10945_v51  ;;  %15728 = vst [vmem:[#allocation20_spill] sm:$0xff] %v10947_v52  ;;  %2337 = vrot.lane.b32.xlu0 %v10912_v41, %s10481_s28  ;;  %2339 = vrot.lane.b32.xlu1 %v10928_v46, %s10481_s28  ;;  %v10953_v53 = vpop.f32.mrb[9].mxu0  ;;  %v10955_v54 = vpop.f32.mrb[9].mxu1 }
  0xf3   :  { %15729 = vst [vmem:[#allocation21_spill] sm:$0xff] %v10953_v53  ;;  %15730 = vst [vmem:[#allocation22_spill] sm:$0xff] %v10955_v54  ;;  %v10957_v55 = vpop.f32.mrb[10].mxu0  ;;  %v10959_v56 = vpop.f32.mrb[10].mxu1 }
  0xf4   :  { %15731 = vst [vmem:[#allocation23_spill] sm:$0xff] %v10957_v55  ;;  %15732 = vst [vmem:[#allocation24_spill] sm:$0xff] %v10959_v56  ;;  %v10961_v57 = vpop.f32.mrb[11].mxu0  ;;  %v10963_v58 = vpop.f32.mrb[11].mxu1 }
  0xf5   :  { %15733 = vst [vmem:[#allocation25_spill] sm:$0xff] %v10961_v57  ;;  %15734 = vst [vmem:[#allocation26_spill] sm:$0xff] %v10963_v58 }
  0xf6   :  { %2561 = vrot.lane.b32.xlu0 %v10914_v42, %s10481_s28  ;;  %2563 = vrot.lane.b32.xlu1 %v10930_v47, %s10481_s28  ;;  %v10401_v47 = vld [vmem:[%s15398_s0 + $0x1a0] sm:$0xff]   ;;  %v10402_v42 = vld [vmem:[%s15398_s0 + $0x1a8] sm:$0xff]  }
  0xf7   :  { %9643 = vmatprep.mubr.msk.bf16.mxu0 %vm828_vm2, %v10401_v47  ;;  %v10403_v47 = vld [vmem:[%s15398_s0 + $0x360] sm:$0xff]  }
  0xf8   :  { %9644 = vmatmul.mubr.msk.bf16.gmra.mrb[104].mxu0 %vm828_vm2, %v10402_v42  ;;  %v10404_v42 = vld [vmem:[%s15398_s0 + $0x368] sm:$0xff]   ;;  %9755 = vmatprep.mubr.msk.bf16.mxu1 %vm828_vm2, %v10403_v47 }
  0xf9   :  { %v10976_v61 = vpop.f32.mrb[12].mxu0  ;;  %v10978_v62 = vpop.f32.mrb[12].mxu1  ;;  %9756 = vmatmul.mubr.msk.bf16.gmra.mrb[104].mxu1 %vm828_vm2, %v10404_v42 }
  0xfa   :  { %15735 = vst [vmem:[#allocation27_spill] sm:$0xff] %v10976_v61  ;;  %15736 = vst [vmem:[#allocation28_spill] sm:$0xff] %v10978_v62  ;;  %2333 = vrot.lane.b32.xlu0 %v10921_v43, %s10481_s28  ;;  %2335 = vrot.lane.b32.xlu1 %v10935_v49, %s10481_s28  ;;  %v10985_v63 = vpop.f32.mrb[13].mxu0  ;;  %v10987_v0 = vpop.f32.mrb[13].mxu1 }
  0xfb   :  { %15737 = vst [vmem:[#allocation29_spill] sm:$0xff] %v10985_v63  ;;  %15738 = vst [vmem:[#allocation30_spill] sm:$0xff] %v10987_v0  ;;  %v10992_v2 = vpop.f32.mrb[14].mxu0  ;;  %v10994_v3 = vpop.f32.mrb[14].mxu1 }
  0xfc   :  { %15739 = vst [vmem:[#allocation31_spill] sm:$0xff] %v10992_v2  ;;  %15740 = vst [vmem:[#allocation32_spill] sm:$0xff] %v10994_v3  ;;  %v10999_v5 = vpop.f32.mrb[15].mxu0  ;;  %v11001_v6 = vpop.f32.mrb[15].mxu1 }
  0xfd   :  { %15741 = vst [vmem:[#allocation33_spill] sm:$0xff] %v10999_v5  ;;  %15742 = vst [vmem:[#allocation34_spill] sm:$0xff] %v11001_v6 }
  0xfe   :  { %2557 = vrot.lane.b32.xlu0 %v10923_v44, %s10481_s28  ;;  %2559 = vrot.lane.b32.xlu1 %v10937_v50, %s10481_s28 }
 0x101   :  { %v11009_v7 = vpop.f32.mrb[16].mxu0  ;;  %v11011_v8 = vpop.f32.mrb[16].mxu1 }
 0x102   :  { %15743 = vst [vmem:[#allocation35_spill] sm:$0xff] %v11009_v7  ;;  %15744 = vst [vmem:[#allocation36_spill] sm:$0xff] %v11011_v8  ;;  %2345 = vrot.lane.b32.xlu0 %v10945_v51, %s10481_s28  ;;  %2347 = vrot.lane.b32.xlu1 %v10957_v55, %s10481_s28  ;;  %v11017_v9 = vpop.f32.mrb[17].mxu0  ;;  %v11019_v10 = vpop.f32.mrb[17].mxu1 }
 0x103   :  { %15745 = vst [vmem:[#allocation37_spill] sm:$0xff] %v11017_v9  ;;  %15746 = vst [vmem:[#allocation38_spill] sm:$0xff] %v11019_v10  ;;  %v11021_v11 = vpop.f32.mrb[18].mxu0  ;;  %v11023_v12 = vpop.f32.mrb[18].mxu1 }
 0x104   :  { %15747 = vst [vmem:[#allocation39_spill] sm:$0xff] %v11021_v11  ;;  %15748 = vst [vmem:[#allocation40_spill] sm:$0xff] %v11023_v12  ;;  %v11025_v13 = vpop.f32.mrb[19].mxu0  ;;  %v11027_v14 = vpop.f32.mrb[19].mxu1 }
 0x105   :  { %15749 = vst [vmem:[#allocation41_spill] sm:$0xff] %v11025_v13  ;;  %15750 = vst [vmem:[#allocation42_spill] sm:$0xff] %v11027_v14 }
 0x106   :  { %2569 = vrot.lane.b32.xlu0 %v10947_v52, %s10481_s28  ;;  %2571 = vrot.lane.b32.xlu1 %v10959_v56, %s10481_s28 }
 0x109   :  { %v11040_v17 = vpop.f32.mrb[20].mxu0  ;;  %v11042_v18 = vpop.f32.mrb[20].mxu1 }
 0x10a   :  { %15751 = vst [vmem:[#allocation43_spill] sm:$0xff] %v11040_v17  ;;  %15752 = vst [vmem:[#allocation44_spill] sm:$0xff] %v11042_v18  ;;  %2341 = vrot.lane.b32.xlu0 %v10953_v53, %s10481_s28  ;;  %2343 = vrot.lane.b32.xlu1 %v10961_v57, %s10481_s28  ;;  %v11049_v19 = vpop.f32.mrb[21].mxu0  ;;  %v11051_v20 = vpop.f32.mrb[21].mxu1 }
 0x10b   :  { %15753 = vst [vmem:[#allocation45_spill] sm:$0xff] %v11049_v19  ;;  %15754 = vst [vmem:[#allocation46_spill] sm:$0xff] %v11051_v20  ;;  %v11056_v22 = vpop.f32.mrb[22].mxu0  ;;  %v11058_v23 = vpop.f32.mrb[22].mxu1 }
 0x10c   :  { %15755 = vst [vmem:[#allocation47_spill] sm:$0xff] %v11056_v22  ;;  %15756 = vst [vmem:[#allocation48_spill] sm:$0xff] %v11058_v23  ;;  %v11063_v25 = vpop.f32.mrb[23].mxu0  ;;  %v11065_v26 = vpop.f32.mrb[23].mxu1 }
 0x10d   :  { %15757 = vst [vmem:[#allocation49_spill] sm:$0xff] %v11063_v25  ;;  %15758 = vst [vmem:[#allocation50_spill] sm:$0xff] %v11065_v26 }
 0x10e   :  { %2565 = vrot.lane.b32.xlu0 %v10955_v54, %s10481_s28  ;;  %2567 = vrot.lane.b32.xlu1 %v10963_v58, %s10481_s28 }
 0x111   :  { %v11073_v27 = vpop.f32.mrb[24].mxu0  ;;  %v11075_v28 = vpop.f32.mrb[24].mxu1 }
 0x112   :  { %15759 = vst [vmem:[#allocation51_spill] sm:$0xff] %v11073_v27  ;;  %15760 = vst [vmem:[#allocation52_spill] sm:$0xff] %v11075_v28  ;;  %2353 = vrot.lane.b32.xlu0 %v10976_v61, %s10481_s28  ;;  %2355 = vrot.lane.b32.xlu1 %v10992_v2, %s10481_s28  ;;  %v11081_v29 = vpop.f32.mrb[25].mxu0  ;;  %v11083_v30 = vpop.f32.mrb[25].mxu1 }
 0x113   :  { %15761 = vst [vmem:[#allocation53_spill] sm:$0xff] %v11081_v29  ;;  %15762 = vst [vmem:[#allocation54_spill] sm:$0xff] %v11083_v30  ;;  %v11085_v39 = vpop.f32.mrb[26].mxu0  ;;  %v11087_v40 = vpop.f32.mrb[26].mxu1 }
 0x114   :  { %15763 = vst [vmem:[#allocation55_spill] sm:$0xff] %v11085_v39  ;;  %15764 = vst [vmem:[#allocation56_spill] sm:$0xff] %v11087_v40  ;;  %v11089_v45 = vpop.f32.mrb[27].mxu0  ;;  %v11091_v48 = vpop.f32.mrb[27].mxu1 }
 0x115   :  { %15765 = vst [vmem:[#allocation57_spill] sm:$0xff] %v11089_v45  ;;  %15766 = vst [vmem:[#allocation58_spill] sm:$0xff] %v11091_v48 }
 0x116   :  { %2577 = vrot.lane.b32.xlu0 %v10978_v62, %s10481_s28  ;;  %2579 = vrot.lane.b32.xlu1 %v10994_v3, %s10481_s28 }
 0x119   :  { %v11104_v1 = vpop.f32.mrb[28].mxu0  ;;  %v11106_v4 = vpop.f32.mrb[28].mxu1 }
 0x11a   :  { %15767 = vst [vmem:[#allocation59_spill] sm:$0xff] %v11104_v1  ;;  %15768 = vst [vmem:[#allocation60_spill] sm:$0xff] %v11106_v4  ;;  %2349 = vrot.lane.b32.xlu0 %v10985_v63, %s10481_s28  ;;  %2351 = vrot.lane.b32.xlu1 %v10999_v5, %s10481_s28  ;;  %v11113_v15 = vpop.f32.mrb[29].mxu0  ;;  %v11115_v16 = vpop.f32.mrb[29].mxu1 }
 0x11b   :  { %15769 = vst [vmem:[#allocation61_spill] sm:$0xff] %v11113_v15  ;;  %15770 = vst [vmem:[#allocation62_spill] sm:$0xff] %v11115_v16  ;;  %v11120_v24 = vpop.f32.mrb[30].mxu0  ;;  %v11122_v59 = vpop.f32.mrb[30].mxu1 }
 0x11c   :  { %15771 = vst [vmem:[#allocation63_spill] sm:$0xff] %v11120_v24  ;;  %15772 = vst [vmem:[#allocation64_spill] sm:$0xff] %v11122_v59  ;;  %v11127_v3 = vpop.f32.mrb[31].mxu0  ;;  %v11129_v62 = vpop.f32.mrb[31].mxu1 }
 0x11d   :  { %15773 = vst [vmem:[#allocation65_spill] sm:$0xff] %v11127_v3  ;;  %15774 = vst [vmem:[#allocation66_spill] sm:$0xff] %v11129_v62 }
 0x11e   :  { %2573 = vrot.lane.b32.xlu0 %v10987_v0, %s10481_s28  ;;  %2575 = vrot.lane.b32.xlu1 %v11001_v6, %s10481_s28 }
 0x121   :  { %v11137_v56 = vpop.f32.mrb[32].mxu0  ;;  %v11139_v52 = vpop.f32.mrb[32].mxu1 }
 0x122   :  { %15775 = vst [vmem:[#allocation67_spill] sm:$0xff] %v11137_v56  ;;  %15776 = vst [vmem:[#allocation68_spill] sm:$0xff] %v11139_v52  ;;  %2361 = vrot.lane.b32.xlu0 %v11009_v7, %s10481_s28  ;;  %2363 = vrot.lane.b32.xlu1 %v11021_v11, %s10481_s28  ;;  %v11145_v58 = vpop.f32.mrb[33].mxu0  ;;  %v11147_v21 = vpop.f32.mrb[33].mxu1 }
 0x123   :  { %15777 = vst [vmem:[#allocation69_spill] sm:$0xff] %v11145_v58  ;;  %15778 = vst [vmem:[#allocation70_spill] sm:$0xff] %v11147_v21  ;;  %v11149_v60 = vpop.f32.mrb[34].mxu0  ;;  %v11151_v0 = vpop.f32.mrb[34].mxu1 }
 0x124   :  { %15779 = vst [vmem:[#allocation71_spill] sm:$0xff] %v11149_v60  ;;  %15780 = vst [vmem:[#allocation72_spill] sm:$0xff] %v11151_v0  ;;  %v11153_v54 = vpop.f32.mrb[35].mxu0  ;;  %v11155_v6 = vpop.f32.mrb[35].mxu1 }
 0x125   :  { %15781 = vst [vmem:[#allocation73_spill] sm:$0xff] %v11153_v54  ;;  %15782 = vst [vmem:[#allocation74_spill] sm:$0xff] %v11155_v6 }
 0x126   :  { %2585 = vrot.lane.b32.xlu0 %v11011_v8, %s10481_s28  ;;  %2587 = vrot.lane.b32.xlu1 %v11023_v12, %s10481_s28 }
 0x129   :  { %v11168_v50 = vpop.f32.mrb[36].mxu0  ;;  %v11170_v44 = vpop.f32.mrb[36].mxu1 }
 0x12a   :  { %15783 = vst [vmem:[#allocation75_spill] sm:$0xff] %v11168_v50  ;;  %15784 = vst [vmem:[#allocation76_spill] sm:$0xff] %v11170_v44  ;;  %2357 = vrot.lane.b32.xlu0 %v11017_v9, %s10481_s28  ;;  %2359 = vrot.lane.b32.xlu1 %v11025_v13, %s10481_s28  ;;  %v11177_v12 = vpop.f32.mrb[37].mxu0  ;;  %v11179_v8 = vpop.f32.mrb[37].mxu1 }
 0x12b   :  { %15785 = vst [vmem:[#allocation77_spill] sm:$0xff] %v11177_v12  ;;  %15786 = vst [vmem:[#allocation78_spill] sm:$0xff] %v11179_v8  ;;  %v11184_v36 = vpop.f32.mrb[38].mxu0  ;;  %v11186_v32 = vpop.f32.mrb[38].mxu1 }
 0x12c   :  { %15787 = vst [vmem:[#allocation79_spill] sm:$0xff] %v11184_v36  ;;  %15788 = vst [vmem:[#allocation80_spill] sm:$0xff] %v11186_v32  ;;  %v11191_v38 = vpop.f32.mrb[39].mxu0  ;;  %v11193_v33 = vpop.f32.mrb[39].mxu1 }
 0x12d   :  { %15789 = vst [vmem:[#allocation81_spill] sm:$0xff] %v11191_v38  ;;  %15790 = vst [vmem:[#allocation82_spill] sm:$0xff] %v11193_v33 }
 0x12e   :  { %2581 = vrot.lane.b32.xlu0 %v11019_v10, %s10481_s28  ;;  %2583 = vrot.lane.b32.xlu1 %v11027_v14, %s10481_s28 }
 0x131   :  { %v11201_v11 = vpop.f32.mrb[40].mxu0  ;;  %v11203_v7 = vpop.f32.mrb[40].mxu1 }
 0x132   :  { %15791 = vst [vmem:[#allocation83_spill] sm:$0xff] %v11201_v11  ;;  %15792 = vst [vmem:[#allocation84_spill] sm:$0xff] %v11203_v7  ;;  %2369 = vrot.lane.b32.xlu0 %v11040_v17, %s10481_s28  ;;  %2371 = vrot.lane.b32.xlu1 %v11056_v22, %s10481_s28  ;;  %v11209_v13 = vpop.f32.mrb[41].mxu0  ;;  %v11211_v47 = vpop.f32.mrb[41].mxu1  ;;  %v10405_v22 = vld [vmem:[%s15398_s0 + $0x1b0] sm:$0xff]   ;;  %v10406_v17 = vld [vmem:[%s15398_s0 + $0x1b8] sm:$0xff]  }
 0x133   :  { %15793 = vst [vmem:[#allocation85_spill] sm:$0xff] %v11209_v13  ;;  %15794 = vst [vmem:[#allocation86_spill] sm:$0xff] %v11211_v47  ;;  %v11213_v42 = vpop.f32.mrb[42].mxu0  ;;  %v11215_v10 = vpop.f32.mrb[42].mxu1  ;;  %9647 = vmatprep.mubr.msk.bf16.mxu0 %vm828_vm2, %v10405_v22  ;;  %v10407_v22 = vld [vmem:[%s15398_s0 + $0x370] sm:$0xff]  }
 0x134   :  { %15795 = vst [vmem:[#allocation87_spill] sm:$0xff] %v11213_v42  ;;  %15796 = vst [vmem:[#allocation88_spill] sm:$0xff] %v11215_v10  ;;  %v11217_v9 = vpop.f32.mrb[43].mxu0  ;;  %v11219_v14 = vpop.f32.mrb[43].mxu1  ;;  %9648 = vmatmul.mubr.msk.bf16.gmra.mrb[108].mxu0 %vm828_vm2, %v10406_v17  ;;  %v10408_v17 = vld [vmem:[%s15398_s0 + $0x378] sm:$0xff]   ;;  %9759 = vmatprep.mubr.msk.bf16.mxu1 %vm828_vm2, %v10407_v22  ;;  %s10483_s0 = smov 64  }
 0x135   :  { %15797 = vst [vmem:[#allocation89_spill] sm:$0xff] %v11217_v9  ;;  %15798 = vst [vmem:[#allocation90_spill] sm:$0xff] %v11219_v14  ;;  %9760 = vmatmul.mubr.msk.bf16.gmra.mrb[108].mxu1 %vm828_vm2, %v10408_v17 }
 0x136   :  { %2593 = vrot.lane.b32.xlu0 %v11042_v18, %s10481_s28  ;;  %2595 = vrot.lane.b32.xlu1 %v11058_v23, %s10481_s28 }
 0x139   :  { %v11232_v2 = vpop.f32.mrb[44].mxu0  ;;  %v11234_v61 = vpop.f32.mrb[44].mxu1 }
 0x13a   :  { %15799 = vst [vmem:[#allocation91_spill] sm:$0xff] %v11232_v2  ;;  %15800 = vst [vmem:[#allocation92_spill] sm:$0xff] %v11234_v61  ;;  %2365 = vrot.lane.b32.xlu0 %v11049_v19, %s10481_s28  ;;  %2367 = vrot.lane.b32.xlu1 %v11063_v25, %s10481_s28  ;;  %v11241_v23 = vpop.f32.mrb[45].mxu0  ;;  %v11243_v18 = vpop.f32.mrb[45].mxu1 }
 0x13b   :  { %15801 = vst [vmem:[#allocation93_spill] sm:$0xff] %v11241_v23  ;;  %15802 = vst [vmem:[#allocation94_spill] sm:$0xff] %v11243_v18  ;;  %v11248_v5 = vpop.f32.mrb[46].mxu0  ;;  %v11250_v63 = vpop.f32.mrb[46].mxu1 }
 0x13c   :  { %15803 = vst [vmem:[#allocation95_spill] sm:$0xff] %v11248_v5  ;;  %15804 = vst [vmem:[#allocation96_spill] sm:$0xff] %v11250_v63  ;;  %v11255_v19 = vpop.f32.mrb[47].mxu0  ;;  %v11257_v55 = vpop.f32.mrb[47].mxu1 }
 0x13d   :  { %15805 = vst [vmem:[#allocation97_spill] sm:$0xff] %v11255_v19  ;;  %15806 = vst [vmem:[#allocation98_spill] sm:$0xff] %v11257_v55 }
 0x13e   :  { %2589 = vrot.lane.b32.xlu0 %v11051_v20, %s10481_s28  ;;  %2591 = vrot.lane.b32.xlu1 %v11065_v26, %s10481_s28 }
 0x141   :  { %v11265_v25 = vpop.f32.mrb[48].mxu0  ;;  %v11267_v51 = vpop.f32.mrb[48].mxu1 }
 0x142   :  { %15807 = vst [vmem:[#allocation99_spill] sm:$0xff] %v11265_v25  ;;  %15808 = vst [vmem:[#allocation100_spill] sm:$0xff] %v11267_v51  ;;  %2377 = vrot.lane.b32.xlu0 %v11073_v27, %s10481_s28  ;;  %2379 = vrot.lane.b32.xlu1 %v11085_v39, %s10481_s28  ;;  %v11273_v57 = vpop.f32.mrb[49].mxu0  ;;  %v11275_v22 = vpop.f32.mrb[49].mxu1 }
 0x143   :  { %15809 = vst [vmem:[#allocation101_spill] sm:$0xff] %v11273_v57  ;;  %15810 = vst [vmem:[#allocation102_spill] sm:$0xff] %v11275_v22  ;;  %v11277_v17 = vpop.f32.mrb[50].mxu0  ;;  %v11279_v20 = vpop.f32.mrb[50].mxu1 }
 0x144   :  { %15811 = vst [vmem:[#allocation103_spill] sm:$0xff] %v11277_v17  ;;  %15812 = vst [vmem:[#allocation104_spill] sm:$0xff] %v11279_v20  ;;  %v11281_v53 = vpop.f32.mrb[51].mxu0  ;;  %v11283_v26 = vpop.f32.mrb[51].mxu1 }
 0x145   :  { %15813 = vst [vmem:[#allocation105_spill] sm:$0xff] %v11281_v53  ;;  %15814 = vst [vmem:[#allocation106_spill] sm:$0xff] %v11283_v26 }
 0x146   :  { %2601 = vrot.lane.b32.xlu0 %v11075_v28, %s10481_s28  ;;  %2603 = vrot.lane.b32.xlu1 %v11087_v40, %s10481_s28 }
 0x149   :  { %v11289_v27 = vpop.f32.mrb[52].mxu0  ;;  %v11291_v39 = vpop.f32.mrb[52].mxu1 }
 0x14a   :  { %15815 = vst [vmem:[#allocation107_spill] sm:$0xff] %v11289_v27  ;;  %15816 = vst [vmem:[#allocation108_spill] sm:$0xff] %v11291_v39  ;;  %2373 = vrot.lane.b32.xlu0 %v11081_v29, %s10481_s28  ;;  %2375 = vrot.lane.b32.xlu1 %v11089_v45, %s10481_s28  ;;  %v11297_v46 = vpop.f32.mrb[53].mxu0  ;;  %v11299_v41 = vpop.f32.mrb[53].mxu1 }
 0x14b   :  { %15817 = vst [vmem:[#allocation109_spill] sm:$0xff] %v11297_v46  ;;  %15818 = vst [vmem:[#allocation110_spill] sm:$0xff] %v11299_v41  ;;  %v11301_v49 = vpop.f32.mrb[54].mxu0  ;;  %v11303_v28 = vpop.f32.mrb[54].mxu1 }
 0x14c   :  { %15819 = vst [vmem:[#allocation111_spill] sm:$0xff] %v11301_v49  ;;  %15820 = vst [vmem:[#allocation112_spill] sm:$0xff] %v11303_v28  ;;  %v11305_v43 = vpop.f32.mrb[55].mxu0  ;;  %v11307_v40 = vpop.f32.mrb[55].mxu1 }
 0x14d   :  { %15821 = vst [vmem:[#allocation113_spill] sm:$0xff] %v11305_v43  ;;  %15822 = vst [vmem:[#allocation114_spill] sm:$0xff] %v11307_v40 }
 0x14e   :  { %2597 = vrot.lane.b32.xlu0 %v11083_v30, %s10481_s28  ;;  %2599 = vrot.lane.b32.xlu1 %v11091_v48, %s10481_s28 }
 0x151   :  { %v11313_v29 = vpop.f32.mrb[56].mxu0  ;;  %v11315_v45 = vpop.f32.mrb[56].mxu1 }
 0x152   :  { %15823 = vst [vmem:[#allocation115_spill] sm:$0xff] %v11313_v29  ;;  %15824 = vst [vmem:[#allocation116_spill] sm:$0xff] %v11315_v45  ;;  %2385 = vrot.lane.b32.xlu0 %v11104_v1, %s10481_s28  ;;  %2387 = vrot.lane.b32.xlu1 %v11120_v24, %s10481_s28  ;;  %v11321_v35 = vpop.f32.mrb[57].mxu0  ;;  %v11323_v31 = vpop.f32.mrb[57].mxu1 }
 0x153   :  { %15825 = vst [vmem:[#allocation117_spill] sm:$0xff] %v11321_v35  ;;  %15826 = vst [vmem:[#allocation118_spill] sm:$0xff] %v11323_v31  ;;  %v11325_v37 = vpop.f32.mrb[58].mxu0  ;;  %v11327_v30 = vpop.f32.mrb[58].mxu1 }
 0x154   :  { %15827 = vst [vmem:[#allocation119_spill] sm:$0xff] %v11325_v37  ;;  %15828 = vst [vmem:[#allocation120_spill] sm:$0xff] %v11327_v30  ;;  %v11329_v34 = vpop.permute.xlu0 %2553  ;;  %v11331_v48 = vpop.permute.xlu1 %2329 }
 0x155   :  { %15829 = vst [vmem:[#allocation121_spill] sm:$0xff] %v11329_v34  ;;  %15830 = vst [vmem:[#allocation122_spill] sm:$0xff] %v11331_v48  ;;  %v11333_v29 = vpop.f32.mrb[59].mxu0  ;;  %v11335_v45 = vpop.f32.mrb[59].mxu1 }
 0x156   :  { %15831 = vst [vmem:[#allocation123_spill] sm:$0xff] %v11333_v29  ;;  %15832 = vst [vmem:[#allocation124_spill] sm:$0xff] %v11335_v45  ;;  %2609 = vrot.lane.b32.xlu0 %v11106_v4, %s10481_s28  ;;  %2611 = vrot.lane.b32.xlu1 %v11122_v59, %s10481_s28 }
 0x158   :  { %v11341_v24 = vpop.permute.xlu0 %2325  ;;  %v11343_v1 = vpop.permute.xlu1 %2331 }
 0x159   :  { %15833 = vst [vmem:[#allocation125_spill] sm:$0xff] %v11341_v24  ;;  %15834 = vst [vmem:[#allocation126_spill] sm:$0xff] %v11343_v1  ;;  %v11345_v31 = vpop.f32.mrb[60].mxu0  ;;  %v11347_v35 = vpop.f32.mrb[60].mxu1 }
 0x15a   :  { %15835 = vst [vmem:[#allocation127_spill] sm:$0xff] %v11345_v31  ;;  %15836 = vst [vmem:[#allocation128_spill] sm:$0xff] %v11347_v35  ;;  %2381 = vrot.lane.b32.xlu0 %v11113_v15, %s10481_s28  ;;  %2383 = vrot.lane.b32.xlu1 %v11127_v3, %s10481_s28  ;;  %v11353_v34 = vpop.f32.mrb[61].mxu0  ;;  %v11355_v4 = vpop.f32.mrb[61].mxu1 }
 0x15b   :  { %15837 = vst [vmem:[#allocation129_spill] sm:$0xff] %v11353_v34  ;;  %15838 = vst [vmem:[#allocation130_spill] sm:$0xff] %v11355_v4  ;;  %v11357_v48 = vpop.f32.mrb[62].mxu0  ;;  %v11359_v59 = vpop.f32.mrb[62].mxu1 }
 0x15c   :  { %15839 = vst [vmem:[#allocation131_spill] sm:$0xff] %v11357_v48  ;;  %15840 = vst [vmem:[#allocation132_spill] sm:$0xff] %v11359_v59  ;;  %v11361_v24 = vpop.permute.xlu0 %2549  ;;  %v11363_v1 = vpop.permute.xlu1 %2555 }
 0x15d   :  { %15841 = vst [vmem:[#allocation133_spill] sm:$0xff] %v11361_v24  ;;  %15842 = vst [vmem:[#allocation134_spill] sm:$0xff] %v11363_v1  ;;  %v11365_v31 = vpop.f32.mrb[63].mxu0  ;;  %v11367_v35 = vpop.f32.mrb[63].mxu1 }
 0x15e   :  { %15843 = vst [vmem:[#allocation135_spill] sm:$0xff] %v11365_v31  ;;  %15844 = vst [vmem:[#allocation136_spill] sm:$0xff] %v11367_v35  ;;  %2605 = vrot.lane.b32.xlu0 %v11115_v16, %s10481_s28  ;;  %2607 = vrot.lane.b32.xlu1 %v11129_v62, %s10481_s28 }
 0x160   :  { %v11373_v3 = vpop.permute.xlu1 %2551  ;;  %v11375_v15 = vpop.permute.xlu0 %2327 }
 0x161   :  { %15845 = vst [vmem:[#allocation137_spill] sm:$0xff] %v11373_v3  ;;  %15846 = vst [vmem:[#allocation138_spill] sm:$0xff] %v11375_v15  ;;  %v11377_v4 = vpop.f32.mrb[64].mxu0  ;;  %v11379_v34 = vpop.f32.mrb[64].mxu1 }
 0x162   :  { %15847 = vst [vmem:[#allocation139_spill] sm:$0xff] %v11377_v4  ;;  %15848 = vst [vmem:[#allocation140_spill] sm:$0xff] %v11379_v34  ;;  %2393 = vrot.lane.b32.xlu0 %v11137_v56, %s10481_s28  ;;  %2395 = vrot.lane.b32.xlu1 %v11149_v60, %s10481_s28  ;;  %v11385_v1 = vpop.f32.mrb[65].mxu0  ;;  %v11387_v16 = vpop.f32.mrb[65].mxu1 }
 0x163   :  { %15849 = vst [vmem:[#allocation141_spill] sm:$0xff] %v11385_v1  ;;  %15850 = vst [vmem:[#allocation142_spill] sm:$0xff] %v11387_v16  ;;  %v11389_v24 = vpop.f32.mrb[66].mxu0  ;;  %v11391_v62 = vpop.f32.mrb[66].mxu1 }
 0x164   :  { %15851 = vst [vmem:[#allocation143_spill] sm:$0xff] %v11389_v24  ;;  %15852 = vst [vmem:[#allocation144_spill] sm:$0xff] %v11391_v62  ;;  %v11393_v3 = vpop.permute.xlu0 %2337  ;;  %v11395_v15 = vpop.permute.xlu1 %2339 }
 0x165   :  { %15853 = vst [vmem:[#allocation145_spill] sm:$0xff] %v11393_v3  ;;  %15854 = vst [vmem:[#allocation146_spill] sm:$0xff] %v11395_v15  ;;  %v11397_v4 = vpop.f32.mrb[67].mxu0  ;;  %v11399_v34 = vpop.f32.mrb[67].mxu1 }
 0x166   :  { %15855 = vst [vmem:[#allocation147_spill] sm:$0xff] %v11397_v4  ;;  %15856 = vst [vmem:[#allocation148_spill] sm:$0xff] %v11399_v34  ;;  %2617 = vrot.lane.b32.xlu0 %v11139_v52, %s10481_s28  ;;  %2619 = vrot.lane.b32.xlu1 %v11151_v0, %s10481_s28 }
 0x168   :  { %v11405_v60 = vpop.permute.xlu0 %2561  ;;  %v11407_v56 = vpop.permute.xlu1 %2563 }
 0x169   :  { %15857 = vst [vmem:[#allocation149_spill] sm:$0xff] %v11405_v60  ;;  %15858 = vst [vmem:[#allocation150_spill] sm:$0xff] %v11407_v56  ;;  %v11417_v34 = vpop.f32.mrb[68].mxu0 }
 0x16a   :  { %2389 = vrot.lane.b32.xlu0 %v11145_v58, %s10481_s28  ;;  %2391 = vrot.lane.b32.xlu1 %v11153_v54, %s10481_s28  ;;  %15861 = vst [vmem:[#allocation153_spill] sm:$0xff] %v11417_v34  ;;  %v11423_v0 = vpop.f32.mrb[69].mxu0  ;;  %v11433_v58 = vpop.f32.mrb[68].mxu1 }
 0x16b   :  { %15862 = vst [vmem:[#allocation154_spill] sm:$0xff] %v11423_v0  ;;  %v11425_v52 = vpop.f32.mrb[70].mxu0  ;;  %15867 = vst [vmem:[#allocation159_spill] sm:$0xff] %v11433_v58 }
 0x16c   :  { %v11413_v15 = vpop.permute.xlu0 %2333  ;;  %v11415_v3 = vpop.permute.xlu1 %2335  ;;  %15863 = vst [vmem:[#allocation155_spill] sm:$0xff] %v11425_v52 }
 0x16d   :  { %15859 = vst [vmem:[#allocation151_spill] sm:$0xff] %v11413_v15  ;;  %15860 = vst [vmem:[#allocation152_spill] sm:$0xff] %v11415_v3  ;;  %v11431_v54 = vpop.f32.mrb[71].mxu0 }
 0x16e   :  { %2613 = vrot.lane.b32.xlu0 %v11147_v21, %s10481_s28  ;;  %2615 = vrot.lane.b32.xlu1 %v11155_v6, %s10481_s28  ;;  %15866 = vst [vmem:[#allocation158_spill] sm:$0xff] %v11431_v54  ;;  %v11439_v21 = vpop.f32.mrb[69].mxu1 }
 0x16f   :  { %15868 = vst [vmem:[#allocation160_spill] sm:$0xff] %v11439_v21  ;;  %v11441_v6 = vpop.f32.mrb[70].mxu1 }
 0x170   :  { %v11427_v56 = vpop.permute.xlu0 %2557  ;;  %v11429_v60 = vpop.permute.xlu1 %2559  ;;  %15869 = vst [vmem:[#allocation161_spill] sm:$0xff] %v11441_v6 }
 0x171   :  { %15864 = vst [vmem:[#allocation156_spill] sm:$0xff] %v11427_v56  ;;  %15865 = vst [vmem:[#allocation157_spill] sm:$0xff] %v11429_v60  ;;  %v11447_v56 = vpop.f32.mrb[71].mxu1 }
 0x172   :  { %2401 = vrot.lane.b32.xlu0 %v11168_v50, %s10481_s28  ;;  %2403 = vrot.lane.b32.xlu1 %v11184_v36, %s10481_s28  ;;  %15872 = vst [vmem:[#allocation164_spill] sm:$0xff] %v11447_v56 }
 0x174   :  { %v11443_v3 = vpop.permute.xlu0 %2345  ;;  %v11445_v15 = vpop.permute.xlu1 %2347 }
 0x175   :  { %15870 = vst [vmem:[#allocation162_spill] sm:$0xff] %v11443_v3  ;;  %15871 = vst [vmem:[#allocation163_spill] sm:$0xff] %v11445_v15  ;;  %v11465_v3 = vpop.f32.mrb[72].mxu0 }
 0x176   :  { %2625 = vrot.lane.b32.xlu0 %v11170_v44, %s10481_s28  ;;  %2627 = vrot.lane.b32.xlu1 %v11186_v32, %s10481_s28  ;;  %15877 = vst [vmem:[#allocation169_spill] sm:$0xff] %v11465_v3  ;;  %v11471_v32 = vpop.f32.mrb[73].mxu0 }
 0x177   :  { %15878 = vst [vmem:[#allocation170_spill] sm:$0xff] %v11471_v32  ;;  %v11473_v44 = vpop.f32.mrb[74].mxu0 }
 0x178   :  { %v11453_v60 = vpop.permute.xlu0 %2569  ;;  %v11455_v50 = vpop.permute.xlu1 %2571  ;;  %15879 = vst [vmem:[#allocation171_spill] sm:$0xff] %v11473_v44 }
 0x179   :  { %15873 = vst [vmem:[#allocation165_spill] sm:$0xff] %v11453_v60  ;;  %15874 = vst [vmem:[#allocation166_spill] sm:$0xff] %v11455_v50 }
 0x17a   :  { %2397 = vrot.lane.b32.xlu0 %v11177_v12, %s10481_s28  ;;  %2399 = vrot.lane.b32.xlu1 %v11191_v38, %s10481_s28  ;;  %v11479_v38 = vpop.f32.mrb[75].mxu0  ;;  %v11481_v12 = vpop.f32.mrb[72].mxu1 }
 0x17b   :  { %15882 = vst [vmem:[#allocation174_spill] sm:$0xff] %v11479_v38  ;;  %15883 = vst [vmem:[#allocation175_spill] sm:$0xff] %v11481_v12 }
 0x17c   :  { %v11461_v36 = vpop.permute.xlu0 %2341  ;;  %v11463_v15 = vpop.permute.xlu1 %2343 }
 0x17d   :  { %15875 = vst [vmem:[#allocation167_spill] sm:$0xff] %v11461_v36  ;;  %15876 = vst [vmem:[#allocation168_spill] sm:$0xff] %v11463_v15 }
 0x17e   :  { %2621 = vrot.lane.b32.xlu0 %v11179_v8, %s10481_s28  ;;  %2623 = vrot.lane.b32.xlu1 %v11193_v33, %s10481_s28  ;;  %v11487_v8 = vpop.f32.mrb[73].mxu1 }
 0x17f   :  { %15884 = vst [vmem:[#allocation176_spill] sm:$0xff] %v11487_v8  ;;  %v11489_v33 = vpop.f32.mrb[74].mxu1 }
 0x180   :  { %v11475_v50 = vpop.permute.xlu0 %2565  ;;  %v11477_v60 = vpop.permute.xlu1 %2567  ;;  %15885 = vst [vmem:[#allocation177_spill] sm:$0xff] %v11489_v33 }
 0x181   :  { %15880 = vst [vmem:[#allocation172_spill] sm:$0xff] %v11475_v50  ;;  %15881 = vst [vmem:[#allocation173_spill] sm:$0xff] %v11477_v60  ;;  %v11495_v50 = vpop.f32.mrb[75].mxu1 }
 0x182   :  { %2409 = vrot.lane.b32.xlu0 %v11201_v11, %s10481_s28  ;;  %2411 = vrot.lane.b32.xlu1 %v11213_v42, %s10481_s28  ;;  %15888 = vst [vmem:[#allocation180_spill] sm:$0xff] %v11495_v50 }
 0x184   :  { %v11491_v15 = vpop.permute.xlu0 %2353  ;;  %v11493_v36 = vpop.permute.xlu1 %2355 }
 0x185   :  { %15886 = vst [vmem:[#allocation178_spill] sm:$0xff] %v11491_v15  ;;  %15887 = vst [vmem:[#allocation179_spill] sm:$0xff] %v11493_v36  ;;  %v11513_v15 = vpop.f32.mrb[76].mxu0 }
 0x186   :  { %2633 = vrot.lane.b32.xlu0 %v11203_v7, %s10481_s28  ;;  %2635 = vrot.lane.b32.xlu1 %v11215_v10, %s10481_s28  ;;  %15893 = vst [vmem:[#allocation185_spill] sm:$0xff] %v11513_v15  ;;  %v11519_v10 = vpop.f32.mrb[77].mxu0 }
 0x187   :  { %v11521_v7 = vpop.f32.mrb[78].mxu0 }
 0x188   :  { %v11501_v60 = vpop.permute.xlu0 %2577  ;;  %v11503_v11 = vpop.permute.xlu1 %2579  ;;  %15894 = vst [vmem:[#allocation186_spill] sm:$0xff] %v11521_v7 }
 0x189   :  { %15889 = vst [vmem:[#allocation181_spill] sm:$0xff] %v11501_v60  ;;  %15890 = vst [vmem:[#allocation182_spill] sm:$0xff] %v11503_v11 }
 0x18a   :  { %2405 = vrot.lane.b32.xlu0 %v11209_v13, %s10481_s28  ;;  %2407 = vrot.lane.b32.xlu1 %v11217_v9, %s10481_s28  ;;  %v11527_v9 = vpop.f32.mrb[79].mxu0  ;;  %v11529_v13 = vpop.f32.mrb[76].mxu1 }
 0x18b   :  { %15897 = vst [vmem:[#allocation189_spill] sm:$0xff] %v11529_v13 }
 0x18c   :  { %v11509_v42 = vpop.permute.xlu0 %2349  ;;  %v11511_v36 = vpop.permute.xlu1 %2351 }
 0x18d   :  { %15891 = vst [vmem:[#allocation183_spill] sm:$0xff] %v11509_v42  ;;  %15892 = vst [vmem:[#allocation184_spill] sm:$0xff] %v11511_v36 }
 0x18e   :  { %2629 = vrot.lane.b32.xlu0 %v11211_v47, %s10481_s28  ;;  %2631 = vrot.lane.b32.xlu1 %v11219_v14, %s10481_s28  ;;  %v11535_v47 = vpop.f32.mrb[77].mxu1 }
 0x18f   :  { %15898 = vst [vmem:[#allocation190_spill] sm:$0xff] %v11535_v47  ;;  %v11537_v14 = vpop.f32.mrb[78].mxu1 }
 0x190   :  { %v11523_v11 = vpop.permute.xlu0 %2573  ;;  %v11525_v60 = vpop.permute.xlu1 %2575  ;;  %15899 = vst [vmem:[#allocation191_spill] sm:$0xff] %v11537_v14 }
 0x191   :  { %15895 = vst [vmem:[#allocation187_spill] sm:$0xff] %v11523_v11  ;;  %15896 = vst [vmem:[#allocation188_spill] sm:$0xff] %v11525_v60  ;;  %v11543_v11 = vpop.f32.mrb[79].mxu1 }
 0x192   :  { %2417 = vrot.lane.b32.xlu0 %v11232_v2, %s10481_s28  ;;  %2419 = vrot.lane.b32.xlu1 %v11248_v5, %s10481_s28  ;;  %15902 = vst [vmem:[#allocation194_spill] sm:$0xff] %v11543_v11 }
 0x194   :  { %v11539_v36 = vpop.permute.xlu0 %2361  ;;  %v11541_v42 = vpop.permute.xlu1 %2363 }
 0x195   :  { %15900 = vst [vmem:[#allocation192_spill] sm:$0xff] %v11539_v36  ;;  %15901 = vst [vmem:[#allocation193_spill] sm:$0xff] %v11541_v42  ;;  %v11561_v36 = vpop.f32.mrb[80].mxu0 }
 0x196   :  { %2641 = vrot.lane.b32.xlu0 %v11234_v61, %s10481_s28  ;;  %2643 = vrot.lane.b32.xlu1 %v11250_v63, %s10481_s28  ;;  %15907 = vst [vmem:[#allocation199_spill] sm:$0xff] %v11561_v36  ;;  %v11567_v63 = vpop.f32.mrb[81].mxu0 }
 0x197   :  { %15908 = vst [vmem:[#allocation200_spill] sm:$0xff] %v11567_v63  ;;  %v11569_v61 = vpop.f32.mrb[82].mxu0 }
 0x198   :  { %v11549_v60 = vpop.permute.xlu0 %2585  ;;  %v11551_v2 = vpop.permute.xlu1 %2587  ;;  %15909 = vst [vmem:[#allocation201_spill] sm:$0xff] %v11569_v61 }
 0x199   :  { %15903 = vst [vmem:[#allocation195_spill] sm:$0xff] %v11549_v60  ;;  %15904 = vst [vmem:[#allocation196_spill] sm:$0xff] %v11551_v2 }
 0x19a   :  { %2413 = vrot.lane.b32.xlu0 %v11241_v23, %s10481_s28  ;;  %2415 = vrot.lane.b32.xlu1 %v11255_v19, %s10481_s28  ;;  %v11575_v19 = vpop.f32.mrb[83].mxu0  ;;  %v11577_v23 = vpop.f32.mrb[80].mxu1 }
 0x19b   :  { %15912 = vst [vmem:[#allocation204_spill] sm:$0xff] %v11575_v19  ;;  %15913 = vst [vmem:[#allocation205_spill] sm:$0xff] %v11577_v23 }
 0x19c   :  { %v11557_v5 = vpop.permute.xlu0 %2357  ;;  %v11559_v42 = vpop.permute.xlu1 %2359 }
 0x19d   :  { %15905 = vst [vmem:[#allocation197_spill] sm:$0xff] %v11557_v5  ;;  %15906 = vst [vmem:[#allocation198_spill] sm:$0xff] %v11559_v42 }
 0x19e   :  { %2637 = vrot.lane.b32.xlu0 %v11243_v18, %s10481_s28  ;;  %2639 = vrot.lane.b32.xlu1 %v11257_v55, %s10481_s28  ;;  %v11583_v18 = vpop.f32.mrb[81].mxu1 }
 0x19f   :  { %15914 = vst [vmem:[#allocation206_spill] sm:$0xff] %v11583_v18  ;;  %v11585_v55 = vpop.f32.mrb[82].mxu1 }
 0x1a0   :  { %v11571_v2 = vpop.permute.xlu0 %2581  ;;  %v11573_v60 = vpop.permute.xlu1 %2583  ;;  %15915 = vst [vmem:[#allocation207_spill] sm:$0xff] %v11585_v55 }
 0x1a1   :  { %15910 = vst [vmem:[#allocation202_spill] sm:$0xff] %v11571_v2  ;;  %15911 = vst [vmem:[#allocation203_spill] sm:$0xff] %v11573_v60  ;;  %v11591_v2 = vpop.f32.mrb[83].mxu1 }
 0x1a2   :  { %2425 = vrot.lane.b32.xlu0 %v11265_v25, %s10481_s28  ;;  %2427 = vrot.lane.b32.xlu1 %v11277_v17, %s10481_s28  ;;  %15918 = vst [vmem:[#allocation210_spill] sm:$0xff] %v11591_v2 }
 0x1a4   :  { %v11587_v42 = vpop.permute.xlu0 %2369  ;;  %v11589_v5 = vpop.permute.xlu1 %2371 }
 0x1a5   :  { %15916 = vst [vmem:[#allocation208_spill] sm:$0xff] %v11587_v42  ;;  %15917 = vst [vmem:[#allocation209_spill] sm:$0xff] %v11589_v5  ;;  %v11609_v42 = vpop.f32.mrb[84].mxu0 }
 0x1a6   :  { %2649 = vrot.lane.b32.xlu0 %v11267_v51, %s10481_s28  ;;  %2651 = vrot.lane.b32.xlu1 %v11279_v20, %s10481_s28  ;;  %15923 = vst [vmem:[#allocation215_spill] sm:$0xff] %v11609_v42  ;;  %v11615_v20 = vpop.f32.mrb[85].mxu0 }
 0x1a7   :  { %15924 = vst [vmem:[#allocation216_spill] sm:$0xff] %v11615_v20  ;;  %v11617_v51 = vpop.f32.mrb[86].mxu0 }
 0x1a8   :  { %v11597_v60 = vpop.permute.xlu0 %2593  ;;  %v11599_v25 = vpop.permute.xlu1 %2595  ;;  %15925 = vst [vmem:[#allocation217_spill] sm:$0xff] %v11617_v51 }
 0x1a9   :  { %15919 = vst [vmem:[#allocation211_spill] sm:$0xff] %v11597_v60  ;;  %15920 = vst [vmem:[#allocation212_spill] sm:$0xff] %v11599_v25 }
 0x1aa   :  { %2421 = vrot.lane.b32.xlu0 %v11273_v57, %s10481_s28  ;;  %2423 = vrot.lane.b32.xlu1 %v11281_v53, %s10481_s28  ;;  %v11623_v53 = vpop.f32.mrb[87].mxu0  ;;  %v11625_v57 = vpop.f32.mrb[84].mxu1 }
 0x1ab   :  { %15928 = vst [vmem:[#allocation220_spill] sm:$0xff] %v11623_v53  ;;  %15929 = vst [vmem:[#allocation221_spill] sm:$0xff] %v11625_v57 }
 0x1ac   :  { %v11605_v17 = vpop.permute.xlu0 %2365  ;;  %v11607_v5 = vpop.permute.xlu1 %2367 }
 0x1ad   :  { %15921 = vst [vmem:[#allocation213_spill] sm:$0xff] %v11605_v17  ;;  %15922 = vst [vmem:[#allocation214_spill] sm:$0xff] %v11607_v5 }
 0x1ae   :  { %2645 = vrot.lane.b32.xlu0 %v11275_v22, %s10481_s28  ;;  %2647 = vrot.lane.b32.xlu1 %v11283_v26, %s10481_s28  ;;  %v11631_v22 = vpop.f32.mrb[85].mxu1 }
 0x1af   :  { %15930 = vst [vmem:[#allocation222_spill] sm:$0xff] %v11631_v22  ;;  %v11633_v26 = vpop.f32.mrb[86].mxu1 }
 0x1b0   :  { %v11619_v25 = vpop.permute.xlu0 %2589  ;;  %v11621_v60 = vpop.permute.xlu1 %2591  ;;  %15931 = vst [vmem:[#allocation223_spill] sm:$0xff] %v11633_v26 }
 0x1b1   :  { %15926 = vst [vmem:[#allocation218_spill] sm:$0xff] %v11619_v25  ;;  %15927 = vst [vmem:[#allocation219_spill] sm:$0xff] %v11621_v60  ;;  %v11639_v25 = vpop.f32.mrb[87].mxu1 }
 0x1b2   :  { %2433 = vrot.lane.b32.xlu0 %v11289_v27, %s10481_s28  ;;  %2435 = vrot.lane.b32.xlu1 %v11301_v49, %s10481_s28  ;;  %15934 = vst [vmem:[#allocation226_spill] sm:$0xff] %v11639_v25 }
 0x1b4   :  { %v11635_v5 = vpop.permute.xlu0 %2377  ;;  %v11637_v17 = vpop.permute.xlu1 %2379 }
 0x1b5   :  { %15932 = vst [vmem:[#allocation224_spill] sm:$0xff] %v11635_v5  ;;  %15933 = vst [vmem:[#allocation225_spill] sm:$0xff] %v11637_v17  ;;  %v11657_v5 = vpop.f32.mrb[88].mxu0 }
 0x1b6   :  { %2657 = vrot.lane.b32.xlu0 %v11291_v39, %s10481_s28  ;;  %2659 = vrot.lane.b32.xlu1 %v11303_v28, %s10481_s28  ;;  %15939 = vst [vmem:[#allocation231_spill] sm:$0xff] %v11657_v5  ;;  %v11663_v28 = vpop.f32.mrb[89].mxu0 }
 0x1b7   :  { %15940 = vst [vmem:[#allocation232_spill] sm:$0xff] %v11663_v28  ;;  %v11665_v39 = vpop.f32.mrb[90].mxu0 }
 0x1b8   :  { %v11645_v60 = vpop.permute.xlu0 %2601  ;;  %v11647_v27 = vpop.permute.xlu1 %2603  ;;  %15941 = vst [vmem:[#allocation233_spill] sm:$0xff] %v11665_v39 }
 0x1b9   :  { %15935 = vst [vmem:[#allocation227_spill] sm:$0xff] %v11645_v60  ;;  %15936 = vst [vmem:[#allocation228_spill] sm:$0xff] %v11647_v27 }
 0x1ba   :  { %2429 = vrot.lane.b32.xlu0 %v11297_v46, %s10481_s28  ;;  %2431 = vrot.lane.b32.xlu1 %v11305_v43, %s10481_s28  ;;  %v11671_v43 = vpop.f32.mrb[91].mxu0  ;;  %v11673_v46 = vpop.f32.mrb[88].mxu1 }
 0x1bb   :  { %15944 = vst [vmem:[#allocation236_spill] sm:$0xff] %v11671_v43  ;;  %15945 = vst [vmem:[#allocation237_spill] sm:$0xff] %v11673_v46 }
 0x1bc   :  { %v11653_v49 = vpop.permute.xlu0 %2373  ;;  %v11655_v17 = vpop.permute.xlu1 %2375 }
 0x1bd   :  { %15937 = vst [vmem:[#allocation229_spill] sm:$0xff] %v11653_v49  ;;  %15938 = vst [vmem:[#allocation230_spill] sm:$0xff] %v11655_v17  ;;  %v15946_v17 = vld [vmem:[#allocation115_spill] sm:$0xff] }
 0x1be   :  { %2653 = vrot.lane.b32.xlu0 %v11299_v41, %s10481_s28  ;;  %2655 = vrot.lane.b32.xlu1 %v11307_v40, %s10481_s28  ;;  %v11679_v41 = vpop.f32.mrb[89].mxu1 }
 0x1bf   :  { %15947 = vst [vmem:[#allocation238_spill] sm:$0xff] %v11679_v41  ;;  %v11681_v40 = vpop.f32.mrb[90].mxu1 }
 0x1c0   :  { %v11667_v27 = vpop.permute.xlu0 %2597  ;;  %v11669_v60 = vpop.permute.xlu1 %2599  ;;  %15948 = vst [vmem:[#allocation239_spill] sm:$0xff] %v11681_v40 }
 0x1c1   :  { %15942 = vst [vmem:[#allocation234_spill] sm:$0xff] %v11667_v27  ;;  %15943 = vst [vmem:[#allocation235_spill] sm:$0xff] %v11669_v60  ;;  %v11687_v27 = vpop.f32.mrb[91].mxu1  ;;  %v15952_v60 = vld [vmem:[#allocation116_spill] sm:$0xff] }
 0x1c2   :  { %2441 = vrot.lane.b32.xlu0 %v15946_v17, %s10481_s28  ;;  %2443 = vrot.lane.b32.xlu1 %v11325_v37, %s10481_s28  ;;  %15951 = vst [vmem:[#allocation242_spill] sm:$0xff] %v11687_v27  ;;  %v15955_v37 = vld [vmem:[#allocation117_spill] sm:$0xff]  ;;  %v11705_v27 = vpop.f32.mrb[92].mxu0 }
 0x1c3   :  { %15958 = vst [vmem:[#allocation247_spill] sm:$0xff] %v11705_v27 }
 0x1c4   :  { %v11683_v49 = vpop.permute.xlu0 %2385  ;;  %v11685_v28 = vpop.permute.xlu1 %2387 }
 0x1c5   :  { %15949 = vst [vmem:[#allocation240_spill] sm:$0xff] %v11683_v49  ;;  %15950 = vst [vmem:[#allocation241_spill] sm:$0xff] %v11685_v28 }
 0x1c6   :  { %2665 = vrot.lane.b32.xlu0 %v15952_v60, %s10481_s28  ;;  %2667 = vrot.lane.b32.xlu1 %v11327_v30, %s10481_s28  ;;  %v15959_v60 = vld [vmem:[#allocation118_spill] sm:$0xff]  ;;  %v11711_v30 = vpop.f32.mrb[93].mxu0 }
 0x1c7   :  { %15960 = vst [vmem:[#allocation248_spill] sm:$0xff] %v11711_v30 }
 0x1c8   :  { %v11693_v17 = vpop.permute.xlu0 %2609  ;;  %v11695_v43 = vpop.permute.xlu1 %2611 }
 0x1c9   :  { %15953 = vst [vmem:[#allocation243_spill] sm:$0xff] %v11693_v17  ;;  %15954 = vst [vmem:[#allocation244_spill] sm:$0xff] %v11695_v43  ;;  %v11713_v43 = vpop.f32.mrb[94].mxu0 }
 0x1ca   :  { %2437 = vrot.lane.b32.xlu0 %v15955_v37, %s10481_s28  ;;  %2439 = vrot.lane.b32.xlu1 %v11333_v29, %s10481_s28  ;;  %15961 = vst [vmem:[#allocation249_spill] sm:$0xff] %v11713_v43  ;;  %v11719_v29 = vpop.f32.mrb[95].mxu0 }
 0x1cb   :  { %15964 = vst [vmem:[#allocation252_spill] sm:$0xff] %v11719_v29 }
 0x1cc   :  { %v11701_v49 = vpop.permute.xlu0 %2381  ;;  %v11703_v28 = vpop.permute.xlu1 %2383 }
 0x1cd   :  { %15956 = vst [vmem:[#allocation245_spill] sm:$0xff] %v11701_v49  ;;  %15957 = vst [vmem:[#allocation246_spill] sm:$0xff] %v11703_v28  ;;  %v11721_v49 = vpop.f32.mrb[92].mxu1  ;;  %v15966_v28 = vld [vmem:[#allocation127_spill] sm:$0xff] }
 0x1ce   :  { %2661 = vrot.lane.b32.xlu0 %v15959_v60, %s10481_s28  ;;  %2663 = vrot.lane.b32.xlu1 %v11335_v45, %s10481_s28  ;;  %15965 = vst [vmem:[#allocation253_spill] sm:$0xff] %v11721_v49  ;;  %v11727_v60 = vpop.f32.mrb[93].mxu1 }
 0x1cf   :  { %15967 = vst [vmem:[#allocation254_spill] sm:$0xff] %v11727_v60  ;;  %v11729_v45 = vpop.f32.mrb[94].mxu1 }
 0x1d0   :  { %v11715_v17 = vpop.permute.xlu0 %2605  ;;  %v11717_v37 = vpop.permute.xlu1 %2607  ;;  %15968 = vst [vmem:[#allocation255_spill] sm:$0xff] %v11729_v45 }
 0x1d1   :  { %15962 = vst [vmem:[#allocation250_spill] sm:$0xff] %v11715_v17  ;;  %15963 = vst [vmem:[#allocation251_spill] sm:$0xff] %v11717_v37  ;;  %v11735_v17 = vpop.f32.mrb[95].mxu1  ;;  %v15972_v37 = vld [vmem:[#allocation128_spill] sm:$0xff] }
 0x1d2   :  { %2449 = vrot.lane.b32.xlu0 %v15966_v28, %s10481_s28  ;;  %2451 = vrot.lane.b32.xlu1 %v11357_v48, %s10481_s28  ;;  %15971 = vst [vmem:[#allocation258_spill] sm:$0xff] %v11735_v17  ;;  %v15975_v48 = vld [vmem:[#allocation129_spill] sm:$0xff]  ;;  %v11753_v17 = vpop.f32.mrb[96].mxu0 }
 0x1d3   :  { %15978 = vst [vmem:[#allocation263_spill] sm:$0xff] %v11753_v17 }
 0x1d4   :  { %v11731_v30 = vpop.permute.xlu0 %2393  ;;  %v11733_v43 = vpop.permute.xlu1 %2395 }
 0x1d5   :  { %15969 = vst [vmem:[#allocation256_spill] sm:$0xff] %v11731_v30  ;;  %15970 = vst [vmem:[#allocation257_spill] sm:$0xff] %v11733_v43 }
 0x1d6   :  { %2673 = vrot.lane.b32.xlu0 %v15972_v37, %s10481_s28  ;;  %2675 = vrot.lane.b32.xlu1 %v11359_v59, %s10481_s28  ;;  %v15979_v37 = vld [vmem:[#allocation130_spill] sm:$0xff]  ;;  %v11759_v59 = vpop.f32.mrb[97].mxu0 }
 0x1d7   :  { %15980 = vst [vmem:[#allocation264_spill] sm:$0xff] %v11759_v59 }
 0x1d8   :  { %v11741_v28 = vpop.permute.xlu0 %2617  ;;  %v11743_v29 = vpop.permute.xlu1 %2619 }
 0x1d9   :  { %15973 = vst [vmem:[#allocation259_spill] sm:$0xff] %v11741_v28  ;;  %15974 = vst [vmem:[#allocation260_spill] sm:$0xff] %v11743_v29  ;;  %v11761_v29 = vpop.f32.mrb[98].mxu0 }
 0x1da   :  { %2445 = vrot.lane.b32.xlu0 %v15975_v48, %s10481_s28  ;;  %2447 = vrot.lane.b32.xlu1 %v11365_v31, %s10481_s28  ;;  %15981 = vst [vmem:[#allocation265_spill] sm:$0xff] %v11761_v29  ;;  %v11767_v31 = vpop.f32.mrb[99].mxu0 }
 0x1db   :  { %15984 = vst [vmem:[#allocation268_spill] sm:$0xff] %v11767_v31 }
 0x1dc   :  { %v11749_v30 = vpop.permute.xlu0 %2389  ;;  %v11751_v43 = vpop.permute.xlu1 %2391 }
 0x1dd   :  { %15976 = vst [vmem:[#allocation261_spill] sm:$0xff] %v11749_v30  ;;  %15977 = vst [vmem:[#allocation262_spill] sm:$0xff] %v11751_v43  ;;  %v11769_v30 = vpop.f32.mrb[96].mxu1  ;;  %v15986_v43 = vld [vmem:[#allocation139_spill] sm:$0xff] }
 0x1de   :  { %2669 = vrot.lane.b32.xlu0 %v15979_v37, %s10481_s28  ;;  %2671 = vrot.lane.b32.xlu1 %v11367_v35, %s10481_s28  ;;  %15985 = vst [vmem:[#allocation269_spill] sm:$0xff] %v11769_v30  ;;  %v11775_v37 = vpop.f32.mrb[97].mxu1 }
 0x1df   :  { %15987 = vst [vmem:[#allocation270_spill] sm:$0xff] %v11775_v37  ;;  %v11777_v35 = vpop.f32.mrb[98].mxu1 }
 0x1e0   :  { %v11763_v28 = vpop.permute.xlu0 %2613  ;;  %v11765_v48 = vpop.permute.xlu1 %2615  ;;  %15988 = vst [vmem:[#allocation271_spill] sm:$0xff] %v11777_v35 }
 0x1e1   :  { %15982 = vst [vmem:[#allocation266_spill] sm:$0xff] %v11763_v28  ;;  %15983 = vst [vmem:[#allocation267_spill] sm:$0xff] %v11765_v48  ;;  %v11783_v28 = vpop.f32.mrb[99].mxu1  ;;  %v15992_v48 = vld [vmem:[#allocation140_spill] sm:$0xff] }
 0x1e2   :  { %2457 = vrot.lane.b32.xlu0 %v15986_v43, %s10481_s28  ;;  %2459 = vrot.lane.b32.xlu1 %v11389_v24, %s10481_s28  ;;  %15991 = vst [vmem:[#allocation274_spill] sm:$0xff] %v11783_v28 }
 0x1e4   :  { %v11779_v59 = vpop.permute.xlu0 %2401  ;;  %v11781_v29 = vpop.permute.xlu1 %2403 }
 0x1e5   :  { %15989 = vst [vmem:[#allocation272_spill] sm:$0xff] %v11779_v59  ;;  %15990 = vst [vmem:[#allocation273_spill] sm:$0xff] %v11781_v29  ;;  %v11801_v59 = vpop.f32.mrb[100].mxu0 }
 0x1e6   :  { %2681 = vrot.lane.b32.xlu0 %v15992_v48, %s10481_s28  ;;  %2683 = vrot.lane.b32.xlu1 %v11391_v62, %s10481_s28  ;;  %15997 = vst [vmem:[#allocation279_spill] sm:$0xff] %v11801_v59  ;;  %v15998_v62 = vld [vmem:[#allocation148_spill] sm:$0xff]  ;;  %v11807_v48 = vpop.f32.mrb[101].mxu0 }
 0x1e7   :  { %15999 = vst [vmem:[#allocation280_spill] sm:$0xff] %v11807_v48 }
 0x1e8   :  { %v11789_v43 = vpop.permute.xlu0 %2625  ;;  %v11791_v31 = vpop.permute.xlu1 %2627 }
 0x1e9   :  { %15993 = vst [vmem:[#allocation275_spill] sm:$0xff] %v11789_v43  ;;  %15994 = vst [vmem:[#allocation276_spill] sm:$0xff] %v11791_v31  ;;  %v11809_v31 = vpop.f32.mrb[102].mxu0 }
 0x1ea   :  { %2453 = vrot.lane.b32.xlu0 %v11385_v1, %s10481_s28  ;;  %2455 = vrot.lane.b32.xlu1 %v11397_v4, %s10481_s28  ;;  %16000 = vst [vmem:[#allocation281_spill] sm:$0xff] %v11809_v31  ;;  %v11815_v4 = vpop.f32.mrb[103].mxu0 }
 0x1eb   :  { %16003 = vst [vmem:[#allocation284_spill] sm:$0xff] %v11815_v4 }
 0x1ec   :  { %v11797_v24 = vpop.permute.xlu0 %2397  ;;  %v11799_v29 = vpop.permute.xlu1 %2399 }
 0x1ed   :  { %15995 = vst [vmem:[#allocation277_spill] sm:$0xff] %v11797_v24  ;;  %15996 = vst [vmem:[#allocation278_spill] sm:$0xff] %v11799_v29  ;;  %v11817_v24 = vpop.f32.mrb[100].mxu1 }
 0x1ee   :  { %2677 = vrot.lane.b32.xlu0 %v11387_v16, %s10481_s28  ;;  %2679 = vrot.lane.b32.xlu1 %v15998_v62, %s10481_s28  ;;  %16004 = vst [vmem:[#allocation285_spill] sm:$0xff] %v11817_v24  ;;  %v11823_v16 = vpop.f32.mrb[101].mxu1 }
 0x1ef   :  { %16005 = vst [vmem:[#allocation286_spill] sm:$0xff] %v11823_v16  ;;  %v11825_v62 = vpop.f32.mrb[102].mxu1 }
 0x1f0   :  { %v11811_v43 = vpop.permute.xlu0 %2621  ;;  %v11813_v1 = vpop.permute.xlu1 %2623  ;;  %16006 = vst [vmem:[#allocation287_spill] sm:$0xff] %v11825_v62 }
 0x1f1   :  { %16001 = vst [vmem:[#allocation282_spill] sm:$0xff] %v11811_v43  ;;  %16002 = vst [vmem:[#allocation283_spill] sm:$0xff] %v11813_v1  ;;  %v11831_v43 = vpop.f32.mrb[103].mxu1 }
 0x1f2   :  { %2465 = vrot.lane.b32.xlu0 %v11417_v34, %s10481_s28  ;;  %2467 = vrot.lane.b32.xlu1 %v11425_v52, %s10481_s28  ;;  %16009 = vst [vmem:[#allocation290_spill] sm:$0xff] %v11831_v43 }
 0x1f4   :  { %v11827_v29 = vpop.permute.xlu0 %2409  ;;  %v11829_v48 = vpop.permute.xlu1 %2411 }
 0x1f5   :  { %16007 = vst [vmem:[#allocation288_spill] sm:$0xff] %v11827_v29  ;;  %16008 = vst [vmem:[#allocation289_spill] sm:$0xff] %v11829_v48  ;;  %v11849_v29 = vpop.f32.mrb[104].mxu0 }
 0x1f6   :  { %2689 = vrot.lane.b32.xlu0 %v11433_v58, %s10481_s28  ;;  %2691 = vrot.lane.b32.xlu1 %v11441_v6, %s10481_s28  ;;  %16014 = vst [vmem:[#allocation295_spill] sm:$0xff] %v11849_v29  ;;  %v11855_v6 = vpop.f32.mrb[105].mxu0 }
 0x1f7   :  { %16015 = vst [vmem:[#allocation296_spill] sm:$0xff] %v11855_v6  ;;  %v11857_v58 = vpop.f32.mrb[106].mxu0 }
 0x1f8   :  { %v11837_v1 = vpop.permute.xlu0 %2633  ;;  %v11839_v34 = vpop.permute.xlu1 %2635  ;;  %16016 = vst [vmem:[#allocation297_spill] sm:$0xff] %v11857_v58 }
 0x1f9   :  { %16010 = vst [vmem:[#allocation291_spill] sm:$0xff] %v11837_v1  ;;  %16011 = vst [vmem:[#allocation292_spill] sm:$0xff] %v11839_v34 }
 0x1fa   :  { %2461 = vrot.lane.b32.xlu0 %v11423_v0, %s10481_s28  ;;  %2463 = vrot.lane.b32.xlu1 %v11431_v54, %s10481_s28  ;;  %v11863_v54 = vpop.f32.mrb[107].mxu0  ;;  %v11865_v0 = vpop.f32.mrb[104].mxu1 }
 0x1fb   :  { %16019 = vst [vmem:[#allocation300_spill] sm:$0xff] %v11863_v54  ;;  %16020 = vst [vmem:[#allocation301_spill] sm:$0xff] %v11865_v0 }
 0x1fc   :  { %v11845_v52 = vpop.permute.xlu0 %2405  ;;  %v11847_v48 = vpop.permute.xlu1 %2407 }
 0x1fd   :  { %16012 = vst [vmem:[#allocation293_spill] sm:$0xff] %v11845_v52  ;;  %16013 = vst [vmem:[#allocation294_spill] sm:$0xff] %v11847_v48 }
 0x1fe   :  { %2685 = vrot.lane.b32.xlu0 %v11439_v21, %s10481_s28  ;;  %2687 = vrot.lane.b32.xlu1 %v11447_v56, %s10481_s28  ;;  %v11871_v21 = vpop.f32.mrb[105].mxu1 }
 0x1ff   :  { %16021 = vst [vmem:[#allocation302_spill] sm:$0xff] %v11871_v21  ;;  %v11873_v56 = vpop.f32.mrb[106].mxu1 }
 0x200   :  { %v11859_v34 = vpop.permute.xlu0 %2629  ;;  %v11861_v1 = vpop.permute.xlu1 %2631  ;;  %16022 = vst [vmem:[#allocation303_spill] sm:$0xff] %v11873_v56 }
 0x201   :  { %16017 = vst [vmem:[#allocation298_spill] sm:$0xff] %v11859_v34  ;;  %16018 = vst [vmem:[#allocation299_spill] sm:$0xff] %v11861_v1  ;;  %v11879_v34 = vpop.f32.mrb[107].mxu1 }
 0x202   :  { %2473 = vrot.lane.b32.xlu0 %v11465_v3, %s10481_s28  ;;  %2475 = vrot.lane.b32.xlu1 %v11473_v44, %s10481_s28  ;;  %16025 = vst [vmem:[#allocation306_spill] sm:$0xff] %v11879_v34 }
 0x204   :  { %v11875_v48 = vpop.permute.xlu0 %2417  ;;  %v11877_v52 = vpop.permute.xlu1 %2419 }
 0x205   :  { %16023 = vst [vmem:[#allocation304_spill] sm:$0xff] %v11875_v48  ;;  %16024 = vst [vmem:[#allocation305_spill] sm:$0xff] %v11877_v52 }
 0x206   :  { %2697 = vrot.lane.b32.xlu0 %v11481_v12, %s10481_s28  ;;  %2699 = vrot.lane.b32.xlu1 %v11489_v33, %s10481_s28 }
 0x207   :  { %v11897_v48 = vpop.f32.mrb[108].mxu0 }
 0x208   :  { %v11885_v1 = vpop.permute.xlu0 %2641  ;;  %v11887_v3 = vpop.permute.xlu1 %2643  ;;  %16030 = vst [vmem:[#allocation311_spill] sm:$0xff] %v11897_v48 }
 0x209   :  { %16026 = vst [vmem:[#allocation307_spill] sm:$0xff] %v11885_v1  ;;  %16027 = vst [vmem:[#allocation308_spill] sm:$0xff] %v11887_v3  ;;  %v11903_v33 = vpop.f32.mrb[109].mxu0 }
 0x20a   :  { %2469 = vrot.lane.b32.xlu0 %v11471_v32, %s10481_s28  ;;  %2471 = vrot.lane.b32.xlu1 %v11479_v38, %s10481_s28  ;;  %16031 = vst [vmem:[#allocation312_spill] sm:$0xff] %v11903_v33  ;;  %v11905_v12 = vpop.f32.mrb[110].mxu0  ;;  %v11913_v32 = vpop.f32.mrb[108].mxu1 }
 0x20b   :  { %16032 = vst [vmem:[#allocation313_spill] sm:$0xff] %v11905_v12  ;;  %v11911_v38 = vpop.f32.mrb[111].mxu0  ;;  %16036 = vst [vmem:[#allocation317_spill] sm:$0xff] %v11913_v32 }
 0x20c   :  { %v11893_v44 = vpop.permute.xlu0 %2413  ;;  %v11895_v52 = vpop.permute.xlu1 %2415  ;;  %16035 = vst [vmem:[#allocation316_spill] sm:$0xff] %v11911_v38 }
 0x20d   :  { %16028 = vst [vmem:[#allocation309_spill] sm:$0xff] %v11893_v44  ;;  %16029 = vst [vmem:[#allocation310_spill] sm:$0xff] %v11895_v52 }
 0x20e   :  { %2693 = vrot.lane.b32.xlu0 %v11487_v8, %s10481_s28  ;;  %2695 = vrot.lane.b32.xlu1 %v11495_v50, %s10481_s28  ;;  %v11919_v8 = vpop.f32.mrb[109].mxu1 }
 0x20f   :  { %16037 = vst [vmem:[#allocation318_spill] sm:$0xff] %v11919_v8  ;;  %v11921_v50 = vpop.f32.mrb[110].mxu1 }
 0x210   :  { %v11907_v3 = vpop.permute.xlu0 %2637  ;;  %v11909_v1 = vpop.permute.xlu1 %2639  ;;  %16038 = vst [vmem:[#allocation319_spill] sm:$0xff] %v11921_v50 }
 0x211   :  { %16033 = vst [vmem:[#allocation314_spill] sm:$0xff] %v11907_v3  ;;  %16034 = vst [vmem:[#allocation315_spill] sm:$0xff] %v11909_v1  ;;  %v11927_v3 = vpop.f32.mrb[111].mxu1 }
 0x212   :  { %2481 = vrot.lane.b32.xlu0 %v11513_v15, %s10481_s28  ;;  %2483 = vrot.lane.b32.xlu1 %v11521_v7, %s10481_s28  ;;  %16040 = vst [vmem:[#allocation321_spill] sm:$0xff] %v11927_v3 }
 0x214   :  { %v11923_v52 = vpop.permute.xlu0 %2425  ;;  %v11925_v44 = vpop.permute.xlu1 %2427 }
 0x215   :  { %16039 = vst [vmem:[#allocation320_spill] sm:$0xff] %v11925_v44 }
 0x216   :  { %2705 = vrot.lane.b32.xlu0 %v11529_v13, %s10481_s28  ;;  %2707 = vrot.lane.b32.xlu1 %v11537_v14, %s10481_s28 }
 0x218   :  { %v11933_v1 = vpop.permute.xlu0 %2649  ;;  %v11935_v15 = vpop.permute.xlu1 %2651 }
 0x219   :  { %16041 = vst [vmem:[#allocation322_spill] sm:$0xff] %v11933_v1  ;;  %16042 = vst [vmem:[#allocation323_spill] sm:$0xff] %v11935_v15 }
 0x21a   :  { %2477 = vrot.lane.b32.xlu0 %v11519_v10, %s10481_s28  ;;  %2479 = vrot.lane.b32.xlu1 %v11527_v9, %s10481_s28 }
 0x21c   :  { %v11941_v7 = vpop.permute.xlu0 %2421  ;;  %v11943_v44 = vpop.permute.xlu1 %2423 }
 0x21e   :  { %2701 = vrot.lane.b32.xlu0 %v11535_v47, %s10481_s28  ;;  %2703 = vrot.lane.b32.xlu1 %v11543_v11, %s10481_s28 }
 0x220   :  { %v11949_v14 = vpop.permute.xlu0 %2645  ;;  %v11951_v13 = vpop.permute.xlu1 %2647 }
 0x221   :  { %16043 = vst [vmem:[#allocation324_spill] sm:$0xff] %v11949_v14  ;;  %16044 = vst [vmem:[#allocation325_spill] sm:$0xff] %v11951_v13 }
 0x222   :  { %2489 = vrot.lane.b32.xlu0 %v11561_v36, %s10481_s28  ;;  %2491 = vrot.lane.b32.xlu1 %v11569_v61, %s10481_s28 }
 0x224   :  { %v11957_v15 = vpop.permute.xlu0 %2433  ;;  %v11959_v1 = vpop.permute.xlu1 %2435 }
 0x226   :  { %2713 = vrot.lane.b32.xlu0 %v11577_v23, %s10481_s28  ;;  %2715 = vrot.lane.b32.xlu1 %v11585_v55, %s10481_s28 }
 0x228   :  { %v11965_v11 = vpop.permute.xlu0 %2657  ;;  %v11967_v47 = vpop.permute.xlu1 %2659 }
 0x229   :  { %16045 = vst [vmem:[#allocation326_spill] sm:$0xff] %v11965_v11  ;;  %16046 = vst [vmem:[#allocation327_spill] sm:$0xff] %v11967_v47 }
 0x22a   :  { %2485 = vrot.lane.b32.xlu0 %v11567_v63, %s10481_s28  ;;  %2487 = vrot.lane.b32.xlu1 %v11575_v19, %s10481_s28 }
 0x22c   :  { %v11973_v13 = vpop.permute.xlu0 %2429  ;;  %v11975_v14 = vpop.permute.xlu1 %2431 }
 0x22e   :  { %2709 = vrot.lane.b32.xlu0 %v11583_v18, %s10481_s28  ;;  %2711 = vrot.lane.b32.xlu1 %v11591_v2, %s10481_s28 }
 0x230   :  { %v11981_v55 = vpop.permute.xlu0 %2653  ;;  %v11983_v23 = vpop.permute.xlu1 %2655 }
 0x231   :  { %16047 = vst [vmem:[#allocation328_spill] sm:$0xff] %v11981_v55  ;;  %16048 = vst [vmem:[#allocation329_spill] sm:$0xff] %v11983_v23 }
 0x232   :  { %2497 = vrot.lane.b32.xlu0 %v11609_v42, %s10481_s28  ;;  %2499 = vrot.lane.b32.xlu1 %v11617_v51, %s10481_s28  ;;  %v16122_v42 = vld [vmem:[#allocation19_spill] sm:$0xff] }
 0x234   :  { %v11989_v47 = vpop.permute.xlu0 %2441  ;;  %v11991_v11 = vpop.permute.xlu1 %2443 }
 0x236   :  { %2721 = vrot.lane.b32.xlu0 %v11625_v57, %s10481_s28  ;;  %2723 = vrot.lane.b32.xlu1 %v11633_v26, %s10481_s28 }
 0x238   :  { %v11997_v2 = vpop.permute.xlu0 %2665  ;;  %v11999_v18 = vpop.permute.xlu1 %2667 }
 0x239   :  { %16049 = vst [vmem:[#allocation330_spill] sm:$0xff] %v11997_v2  ;;  %16050 = vst [vmem:[#allocation331_spill] sm:$0xff] %v11999_v18 }
 0x23a   :  { %2493 = vrot.lane.b32.xlu0 %v11615_v20, %s10481_s28  ;;  %2495 = vrot.lane.b32.xlu1 %v11623_v53, %s10481_s28 }
 0x23c   :  { %v12005_v23 = vpop.permute.xlu0 %2437  ;;  %v12007_v55 = vpop.permute.xlu1 %2439 }
 0x23e   :  { %2717 = vrot.lane.b32.xlu0 %v11631_v22, %s10481_s28  ;;  %2719 = vrot.lane.b32.xlu1 %v11639_v25, %s10481_s28 }
 0x240   :  { %v12013_v26 = vpop.permute.xlu0 %2661  ;;  %v12015_v57 = vpop.permute.xlu1 %2663 }
 0x241   :  { %16051 = vst [vmem:[#allocation332_spill] sm:$0xff] %v12013_v26  ;;  %16052 = vst [vmem:[#allocation333_spill] sm:$0xff] %v12015_v57  ;;  %v16055_v57 = vld [vmem:[#allocation232_spill] sm:$0xff] }
 0x242   :  { %2505 = vrot.lane.b32.xlu0 %v11657_v5, %s10481_s28  ;;  %2507 = vrot.lane.b32.xlu1 %v11665_v39, %s10481_s28  ;;  %v16056_v26 = vld [vmem:[#allocation236_spill] sm:$0xff] }
 0x244   :  { %v12021_v18 = vpop.permute.xlu0 %2449  ;;  %v12023_v2 = vpop.permute.xlu1 %2451 }
 0x246   :  { %2729 = vrot.lane.b32.xlu0 %v11673_v46, %s10481_s28  ;;  %2731 = vrot.lane.b32.xlu1 %v11681_v40, %s10481_s28  ;;  %v16057_v46 = vld [vmem:[#allocation242_spill] sm:$0xff] }
 0x248   :  { %v12029_v25 = vpop.permute.xlu0 %2673  ;;  %v12031_v22 = vpop.permute.xlu1 %2675 }
 0x249   :  { %16053 = vst [vmem:[#allocation334_spill] sm:$0xff] %v12029_v25  ;;  %16054 = vst [vmem:[#allocation335_spill] sm:$0xff] %v12031_v22  ;;  %v16060_v22 = vld [vmem:[#allocation249_spill] sm:$0xff] }
 0x24a   :  { %2501 = vrot.lane.b32.xlu0 %v16055_v57, %s10481_s28  ;;  %2503 = vrot.lane.b32.xlu1 %v16056_v26, %s10481_s28 }
 0x24c   :  { %v12037_v39 = vpop.permute.xlu0 %2445  ;;  %v12039_v5 = vpop.permute.xlu1 %2447 }
 0x24e   :  { %2725 = vrot.lane.b32.xlu0 %v11679_v41, %s10481_s28  ;;  %2727 = vrot.lane.b32.xlu1 %v16057_v46, %s10481_s28 }
 0x250   :  { %v12045_v40 = vpop.permute.xlu0 %2669  ;;  %v12047_v25 = vpop.permute.xlu1 %2671 }
 0x251   :  { %16058 = vst [vmem:[#allocation336_spill] sm:$0xff] %v12045_v40  ;;  %16059 = vst [vmem:[#allocation337_spill] sm:$0xff] %v12047_v25  ;;  %v16063_v25 = vld [vmem:[#allocation248_spill] sm:$0xff] }
 0x252   :  { %2513 = vrot.lane.b32.xlu0 %v11705_v27, %s10481_s28  ;;  %2515 = vrot.lane.b32.xlu1 %v16060_v22, %s10481_s28  ;;  %v16064_v40 = vld [vmem:[#allocation252_spill] sm:$0xff] }
 0x254   :  { %v12053_v26 = vpop.permute.xlu0 %2457  ;;  %v12055_v57 = vpop.permute.xlu1 %2459 }
 0x256   :  { %2737 = vrot.lane.b32.xlu0 %v11721_v49, %s10481_s28  ;;  %2739 = vrot.lane.b32.xlu1 %v11729_v45, %s10481_s28  ;;  %v16065_v49 = vld [vmem:[#allocation258_spill] sm:$0xff] }
 0x258   :  { %v12061_v46 = vpop.permute.xlu0 %2681  ;;  %v12063_v41 = vpop.permute.xlu1 %2683 }
 0x259   :  { %16061 = vst [vmem:[#allocation338_spill] sm:$0xff] %v12061_v46  ;;  %16062 = vst [vmem:[#allocation339_spill] sm:$0xff] %v12063_v41  ;;  %v16068_v41 = vld [vmem:[#allocation265_spill] sm:$0xff] }
 0x25a   :  { %2509 = vrot.lane.b32.xlu0 %v16063_v25, %s10481_s28  ;;  %2511 = vrot.lane.b32.xlu1 %v16064_v40, %s10481_s28 }
 0x25c   :  { %v12069_v22 = vpop.permute.xlu0 %2453  ;;  %v12071_v27 = vpop.permute.xlu1 %2455 }
 0x25e   :  { %2733 = vrot.lane.b32.xlu0 %v11727_v60, %s10481_s28  ;;  %2735 = vrot.lane.b32.xlu1 %v16065_v49, %s10481_s28 }
 0x260   :  { %v12077_v45 = vpop.permute.xlu0 %2677  ;;  %v12079_v46 = vpop.permute.xlu1 %2679 }
 0x261   :  { %16066 = vst [vmem:[#allocation340_spill] sm:$0xff] %v12077_v45  ;;  %16067 = vst [vmem:[#allocation341_spill] sm:$0xff] %v12079_v46  ;;  %v16071_v46 = vld [vmem:[#allocation264_spill] sm:$0xff] }
 0x262   :  { %2521 = vrot.lane.b32.xlu0 %v11753_v17, %s10481_s28  ;;  %2523 = vrot.lane.b32.xlu1 %v16068_v41, %s10481_s28  ;;  %v16072_v45 = vld [vmem:[#allocation268_spill] sm:$0xff] }
 0x264   :  { %v12085_v40 = vpop.permute.xlu0 %2465  ;;  %v12087_v25 = vpop.permute.xlu1 %2467 }
 0x266   :  { %2745 = vrot.lane.b32.xlu0 %v11769_v30, %s10481_s28  ;;  %2747 = vrot.lane.b32.xlu1 %v11777_v35, %s10481_s28 }
 0x268   :  { %v12093_v49 = vpop.permute.xlu0 %2689  ;;  %v12095_v60 = vpop.permute.xlu1 %2691 }
 0x269   :  { %16069 = vst [vmem:[#allocation342_spill] sm:$0xff] %v12093_v49  ;;  %16070 = vst [vmem:[#allocation343_spill] sm:$0xff] %v12095_v60 }
 0x26a   :  { %2517 = vrot.lane.b32.xlu0 %v16071_v46, %s10481_s28  ;;  %2519 = vrot.lane.b32.xlu1 %v16072_v45, %s10481_s28 }
 0x26c   :  { %v12101_v41 = vpop.permute.xlu0 %2461  ;;  %v12103_v17 = vpop.permute.xlu1 %2463 }
 0x26e   :  { %2741 = vrot.lane.b32.xlu0 %v11775_v37, %s10481_s28  ;;  %2743 = vrot.lane.b32.xlu1 %v11783_v28, %s10481_s28 }
 0x270   :  { %v12109_v35 = vpop.permute.xlu0 %2685  ;;  %v12111_v30 = vpop.permute.xlu1 %2687 }
 0x271   :  { %16073 = vst [vmem:[#allocation344_spill] sm:$0xff] %v12109_v35  ;;  %16074 = vst [vmem:[#allocation345_spill] sm:$0xff] %v12111_v30  ;;  %v16077_v30 = vld [vmem:[#allocation280_spill] sm:$0xff] }
 0x272   :  { %2529 = vrot.lane.b32.xlu0 %v11801_v59, %s10481_s28  ;;  %2531 = vrot.lane.b32.xlu1 %v11809_v31, %s10481_s28  ;;  %v16109_v59 = vld [vmem:[#allocation145_spill] sm:$0xff] }
 0x274   :  { %v12117_v60 = vpop.permute.xlu0 %2473  ;;  %v12119_v49 = vpop.permute.xlu1 %2475 }
 0x276   :  { %2753 = vrot.lane.b32.xlu0 %v11817_v24, %s10481_s28  ;;  %2755 = vrot.lane.b32.xlu1 %v11825_v62, %s10481_s28 }
 0x278   :  { %v12125_v28 = vpop.permute.xlu0 %2697  ;;  %v12127_v37 = vpop.permute.xlu1 %2699 }
 0x279   :  { %16075 = vst [vmem:[#allocation346_spill] sm:$0xff] %v12125_v28  ;;  %16076 = vst [vmem:[#allocation347_spill] sm:$0xff] %v12127_v37 }
 0x27a   :  { %2525 = vrot.lane.b32.xlu0 %v16077_v30, %s10481_s28  ;;  %2527 = vrot.lane.b32.xlu1 %v11815_v4, %s10481_s28  ;;  %v16110_v4 = vld [vmem:[#allocation11_spill] sm:$0xff] }
 0x27b   :  { %v12303_v30 = vmax.f32 %v16110_v4, %v16109_v59  ;;  %v16117_v4 = vld [vmem:[#allocation168_spill] sm:$0xff]  ;;  %v16118_v59 = vld [vmem:[#allocation25_spill] sm:$0xff] }
 0x27c   :  { %v12133_v35 = vpop.permute.xlu0 %2469  ;;  %v12135_v31 = vpop.permute.xlu1 %2471  ;;  %v12323_v51 = vmax.f32 %v16118_v59, %v16117_v4 }
 0x27e   :  { %2749 = vrot.lane.b32.xlu0 %v11823_v16, %s10481_s28  ;;  %2751 = vrot.lane.b32.xlu1 %v11831_v43, %s10481_s28 }
 0x280   :  { %v12141_v62 = vpop.permute.xlu0 %2693  ;;  %v12143_v24 = vpop.permute.xlu1 %2695 }
 0x281   :  { %16078 = vst [vmem:[#allocation348_spill] sm:$0xff] %v12141_v62  ;;  %16079 = vst [vmem:[#allocation349_spill] sm:$0xff] %v12143_v24 }
 0x282   :  { %2537 = vrot.lane.b32.xlu0 %v11849_v29, %s10481_s28  ;;  %2539 = vrot.lane.b32.xlu1 %v11857_v58, %s10481_s28 }
 0x284   :  { %v12149_v37 = vpop.permute.xlu0 %2481  ;;  %v12151_v28 = vpop.permute.xlu1 %2483 }
 0x285   :  { %16080 = vst [vmem:[#allocation350_spill] sm:$0xff] %v12151_v28 }
 0x286   :  { %2761 = vrot.lane.b32.xlu0 %v11865_v0, %s10481_s28  ;;  %2763 = vrot.lane.b32.xlu1 %v11873_v56, %s10481_s28 }
 0x288   :  { %v12157_v43 = vpop.permute.xlu0 %2705  ;;  %v12159_v16 = vpop.permute.xlu1 %2707 }
 0x289   :  { %16081 = vst [vmem:[#allocation351_spill] sm:$0xff] %v12157_v43  ;;  %16082 = vst [vmem:[#allocation352_spill] sm:$0xff] %v12159_v16 }
 0x28a   :  { %2533 = vrot.lane.b32.xlu0 %v11855_v6, %s10481_s28  ;;  %2535 = vrot.lane.b32.xlu1 %v11863_v54, %s10481_s28 }
 0x28c   :  { %v12165_v24 = vpop.permute.xlu0 %2477  ;;  %v12167_v62 = vpop.permute.xlu1 %2479 }
 0x28e   :  { %2757 = vrot.lane.b32.xlu0 %v11871_v21, %s10481_s28  ;;  %2759 = vrot.lane.b32.xlu1 %v11879_v34, %s10481_s28 }
 0x290   :  { %v12173_v56 = vpop.permute.xlu0 %2701  ;;  %v12175_v0 = vpop.permute.xlu1 %2703 }
 0x291   :  { %16083 = vst [vmem:[#allocation353_spill] sm:$0xff] %v12173_v56  ;;  %16084 = vst [vmem:[#allocation354_spill] sm:$0xff] %v12175_v0  ;;  %v15606_v0 = vmov 0  }
 0x292   :  { %2545 = vrot.lane.b32.xlu0 %v11897_v48, %s10481_s28  ;;  %2547 = vrot.lane.b32.xlu1 %v11905_v12, %s10481_s28  ;;  %4909 = vst.msk [vmem:[#allocation2] sm:$0xff] %vm4908_vm3, %v15606_v0  ;;  %4986 = vst.msk [vmem:[#allocation2 + $0x80] sm:$0xff] %vm4908_vm3, %v15606_v0  ;;  %v16093_v12 = vld [vmem:[#allocation138_spill] sm:$0xff]  ;;  %v16094_v48 = vld [vmem:[#allocation9_spill] sm:$0xff] }
 0x293   :  { %4988 = vst.msk [vmem:[#allocation2 + $0x88] sm:$0xff] %vm4908_vm3, %v15606_v0  ;;  %5062 = vst.msk [vmem:[#allocation2 + $0x108] sm:$0xff] %vm4908_vm3, %v15606_v0 }
 0x294   :  { %v12181_v16 = vpop.permute.xlu0 %2489  ;;  %v12183_v43 = vpop.permute.xlu1 %2491  ;;  %5064 = vst.msk [vmem:[#allocation2 + $0x110] sm:$0xff] %vm4908_vm3, %v15606_v0  ;;  %5138 = vst.msk [vmem:[#allocation2 + $0x190] sm:$0xff] %vm4908_vm3, %v15606_v0 }
 0x295   :  { %16085 = vst [vmem:[#allocation355_spill] sm:$0xff] %v12181_v16  ;;  %16086 = vst [vmem:[#allocation356_spill] sm:$0xff] %v12183_v43 }
 0x296   :  { %2769 = vrot.lane.b32.xlu0 %v11913_v32, %s10481_s28  ;;  %2771 = vrot.lane.b32.xlu1 %v11921_v50, %s10481_s28  ;;  %5140 = vst.msk [vmem:[#allocation2 + $0x198] sm:$0xff] %vm4908_vm3, %v15606_v0  ;;  %5214 = vst.msk [vmem:[#allocation2 + $0x218] sm:$0xff] %vm4908_vm3, %v15606_v0 }
 0x297   :  { %5216 = vst.msk [vmem:[#allocation2 + $0x220] sm:$0xff] %vm4908_vm3, %v15606_v0  ;;  %5290 = vst.msk [vmem:[#allocation2 + $0x2a0] sm:$0xff] %vm4908_vm3, %v15606_v0 }
 0x298   :  { %v12189_v34 = vpop.permute.xlu0 %2713  ;;  %v12191_v21 = vpop.permute.xlu1 %2715  ;;  %5292 = vst.msk [vmem:[#allocation2 + $0x2a8] sm:$0xff] %vm4908_vm3, %v15606_v0  ;;  %5366 = vst.msk [vmem:[#allocation2 + $0x328] sm:$0xff] %vm4908_vm3, %v15606_v0 }
 0x299   :  { %16087 = vst [vmem:[#allocation357_spill] sm:$0xff] %v12189_v34  ;;  %16088 = vst [vmem:[#allocation358_spill] sm:$0xff] %v12191_v21  ;;  %v16091_v21 = vld [vmem:[#allocation125_spill] sm:$0xff]  ;;  %v16092_v34 = vld [vmem:[#allocation6_spill] sm:$0xff] }
 0x29a   :  { %2541 = vrot.lane.b32.xlu0 %v11903_v33, %s10481_s28  ;;  %2543 = vrot.lane.b32.xlu1 %v11911_v38, %s10481_s28  ;;  %5368 = vst.msk [vmem:[#allocation2 + $0x330] sm:$0xff] %vm4908_vm3, %v15606_v0  ;;  %5442 = vst.msk [vmem:[#allocation2 + $0x3b0] sm:$0xff] %vm4908_vm3, %v15606_v0  ;;  %v12255_v56 = vmax.f32 %v16092_v34, %v16091_v21  ;;  %v12259_v38 = vmax.f32 %v16094_v48, %v16093_v12  ;;  %v16099_v34 = vld [vmem:[#allocation126_spill] sm:$0xff]  ;;  %v16100_v21 = vld [vmem:[#allocation7_spill] sm:$0xff] }
 0x29b   :  { %5444 = vst.msk [vmem:[#allocation2 + $0x3b8] sm:$0xff] %vm4908_vm3, %v15606_v0  ;;  %5518 = vst.msk [vmem:[#allocation2 + $0x438] sm:$0xff] %vm4908_vm3, %v15606_v0  ;;  %v12275_v29 = vmax.f32 %v16100_v21, %v16099_v34 }
 0x29c   :  { %4985 = vst.msk [vmem:[#allocation2 + $0x78] sm:$0xf0] %vm4969_vm4, %v15606_v0  ;;  %5061 = vst.msk [vmem:[#allocation2 + $0x100] sm:$0xf0] %vm4969_vm4, %v15606_v0  ;;  %v12245_v50 = vpop.permute.xlu0 %2485  ;;  %v12247_v32 = vpop.permute.xlu1 %2487 }
 0x29d   :  { %5137 = vst.msk [vmem:[#allocation2 + $0x188] sm:$0xf0] %vm4969_vm4, %v15606_v0  ;;  %5213 = vst.msk [vmem:[#allocation2 + $0x210] sm:$0xf0] %vm4969_vm4, %v15606_v0 }
 0x29e   :  { %5289 = vst.msk [vmem:[#allocation2 + $0x298] sm:$0xf0] %vm4969_vm4, %v15606_v0  ;;  %5365 = vst.msk [vmem:[#allocation2 + $0x320] sm:$0xf0] %vm4969_vm4, %v15606_v0  ;;  %2765 = vrot.lane.b32.xlu0 %v11919_v8, %s10481_s28  ;;  %2767 = vrot.lane.b32.xlu1 %v11927_v3, %s10481_s28  ;;  %v16097_v3 = vld [vmem:[#allocation122_spill] sm:$0xff]  ;;  %v16098_v8 = vld [vmem:[#allocation3_spill] sm:$0xff] }
 0x29f   :  { %5441 = vst.msk [vmem:[#allocation2 + $0x3a8] sm:$0xf0] %vm4969_vm4, %v15606_v0  ;;  %5517 = vst.msk [vmem:[#allocation2 + $0x430] sm:$0xf0] %vm4969_vm4, %v15606_v0  ;;  %v12271_v58 = vmax.f32 %v16098_v8, %v16097_v3  ;;  %v16105_v3 = vld [vmem:[#allocation152_spill] sm:$0xff]  ;;  %v16106_v8 = vld [vmem:[#allocation17_spill] sm:$0xff] }
 0x2a0   :  { %16089 = vst [vmem:[#allocation359_spill] sm:$0xff] %v12245_v50  ;;  %16090 = vst [vmem:[#allocation360_spill] sm:$0xff] %v12247_v32  ;;  %v12261_v33 = vpop.permute.xlu0 %2709  ;;  %v12263_v0 = vpop.permute.xlu1 %2711  ;;  %v12291_v6 = vmax.f32 %v16106_v8, %v16105_v3 }
 0x2a1   :  { %16095 = vst [vmem:[#allocation125_spill] sm:$0xff] %v12261_v33  ;;  %16096 = vst [vmem:[#allocation6_spill] sm:$0xff] %v12263_v0  ;;  %v16103_v0 = vld [vmem:[#allocation151_spill] sm:$0xff]  ;;  %v16104_v33 = vld [vmem:[#allocation13_spill] sm:$0xff] }
 0x2a2   :  { %3445 = vrot.lane.b32.xlu0 %v12255_v56, %s10483_s0  ;;  %3447 = vrot.lane.b32.xlu1 %v12259_v38, %s10483_s0  ;;  %v12287_v54 = vmax.f32 %v16104_v33, %v16103_v0  ;;  %v16111_v33 = vld [vmem:[#allocation146_spill] sm:$0xff]  ;;  %v16112_v0 = vld [vmem:[#allocation15_spill] sm:$0xff] }
 0x2a3   :  { %v12307_v45 = vmax.f32 %v16112_v0, %v16111_v33 }
 0x2a4   :  { %v12277_v12 = vpop.permute.xlu0 %2497  ;;  %v12279_v48 = vpop.permute.xlu1 %2499 }
 0x2a5   :  { %16101 = vst [vmem:[#allocation138_spill] sm:$0xff] %v12277_v12  ;;  %16102 = vst [vmem:[#allocation9_spill] sm:$0xff] %v12279_v48  ;;  %v16121_v48 = vld [vmem:[#allocation162_spill] sm:$0xff] }
 0x2a6   :  { %3449 = vrot.lane.b32.xlu0 %v12271_v58, %s10483_s0  ;;  %3451 = vrot.lane.b32.xlu1 %v12275_v29, %s10483_s0  ;;  %v12335_v12 = vmax.f32 %v16122_v42, %v16121_v48  ;;  %v16129_v42 = vld [vmem:[#allocation184_spill] sm:$0xff]  ;;  %v16130_v48 = vld [vmem:[#allocation33_spill] sm:$0xff] }
 0x2a7   :  { %v12355_v20 = vmax.f32 %v16130_v48, %v16129_v42 }
 0x2a8   :  { %v12293_v34 = vpop.permute.xlu0 %2721  ;;  %v12295_v21 = vpop.permute.xlu1 %2723 }
 0x2a9   :  { %16107 = vst [vmem:[#allocation122_spill] sm:$0xff] %v12293_v34  ;;  %16108 = vst [vmem:[#allocation3_spill] sm:$0xff] %v12295_v21  ;;  %v16115_v21 = vld [vmem:[#allocation167_spill] sm:$0xff]  ;;  %v16116_v34 = vld [vmem:[#allocation21_spill] sm:$0xff] }
 0x2aa   :  { %3453 = vrot.lane.b32.xlu0 %v12287_v54, %s10483_s0  ;;  %3455 = vrot.lane.b32.xlu1 %v12291_v6, %s10483_s0  ;;  %v12319_v46 = vmax.f32 %v16116_v34, %v16115_v21  ;;  %v16123_v34 = vld [vmem:[#allocation163_spill] sm:$0xff] }
 0x2ab   :  { %v16124_v21 = vld [vmem:[#allocation23_spill] sm:$0xff] }
 0x2ac   :  { %v12309_v3 = vpop.permute.xlu0 %2493  ;;  %v12311_v8 = vpop.permute.xlu1 %2495  ;;  %v12339_v53 = vmax.f32 %v16124_v21, %v16123_v34 }
 0x2ad   :  { %16113 = vst [vmem:[#allocation126_spill] sm:$0xff] %v12309_v3  ;;  %16114 = vst [vmem:[#allocation7_spill] sm:$0xff] %v12311_v8 }
 0x2ae   :  { %3457 = vrot.lane.b32.xlu0 %v12303_v30, %s10483_s0  ;;  %3459 = vrot.lane.b32.xlu1 %v12307_v45, %s10483_s0 }
 0x2b0   :  { %v12325_v33 = vpop.permute.xlu0 %2717  ;;  %v12327_v0 = vpop.permute.xlu1 %2719 }
 0x2b1   :  { %16119 = vst [vmem:[#allocation151_spill] sm:$0xff] %v12325_v33  ;;  %16120 = vst [vmem:[#allocation13_spill] sm:$0xff] %v12327_v0  ;;  %v16127_v0 = vld [vmem:[#allocation183_spill] sm:$0xff]  ;;  %v16128_v33 = vld [vmem:[#allocation29_spill] sm:$0xff] }
 0x2b2   :  { %3461 = vrot.lane.b32.xlu0 %v12319_v46, %s10483_s0  ;;  %3463 = vrot.lane.b32.xlu1 %v12323_v51, %s10483_s0  ;;  %v12351_v8 = vmax.f32 %v16128_v33, %v16127_v0  ;;  %v16135_v33 = vld [vmem:[#allocation179_spill] sm:$0xff] }
 0x2b3   :  { %v16136_v0 = vld [vmem:[#allocation31_spill] sm:$0xff] }
 0x2b4   :  { %v12341_v4 = vpop.permute.xlu0 %2505  ;;  %v12343_v59 = vpop.permute.xlu1 %2507  ;;  %v12371_v61 = vmax.f32 %v16136_v0, %v16135_v33 }
 0x2b5   :  { %16125 = vst [vmem:[#allocation152_spill] sm:$0xff] %v12341_v4  ;;  %16126 = vst [vmem:[#allocation17_spill] sm:$0xff] %v12343_v59  ;;  %v16133_v59 = vld [vmem:[#allocation178_spill] sm:$0xff]  ;;  %v16134_v4 = vld [vmem:[#allocation27_spill] sm:$0xff] }
 0x2b6   :  { %3465 = vrot.lane.b32.xlu0 %v12335_v12, %s10483_s0  ;;  %3467 = vrot.lane.b32.xlu1 %v12339_v53, %s10483_s0  ;;  %v12367_v3 = vmax.f32 %v16134_v4, %v16133_v59  ;;  %v16141_v4 = vld [vmem:[#allocation198_spill] sm:$0xff]  ;;  %v16142_v59 = vld [vmem:[#allocation41_spill] sm:$0xff] }
 0x2b7   :  { %v12387_v36 = vmax.f32 %v16142_v59, %v16141_v4 }
 0x2b8   :  { %v12357_v34 = vpop.permute.xlu0 %2729  ;;  %v12359_v21 = vpop.permute.xlu1 %2731 }
 0x2b9   :  { %16131 = vst [vmem:[#allocation145_spill] sm:$0xff] %v12357_v34  ;;  %16132 = vst [vmem:[#allocation11_spill] sm:$0xff] %v12359_v21  ;;  %v16139_v21 = vld [vmem:[#allocation197_spill] sm:$0xff] }
 0x2ba   :  { %3469 = vrot.lane.b32.xlu0 %v12351_v8, %s10483_s0  ;;  %3471 = vrot.lane.b32.xlu1 %v12355_v20, %s10483_s0  ;;  %v16140_v34 = vld [vmem:[#allocation37_spill] sm:$0xff] }
 0x2bb   :  { %v12383_v43 = vmax.f32 %v16140_v34, %v16139_v21  ;;  %v16147_v34 = vld [vmem:[#allocation193_spill] sm:$0xff]  ;;  %v16148_v21 = vld [vmem:[#allocation39_spill] sm:$0xff] }
 0x2bc   :  { %v12373_v42 = vpop.permute.xlu0 %2501  ;;  %v12375_v48 = vpop.permute.xlu1 %2503  ;;  %v12403_v19 = vmax.f32 %v16148_v21, %v16147_v34 }
 0x2bd   :  { %16137 = vst [vmem:[#allocation146_spill] sm:$0xff] %v12373_v42  ;;  %16138 = vst [vmem:[#allocation15_spill] sm:$0xff] %v12375_v48  ;;  %v16145_v48 = vld [vmem:[#allocation192_spill] sm:$0xff]  ;;  %v16146_v42 = vld [vmem:[#allocation35_spill] sm:$0xff] }
 0x2be   :  { %3473 = vrot.lane.b32.xlu0 %v12367_v3, %s10483_s0  ;;  %3475 = vrot.lane.b32.xlu1 %v12371_v61, %s10483_s0  ;;  %v12399_v16 = vmax.f32 %v16146_v42, %v16145_v48  ;;  %v16154_v42 = vld [vmem:[#allocation214_spill] sm:$0xff]  ;;  %v16155_v48 = vld [vmem:[#allocation49_spill] sm:$0xff] }
 0x2bf   :  { %v12419_v63 = vmax.f32 %v16155_v48, %v16154_v42 }
 0x2c0   :  { %v12389_v33 = vpop.permute.xlu0 %2725  ;;  %v12391_v0 = vpop.permute.xlu1 %2727 }
 0x2c1   :  { %16143 = vst [vmem:[#allocation167_spill] sm:$0xff] %v12389_v33  ;;  %16144 = vst [vmem:[#allocation21_spill] sm:$0xff] %v12391_v0  ;;  %v16151_v0 = vld [vmem:[#allocation213_spill] sm:$0xff] }
 0x2c2   :  { %3477 = vrot.lane.b32.xlu0 %v12383_v43, %s10483_s0  ;;  %3479 = vrot.lane.b32.xlu1 %v12387_v36, %s10483_s0  ;;  %v16152_v33 = vld [vmem:[#allocation45_spill] sm:$0xff]  ;;  %16156 = vst [vmem:[#allocation19_spill] sm:$0xff] %v12419_v63 }
 0x2c3   :  { %v12415_v32 = vmax.f32 %v16152_v33, %v16151_v0  ;;  %v16162_v33 = vld [vmem:[#allocation209_spill] sm:$0xff]  ;;  %v16163_v0 = vld [vmem:[#allocation47_spill] sm:$0xff] }
 0x2c4   :  { %v12405_v4 = vpop.permute.xlu0 %2513  ;;  %v12407_v59 = vpop.permute.xlu1 %2515  ;;  %v12435_v28 = vmax.f32 %v16163_v0, %v16162_v33 }
 0x2c5   :  { %16149 = vst [vmem:[#allocation168_spill] sm:$0xff] %v12405_v4  ;;  %16150 = vst [vmem:[#allocation25_spill] sm:$0xff] %v12407_v59  ;;  %v16159_v59 = vld [vmem:[#allocation208_spill] sm:$0xff]  ;;  %v16160_v4 = vld [vmem:[#allocation43_spill] sm:$0xff] }
 0x2c6   :  { %3481 = vrot.lane.b32.xlu0 %v12399_v16, %s10483_s0  ;;  %3483 = vrot.lane.b32.xlu1 %v12403_v19, %s10483_s0  ;;  %16153 = vst [vmem:[#allocation162_spill] sm:$0xff] %v12415_v32  ;;  %v12431_v50 = vmax.f32 %v16160_v4, %v16159_v59  ;;  %16164 = vst [vmem:[#allocation29_spill] sm:$0xff] %v12435_v28  ;;  %v16170_v4 = vld [vmem:[#allocation230_spill] sm:$0xff]  ;;  %v16171_v59 = vld [vmem:[#allocation57_spill] sm:$0xff] }
 0x2c8   :  { %v12421_v34 = vpop.permute.xlu0 %2737  ;;  %v12423_v21 = vpop.permute.xlu1 %2739  ;;  %16161 = vst [vmem:[#allocation183_spill] sm:$0xff] %v12431_v50 }
 0x2c9   :  { %16157 = vst [vmem:[#allocation163_spill] sm:$0xff] %v12421_v34  ;;  %16158 = vst [vmem:[#allocation23_spill] sm:$0xff] %v12423_v21  ;;  %v16167_v21 = vld [vmem:[#allocation229_spill] sm:$0xff] }
 0x2ca   :  { %3485 = vrot.lane.b32.xlu0 %v12415_v32, %s10483_s0  ;;  %3487 = vrot.lane.b32.xlu1 %v12419_v63, %s10483_s0  ;;  %v16168_v34 = vld [vmem:[#allocation53_spill] sm:$0xff]  ;;  %v12451_v32 = vmax.f32 %v16171_v59, %v16170_v4 }
 0x2cb   :  { %v12447_v63 = vmax.f32 %v16168_v34, %v16167_v21  ;;  %v16176_v34 = vld [vmem:[#allocation224_spill] sm:$0xff]  ;;  %v16177_v21 = vld [vmem:[#allocation51_spill] sm:$0xff]  ;;  %v16179_v59 = vld [vmem:[#allocation225_spill] sm:$0xff] }
 0x2cc   :  { %v12437_v42 = vpop.permute.xlu0 %2509  ;;  %v12439_v48 = vpop.permute.xlu1 %2511  ;;  %16172 = vst [vmem:[#allocation27_spill] sm:$0xff] %v12451_v32  ;;  %v12479_v4 = vmax.f32 %v16177_v21, %v16176_v34  ;;  %v16187_v34 = vld [vmem:[#allocation246_spill] sm:$0xff]  ;;  %v16188_v21 = vld [vmem:[#allocation65_spill] sm:$0xff] }
 0x2cd   :  { %16165 = vst [vmem:[#allocation184_spill] sm:$0xff] %v12437_v42  ;;  %16166 = vst [vmem:[#allocation33_spill] sm:$0xff] %v12439_v48  ;;  %v16175_v48 = vmov 0  }
 0x2ce   :  { %3489 = vrot.lane.b32.xlu0 %v12431_v50, %s10483_s0  ;;  %3491 = vrot.lane.b32.xlu1 %v12435_v28, %s10483_s0  ;;  %16169 = vst [vmem:[#allocation178_spill] sm:$0xff] %v12447_v63  ;;  %4911 = vst.msk [vmem:[#allocation2 + $0x8] sm:$0xf] %vm4910_vm5, %v16175_v48  ;;  %v12499_v50 = vmax.f32 %v16188_v21, %v16187_v34 }
 0x2cf   :  { %4989 = vst.msk [vmem:[#allocation2 + $0x90] sm:$0xf] %vm4910_vm5, %v16175_v48  ;;  %5065 = vst.msk [vmem:[#allocation2 + $0x118] sm:$0xf] %vm4910_vm5, %v16175_v48 }
 0x2d0   :  { %v12453_v33 = vpop.permute.xlu0 %2733  ;;  %v12455_v0 = vpop.permute.xlu1 %2735  ;;  %5141 = vst.msk [vmem:[#allocation2 + $0x1a0] sm:$0xf] %vm4910_vm5, %v16175_v48  ;;  %5217 = vst.msk [vmem:[#allocation2 + $0x228] sm:$0xf] %vm4910_vm5, %v16175_v48 }
 0x2d1   :  { %16173 = vst [vmem:[#allocation179_spill] sm:$0xff] %v12453_v33  ;;  %16174 = vst [vmem:[#allocation31_spill] sm:$0xff] %v12455_v0  ;;  %v16180_v0 = vld [vmem:[#allocation55_spill] sm:$0xff] }
 0x2d2   :  { %5293 = vst.msk [vmem:[#allocation2 + $0x2b0] sm:$0xf] %vm4910_vm5, %v16175_v48  ;;  %5369 = vst.msk [vmem:[#allocation2 + $0x338] sm:$0xf] %vm4910_vm5, %v16175_v48  ;;  %3493 = vrot.lane.b32.xlu0 %v12447_v63, %s10483_s0  ;;  %3495 = vrot.lane.b32.xlu1 %v12451_v32, %s10483_s0  ;;  %v12483_v33 = vmax.f32 %v16180_v0, %v16179_v59  ;;  %v16185_v32 = vld [vmem:[#allocation61_spill] sm:$0xff] }
 0x2d3   :  { %5445 = vst.msk [vmem:[#allocation2 + $0x3c0] sm:$0xf] %vm4910_vm5, %v16175_v48  ;;  %16178 = vst [vmem:[#allocation197_spill] sm:$0xff] %v12479_v4  ;;  %v16184_v48 = vld [vmem:[#allocation245_spill] sm:$0xff] }
 0x2d4   :  { %16181 = vst [vmem:[#allocation37_spill] sm:$0xff] %v12483_v33  ;;  %v12485_v42 = vpop.permute.xlu0 %2521  ;;  %v12487_v28 = vpop.permute.xlu1 %2523  ;;  %v12495_v63 = vmax.f32 %v16185_v32, %v16184_v48  ;;  %16189 = vst [vmem:[#allocation35_spill] sm:$0xff] %v12499_v50  ;;  %v16195_v32 = vld [vmem:[#allocation241_spill] sm:$0xff]  ;;  %v16196_v48 = vld [vmem:[#allocation63_spill] sm:$0xff] }
 0x2d5   :  { %16182 = vst [vmem:[#allocation198_spill] sm:$0xff] %v12485_v42  ;;  %16183 = vst [vmem:[#allocation41_spill] sm:$0xff] %v12487_v28  ;;  %v16192_v28 = vld [vmem:[#allocation240_spill] sm:$0xff]  ;;  %v16193_v42 = vld [vmem:[#allocation59_spill] sm:$0xff] }
 0x2d6   :  { %3497 = vrot.lane.b32.xlu0 %v12479_v4, %s10483_s0  ;;  %3499 = vrot.lane.b32.xlu1 %v12483_v33, %s10483_s0  ;;  %16186 = vst [vmem:[#allocation192_spill] sm:$0xff] %v12495_v63  ;;  %v12511_v33 = vmax.f32 %v16193_v42, %v16192_v28  ;;  %v12515_v4 = vmax.f32 %v16196_v48, %v16195_v32  ;;  %v16203_v28 = vld [vmem:[#allocation262_spill] sm:$0xff]  ;;  %v16204_v42 = vld [vmem:[#allocation73_spill] sm:$0xff] }
 0x2d8   :  { %v12501_v0 = vpop.permute.xlu0 %2745  ;;  %v12503_v59 = vpop.permute.xlu1 %2747  ;;  %16194 = vst [vmem:[#allocation213_spill] sm:$0xff] %v12511_v33  ;;  %16197 = vst [vmem:[#allocation45_spill] sm:$0xff] %v12515_v4 }
 0x2d9   :  { %16190 = vst [vmem:[#allocation193_spill] sm:$0xff] %v12501_v0  ;;  %16191 = vst [vmem:[#allocation39_spill] sm:$0xff] %v12503_v59  ;;  %v16200_v59 = vld [vmem:[#allocation261_spill] sm:$0xff] }
 0x2da   :  { %3501 = vrot.lane.b32.xlu0 %v12495_v63, %s10483_s0  ;;  %3503 = vrot.lane.b32.xlu1 %v12499_v50, %s10483_s0  ;;  %v16201_v0 = vld [vmem:[#allocation69_spill] sm:$0xff]  ;;  %v12531_v63 = vmax.f32 %v16204_v42, %v16203_v28 }
 0x2db   :  { %v12527_v50 = vmax.f32 %v16201_v0, %v16200_v59  ;;  %v16211_v0 = vld [vmem:[#allocation257_spill] sm:$0xff]  ;;  %v16212_v59 = vld [vmem:[#allocation71_spill] sm:$0xff] }
 0x2dc   :  { %v12517_v34 = vpop.permute.xlu0 %2517  ;;  %v12519_v21 = vpop.permute.xlu1 %2519  ;;  %16205 = vst [vmem:[#allocation43_spill] sm:$0xff] %v12531_v63 }
 0x2dd   :  { %16198 = vst [vmem:[#allocation214_spill] sm:$0xff] %v12517_v34  ;;  %16199 = vst [vmem:[#allocation49_spill] sm:$0xff] %v12519_v21  ;;  %v16208_v21 = vld [vmem:[#allocation256_spill] sm:$0xff]  ;;  %v16209_v34 = vld [vmem:[#allocation67_spill] sm:$0xff] }
 0x2de   :  { %3505 = vrot.lane.b32.xlu0 %v12511_v33, %s10483_s0  ;;  %3507 = vrot.lane.b32.xlu1 %v12515_v4, %s10483_s0  ;;  %16202 = vst [vmem:[#allocation208_spill] sm:$0xff] %v12527_v50  ;;  %v12543_v4 = vmax.f32 %v16209_v34, %v16208_v21  ;;  %v12547_v33 = vmax.f32 %v16212_v59, %v16211_v0  ;;  %v16219_v34 = vld [vmem:[#allocation278_spill] sm:$0xff]  ;;  %v16220_v21 = vld [vmem:[#allocation81_spill] sm:$0xff] }
 0x2e0   :  { %v12533_v32 = vpop.permute.xlu0 %2741  ;;  %v12535_v48 = vpop.permute.xlu1 %2743  ;;  %16210 = vst [vmem:[#allocation229_spill] sm:$0xff] %v12543_v4  ;;  %16213 = vst [vmem:[#allocation53_spill] sm:$0xff] %v12547_v33 }
 0x2e1   :  { %16206 = vst [vmem:[#allocation209_spill] sm:$0xff] %v12533_v32  ;;  %16207 = vst [vmem:[#allocation47_spill] sm:$0xff] %v12535_v48  ;;  %v16216_v48 = vld [vmem:[#allocation277_spill] sm:$0xff] }
 0x2e2   :  { %3509 = vrot.lane.b32.xlu0 %v12527_v50, %s10483_s0  ;;  %3511 = vrot.lane.b32.xlu1 %v12531_v63, %s10483_s0  ;;  %v16217_v32 = vld [vmem:[#allocation77_spill] sm:$0xff]  ;;  %v12563_v50 = vmax.f32 %v16220_v21, %v16219_v34 }
 0x2e3   :  { %v12559_v63 = vmax.f32 %v16217_v32, %v16216_v48  ;;  %v16227_v32 = vld [vmem:[#allocation273_spill] sm:$0xff]  ;;  %v16228_v48 = vld [vmem:[#allocation79_spill] sm:$0xff] }
 0x2e4   :  { %v12549_v28 = vpop.permute.xlu0 %2529  ;;  %v12551_v42 = vpop.permute.xlu1 %2531  ;;  %16221 = vst [vmem:[#allocation51_spill] sm:$0xff] %v12563_v50 }
 0x2e5   :  { %16214 = vst [vmem:[#allocation230_spill] sm:$0xff] %v12549_v28  ;;  %16215 = vst [vmem:[#allocation57_spill] sm:$0xff] %v12551_v42  ;;  %v16224_v42 = vld [vmem:[#allocation272_spill] sm:$0xff]  ;;  %v16225_v28 = vld [vmem:[#allocation75_spill] sm:$0xff] }
 0x2e6   :  { %3513 = vrot.lane.b32.xlu0 %v12543_v4, %s10483_s0  ;;  %3515 = vrot.lane.b32.xlu1 %v12547_v33, %s10483_s0  ;;  %16218 = vst [vmem:[#allocation224_spill] sm:$0xff] %v12559_v63  ;;  %v12575_v33 = vmax.f32 %v16225_v28, %v16224_v42  ;;  %v12579_v4 = vmax.f32 %v16228_v48, %v16227_v32  ;;  %v16235_v28 = vld [vmem:[#allocation294_spill] sm:$0xff]  ;;  %v16236_v42 = vld [vmem:[#allocation89_spill] sm:$0xff] }
 0x2e8   :  { %v12565_v0 = vpop.permute.xlu0 %2753  ;;  %v12567_v59 = vpop.permute.xlu1 %2755  ;;  %16226 = vst [vmem:[#allocation245_spill] sm:$0xff] %v12575_v33  ;;  %16229 = vst [vmem:[#allocation61_spill] sm:$0xff] %v12579_v4 }
 0x2e9   :  { %16222 = vst [vmem:[#allocation225_spill] sm:$0xff] %v12565_v0  ;;  %16223 = vst [vmem:[#allocation55_spill] sm:$0xff] %v12567_v59  ;;  %v16232_v59 = vld [vmem:[#allocation293_spill] sm:$0xff] }
 0x2ea   :  { %3517 = vrot.lane.b32.xlu0 %v12559_v63, %s10483_s0  ;;  %3519 = vrot.lane.b32.xlu1 %v12563_v50, %s10483_s0  ;;  %v16233_v0 = vld [vmem:[#allocation85_spill] sm:$0xff]  ;;  %v12595_v63 = vmax.f32 %v16236_v42, %v16235_v28 }
 0x2eb   :  { %v12591_v50 = vmax.f32 %v16233_v0, %v16232_v59  ;;  %v16243_v0 = vld [vmem:[#allocation289_spill] sm:$0xff]  ;;  %v16244_v59 = vld [vmem:[#allocation87_spill] sm:$0xff] }
 0x2ec   :  { %v12581_v34 = vpop.permute.xlu0 %2525  ;;  %v12583_v21 = vpop.permute.xlu1 %2527  ;;  %16237 = vst [vmem:[#allocation59_spill] sm:$0xff] %v12595_v63 }
 0x2ed   :  { %16230 = vst [vmem:[#allocation246_spill] sm:$0xff] %v12581_v34  ;;  %16231 = vst [vmem:[#allocation65_spill] sm:$0xff] %v12583_v21  ;;  %v16240_v21 = vld [vmem:[#allocation288_spill] sm:$0xff]  ;;  %v16241_v34 = vld [vmem:[#allocation83_spill] sm:$0xff] }
 0x2ee   :  { %3521 = vrot.lane.b32.xlu0 %v12575_v33, %s10483_s0  ;;  %3523 = vrot.lane.b32.xlu1 %v12579_v4, %s10483_s0  ;;  %16234 = vst [vmem:[#allocation240_spill] sm:$0xff] %v12591_v50  ;;  %v12607_v4 = vmax.f32 %v16241_v34, %v16240_v21  ;;  %v12611_v33 = vmax.f32 %v16244_v59, %v16243_v0  ;;  %v16250_v34 = vld [vmem:[#allocation310_spill] sm:$0xff]  ;;  %v16251_v21 = vld [vmem:[#allocation97_spill] sm:$0xff] }
 0x2f0   :  { %v12597_v32 = vpop.permute.xlu0 %2749  ;;  %v12599_v48 = vpop.permute.xlu1 %2751  ;;  %16242 = vst [vmem:[#allocation261_spill] sm:$0xff] %v12607_v4  ;;  %16245 = vst [vmem:[#allocation69_spill] sm:$0xff] %v12611_v33 }
 0x2f1   :  { %16238 = vst [vmem:[#allocation241_spill] sm:$0xff] %v12597_v32  ;;  %16239 = vst [vmem:[#allocation63_spill] sm:$0xff] %v12599_v48  ;;  %v16248_v48 = vld [vmem:[#allocation309_spill] sm:$0xff] }
 0x2f2   :  { %3525 = vrot.lane.b32.xlu0 %v12591_v50, %s10483_s0  ;;  %3527 = vrot.lane.b32.xlu1 %v12595_v63, %s10483_s0  ;;  %v16249_v32 = vld [vmem:[#allocation93_spill] sm:$0xff]  ;;  %v12627_v50 = vmax.f32 %v16251_v21, %v16250_v34 }
 0x2f3   :  { %v12623_v63 = vmax.f32 %v16249_v32, %v16248_v48  ;;  %v16257_v32 = vld [vmem:[#allocation305_spill] sm:$0xff]  ;;  %v16258_v48 = vld [vmem:[#allocation95_spill] sm:$0xff] }
 0x2f4   :  { %v12613_v28 = vpop.permute.xlu0 %2537  ;;  %v12615_v42 = vpop.permute.xlu1 %2539 }
 0x2f5   :  { %16246 = vst [vmem:[#allocation262_spill] sm:$0xff] %v12613_v28  ;;  %16247 = vst [vmem:[#allocation73_spill] sm:$0xff] %v12615_v42  ;;  %v16254_v42 = vld [vmem:[#allocation304_spill] sm:$0xff]  ;;  %v16255_v28 = vld [vmem:[#allocation91_spill] sm:$0xff] }
 0x2f6   :  { %3529 = vrot.lane.b32.xlu0 %v12607_v4, %s10483_s0  ;;  %3531 = vrot.lane.b32.xlu1 %v12611_v33, %s10483_s0  ;;  %v12639_v33 = vmax.f32 %v16255_v28, %v16254_v42  ;;  %v12643_v4 = vmax.f32 %v16258_v48, %v16257_v32  ;;  %v16262_v28 = vld [vmem:[#allocation105_spill] sm:$0xff] }
 0x2f7   :  { %v12659_v42 = vmax.f32 %v16262_v28, %v11943_v44 }
 0x2f8   :  { %v12629_v0 = vpop.permute.xlu0 %2761  ;;  %v12631_v59 = vpop.permute.xlu1 %2763  ;;  %16256 = vst [vmem:[#allocation257_spill] sm:$0xff] %v12639_v33  ;;  %16259 = vst [vmem:[#allocation71_spill] sm:$0xff] %v12643_v4 }
 0x2f9   :  { %16252 = vst [vmem:[#allocation256_spill] sm:$0xff] %v12629_v0  ;;  %16253 = vst [vmem:[#allocation67_spill] sm:$0xff] %v12631_v59  ;;  %v16261_v59 = vld [vmem:[#allocation101_spill] sm:$0xff] }
 0x2fa   :  { %3533 = vrot.lane.b32.xlu0 %v12623_v63, %s10483_s0  ;;  %3535 = vrot.lane.b32.xlu1 %v12627_v50, %s10483_s0  ;;  %v12655_v0 = vmax.f32 %v16261_v59, %v11941_v7  ;;  %v16266_v7 = vld [vmem:[#allocation320_spill] sm:$0xff]  ;;  %v16267_v59 = vld [vmem:[#allocation103_spill] sm:$0xff] }
 0x2fc   :  { %v12645_v34 = vpop.permute.xlu0 %2533  ;;  %v12647_v21 = vpop.permute.xlu1 %2535 }
 0x2fd   :  { %16260 = vst [vmem:[#allocation277_spill] sm:$0xff] %v12647_v21  ;;  %v12675_v21 = vmax.f32 %v16267_v59, %v16266_v7 }
 0x2fe   :  { %3537 = vrot.lane.b32.xlu0 %v12639_v33, %s10483_s0  ;;  %3539 = vrot.lane.b32.xlu1 %v12643_v4, %s10483_s0  ;;  %v16265_v4 = vld [vmem:[#allocation99_spill] sm:$0xff] }
 0x2ff   :  { %v12671_v33 = vmax.f32 %v16265_v4, %v11923_v52  ;;  %v16271_v52 = vld [vmem:[#allocation113_spill] sm:$0xff] }
 0x300   :  { %v12661_v32 = vpop.permute.xlu0 %2757  ;;  %v12663_v48 = vpop.permute.xlu1 %2759  ;;  %v12691_v4 = vmax.f32 %v16271_v52, %v11975_v14 }
 0x301   :  { %16263 = vst [vmem:[#allocation77_spill] sm:$0xff] %v12661_v32  ;;  %16264 = vst [vmem:[#allocation278_spill] sm:$0xff] %v12663_v48  ;;  %v16270_v48 = vld [vmem:[#allocation109_spill] sm:$0xff] }
 0x302   :  { %3541 = vrot.lane.b32.xlu0 %v12655_v0, %s10483_s0  ;;  %3543 = vrot.lane.b32.xlu1 %v12659_v42, %s10483_s0  ;;  %v12687_v32 = vmax.f32 %v16270_v48, %v11973_v13  ;;  %16272 = vst [vmem:[#allocation75_spill] sm:$0xff] %v12691_v4  ;;  %v16277_v13 = vld [vmem:[#allocation111_spill] sm:$0xff] }
 0x303   :  { %v12707_v48 = vmax.f32 %v16277_v13, %v11959_v1 }
 0x304   :  { %v12677_v44 = vpop.permute.xlu0 %2545  ;;  %v12679_v28 = vpop.permute.xlu1 %2547 }
 0x305   :  { %16268 = vst [vmem:[#allocation81_spill] sm:$0xff] %v12677_v44  ;;  %16269 = vst [vmem:[#allocation272_spill] sm:$0xff] %v12679_v28  ;;  %v16275_v28 = vld [vmem:[#allocation107_spill] sm:$0xff] }
 0x306   :  { %3545 = vrot.lane.b32.xlu0 %v12671_v33, %s10483_s0  ;;  %3547 = vrot.lane.b32.xlu1 %v12675_v21, %s10483_s0  ;;  %v12703_v44 = vmax.f32 %v16275_v28, %v11957_v15  ;;  %16278 = vst [vmem:[#allocation85_spill] sm:$0xff] %v12707_v48  ;;  %v16281_v15 = vld [vmem:[#allocation123_spill] sm:$0xff] }
 0x307   :  { %v12723_v28 = vmax.f32 %v16281_v15, %v12007_v55  ;;  %v12744_v55 = vld [vmem:[%s15399_s2] ss:$0 sm:$0xff] }
 0x308   :  { %v12693_v7 = vpop.permute.xlu0 %2769  ;;  %v12695_v59 = vpop.permute.xlu1 %2771  ;;  %16276 = vst [vmem:[#allocation293_spill] sm:$0xff] %v12703_v44 }
 0x309   :  { %16273 = vst [vmem:[#allocation273_spill] sm:$0xff] %v12693_v7  ;;  %16274 = vst [vmem:[#allocation79_spill] sm:$0xff] %v12695_v59  ;;  %v16279_v59 = vld [vmem:[#allocation117_spill] sm:$0xff] }
 0x30a   :  { %3549 = vrot.lane.b32.xlu0 %v12687_v32, %s10483_s0  ;;  %3551 = vrot.lane.b32.xlu1 %v12691_v4, %s10483_s0  ;;  %v12719_v7 = vmax.f32 %v16279_v59, %v12005_v23  ;;  %16282 = vst [vmem:[#allocation89_spill] sm:$0xff] %v12723_v28  ;;  %v16287_v23 = vld [vmem:[#allocation119_spill] sm:$0xff] }
 0x30b   :  { %v12739_v59 = vmax.f32 %v16287_v23, %v11991_v11 }
 0x30c   :  { %v12709_v14 = vpop.permute.xlu0 %2541  ;;  %v12711_v52 = vpop.permute.xlu1 %2543  ;;  %16280 = vst [vmem:[#allocation294_spill] sm:$0xff] %v12719_v7 }
 0x30d   :  { %16288 = vst [vmem:[#allocation87_spill] sm:$0xff] %v12739_v59 }
 0x30e   :  { %3553 = vrot.lane.b32.xlu0 %v12703_v44, %s10483_s0  ;;  %3555 = vrot.lane.b32.xlu1 %v12707_v48, %s10483_s0  ;;  %v16285_v48 = vld [vmem:[#allocation115_spill] sm:$0xff] }
 0x30f   :  { %v12735_v44 = vmax.f32 %v16285_v48, %v11989_v47  ;;  %v16289_v48 = vld [vmem:[#allocation129_spill] sm:$0xff] }
 0x310   :  { %v12725_v1 = vpop.permute.xlu0 %2765  ;;  %v12727_v13 = vpop.permute.xlu1 %2767  ;;  %v12756_v23 = vmax.f32 %v16289_v48, %v12037_v39 }
 0x311   :  { %16283 = vst [vmem:[#allocation288_spill] sm:$0xff] %v12725_v1  ;;  %16284 = vst [vmem:[#allocation83_spill] sm:$0xff] %v12727_v13 }
 0x312   :  { %3557 = vrot.lane.b32.xlu0 %v12719_v7, %s10483_s0  ;;  %3559 = vrot.lane.b32.xlu1 %v12723_v28, %s10483_s0  ;;  %16286 = vst [vmem:[#allocation289_spill] sm:$0xff] %v12735_v44  ;;  %v16290_v28 = vld [vmem:[#allocation135_spill] sm:$0xff] }
 0x313   :  { %v12760_v4 = vmax.f32 %v16290_v28, %v12039_v5  ;;  %v16292_v28 = vld [vmem:[#allocation127_spill] sm:$0xff] }
 0x314   :  { %v3446_v15 = vpop.permute.xlu0 %3445  ;;  %v3448_v13 = vpop.permute.xlu1 %3447 }
 0x315   :  { %v4117_v1 = vmax.f32 %v12255_v56, %v3446_v15  ;;  %v4118_v7 = vmax.f32 %v12259_v38, %v3448_v13  ;;  %16291 = vst [vmem:[#allocation309_spill] sm:$0xff] %v12760_v4 }
 0x316   :  { %3561 = vrot.lane.b32.xlu0 %v12735_v44, %s10483_s0  ;;  %3563 = vrot.lane.b32.xlu1 %v12739_v59, %s10483_s0 }
 0x317   :  { %v4348_v11 = vadd.f32 %v12744_v55, %v4117_v1  ;;  %v4349_v47 = vadd.f32 %v12744_v55, %v4118_v7  ;;  %v12772_v1 = vmax.f32 %v16292_v28, %v12021_v18 }
 0x318   :  { %v3450_v56 = vpop.permute.xlu0 %3449  ;;  %v3452_v38 = vpop.permute.xlu1 %3451 }
 0x319   :  { %v4572_v13 = vmax.f32 %v4348_v11, 0.0  ;;  %v4573_v15 = vmax.f32 %v4349_v47, 0.0  ;;  %v4119_v44 = vmax.f32 %v12271_v58, %v3450_v56  ;;  %v4120_v59 = vmax.f32 %v12275_v29, %v3452_v38  ;;  %v16293_v11 = vld [vmem:[#allocation131_spill] sm:$0xff] }
 0x31a   :  { %3565 = vrot.lane.b32.xlu0 %v12756_v23, %s10483_s0  ;;  %3567 = vrot.lane.b32.xlu1 %v12760_v4, %s10483_s0  ;;  %v12776_v58 = vmax.f32 %v16293_v11, %v12023_v2 }
 0x31b   :  { %v4796_v39 = vpack.c.bf16 %v4573_v15, %v4572_v13  ;;  %v4350_v7 = vadd.f32 %v12744_v55, %v4119_v44  ;;  %v4351_v5 = vadd.f32 %v12744_v55, %v4120_v59  ;;  %v16294_v44 = vld [vmem:[#allocation141_spill] sm:$0xff]  ;;  %v16295_v15 = vld [vmem:[#allocation147_spill] sm:$0xff] }
 0x31c   :  { %v3454_v29 = vpop.permute.xlu0 %3453  ;;  %v3456_v47 = vpop.permute.xlu1 %3455  ;;  %v12788_v59 = vmax.f32 %v16294_v44, %v12069_v22 }
 0x31d   :  { %v4927_v48 = vrot.slane %v4796_v39, 4  ;;  %v4574_v56 = vmax.f32 %v4350_v7, 0.0  ;;  %v4575_v38 = vmax.f32 %v4351_v5, 0.0  ;;  %v4121_v4 = vmax.f32 %v12287_v54, %v3454_v29 }
 0x31e   :  { %v4122_v13 = vmax.f32 %v12291_v6, %v3456_v47  ;;  %3569 = vrot.lane.b32.xlu0 %v12772_v1, %s10483_s0  ;;  %3571 = vrot.lane.b32.xlu1 %v12776_v58, %s10483_s0  ;;  %v12792_v54 = vmax.f32 %v16295_v15, %v12071_v27 }
 0x31f   :  { %4970 = vst.msk [vmem:[#allocation2 + $0x8] sm:$0xf0] %vm4969_vm4, %v4927_v48  ;;  %v4797_v18 = vpack.c.bf16 %v4575_v38, %v4574_v56  ;;  %v4352_v2 = vadd.f32 %v12744_v55, %v4121_v4  ;;  %v16296_v56 = vld [vmem:[#allocation139_spill] sm:$0xff] }
 0x320   :  { %v4353_v6 = vadd.f32 %v12744_v55, %v4122_v13  ;;  %v3458_v39 = vpop.permute.xlu0 %3457  ;;  %v3460_v7 = vpop.permute.xlu1 %3459  ;;  %v12806_v38 = vmax.f32 %v16296_v56, %v12053_v26 }
 0x321   :  { %v4928_v5 = vrot.slane %v4797_v18, 4  ;;  %v4576_v28 = vmax.f32 %v4352_v2, 0.0  ;;  %v4123_v11 = vmax.f32 %v12303_v30, %v3458_v39  ;;  %v4124_v29 = vmax.f32 %v12307_v45, %v3460_v7  ;;  %v16297_v30 = vld [vmem:[#allocation143_spill] sm:$0xff] }
 0x322   :  { %v4577_v4 = vmax.f32 %v4353_v6, 0.0  ;;  %3573 = vrot.lane.b32.xlu0 %v12788_v59, %s10483_s0  ;;  %3575 = vrot.lane.b32.xlu1 %v12792_v54, %s10483_s0  ;;  %v12810_v45 = vmax.f32 %v16297_v30, %v12055_v57 }
 0x323   :  { %v4929_v27 = vsel %vm4926_vm6, %v4927_v48, %v4928_v5  ;;  %v4354_v22 = vadd.f32 %v12744_v55, %v4123_v11  ;;  %v4355_v47 = vadd.f32 %v12744_v55, %v4124_v29 }
 0x324   :  { %4971 = vst.msk [vmem:[#allocation2 + $0x10] sm:$0xff] %vm4908_vm3, %v4929_v27  ;;  %v4798_v13 = vpack.c.bf16 %v4577_v4, %v4576_v28  ;;  %v3462_v18 = vpop.permute.xlu0 %3461  ;;  %v3464_v2 = vpop.permute.xlu1 %3463  ;;  %v16298_v28 = vld [vmem:[#allocation154_spill] sm:$0xff] }
 0x325   :  { %v4578_v44 = vmax.f32 %v4354_v22, 0.0  ;;  %v4579_v15 = vmax.f32 %v4355_v47, 0.0  ;;  %v4125_v48 = vmax.f32 %v12319_v46, %v3462_v18  ;;  %v4126_v6 = vmax.f32 %v12323_v51, %v3464_v2  ;;  %v16299_v46 = vld [vmem:[#allocation158_spill] sm:$0xff]  ;;  %v16300_v18 = vld [vmem:[#allocation153_spill] sm:$0xff] }
 0x326   :  { %v4930_v39 = vrot.slane %v4798_v13, 4  ;;  %3577 = vrot.lane.b32.xlu0 %v12806_v38, %s10483_s0  ;;  %3579 = vrot.lane.b32.xlu1 %v12810_v45, %s10483_s0  ;;  %v12823_v11 = vmax.f32 %v16298_v28, %v12101_v41  ;;  %v12827_v29 = vmax.f32 %v16299_v46, %v12103_v17  ;;  %v12841_v2 = vmax.f32 %v16300_v18, %v12085_v40  ;;  %v16302_v46 = vld [vmem:[#allocation170_spill] sm:$0xff] }
 0x327   :  { %v4799_v57 = vpack.c.bf16 %v4579_v15, %v4578_v44  ;;  %v4356_v26 = vadd.f32 %v12744_v55, %v4125_v48  ;;  %v4357_v7 = vadd.f32 %v12744_v55, %v4126_v6  ;;  %v16301_v44 = vld [vmem:[#allocation155_spill] sm:$0xff] }
 0x328   :  { %v4931_v51 = vsel %vm4926_vm6, %v4928_v5, %v4930_v39  ;;  %v3466_v4 = vpop.permute.xlu0 %3465  ;;  %v3468_v27 = vpop.permute.xlu1 %3467 }
 0x329   :  { %4972 = vst.msk [vmem:[#allocation2 + $0x18] sm:$0xff] %vm4908_vm3, %v4931_v51  ;;  %v4932_v22 = vrot.slane %v4799_v57, 4  ;;  %v4580_v47 = vmax.f32 %v4356_v26, 0.0  ;;  %v4581_v56 = vmax.f32 %v4357_v7, 0.0  ;;  %v4127_v30 = vmax.f32 %v12335_v12, %v3466_v4 }
 0x32a   :  { %v4128_v13 = vmax.f32 %v12339_v53, %v3468_v27  ;;  %3581 = vrot.lane.b32.xlu0 %v12823_v11, %s10483_s0  ;;  %3583 = vrot.lane.b32.xlu1 %v12827_v29, %s10483_s0  ;;  %v12845_v12 = vmax.f32 %v16301_v44, %v12087_v25  ;;  %v12860_v51 = vmax.f32 %v16302_v46, %v12133_v35 }
 0x32b   :  { %v4933_v41 = vsel %vm4926_vm6, %v4930_v39, %v4932_v22  ;;  %v4800_v17 = vpack.c.bf16 %v4581_v56, %v4580_v47  ;;  %v4358_v5 = vadd.f32 %v12744_v55, %v4127_v30 }
 0x32c   :  { %4973 = vst.msk [vmem:[#allocation2 + $0x20] sm:$0xff] %vm4908_vm3, %v4933_v41  ;;  %v4359_v53 = vadd.f32 %v12744_v55, %v4128_v13  ;;  %v3470_v15 = vpop.permute.xlu0 %3469  ;;  %v3472_v48 = vpop.permute.xlu1 %3471 }
 0x32d   :  { %v4934_v6 = vrot.slane %v4800_v17, 4  ;;  %v4582_v57 = vmax.f32 %v4358_v5, 0.0  ;;  %v4129_v39 = vmax.f32 %v12351_v8, %v3470_v15  ;;  %v4130_v26 = vmax.f32 %v12355_v20, %v3472_v48  ;;  %v16303_v8 = vld [vmem:[#allocation174_spill] sm:$0xff]  ;;  %v16304_v5 = vld [vmem:[#allocation169_spill] sm:$0xff] }
 0x32e   :  { %v4583_v7 = vmax.f32 %v4359_v53, 0.0  ;;  %3585 = vrot.lane.b32.xlu0 %v12841_v2, %s10483_s0  ;;  %3587 = vrot.lane.b32.xlu1 %v12845_v12, %s10483_s0  ;;  %v12864_v20 = vmax.f32 %v16303_v8, %v12135_v31  ;;  %v12877_v18 = vmax.f32 %v16304_v5, %v12117_v60 }
 0x32f   :  { %v4935_v25 = vsel %vm4926_vm6, %v4932_v22, %v4934_v6  ;;  %v4360_v40 = vadd.f32 %v12744_v55, %v4129_v39  ;;  %v4361_v28 = vadd.f32 %v12744_v55, %v4130_v26 }
 0x330   :  { %4974 = vst.msk [vmem:[#allocation2 + $0x28] sm:$0xff] %vm4908_vm3, %v4935_v25  ;;  %v4801_v4 = vpack.c.bf16 %v4583_v7, %v4582_v57  ;;  %v3474_v27 = vpop.permute.xlu0 %3473  ;;  %v3476_v47 = vpop.permute.xlu1 %3475  ;;  %v12895_v25 = vmax.f32 %v11519_v10, %v12165_v24  ;;  %v16306_v24 = vld [vmem:[#allocation185_spill] sm:$0xff] }
 0x331   :  { %v4584_v56 = vmax.f32 %v4360_v40, 0.0  ;;  %v4585_v30 = vmax.f32 %v4361_v28, 0.0  ;;  %v4131_v22 = vmax.f32 %v12367_v3, %v3474_v27  ;;  %v4132_v13 = vmax.f32 %v12371_v61, %v3476_v47  ;;  %v16305_v3 = vld [vmem:[#allocation171_spill] sm:$0xff] }
 0x332   :  { %v4936_v41 = vrot.slane %v4801_v4, 4  ;;  %3589 = vrot.lane.b32.xlu0 %v12860_v51, %s10483_s0  ;;  %3591 = vrot.lane.b32.xlu1 %v12864_v20, %s10483_s0  ;;  %v12881_v44 = vmax.f32 %v16305_v3, %v12119_v49  ;;  %v16310_v3 = vld [vmem:[#allocation19_spill] sm:$0xff] }
 0x333   :  { %v4802_v31 = vpack.c.bf16 %v4585_v30, %v4584_v56  ;;  %v4362_v35 = vadd.f32 %v12744_v55, %v4131_v22  ;;  %v4363_v17 = vadd.f32 %v12744_v55, %v4132_v13  ;;  %v12914_v56 = vmax.f32 %v16306_v24, %v12149_v37  ;;  %v16308_v30 = vld [vmem:[#allocation186_spill] sm:$0xff] }
 0x334   :  { %v4937_v61 = vsel %vm4926_vm6, %v4934_v6, %v4936_v41  ;;  %v3478_v53 = vpop.permute.xlu0 %3477  ;;  %v3480_v15 = vpop.permute.xlu1 %3479 }
 0x335   :  { %4975 = vst.msk [vmem:[#allocation2 + $0x30] sm:$0xff] %vm4908_vm3, %v4937_v61  ;;  %v4938_v48 = vrot.slane %v4802_v31, 4  ;;  %v4586_v57 = vmax.f32 %v4362_v35, 0.0  ;;  %v4587_v39 = vmax.f32 %v4363_v17, 0.0  ;;  %v4133_v26 = vmax.f32 %v12383_v43, %v3478_v53  ;;  %v16309_v17 = vld [vmem:[#allocation162_spill] sm:$0xff] }
 0x336   :  { %v4134_v7 = vmax.f32 %v12387_v36, %v3480_v15  ;;  %3593 = vrot.lane.b32.xlu0 %v12877_v18, %s10483_s0  ;;  %3595 = vrot.lane.b32.xlu1 %v12881_v44, %s10483_s0  ;;  %v12899_v43 = vmax.f32 %v11527_v9, %v12167_v62 }
 0x337   :  { %v4939_v49 = vsel %vm4926_vm6, %v4936_v41, %v4938_v48  ;;  %v4803_v60 = vpack.c.bf16 %v4587_v39, %v4586_v57  ;;  %v4364_v6 = vadd.f32 %v12744_v55, %v4133_v26  ;;  %v16311_v57 = vld [vmem:[#allocation359_spill] sm:$0xff]  ;;  %v16312_v39 = vld [vmem:[#allocation200_spill] sm:$0xff] }
 0x338   :  { %4976 = vst.msk [vmem:[#allocation2 + $0x38] sm:$0xff] %vm4908_vm3, %v4939_v49  ;;  %v4365_v36 = vadd.f32 %v12744_v55, %v4134_v7  ;;  %v3482_v40 = vpop.permute.xlu0 %3481  ;;  %v3484_v28 = vpop.permute.xlu1 %3483  ;;  %v12931_v26 = vmax.f32 %v16312_v39, %v16311_v57  ;;  %v16313_v7 = vld [vmem:[#allocation360_spill] sm:$0xff] }
 0x339   :  { %v4940_v46 = vrot.slane %v4803_v60, 4  ;;  %v4588_v8 = vmax.f32 %v4364_v6, 0.0  ;;  %v4135_v4 = vmax.f32 %v12399_v16, %v3482_v40  ;;  %v4136_v27 = vmax.f32 %v12403_v19, %v3484_v28  ;;  %v16307_v16 = vld [vmem:[#allocation350_spill] sm:$0xff]  ;;  %v16314_v49 = vld [vmem:[#allocation204_spill] sm:$0xff] }
 0x33a   :  { %v4589_v47 = vmax.f32 %v4365_v36, 0.0  ;;  %3597 = vrot.lane.b32.xlu0 %v12895_v25, %s10483_s0  ;;  %3599 = vrot.lane.b32.xlu1 %v12899_v43, %s10483_s0  ;;  %v12918_v19 = vmax.f32 %v16308_v30, %v16307_v16  ;;  %v12935_v60 = vmax.f32 %v16314_v49, %v16313_v7  ;;  %v16317_v16 = vld [vmem:[#allocation355_spill] sm:$0xff] }
 0x33b   :  { %v4941_v62 = vsel %vm4926_vm6, %v4938_v48, %v4940_v46  ;;  %v4366_v9 = vadd.f32 %v12744_v55, %v4135_v4  ;;  %v4367_v10 = vadd.f32 %v12744_v55, %v4136_v27  ;;  %v16315_v27 = vld [vmem:[#allocation183_spill] sm:$0xff] }
 0x33c   :  { %4977 = vst.msk [vmem:[#allocation2 + $0x40] sm:$0xff] %vm4908_vm3, %v4941_v62  ;;  %v4804_v22 = vpack.c.bf16 %v4589_v47, %v4588_v8  ;;  %v3486_v13 = vpop.permute.xlu0 %3485  ;;  %v3488_v41 = vpop.permute.xlu1 %3487  ;;  %v16316_v62 = vld [vmem:[#allocation29_spill] sm:$0xff]  ;;  %v16318_v30 = vld [vmem:[#allocation199_spill] sm:$0xff] }
 0x33d   :  { %v4590_v31 = vmax.f32 %v4366_v9, 0.0  ;;  %v4591_v35 = vmax.f32 %v4367_v10, 0.0  ;;  %v4137_v5 = vmax.f32 %v16309_v17, %v3486_v13  ;;  %v4138_v61 = vmax.f32 %v16310_v3, %v3488_v41  ;;  %v16319_v13 = vld [vmem:[#allocation356_spill] sm:$0xff]  ;;  %v16320_v41 = vld [vmem:[#allocation201_spill] sm:$0xff] }
 0x33e   :  { %v4942_v53 = vrot.slane %v4804_v22, 4  ;;  %3601 = vrot.lane.b32.xlu0 %v12914_v56, %s10483_s0  ;;  %3603 = vrot.lane.b32.xlu1 %v12918_v19, %s10483_s0  ;;  %v12949_v22 = vmax.f32 %v16318_v30, %v16317_v16  ;;  %v16328_v16 = vld [vmem:[#allocation37_spill] sm:$0xff] }
 0x33f   :  { %v4805_v37 = vpack.c.bf16 %v4591_v35, %v4590_v31  ;;  %v4368_v15 = vadd.f32 %v12744_v55, %v4137_v5  ;;  %v4369_v48 = vadd.f32 %v12744_v55, %v4138_v61  ;;  %v12953_v31 = vmax.f32 %v16320_v41, %v16319_v13 }
 0x340   :  { %v4943_v6 = vsel %vm4926_vm6, %v4940_v46, %v4942_v53  ;;  %v3490_v36 = vpop.permute.xlu0 %3489  ;;  %v3492_v40 = vpop.permute.xlu1 %3491 }
 0x341   :  { %4978 = vst.msk [vmem:[#allocation2 + $0x48] sm:$0xff] %vm4908_vm3, %v4943_v6  ;;  %v4944_v28 = vrot.slane %v4805_v37, 4  ;;  %v4592_v8 = vmax.f32 %v4368_v15, 0.0  ;;  %v4593_v4 = vmax.f32 %v4369_v48, 0.0  ;;  %v4139_v47 = vmax.f32 %v16315_v27, %v3490_v36  ;;  %v16322_v15 = vld [vmem:[#allocation27_spill] sm:$0xff]  ;;  %v16323_v6 = vld [vmem:[#allocation126_spill] sm:$0xff] }
 0x342   :  { %v4140_v9 = vmax.f32 %v16316_v62, %v3492_v40  ;;  %3605 = vrot.lane.b32.xlu0 %v12931_v26, %s10483_s0  ;;  %3607 = vrot.lane.b32.xlu1 %v12935_v60, %s10483_s0  ;;  %v16324_v36 = vld [vmem:[#allocation216_spill] sm:$0xff] }
 0x343   :  { %v4945_v10 = vsel %vm4926_vm6, %v4942_v53, %v4944_v28  ;;  %v4806_v46 = vpack.c.bf16 %v4593_v4, %v4592_v8  ;;  %v4370_v24 = vadd.f32 %v12744_v55, %v4139_v47  ;;  %v16321_v53 = vld [vmem:[#allocation178_spill] sm:$0xff]  ;;  %v12968_v40 = vmax.f32 %v16324_v36, %v16323_v6  ;;  %v16325_v8 = vld [vmem:[#allocation7_spill] sm:$0xff]  ;;  %v16326_v4 = vld [vmem:[#allocation220_spill] sm:$0xff] }
 0x344   :  { %4979 = vst.msk [vmem:[#allocation2 + $0x50] sm:$0xff] %vm4908_vm3, %v4945_v10  ;;  %v4371_v35 = vadd.f32 %v12744_v55, %v4140_v9  ;;  %v3494_v17 = vpop.permute.xlu0 %3493  ;;  %v3496_v5 = vpop.permute.xlu1 %3495  ;;  %v12972_v27 = vmax.f32 %v16326_v4, %v16325_v8  ;;  %v16333_v8 = vld [vmem:[#allocation192_spill] sm:$0xff] }
 0x345   :  { %v4946_v3 = vrot.slane %v4806_v46, 4  ;;  %v4594_v61 = vmax.f32 %v4370_v24, 0.0  ;;  %v4141_v37 = vmax.f32 %v16321_v53, %v3494_v17  ;;  %v4142_v48 = vmax.f32 %v16322_v15, %v3496_v5  ;;  %v16329_v5 = vld [vmem:[#allocation138_spill] sm:$0xff]  ;;  %v16332_v15 = vld [vmem:[#allocation217_spill] sm:$0xff] }
 0x346   :  { %v4595_v57 = vmax.f32 %v4371_v35, 0.0  ;;  %3609 = vrot.lane.b32.xlu0 %v12949_v22, %s10483_s0  ;;  %3611 = vrot.lane.b32.xlu1 %v12953_v31, %s10483_s0 }
 0x347   :  { %v4947_v39 = vsel %vm4926_vm6, %v4944_v28, %v4946_v3  ;;  %v4372_v7 = vadd.f32 %v12744_v55, %v4141_v37  ;;  %v4373_v49 = vadd.f32 %v12744_v55, %v4142_v48  ;;  %v16327_v28 = vld [vmem:[#allocation197_spill] sm:$0xff] }
 0x348   :  { %4980 = vst.msk [vmem:[#allocation2 + $0x58] sm:$0xff] %vm4908_vm3, %v4947_v39  ;;  %v4807_v47 = vpack.c.bf16 %v4595_v57, %v4594_v61  ;;  %v3498_v62 = vpop.permute.xlu0 %3497  ;;  %v3500_v9 = vpop.permute.xlu1 %3499  ;;  %v16330_v61 = vld [vmem:[#allocation215_spill] sm:$0xff]  ;;  %v16331_v37 = vld [vmem:[#allocation9_spill] sm:$0xff] }
 0x349   :  { %v4596_v10 = vmax.f32 %v4372_v7, 0.0  ;;  %v4597_v46 = vmax.f32 %v4373_v49, 0.0  ;;  %v4143_v24 = vmax.f32 %v16327_v28, %v3498_v62  ;;  %v4144_v30 = vmax.f32 %v16328_v16, %v3500_v9  ;;  %v16336_v28 = vld [vmem:[#allocation232_spill] sm:$0xff]  ;;  %v16337_v16 = vld [vmem:[#allocation15_spill] sm:$0xff] }
 0x34a   :  { %v4948_v13 = vrot.slane %v4807_v47, 4  ;;  %3613 = vrot.lane.b32.xlu0 %v12968_v40, %s10483_s0  ;;  %3615 = vrot.lane.b32.xlu1 %v12972_v27, %s10483_s0  ;;  %v12985_v53 = vmax.f32 %v16330_v61, %v16329_v5  ;;  %v12989_v48 = vmax.f32 %v16332_v15, %v16331_v37  ;;  %v16334_v47 = vld [vmem:[#allocation35_spill] sm:$0xff] }
 0x34b   :  { %v4808_v41 = vpack.c.bf16 %v4597_v46, %v4596_v10  ;;  %v4374_v35 = vadd.f32 %v12744_v55, %v4143_v24  ;;  %v4375_v17 = vadd.f32 %v12744_v55, %v4144_v30  ;;  %v16335_v46 = vld [vmem:[#allocation146_spill] sm:$0xff]  ;;  %v16338_v30 = vld [vmem:[#allocation236_spill] sm:$0xff] }
 0x34c   :  { %v4949_v57 = vsel %vm4926_vm6, %v4946_v3, %v4948_v13  ;;  %v3502_v39 = vpop.permute.xlu0 %3501  ;;  %v3504_v7 = vpop.permute.xlu1 %3503  ;;  %v13003_v24 = vmax.f32 %v16336_v28, %v16335_v46 }
 0x34d   :  { %4981 = vst.msk [vmem:[#allocation2 + $0x60] sm:$0xff] %vm4908_vm3, %v4949_v57  ;;  %v4950_v49 = vrot.slane %v4808_v41, 4  ;;  %v4598_v6 = vmax.f32 %v4374_v35, 0.0  ;;  %v4599_v36 = vmax.f32 %v4375_v17, 0.0  ;;  %v4145_v4 = vmax.f32 %v16333_v8, %v3502_v39  ;;  %v16340_v57 = vld [vmem:[#allocation45_spill] sm:$0xff] }
 0x34e   :  { %v4146_v62 = vmax.f32 %v16334_v47, %v3504_v7  ;;  %3617 = vrot.lane.b32.xlu0 %v12985_v53, %s10483_s0  ;;  %3619 = vrot.lane.b32.xlu1 %v12989_v48, %s10483_s0  ;;  %v13007_v41 = vmax.f32 %v16338_v30, %v16337_v16  ;;  %v16342_v47 = vld [vmem:[#allocation231_spill] sm:$0xff] }
 0x34f   :  { %v4951_v9 = vsel %vm4926_vm6, %v4948_v13, %v4950_v49  ;;  %v4809_v3 = vpack.c.bf16 %v4599_v36, %v4598_v6  ;;  %v4376_v10 = vadd.f32 %v12744_v55, %v4145_v4  ;;  %v16339_v13 = vld [vmem:[#allocation213_spill] sm:$0xff]  ;;  %v16341_v4 = vld [vmem:[#allocation152_spill] sm:$0xff] }
 0x350   :  { %4982 = vst.msk [vmem:[#allocation2 + $0x68] sm:$0xff] %vm4908_vm3, %v4951_v9  ;;  %v4377_v35 = vadd.f32 %v12744_v55, %v4146_v62  ;;  %v3506_v17 = vpop.permute.xlu0 %3505  ;;  %v3508_v5 = vpop.permute.xlu1 %3507  ;;  %v13023_v62 = vmax.f32 %v16342_v47, %v16341_v4  ;;  %v16343_v9 = vld [vmem:[#allocation17_spill] sm:$0xff] }
 0x351   :  { %v4952_v61 = vrot.slane %v4809_v3, 4  ;;  %v4600_v37 = vmax.f32 %v4376_v10, 0.0  ;;  %v4147_v15 = vmax.f32 %v16339_v13, %v3506_v17  ;;  %v4148_v39 = vmax.f32 %v16340_v57, %v3508_v5  ;;  %v16344_v3 = vld [vmem:[#allocation233_spill] sm:$0xff]  ;;  %v16346_v5 = vld [vmem:[#allocation43_spill] sm:$0xff] }
 0x352   :  { %v4601_v7 = vmax.f32 %v4377_v35, 0.0  ;;  %3621 = vrot.lane.b32.xlu0 %v13003_v24, %s10483_s0  ;;  %3623 = vrot.lane.b32.xlu1 %v13007_v41, %s10483_s0  ;;  %v13027_v10 = vmax.f32 %v16344_v3, %v16343_v9  ;;  %v16345_v35 = vld [vmem:[#allocation208_spill] sm:$0xff] }
 0x353   :  { %v4953_v6 = vsel %vm4926_vm6, %v4950_v49, %v4952_v61  ;;  %4984 = vst.msk [vmem:[#allocation2 + $0x78] sm:$0xf] %vm4910_vm5, %v4952_v61  ;;  %v4378_v36 = vadd.f32 %v12744_v55, %v4147_v15  ;;  %v4379_v8 = vadd.f32 %v12744_v55, %v4148_v39  ;;  %v16347_v39 = vld [vmem:[#allocation184_spill] sm:$0xff] }
 0x354   :  { %4983 = vst.msk [vmem:[#allocation2 + $0x70] sm:$0xff] %vm4908_vm3, %v4953_v6  ;;  %v4810_v46 = vpack.c.bf16 %v4601_v7, %v4600_v37  ;;  %v3510_v28 = vpop.permute.xlu0 %3509  ;;  %v3512_v16 = vpop.permute.xlu1 %3511  ;;  %v16348_v7 = vld [vmem:[#allocation248_spill] sm:$0xff] }
 0x355   :  { %v4602_v49 = vmax.f32 %v4378_v36, 0.0  ;;  %v4603_v30 = vmax.f32 %v4379_v8, 0.0  ;;  %v4149_v17 = vmax.f32 %v16345_v35, %v3510_v28  ;;  %v4150_v61 = vmax.f32 %v16346_v5, %v3512_v16  ;;  %v16350_v36 = vld [vmem:[#allocation33_spill] sm:$0xff]  ;;  %v16351_v8 = vld [vmem:[#allocation252_spill] sm:$0xff] }
 0x356   :  { %v5004_v13 = vrot.slane %v4810_v46, 4  ;;  %3625 = vrot.lane.b32.xlu0 %v13023_v62, %s10483_s0  ;;  %3627 = vrot.lane.b32.xlu1 %v13027_v10, %s10483_s0  ;;  %v13040_v6 = vmax.f32 %v16348_v7, %v16347_v39  ;;  %v13044_v4 = vmax.f32 %v16351_v8, %v16350_v36  ;;  %v16353_v16 = vld [vmem:[#allocation229_spill] sm:$0xff]  ;;  %v16355_v39 = vld [vmem:[#allocation168_spill] sm:$0xff]  ;;  %v16356_v7 = vld [vmem:[#allocation247_spill] sm:$0xff] }
 0x357   :  { %v4811_v15 = vpack.c.bf16 %v4603_v30, %v4602_v49  ;;  %v4380_v57 = vadd.f32 %v12744_v55, %v4149_v17  ;;  %v4381_v37 = vadd.f32 %v12744_v55, %v4150_v61  ;;  %v16354_v30 = vld [vmem:[#allocation53_spill] sm:$0xff] }
 0x358   :  { %16349 = vst [vmem:[#allocation93_spill] sm:$0xff] %v13040_v6  ;;  %16352 = vst [vmem:[#allocation310_spill] sm:$0xff] %v13044_v4  ;;  %v3514_v47 = vpop.permute.xlu0 %3513  ;;  %v3516_v9 = vpop.permute.xlu1 %3515 }
 0x359   :  { %5046 = vst.msk [vmem:[#allocation2 + $0x90] sm:$0xf0] %vm4969_vm4, %v5004_v13  ;;  %v5005_v3 = vrot.slane %v4811_v15, 4  ;;  %v4604_v46 = vmax.f32 %v4380_v57, 0.0  ;;  %v4605_v28 = vmax.f32 %v4381_v37, 0.0  ;;  %v4151_v49 = vmax.f32 %v16353_v16, %v3514_v47  ;;  %v16358_v57 = vld [vmem:[#allocation25_spill] sm:$0xff] }
 0x35a   :  { %v4152_v35 = vmax.f32 %v16354_v30, %v3516_v9  ;;  %3629 = vrot.lane.b32.xlu0 %v13040_v6, %s10483_s0  ;;  %3631 = vrot.lane.b32.xlu1 %v13044_v4, %s10483_s0  ;;  %v13057_v15 = vmax.f32 %v16356_v7, %v16355_v39  ;;  %v16359_v37 = vld [vmem:[#allocation249_spill] sm:$0xff]  ;;  %v16363_v7 = vld [vmem:[#allocation214_spill] sm:$0xff] }
 0x35b   :  { %v5006_v17 = vsel %vm4926_vm6, %v5004_v13, %v5005_v3  ;;  %v4812_v5 = vpack.c.bf16 %v4605_v28, %v4604_v46  ;;  %v4382_v61 = vadd.f32 %v12744_v55, %v4151_v49  ;;  %v13061_v36 = vmax.f32 %v16359_v37, %v16358_v57  ;;  %v16361_v13 = vld [vmem:[#allocation224_spill] sm:$0xff]  ;;  %v16362_v28 = vld [vmem:[#allocation51_spill] sm:$0xff]  ;;  %v16365_v57 = vld [vmem:[#allocation49_spill] sm:$0xff] }
 0x35c   :  { %16357 = vst [vmem:[#allocation97_spill] sm:$0xff] %v13057_v15  ;;  %5047 = vst.msk [vmem:[#allocation2 + $0x98] sm:$0xff] %vm4908_vm3, %v5006_v17  ;;  %v4383_v8 = vadd.f32 %v12744_v55, %v4152_v35  ;;  %v3518_v47 = vpop.permute.xlu0 %3517  ;;  %v3520_v9 = vpop.permute.xlu1 %3519  ;;  %v16366_v37 = vld [vmem:[#allocation268_spill] sm:$0xff] }
 0x35d   :  { %16360 = vst [vmem:[#allocation304_spill] sm:$0xff] %v13061_v36  ;;  %v5007_v16 = vrot.slane %v4812_v5, 4  ;;  %v4606_v30 = vmax.f32 %v4382_v61, 0.0  ;;  %v4153_v46 = vmax.f32 %v16361_v13, %v3518_v47  ;;  %v4154_v49 = vmax.f32 %v16362_v28, %v3520_v9  ;;  %v16364_v5 = vld [vmem:[#allocation264_spill] sm:$0xff] }
 0x35e   :  { %v4607_v4 = vmax.f32 %v4383_v8, 0.0  ;;  %3633 = vrot.lane.b32.xlu0 %v13057_v15, %s10483_s0  ;;  %3635 = vrot.lane.b32.xlu1 %v13061_v36, %s10483_s0  ;;  %v13076_v61 = vmax.f32 %v16364_v5, %v16363_v7  ;;  %v13080_v47 = vmax.f32 %v16366_v37, %v16365_v57  ;;  %v16374_v57 = vld [vmem:[#allocation265_spill] sm:$0xff] }
 0x35f   :  { %v5008_v39 = vsel %vm4926_vm6, %v5005_v3, %v5007_v16  ;;  %v4384_v17 = vadd.f32 %v12744_v55, %v4153_v46  ;;  %v4385_v35 = vadd.f32 %v12744_v55, %v4154_v49  ;;  %v16368_v3 = vld [vmem:[#allocation245_spill] sm:$0xff] }
 0x360   :  { %16367 = vst [vmem:[#allocation91_spill] sm:$0xff] %v13080_v47  ;;  %5048 = vst.msk [vmem:[#allocation2 + $0xa0] sm:$0xff] %vm4908_vm3, %v5008_v39  ;;  %v4813_v8 = vpack.c.bf16 %v4607_v4, %v4606_v30  ;;  %v3522_v9 = vpop.permute.xlu0 %3521  ;;  %v3524_v13 = vpop.permute.xlu1 %3523  ;;  %v16369_v46 = vld [vmem:[#allocation61_spill] sm:$0xff]  ;;  %v16370_v30 = vld [vmem:[#allocation198_spill] sm:$0xff] }
 0x361   :  { %v4608_v28 = vmax.f32 %v4384_v17, 0.0  ;;  %v4609_v36 = vmax.f32 %v4385_v35, 0.0  ;;  %v4155_v15 = vmax.f32 %v16368_v3, %v3522_v9  ;;  %v4156_v6 = vmax.f32 %v16369_v46, %v3524_v13  ;;  %v16371_v39 = vld [vmem:[#allocation263_spill] sm:$0xff]  ;;  %v16373_v35 = vld [vmem:[#allocation41_spill] sm:$0xff] }
 0x362   :  { %v5009_v49 = vrot.slane %v4813_v8, 4  ;;  %3637 = vrot.lane.b32.xlu0 %v13076_v61, %s10483_s0  ;;  %3639 = vrot.lane.b32.xlu1 %v13080_v47, %s10483_s0  ;;  %v13093_v17 = vmax.f32 %v16371_v39, %v16370_v30  ;;  %v13097_v37 = vmax.f32 %v16374_v57, %v16373_v35  ;;  %v16378_v35 = vld [vmem:[#allocation246_spill] sm:$0xff]  ;;  %v16379_v57 = vld [vmem:[#allocation280_spill] sm:$0xff] }
 0x363   :  { %v4814_v7 = vpack.c.bf16 %v4609_v36, %v4608_v28  ;;  %v4386_v5 = vadd.f32 %v12744_v55, %v4155_v15  ;;  %v4387_v4 = vadd.f32 %v12744_v55, %v4156_v6  ;;  %v16376_v15 = vld [vmem:[#allocation240_spill] sm:$0xff]  ;;  %v16377_v6 = vld [vmem:[#allocation59_spill] sm:$0xff] }
 0x364   :  { %16372 = vst [vmem:[#allocation305_spill] sm:$0xff] %v13093_v17  ;;  %16375 = vst [vmem:[#allocation95_spill] sm:$0xff] %v13097_v37  ;;  %v5010_v8 = vsel %vm4926_vm6, %v5007_v16, %v5009_v49  ;;  %v3526_v9 = vpop.permute.xlu0 %3525  ;;  %v3528_v13 = vpop.permute.xlu1 %3527 }
 0x365   :  { %5049 = vst.msk [vmem:[#allocation2 + $0xa8] sm:$0xff] %vm4908_vm3, %v5010_v8  ;;  %v5011_v3 = vrot.slane %v4814_v7, 4  ;;  %v4610_v36 = vmax.f32 %v4386_v5, 0.0  ;;  %v4611_v28 = vmax.f32 %v4387_v4, 0.0  ;;  %v4157_v46 = vmax.f32 %v16376_v15, %v3526_v9  ;;  %v16380_v5 = vld [vmem:[#allocation65_spill] sm:$0xff]  ;;  %v16381_v4 = vld [vmem:[#allocation284_spill] sm:$0xff] }
 0x366   :  { %v4158_v47 = vmax.f32 %v16377_v6, %v3528_v13  ;;  %3641 = vrot.lane.b32.xlu0 %v13093_v17, %s10483_s0  ;;  %3643 = vrot.lane.b32.xlu1 %v13097_v37, %s10483_s0  ;;  %v13111_v7 = vmax.f32 %v16379_v57, %v16378_v35  ;;  %v13115_v8 = vmax.f32 %v16381_v4, %v16380_v5  ;;  %v16385_v57 = vld [vmem:[#allocation230_spill] sm:$0xff]  ;;  %v16387_v5 = vld [vmem:[#allocation57_spill] sm:$0xff] }
 0x367   :  { %v5012_v30 = vsel %vm4926_vm6, %v5009_v49, %v5011_v3  ;;  %v4815_v16 = vpack.c.bf16 %v4611_v28, %v4610_v36  ;;  %v4388_v39 = vadd.f32 %v12744_v55, %v4157_v46  ;;  %v16383_v49 = vld [vmem:[#allocation261_spill] sm:$0xff] }
 0x368   :  { %16382 = vst [vmem:[#allocation101_spill] sm:$0xff] %v13115_v8  ;;  %5050 = vst.msk [vmem:[#allocation2 + $0xb0] sm:$0xff] %vm4908_vm3, %v5012_v30  ;;  %v4389_v9 = vadd.f32 %v12744_v55, %v4158_v47  ;;  %v3530_v13 = vpop.permute.xlu0 %3529  ;;  %v3532_v15 = vpop.permute.xlu1 %3531  ;;  %v16384_v28 = vld [vmem:[#allocation69_spill] sm:$0xff] }
 0x369   :  { %v5013_v6 = vrot.slane %v4815_v16, 4  ;;  %v4612_v37 = vmax.f32 %v4388_v39, 0.0  ;;  %v4159_v36 = vmax.f32 %v16383_v49, %v3530_v13  ;;  %v4160_v46 = vmax.f32 %v16384_v28, %v3532_v15  ;;  %v16386_v16 = vld [vmem:[#allocation279_spill] sm:$0xff]  ;;  %v16388_v4 = vld [vmem:[#allocation281_spill] sm:$0xff] }
 0x36a   :  { %v4613_v17 = vmax.f32 %v4389_v9, 0.0  ;;  %3645 = vrot.lane.b32.xlu0 %v13111_v7, %s10483_s0  ;;  %3647 = vrot.lane.b32.xlu1 %v13115_v8, %s10483_s0  ;;  %v13130_v39 = vmax.f32 %v16386_v16, %v16385_v57  ;;  %v13134_v13 = vmax.f32 %v16388_v4, %v16387_v5 }
 0x36b   :  { %v5014_v35 = vsel %vm4926_vm6, %v5011_v3, %v5013_v6  ;;  %v4390_v30 = vadd.f32 %v12744_v55, %v4159_v36  ;;  %v4391_v47 = vadd.f32 %v12744_v55, %v4160_v46 }
 0x36c   :  { %5051 = vst.msk [vmem:[#allocation2 + $0xb8] sm:$0xff] %vm4908_vm3, %v5014_v35  ;;  %v4816_v9 = vpack.c.bf16 %v4613_v17, %v4612_v37  ;;  %v3534_v15 = vpop.permute.xlu0 %3533  ;;  %v3536_v49 = vpop.permute.xlu1 %3535  ;;  %v16389_v37 = vld [vmem:[#allocation296_spill] sm:$0xff] }
 0x36d   :  { %v4614_v28 = vmax.f32 %v4390_v30, 0.0  ;;  %v4615_v8 = vmax.f32 %v4391_v47, 0.0  ;;  %v4161_v3 = vmax.f32 %v12623_v63, %v3534_v15  ;;  %v4162_v36 = vmax.f32 %v12627_v50, %v3536_v49  ;;  %v16390_v30 = vld [vmem:[#allocation277_spill] sm:$0xff]  ;;  %v16391_v63 = vld [vmem:[#allocation300_spill] sm:$0xff] }
 0x36e   :  { %v5015_v46 = vrot.slane %v4816_v9, 4  ;;  %3649 = vrot.lane.b32.xlu0 %v13130_v39, %s10483_s0  ;;  %3651 = vrot.lane.b32.xlu1 %v13134_v13, %s10483_s0  ;;  %v13147_v35 = vmax.f32 %v16389_v37, %v12645_v34  ;;  %v13151_v47 = vmax.f32 %v16391_v63, %v16390_v30  ;;  %v16393_v49 = vld [vmem:[#allocation257_spill] sm:$0xff]  ;;  %v16395_v30 = vld [vmem:[#allocation262_spill] sm:$0xff]  ;;  %v16396_v63 = vld [vmem:[#allocation295_spill] sm:$0xff] }
 0x36f   :  { %v4817_v57 = vpack.c.bf16 %v4615_v8, %v4614_v28  ;;  %v4392_v16 = vadd.f32 %v12744_v55, %v4161_v3  ;;  %v4393_v17 = vadd.f32 %v12744_v55, %v4162_v36  ;;  %v16394_v3 = vld [vmem:[#allocation71_spill] sm:$0xff] }
 0x370   :  { %16392 = vst [vmem:[#allocation105_spill] sm:$0xff] %v13151_v47  ;;  %v5016_v50 = vsel %vm4926_vm6, %v5013_v6, %v5015_v46  ;;  %v3538_v5 = vpop.permute.xlu0 %3537  ;;  %v3540_v4 = vpop.permute.xlu1 %3539 }
 0x371   :  { %5052 = vst.msk [vmem:[#allocation2 + $0xc0] sm:$0xff] %vm4908_vm3, %v5016_v50  ;;  %v5017_v9 = vrot.slane %v4817_v57, 4  ;;  %v4616_v8 = vmax.f32 %v4392_v16, 0.0  ;;  %v4617_v15 = vmax.f32 %v4393_v17, 0.0  ;;  %v4163_v28 = vmax.f32 %v16393_v49, %v3538_v5  ;;  %v16397_v16 = vld [vmem:[#allocation73_spill] sm:$0xff] }
 0x372   :  { %v4164_v36 = vmax.f32 %v16394_v3, %v3540_v4  ;;  %3653 = vrot.lane.b32.xlu0 %v13147_v35, %s10483_s0  ;;  %3655 = vrot.lane.b32.xlu1 %v13151_v47, %s10483_s0  ;;  %v13165_v57 = vmax.f32 %v16396_v63, %v16395_v30  ;;  %v16398_v17 = vld [vmem:[#allocation297_spill] sm:$0xff] }
 0x373   :  { %v5018_v34 = vsel %vm4926_vm6, %v5015_v46, %v5017_v9  ;;  %v4818_v6 = vpack.c.bf16 %v4617_v15, %v4616_v8  ;;  %v4394_v37 = vadd.f32 %v12744_v55, %v4163_v28  ;;  %v13169_v50 = vmax.f32 %v16398_v17, %v16397_v16 }
 0x374   :  { %5053 = vst.msk [vmem:[#allocation2 + $0xc8] sm:$0xff] %vm4908_vm3, %v5018_v34  ;;  %v4395_v5 = vadd.f32 %v12744_v55, %v4164_v36  ;;  %v3542_v4 = vpop.permute.xlu0 %3541  ;;  %v3544_v49 = vpop.permute.xlu1 %3543 }
 0x375   :  { %v5019_v3 = vrot.slane %v4818_v6, 4  ;;  %v4618_v47 = vmax.f32 %v4394_v37, 0.0  ;;  %v4165_v46 = vmax.f32 %v12655_v0, %v3542_v4  ;;  %v4166_v8 = vmax.f32 %v12659_v42, %v3544_v49  ;;  %v16399_v6 = vld [vmem:[#allocation312_spill] sm:$0xff] }
 0x376   :  { %v4619_v15 = vmax.f32 %v4395_v5, 0.0  ;;  %3657 = vrot.lane.b32.xlu0 %v13165_v57, %s10483_s0  ;;  %3659 = vrot.lane.b32.xlu1 %v13169_v50, %s10483_s0  ;;  %v13184_v37 = vmax.f32 %v16399_v6, %v12709_v14  ;;  %v16400_v0 = vld [vmem:[#allocation316_spill] sm:$0xff] }
 0x377   :  { %v5020_v28 = vsel %vm4926_vm6, %v5017_v9, %v5019_v3  ;;  %v4396_v34 = vadd.f32 %v12744_v55, %v4165_v46  ;;  %v4397_v36 = vadd.f32 %v12744_v55, %v4166_v8  ;;  %v13188_v42 = vmax.f32 %v16400_v0, %v12711_v52  ;;  %v16401_v46 = vld [vmem:[#allocation81_spill] sm:$0xff]  ;;  %v16402_v8 = vld [vmem:[#allocation311_spill] sm:$0xff] }
 0x378   :  { %5054 = vst.msk [vmem:[#allocation2 + $0xd0] sm:$0xff] %vm4908_vm3, %v5020_v28  ;;  %v4819_v30 = vpack.c.bf16 %v4619_v15, %v4618_v47  ;;  %v3546_v63 = vpop.permute.xlu0 %3545  ;;  %v3548_v16 = vpop.permute.xlu1 %3547  ;;  %v13201_v15 = vmax.f32 %v16402_v8, %v16401_v46  ;;  %v16403_v28 = vld [vmem:[#allocation272_spill] sm:$0xff]  ;;  %v16407_v46 = vld [vmem:[#allocation133_spill] sm:$0xff] }
 0x379   :  { %v4620_v17 = vmax.f32 %v4396_v34, 0.0  ;;  %v4621_v5 = vmax.f32 %v4397_v36, 0.0  ;;  %v4167_v9 = vmax.f32 %v12671_v33, %v3546_v63  ;;  %v4168_v4 = vmax.f32 %v12675_v21, %v3548_v16  ;;  %v16404_v33 = vld [vmem:[#allocation313_spill] sm:$0xff] }
 0x37a   :  { %v5021_v49 = vrot.slane %v4819_v30, 4  ;;  %3661 = vrot.lane.b32.xlu0 %v13184_v37, %s10483_s0  ;;  %3663 = vrot.lane.b32.xlu1 %v13188_v42, %s10483_s0  ;;  %v13205_v34 = vmax.f32 %v16404_v33, %v16403_v28  ;;  %v16408_v8 = vld [vmem:[#allocation5_spill] sm:$0xff] }
 0x37b   :  { %v4820_v14 = vpack.c.bf16 %v4621_v5, %v4620_v17  ;;  %v4398_v52 = vadd.f32 %v12744_v55, %v4167_v9  ;;  %v4399_v47 = vadd.f32 %v12744_v55, %v4168_v4  ;;  %v16406_v17 = vld [vmem:[#allocation75_spill] sm:$0xff] }
 0x37c   :  { %16405 = vst [vmem:[#allocation99_spill] sm:$0xff] %v13205_v34  ;;  %v5022_v21 = vsel %vm4926_vm6, %v5019_v3, %v5021_v49  ;;  %v3550_v36 = vpop.permute.xlu0 %3549  ;;  %v3552_v6 = vpop.permute.xlu1 %3551 }
 0x37d   :  { %5055 = vst.msk [vmem:[#allocation2 + $0xd8] sm:$0xff] %vm4908_vm3, %v5022_v21  ;;  %v5023_v0 = vrot.slane %v4820_v14, 4  ;;  %v4622_v30 = vmax.f32 %v4398_v52, 0.0  ;;  %v4623_v63 = vmax.f32 %v4399_v47, 0.0  ;;  %v4169_v16 = vmax.f32 %v12687_v32, %v3550_v36  ;;  %v16410_v52 = vld [vmem:[#allocation137_spill] sm:$0xff]  ;;  %v16411_v47 = vld [vmem:[#allocation10_spill] sm:$0xff] }
 0x37e   :  { %v4170_v5 = vmax.f32 %v16406_v17, %v3552_v6  ;;  %3665 = vrot.lane.b32.xlu0 %v13201_v15, %s10483_s0  ;;  %3667 = vrot.lane.b32.xlu1 %v13205_v34, %s10483_s0  ;;  %v13219_v14 = vmax.f32 %v16408_v8, %v16407_v46  ;;  %v13223_v32 = vmax.f32 %v16411_v47, %v16410_v52  ;;  %v16415_v8 = vld [vmem:[#allocation121_spill] sm:$0xff]  ;;  %v16417_v52 = vld [vmem:[#allocation134_spill] sm:$0xff]  ;;  %v16418_v47 = vld [vmem:[#allocation8_spill] sm:$0xff] }
 0x37f   :  { %v5024_v9 = vsel %vm4926_vm6, %v5021_v49, %v5023_v0  ;;  %v4821_v3 = vpack.c.bf16 %v4623_v63, %v4622_v30  ;;  %v4400_v4 = vadd.f32 %v12744_v55, %v4169_v16  ;;  %v16413_v49 = vld [vmem:[#allocation293_spill] sm:$0xff] }
 0x380   :  { %16409 = vst [vmem:[#allocation320_spill] sm:$0xff] %v13219_v14  ;;  %16412 = vst [vmem:[#allocation103_spill] sm:$0xff] %v13223_v32  ;;  %v4401_v28 = vadd.f32 %v12744_v55, %v4170_v5  ;;  %v3554_v33 = vpop.permute.xlu0 %3553  ;;  %v3556_v21 = vpop.permute.xlu1 %3555  ;;  %v16414_v63 = vld [vmem:[#allocation85_spill] sm:$0xff] }
 0x381   :  { %5056 = vst.msk [vmem:[#allocation2 + $0xe0] sm:$0xff] %vm4908_vm3, %v5024_v9  ;;  %v5025_v36 = vrot.slane %v4821_v3, 4  ;;  %v4624_v6 = vmax.f32 %v4400_v4, 0.0  ;;  %v4171_v30 = vmax.f32 %v16413_v49, %v3554_v33  ;;  %v4172_v16 = vmax.f32 %v16414_v63, %v3556_v21  ;;  %v16416_v3 = vld [vmem:[#allocation4_spill] sm:$0xff] }
 0x382   :  { %v4625_v17 = vmax.f32 %v4401_v28, 0.0  ;;  %3669 = vrot.lane.b32.xlu0 %v13219_v14, %s10483_s0  ;;  %3671 = vrot.lane.b32.xlu1 %v13223_v32, %s10483_s0  ;;  %v13238_v4 = vmax.f32 %v16416_v3, %v16415_v8  ;;  %v13242_v33 = vmax.f32 %v16418_v47, %v16417_v52  ;;  %v16425_v52 = vld [vmem:[#allocation18_spill] sm:$0xff] }
 0x383   :  { %v5026_v46 = vsel %vm4926_vm6, %v5023_v0, %v5025_v36  ;;  %v4402_v9 = vadd.f32 %v12744_v55, %v4171_v30  ;;  %v4403_v5 = vadd.f32 %v12744_v55, %v4172_v16  ;;  %v16420_v0 = vld [vmem:[#allocation294_spill] sm:$0xff]  ;;  %v16421_v30 = vld [vmem:[#allocation89_spill] sm:$0xff] }
 0x384   :  { %16419 = vst [vmem:[#allocation109_spill] sm:$0xff] %v13242_v33  ;;  %5057 = vst.msk [vmem:[#allocation2 + $0xe8] sm:$0xff] %vm4908_vm3, %v5026_v46  ;;  %v4822_v28 = vpack.c.bf16 %v4625_v17, %v4624_v6  ;;  %v3558_v21 = vpop.permute.xlu0 %3557  ;;  %v3560_v49 = vpop.permute.xlu1 %3559  ;;  %v16422_v17 = vld [vmem:[#allocation156_spill] sm:$0xff]  ;;  %v16423_v46 = vld [vmem:[#allocation14_spill] sm:$0xff] }
 0x385   :  { %v4626_v63 = vmax.f32 %v4402_v9, 0.0  ;;  %v4627_v32 = vmax.f32 %v4403_v5, 0.0  ;;  %v4173_v14 = vmax.f32 %v16420_v0, %v3558_v21  ;;  %v4174_v34 = vmax.f32 %v16421_v30, %v3560_v49  ;;  %v16424_v5 = vld [vmem:[#allocation157_spill] sm:$0xff] }
 0x386   :  { %v5027_v16 = vrot.slane %v4822_v28, 4  ;;  %3673 = vrot.lane.b32.xlu0 %v13238_v4, %s10483_s0  ;;  %3675 = vrot.lane.b32.xlu1 %v13242_v33, %s10483_s0  ;;  %v13255_v9 = vmax.f32 %v16423_v46, %v16422_v17  ;;  %v13259_v47 = vmax.f32 %v16425_v52, %v16424_v5  ;;  %v16431_v5 = vld [vmem:[#allocation150_spill] sm:$0xff]  ;;  %v16432_v52 = vld [vmem:[#allocation16_spill] sm:$0xff] }
 0x387   :  { %v4823_v8 = vpack.c.bf16 %v4627_v32, %v4626_v63  ;;  %v4404_v3 = vadd.f32 %v12744_v55, %v4173_v14  ;;  %v4405_v6 = vadd.f32 %v12744_v55, %v4174_v34  ;;  %v16426_v14 = vld [vmem:[#allocation289_spill] sm:$0xff]  ;;  %v16427_v34 = vld [vmem:[#allocation87_spill] sm:$0xff] }
 0x388   :  { %v5028_v28 = vsel %vm4926_vm6, %v5025_v36, %v5027_v16  ;;  %v3562_v21 = vpop.permute.xlu0 %3561  ;;  %v3564_v49 = vpop.permute.xlu1 %3563 }
 0x389   :  { %5058 = vst.msk [vmem:[#allocation2 + $0xf0] sm:$0xff] %vm4908_vm3, %v5028_v28  ;;  %v5029_v0 = vrot.slane %v4823_v8, 4  ;;  %v4628_v32 = vmax.f32 %v4404_v3, 0.0  ;;  %v4629_v63 = vmax.f32 %v4405_v6, 0.0  ;;  %v4175_v30 = vmax.f32 %v16426_v14, %v3562_v21  ;;  %v16428_v8 = vld [vmem:[#allocation149_spill] sm:$0xff]  ;;  %v16429_v3 = vld [vmem:[#allocation12_spill] sm:$0xff] }
 0x38a   :  { %v4176_v33 = vmax.f32 %v16427_v34, %v3564_v49  ;;  %3677 = vrot.lane.b32.xlu0 %v13255_v9, %s10483_s0  ;;  %3679 = vrot.lane.b32.xlu1 %v13259_v47, %s10483_s0  ;;  %v13274_v6 = vmax.f32 %v16429_v3, %v16428_v8  ;;  %v13278_v28 = vmax.f32 %v16432_v52, %v16431_v5  ;;  %v16435_v8 = vld [vmem:[#allocation172_spill] sm:$0xff]  ;;  %v16438_v3 = vld [vmem:[#allocation26_spill] sm:$0xff] }
 0x38b   :  { %v5030_v17 = vsel %vm4926_vm6, %v5027_v16, %v5029_v0  ;;  %5060 = vst.msk [vmem:[#allocation2 + $0x100] sm:$0xf] %vm4910_vm5, %v5029_v0  ;;  %v4824_v36 = vpack.c.bf16 %v4629_v63, %v4628_v32  ;;  %v4406_v46 = vadd.f32 %v12744_v55, %v4175_v30  ;;  %v16434_v32 = vld [vmem:[#allocation309_spill] sm:$0xff] }
 0x38c   :  { %16430 = vst [vmem:[#allocation113_spill] sm:$0xff] %v13274_v6  ;;  %16433 = vst [vmem:[#allocation107_spill] sm:$0xff] %v13278_v28  ;;  %v4407_v21 = vadd.f32 %v12744_v55, %v4176_v33  ;;  %v3566_v49 = vpop.permute.xlu0 %3565  ;;  %v3568_v14 = vpop.permute.xlu1 %3567 }
 0x38d   :  { %5059 = vst.msk [vmem:[#allocation2 + $0xf8] sm:$0xff] %vm4908_vm3, %v5030_v17  ;;  %v5080_v16 = vrot.slane %v4824_v36, 4  ;;  %v4630_v34 = vmax.f32 %v4406_v46, 0.0  ;;  %v4177_v0 = vmax.f32 %v12756_v23, %v3566_v49  ;;  %v4178_v63 = vmax.f32 %v16434_v32, %v3568_v14  ;;  %v16436_v36 = vld [vmem:[#allocation22_spill] sm:$0xff]  ;;  %v16437_v23 = vld [vmem:[#allocation173_spill] sm:$0xff] }
 0x38e   :  { %v4631_v30 = vmax.f32 %v4407_v21, 0.0  ;;  %3681 = vrot.lane.b32.xlu0 %v13274_v6, %s10483_s0  ;;  %3683 = vrot.lane.b32.xlu1 %v13278_v28, %s10483_s0  ;;  %v13293_v46 = vmax.f32 %v16436_v36, %v16435_v8  ;;  %v13297_v5 = vmax.f32 %v16438_v3, %v16437_v23  ;;  %v16440_v36 = vld [vmem:[#allocation20_spill] sm:$0xff] }
 0x38f   :  { %5122 = vst.msk [vmem:[#allocation2 + $0x118] sm:$0xf0] %vm4969_vm4, %v5080_v16  ;;  %v4408_v17 = vadd.f32 %v12744_v55, %v4177_v0  ;;  %v4409_v33 = vadd.f32 %v12744_v55, %v4178_v63 }
 0x390   :  { %v4825_v52 = vpack.c.bf16 %v4631_v30, %v4630_v34  ;;  %v3570_v21 = vpop.permute.xlu0 %3569  ;;  %v3572_v49 = vpop.permute.xlu1 %3571  ;;  %v16439_v30 = vld [vmem:[#allocation165_spill] sm:$0xff] }
 0x391   :  { %v4632_v14 = vmax.f32 %v4408_v17, 0.0  ;;  %v4633_v32 = vmax.f32 %v4409_v33, 0.0  ;;  %v4179_v28 = vmax.f32 %v12772_v1, %v3570_v21  ;;  %v4180_v6 = vmax.f32 %v12776_v58, %v3572_v49  ;;  %v16441_v33 = vld [vmem:[#allocation166_spill] sm:$0xff]  ;;  %v16442_v1 = vld [vmem:[#allocation24_spill] sm:$0xff] }
 0x392   :  { %v5081_v0 = vrot.slane %v4825_v52, 4  ;;  %3685 = vrot.lane.b32.xlu0 %v13293_v46, %s10483_s0  ;;  %3687 = vrot.lane.b32.xlu1 %v13297_v5, %s10483_s0  ;;  %v13309_v17 = vmax.f32 %v16440_v36, %v16439_v30  ;;  %v13313_v23 = vmax.f32 %v16442_v1, %v16441_v33  ;;  %v16446_v30 = vld [vmem:[#allocation34_spill] sm:$0xff] }
 0x393   :  { %v4826_v63 = vpack.c.bf16 %v4633_v32, %v4632_v14  ;;  %v4410_v8 = vadd.f32 %v12744_v55, %v4179_v28  ;;  %v4411_v34 = vadd.f32 %v12744_v55, %v4180_v6  ;;  %v13327_v32 = vld [vmem:[%s15399_s2] ss:$0 sm:$0xff] }
 0x394   :  { %v5082_v58 = vsel %vm4926_vm6, %v5080_v16, %v5081_v0  ;;  %v3574_v3 = vpop.permute.xlu0 %3573  ;;  %v3576_v52 = vpop.permute.xlu1 %3575 }
 0x395   :  { %5123 = vst.msk [vmem:[#allocation2 + $0x120] sm:$0xff] %vm4908_vm3, %v5082_v58  ;;  %v5083_v21 = vrot.slane %v4826_v63, 4  ;;  %v4634_v49 = vmax.f32 %v4410_v8, 0.0  ;;  %v4635_v14 = vmax.f32 %v4411_v34, 0.0  ;;  %v4181_v28 = vmax.f32 %v12788_v59, %v3574_v3  ;;  %v16443_v8 = vld [vmem:[#allocation187_spill] sm:$0xff]  ;;  %v16444_v59 = vld [vmem:[#allocation30_spill] sm:$0xff] }
 0x396   :  { %v4182_v55 = vmax.f32 %v12792_v54, %v3576_v52  ;;  %3689 = vrot.lane.b32.xlu0 %v13309_v17, %s10483_s0  ;;  %3691 = vrot.lane.b32.xlu1 %v13313_v23, %s10483_s0  ;;  %v13332_v34 = vmax.f32 %v16444_v59, %v16443_v8  ;;  %v16445_v54 = vld [vmem:[#allocation188_spill] sm:$0xff]  ;;  %v16447_v8 = vld [vmem:[#allocation181_spill] sm:$0xff] }
 0x397   :  { %v5084_v6 = vsel %vm4926_vm6, %v5081_v0, %v5083_v21  ;;  %v4827_v16 = vpack.c.bf16 %v4635_v14, %v4634_v49  ;;  %v4412_v63 = vadd.f32 %v13327_v32, %v4181_v28  ;;  %v13336_v36 = vmax.f32 %v16446_v30, %v16445_v54  ;;  %v16450_v59 = vld [vmem:[#allocation32_spill] sm:$0xff] }
 0x398   :  { %5124 = vst.msk [vmem:[#allocation2 + $0x128] sm:$0xff] %vm4908_vm3, %v5084_v6  ;;  %v4413_v0 = vadd.f32 %v13327_v32, %v4182_v55  ;;  %v3578_v33 = vpop.permute.xlu0 %3577  ;;  %v3580_v1 = vpop.permute.xlu1 %3579 }
 0x399   :  { %v5085_v58 = vrot.slane %v4827_v16, 4  ;;  %v4636_v3 = vmax.f32 %v4412_v63, 0.0  ;;  %v4183_v52 = vmax.f32 %v12806_v38, %v3578_v33  ;;  %v4184_v49 = vmax.f32 %v12810_v45, %v3580_v1  ;;  %v16448_v16 = vld [vmem:[#allocation28_spill] sm:$0xff]  ;;  %v16449_v38 = vld [vmem:[#allocation182_spill] sm:$0xff] }
 0x39a   :  { %v4637_v14 = vmax.f32 %v4413_v0, 0.0  ;;  %3693 = vrot.lane.b32.xlu0 %v13332_v34, %s10483_s0  ;;  %3695 = vrot.lane.b32.xlu1 %v13336_v36, %s10483_s0  ;;  %v13351_v63 = vmax.f32 %v16448_v16, %v16447_v8  ;;  %v13355_v45 = vmax.f32 %v16450_v59, %v16449_v38 }
 0x39b   :  { %v5086_v28 = vsel %vm4926_vm6, %v5083_v21, %v5085_v58  ;;  %v4414_v6 = vadd.f32 %v13327_v32, %v4183_v52  ;;  %v4415_v55 = vadd.f32 %v13327_v32, %v4184_v49 }
 0x39c   :  { %5125 = vst.msk [vmem:[#allocation2 + $0x130] sm:$0xff] %vm4908_vm3, %v5086_v28  ;;  %v4828_v54 = vpack.c.bf16 %v4637_v14, %v4636_v3  ;;  %v3582_v30 = vpop.permute.xlu0 %3581  ;;  %v3584_v0 = vpop.permute.xlu1 %3583  ;;  %v16451_v14 = vld [vmem:[#allocation202_spill] sm:$0xff] }
 0x39d   :  { %v4638_v33 = vmax.f32 %v4414_v6, 0.0  ;;  %v4639_v1 = vmax.f32 %v4415_v55, 0.0  ;;  %v4185_v21 = vmax.f32 %v12823_v11, %v3582_v30  ;;  %v4186_v52 = vmax.f32 %v12827_v29, %v3584_v0  ;;  %v16452_v28 = vld [vmem:[#allocation38_spill] sm:$0xff]  ;;  %v16453_v55 = vld [vmem:[#allocation203_spill] sm:$0xff] }
 0x39e   :  { %v5087_v49 = vrot.slane %v4828_v54, 4  ;;  %3697 = vrot.lane.b32.xlu0 %v13351_v63, %s10483_s0  ;;  %3699 = vrot.lane.b32.xlu1 %v13355_v45, %s10483_s0  ;;  %v13368_v6 = vmax.f32 %v16452_v28, %v16451_v14  ;;  %v16454_v11 = vld [vmem:[#allocation42_spill] sm:$0xff]  ;;  %v16455_v28 = vld [vmem:[#allocation195_spill] sm:$0xff] }
 0x39f   :  { %v4829_v8 = vpack.c.bf16 %v4639_v1, %v4638_v33  ;;  %v4416_v16 = vadd.f32 %v13327_v32, %v4185_v21  ;;  %v4417_v3 = vadd.f32 %v13327_v32, %v4186_v52  ;;  %v13372_v38 = vmax.f32 %v16454_v11, %v16453_v55  ;;  %v16456_v55 = vld [vmem:[#allocation36_spill] sm:$0xff] }
 0x3a0   :  { %v5088_v29 = vsel %vm4926_vm6, %v5085_v58, %v5087_v49  ;;  %v3586_v59 = vpop.permute.xlu0 %3585  ;;  %v3588_v54 = vpop.permute.xlu1 %3587 }
 0x3a1   :  { %5126 = vst.msk [vmem:[#allocation2 + $0x138] sm:$0xff] %vm4908_vm3, %v5088_v29  ;;  %v5089_v30 = vrot.slane %v4829_v8, 4  ;;  %v4640_v0 = vmax.f32 %v4416_v16, 0.0  ;;  %v4641_v33 = vmax.f32 %v4417_v3, 0.0  ;;  %v4187_v1 = vmax.f32 %v12841_v2, %v3586_v59  ;;  %v16457_v16 = vld [vmem:[#allocation196_spill] sm:$0xff] }
 0x3a2   :  { %v4188_v21 = vmax.f32 %v12845_v12, %v3588_v54  ;;  %3701 = vrot.lane.b32.xlu0 %v13368_v6, %s10483_s0  ;;  %3703 = vrot.lane.b32.xlu1 %v13372_v38, %s10483_s0  ;;  %v13386_v8 = vmax.f32 %v16456_v55, %v16455_v28  ;;  %v16458_v3 = vld [vmem:[#allocation40_spill] sm:$0xff]  ;;  %v16459_v28 = vld [vmem:[#allocation218_spill] sm:$0xff] }
 0x3a3   :  { %v5090_v52 = vsel %vm4926_vm6, %v5087_v49, %v5089_v30  ;;  %v4830_v58 = vpack.c.bf16 %v4641_v33, %v4640_v0  ;;  %v4418_v14 = vadd.f32 %v13327_v32, %v4187_v1  ;;  %v13390_v2 = vmax.f32 %v16458_v3, %v16457_v16  ;;  %v16462_v55 = vld [vmem:[#allocation50_spill] sm:$0xff] }
 0x3a4   :  { %5127 = vst.msk [vmem:[#allocation2 + $0x140] sm:$0xff] %vm4908_vm3, %v5090_v52  ;;  %v4419_v12 = vadd.f32 %v13327_v32, %v4188_v21  ;;  %v3590_v11 = vpop.permute.xlu0 %3589  ;;  %v3592_v29 = vpop.permute.xlu1 %3591 }
 0x3a5   :  { %v5091_v59 = vrot.slane %v4830_v58, 4  ;;  %v4642_v54 = vmax.f32 %v4418_v14, 0.0  ;;  %v4189_v49 = vmax.f32 %v12860_v51, %v3590_v11  ;;  %v4190_v0 = vmax.f32 %v12864_v20, %v3592_v29  ;;  %v16460_v58 = vld [vmem:[#allocation46_spill] sm:$0xff]  ;;  %v16461_v51 = vld [vmem:[#allocation219_spill] sm:$0xff] }
 0x3a6   :  { %v4643_v33 = vmax.f32 %v4419_v12, 0.0  ;;  %3705 = vrot.lane.b32.xlu0 %v13386_v8, %s10483_s0  ;;  %3707 = vrot.lane.b32.xlu1 %v13390_v2, %s10483_s0  ;;  %v13405_v14 = vmax.f32 %v16460_v58, %v16459_v28  ;;  %v13409_v20 = vmax.f32 %v16462_v55, %v16461_v51 }
 0x3a7   :  { %v5092_v1 = vsel %vm4926_vm6, %v5089_v30, %v5091_v59  ;;  %v4420_v52 = vadd.f32 %v13327_v32, %v4189_v49  ;;  %v4421_v21 = vadd.f32 %v13327_v32, %v4190_v0 }
 0x3a8   :  { %5128 = vst.msk [vmem:[#allocation2 + $0x148] sm:$0xff] %vm4908_vm3, %v5092_v1  ;;  %v4831_v16 = vpack.c.bf16 %v4643_v33, %v4642_v54  ;;  %v3594_v3 = vpop.permute.xlu0 %3593  ;;  %v3596_v12 = vpop.permute.xlu1 %3595  ;;  %v16463_v33 = vld [vmem:[#allocation211_spill] sm:$0xff]  ;;  %v16464_v1 = vld [vmem:[#allocation44_spill] sm:$0xff] }
 0x3a9   :  { %v4644_v11 = vmax.f32 %v4420_v52, 0.0  ;;  %v4645_v29 = vmax.f32 %v4421_v21, 0.0  ;;  %v4191_v30 = vmax.f32 %v12877_v18, %v3594_v3  ;;  %v4192_v49 = vmax.f32 %v12881_v44, %v3596_v12  ;;  %v16465_v21 = vld [vmem:[#allocation212_spill] sm:$0xff] }
 0x3aa   :  { %v5093_v0 = vrot.slane %v4831_v16, 4  ;;  %3709 = vrot.lane.b32.xlu0 %v13405_v14, %s10483_s0  ;;  %3711 = vrot.lane.b32.xlu1 %v13409_v20, %s10483_s0  ;;  %v13422_v52 = vmax.f32 %v16464_v1, %v16463_v33  ;;  %v16466_v18 = vld [vmem:[#allocation48_spill] sm:$0xff]  ;;  %v16467_v1 = vld [vmem:[#allocation234_spill] sm:$0xff] }
 0x3ab   :  { %v4832_v28 = vpack.c.bf16 %v4645_v29, %v4644_v11  ;;  %v4422_v58 = vadd.f32 %v13327_v32, %v4191_v30  ;;  %v4423_v54 = vadd.f32 %v13327_v32, %v4192_v49  ;;  %v13426_v51 = vmax.f32 %v16466_v18, %v16465_v21  ;;  %v16468_v21 = vld [vmem:[#allocation54_spill] sm:$0xff] }
 0x3ac   :  { %v5094_v44 = vsel %vm4926_vm6, %v5091_v59, %v5093_v0  ;;  %v3598_v55 = vpop.permute.xlu0 %3597  ;;  %v3600_v16 = vpop.permute.xlu1 %3599 }
 0x3ad   :  { %5129 = vst.msk [vmem:[#allocation2 + $0x150] sm:$0xff] %vm4908_vm3, %v5094_v44  ;;  %v5095_v3 = vrot.slane %v4832_v28, 4  ;;  %v4646_v12 = vmax.f32 %v4422_v58, 0.0  ;;  %v4647_v11 = vmax.f32 %v4423_v54, 0.0  ;;  %v4193_v29 = vmax.f32 %v12895_v25, %v3598_v55  ;;  %v16469_v58 = vld [vmem:[#allocation235_spill] sm:$0xff]  ;;  %v16470_v54 = vld [vmem:[#allocation58_spill] sm:$0xff] }
 0x3ae   :  { %v4194_v30 = vmax.f32 %v12899_v43, %v3600_v16  ;;  %3713 = vrot.lane.b32.xlu0 %v13422_v52, %s10483_s0  ;;  %3715 = vrot.lane.b32.xlu1 %v13426_v51, %s10483_s0  ;;  %v13440_v28 = vmax.f32 %v16468_v21, %v16467_v1  ;;  %v13444_v25 = vmax.f32 %v16470_v54, %v16469_v58  ;;  %v16471_v1 = vld [vmem:[#allocation227_spill] sm:$0xff]  ;;  %v16474_v21 = vld [vmem:[#allocation56_spill] sm:$0xff] }
 0x3af   :  { %v5096_v49 = vsel %vm4926_vm6, %v5093_v0, %v5095_v3  ;;  %v4833_v59 = vpack.c.bf16 %v4647_v11, %v4646_v12  ;;  %v4424_v33 = vadd.f32 %v13327_v32, %v4193_v29 }
 0x3b0   :  { %5130 = vst.msk [vmem:[#allocation2 + $0x158] sm:$0xff] %vm4908_vm3, %v5096_v49  ;;  %v4425_v43 = vadd.f32 %v13327_v32, %v4194_v30  ;;  %v3602_v18 = vpop.permute.xlu0 %3601  ;;  %v3604_v44 = vpop.permute.xlu1 %3603 }
 0x3b1   :  { %v5097_v55 = vrot.slane %v4833_v59, 4  ;;  %v4648_v16 = vmax.f32 %v4424_v33, 0.0  ;;  %v4195_v0 = vmax.f32 %v12914_v56, %v3602_v18  ;;  %v4196_v12 = vmax.f32 %v12918_v19, %v3604_v44  ;;  %v16472_v59 = vld [vmem:[#allocation52_spill] sm:$0xff] }
 0x3b2   :  { %v4649_v11 = vmax.f32 %v4425_v43, 0.0  ;;  %3717 = vrot.lane.b32.xlu0 %v13440_v28, %s10483_s0  ;;  %3719 = vrot.lane.b32.xlu1 %v13444_v25, %s10483_s0  ;;  %v13459_v33 = vmax.f32 %v16472_v59, %v16471_v1  ;;  %v16473_v56 = vld [vmem:[#allocation228_spill] sm:$0xff] }
 0x3b3   :  { %v5098_v29 = vsel %vm4926_vm6, %v5095_v3, %v5097_v55  ;;  %v4426_v49 = vadd.f32 %v13327_v32, %v4195_v0  ;;  %v4427_v30 = vadd.f32 %v13327_v32, %v4196_v12  ;;  %v13463_v19 = vmax.f32 %v16474_v21, %v16473_v56 }
 0x3b4   :  { %5131 = vst.msk [vmem:[#allocation2 + $0x160] sm:$0xff] %vm4908_vm3, %v5098_v29  ;;  %v4834_v58 = vpack.c.bf16 %v4649_v11, %v4648_v16  ;;  %v3606_v54 = vpop.permute.xlu0 %3605  ;;  %v3608_v43 = vpop.permute.xlu1 %3607  ;;  %v16475_v11 = vld [vmem:[#allocation250_spill] sm:$0xff] }
 0x3b5   :  { %v4650_v18 = vmax.f32 %v4426_v49, 0.0  ;;  %v4651_v44 = vmax.f32 %v4427_v30, 0.0  ;;  %v4197_v3 = vmax.f32 %v12931_v26, %v3606_v54  ;;  %v4198_v0 = vmax.f32 %v12935_v60, %v3608_v43  ;;  %v16476_v29 = vld [vmem:[#allocation62_spill] sm:$0xff]  ;;  %v16477_v30 = vld [vmem:[#allocation251_spill] sm:$0xff] }
 0x3b6   :  { %v5099_v12 = vrot.slane %v4834_v58, 4  ;;  %3721 = vrot.lane.b32.xlu0 %v13459_v33, %s10483_s0  ;;  %3723 = vrot.lane.b32.xlu1 %v13463_v19, %s10483_s0  ;;  %v13476_v49 = vmax.f32 %v16476_v29, %v16475_v11  ;;  %v16478_v26 = vld [vmem:[#allocation66_spill] sm:$0xff]  ;;  %v16479_v29 = vld [vmem:[#allocation243_spill] sm:$0xff] }
 0x3b7   :  { %v4835_v1 = vpack.c.bf16 %v4651_v44, %v4650_v18  ;;  %v4428_v59 = vadd.f32 %v13327_v32, %v4197_v3  ;;  %v4429_v16 = vadd.f32 %v13327_v32, %v4198_v0  ;;  %v13480_v56 = vmax.f32 %v16478_v26, %v16477_v30  ;;  %v16480_v30 = vld [vmem:[#allocation60_spill] sm:$0xff] }
 0x3b8   :  { %v5100_v60 = vsel %vm4926_vm6, %v5097_v55, %v5099_v12  ;;  %v3610_v21 = vpop.permute.xlu0 %3609  ;;  %v3612_v58 = vpop.permute.xlu1 %3611 }
 0x3b9   :  { %5132 = vst.msk [vmem:[#allocation2 + $0x168] sm:$0xff] %vm4908_vm3, %v5100_v60  ;;  %v5101_v54 = vrot.slane %v4835_v1, 4  ;;  %v4652_v43 = vmax.f32 %v4428_v59, 0.0  ;;  %v4653_v18 = vmax.f32 %v4429_v16, 0.0  ;;  %v4199_v44 = vmax.f32 %v12949_v22, %v3610_v21  ;;  %v16481_v59 = vld [vmem:[#allocation244_spill] sm:$0xff] }
 0x3ba   :  { %v4200_v3 = vmax.f32 %v12953_v31, %v3612_v58  ;;  %3725 = vrot.lane.b32.xlu0 %v13476_v49, %s10483_s0  ;;  %3727 = vrot.lane.b32.xlu1 %v13480_v56, %s10483_s0  ;;  %v13494_v1 = vmax.f32 %v16480_v30, %v16479_v29  ;;  %v16482_v16 = vld [vmem:[#allocation64_spill] sm:$0xff]  ;;  %v16483_v29 = vld [vmem:[#allocation266_spill] sm:$0xff] }
 0x3bb   :  { %v5102_v0 = vsel %vm4926_vm6, %v5099_v12, %v5101_v54  ;;  %v4836_v55 = vpack.c.bf16 %v4653_v18, %v4652_v43  ;;  %v4430_v11 = vadd.f32 %v13327_v32, %v4199_v44  ;;  %v13498_v22 = vmax.f32 %v16482_v16, %v16481_v59  ;;  %v16486_v30 = vld [vmem:[#allocation74_spill] sm:$0xff] }
 0x3bc   :  { %5133 = vst.msk [vmem:[#allocation2 + $0x170] sm:$0xff] %vm4908_vm3, %v5102_v0  ;;  %v4431_v31 = vadd.f32 %v13327_v32, %v4200_v3  ;;  %v3614_v26 = vpop.permute.xlu0 %3613  ;;  %v3616_v60 = vpop.permute.xlu1 %3615 }
 0x3bd   :  { %v5103_v21 = vrot.slane %v4836_v55, 4  ;;  %v4654_v58 = vmax.f32 %v4430_v11, 0.0  ;;  %v4201_v12 = vmax.f32 %v12968_v40, %v3614_v26  ;;  %v4202_v43 = vmax.f32 %v12972_v27, %v3616_v60  ;;  %v16484_v55 = vld [vmem:[#allocation70_spill] sm:$0xff]  ;;  %v16485_v40 = vld [vmem:[#allocation267_spill] sm:$0xff] }
 0x3be   :  { %v4655_v18 = vmax.f32 %v4431_v31, 0.0  ;;  %3729 = vrot.lane.b32.xlu0 %v13494_v1, %s10483_s0  ;;  %3731 = vrot.lane.b32.xlu1 %v13498_v22, %s10483_s0  ;;  %v13513_v11 = vmax.f32 %v16484_v55, %v16483_v29  ;;  %v13517_v27 = vmax.f32 %v16486_v30, %v16485_v40 }
 0x3bf   :  { %v5104_v44 = vsel %vm4926_vm6, %v5101_v54, %v5103_v21  ;;  %v4432_v0 = vadd.f32 %v13327_v32, %v4201_v12  ;;  %v4433_v3 = vadd.f32 %v13327_v32, %v4202_v43 }
 0x3c0   :  { %5134 = vst.msk [vmem:[#allocation2 + $0x178] sm:$0xff] %vm4908_vm3, %v5104_v44  ;;  %v4837_v59 = vpack.c.bf16 %v4655_v18, %v4654_v58  ;;  %v3618_v16 = vpop.permute.xlu0 %3617  ;;  %v3620_v31 = vpop.permute.xlu1 %3619  ;;  %v16487_v18 = vld [vmem:[#allocation259_spill] sm:$0xff]  ;;  %v16488_v44 = vld [vmem:[#allocation68_spill] sm:$0xff] }
 0x3c1   :  { %v4656_v26 = vmax.f32 %v4432_v0, 0.0  ;;  %v4657_v60 = vmax.f32 %v4433_v3, 0.0  ;;  %v4203_v54 = vmax.f32 %v12985_v53, %v3618_v16  ;;  %v4204_v12 = vmax.f32 %v12989_v48, %v3620_v31  ;;  %v16489_v3 = vld [vmem:[#allocation260_spill] sm:$0xff] }
 0x3c2   :  { %v5105_v43 = vrot.slane %v4837_v59, 4  ;;  %3733 = vrot.lane.b32.xlu0 %v13513_v11, %s10483_s0  ;;  %3735 = vrot.lane.b32.xlu1 %v13517_v27, %s10483_s0  ;;  %v13530_v0 = vmax.f32 %v16488_v44, %v16487_v18  ;;  %v16490_v53 = vld [vmem:[#allocation72_spill] sm:$0xff]  ;;  %v16492_v18 = vld [vmem:[#allocation78_spill] sm:$0xff] }
 0x3c3   :  { %v4838_v29 = vpack.c.bf16 %v4657_v60, %v4656_v26  ;;  %v4434_v55 = vadd.f32 %v13327_v32, %v4203_v54  ;;  %v4435_v58 = vadd.f32 %v13327_v32, %v4204_v12  ;;  %v13534_v40 = vmax.f32 %v16490_v53, %v16489_v3 }
 0x3c4   :  { %v5106_v48 = vsel %vm4926_vm6, %v5103_v21, %v5105_v43  ;;  %5136 = vst.msk [vmem:[#allocation2 + $0x188] sm:$0xf] %vm4910_vm5, %v5105_v43  ;;  %v3622_v30 = vpop.permute.xlu0 %3621  ;;  %v3624_v59 = vpop.permute.xlu1 %3623  ;;  %v16491_v43 = vld [vmem:[#allocation282_spill] sm:$0xff] }
 0x3c5   :  { %5135 = vst.msk [vmem:[#allocation2 + $0x180] sm:$0xff] %vm4908_vm3, %v5106_v48  ;;  %v5156_v16 = vrot.slane %v4838_v29, 4  ;;  %v4658_v31 = vmax.f32 %v4434_v55, 0.0  ;;  %v4659_v26 = vmax.f32 %v4435_v58, 0.0  ;;  %v4205_v60 = vmax.f32 %v13003_v24, %v3622_v30  ;;  %v16494_v55 = vld [vmem:[#allocation283_spill] sm:$0xff]  ;;  %v16495_v58 = vld [vmem:[#allocation82_spill] sm:$0xff] }
 0x3c6   :  { %v4206_v54 = vmax.f32 %v13007_v41, %v3624_v59  ;;  %3737 = vrot.lane.b32.xlu0 %v13530_v0, %s10483_s0  ;;  %3739 = vrot.lane.b32.xlu1 %v13534_v40, %s10483_s0  ;;  %v13549_v29 = vmax.f32 %v16492_v18, %v16491_v43  ;;  %v13553_v24 = vmax.f32 %v16495_v58, %v16494_v55  ;;  %v16497_v43 = vld [vmem:[#allocation275_spill] sm:$0xff]  ;;  %v16500_v18 = vld [vmem:[#allocation80_spill] sm:$0xff] }
 0x3c7   :  { %5198 = vst.msk [vmem:[#allocation2 + $0x1a0] sm:$0xf0] %vm4969_vm4, %v5156_v16  ;;  %v4839_v21 = vpack.c.bf16 %v4659_v26, %v4658_v31  ;;  %v4436_v12 = vadd.f32 %v13327_v32, %v4205_v60 }
 0x3c8   :  { %16493 = vst [vmem:[#allocation111_spill] sm:$0xff] %v13549_v29  ;;  %16496 = vst [vmem:[#allocation117_spill] sm:$0xff] %v13553_v24  ;;  %v4437_v41 = vadd.f32 %v13327_v32, %v4206_v54  ;;  %v3626_v44 = vpop.permute.xlu0 %3625  ;;  %v3628_v3 = vpop.permute.xlu1 %3627 }
 0x3c9   :  { %v5157_v53 = vrot.slane %v4839_v21, 4  ;;  %v4660_v48 = vmax.f32 %v4436_v12, 0.0  ;;  %v4207_v30 = vmax.f32 %v13023_v62, %v3626_v44  ;;  %v4208_v59 = vmax.f32 %v13027_v10, %v3628_v3  ;;  %v16498_v21 = vld [vmem:[#allocation76_spill] sm:$0xff] }
 0x3ca   :  { %v4661_v31 = vmax.f32 %v4437_v41, 0.0  ;;  %3741 = vrot.lane.b32.xlu0 %v13549_v29, %s10483_s0  ;;  %3743 = vrot.lane.b32.xlu1 %v13553_v24, %s10483_s0  ;;  %v13567_v12 = vmax.f32 %v16498_v21, %v16497_v43  ;;  %v16499_v62 = vld [vmem:[#allocation276_spill] sm:$0xff] }
 0x3cb   :  { %v5158_v26 = vsel %vm4926_vm6, %v5156_v16, %v5157_v53  ;;  %v4438_v60 = vadd.f32 %v13327_v32, %v4207_v30  ;;  %v4439_v54 = vadd.f32 %v13327_v32, %v4208_v59  ;;  %v13571_v10 = vmax.f32 %v16500_v18, %v16499_v62  ;;  %v16502_v16 = vld [vmem:[#allocation93_spill] sm:$0xff]  ;;  %v16503_v30 = vld [vmem:[#allocation310_spill] sm:$0xff] }
 0x3cc   :  { %5199 = vst.msk [vmem:[#allocation2 + $0x1a8] sm:$0xff] %vm4908_vm3, %v5158_v26  ;;  %v4840_v55 = vpack.c.bf16 %v4661_v31, %v4660_v48  ;;  %v3630_v58 = vpop.permute.xlu0 %3629  ;;  %v3632_v41 = vpop.permute.xlu1 %3631  ;;  %v16504_v31 = vld [vmem:[#allocation298_spill] sm:$0xff] }
 0x3cd   :  { %16501 = vst [vmem:[#allocation123_spill] sm:$0xff] %v13571_v10  ;;  %v4662_v44 = vmax.f32 %v4438_v60, 0.0  ;;  %v4663_v3 = vmax.f32 %v4439_v54, 0.0  ;;  %v4209_v24 = vmax.f32 %v16502_v16, %v3630_v58  ;;  %v4210_v29 = vmax.f32 %v16503_v30, %v3632_v41  ;;  %v16505_v26 = vld [vmem:[#allocation86_spill] sm:$0xff]  ;;  %v16507_v54 = vld [vmem:[#allocation299_spill] sm:$0xff] }
 0x3ce   :  { %v5159_v59 = vrot.slane %v4840_v55, 4  ;;  %3745 = vrot.lane.b32.xlu0 %v13567_v12, %s10483_s0  ;;  %3747 = vrot.lane.b32.xlu1 %v13571_v10, %s10483_s0  ;;  %v13584_v60 = vmax.f32 %v16505_v26, %v16504_v31  ;;  %v16508_v62 = vld [vmem:[#allocation90_spill] sm:$0xff] }
 0x3cf   :  { %v4841_v43 = vpack.c.bf16 %v4663_v3, %v4662_v44  ;;  %v4440_v21 = vadd.f32 %v13327_v32, %v4209_v24  ;;  %v4441_v48 = vadd.f32 %v13327_v32, %v4210_v29  ;;  %v13588_v18 = vmax.f32 %v16508_v62, %v16507_v54  ;;  %v16510_v24 = vld [vmem:[#allocation97_spill] sm:$0xff]  ;;  %v16511_v29 = vld [vmem:[#allocation304_spill] sm:$0xff]  ;;  %v16512_v54 = vld [vmem:[#allocation291_spill] sm:$0xff] }
 0x3d0   :  { %16506 = vst [vmem:[#allocation115_spill] sm:$0xff] %v13584_v60  ;;  %v5160_v55 = vsel %vm4926_vm6, %v5157_v53, %v5159_v59  ;;  %v3634_v58 = vpop.permute.xlu0 %3633  ;;  %v3636_v41 = vpop.permute.xlu1 %3635  ;;  %v16513_v62 = vld [vmem:[#allocation84_spill] sm:$0xff] }
 0x3d1   :  { %16509 = vst [vmem:[#allocation119_spill] sm:$0xff] %v13588_v18  ;;  %5200 = vst.msk [vmem:[#allocation2 + $0x1b0] sm:$0xff] %vm4908_vm3, %v5160_v55  ;;  %v5161_v16 = vrot.slane %v4841_v43, 4  ;;  %v4664_v44 = vmax.f32 %v4440_v21, 0.0  ;;  %v4665_v3 = vmax.f32 %v4441_v48, 0.0  ;;  %v4211_v30 = vmax.f32 %v16510_v24, %v3634_v58  ;;  %v16515_v21 = vld [vmem:[#allocation292_spill] sm:$0xff] }
 0x3d2   :  { %v4212_v10 = vmax.f32 %v16511_v29, %v3636_v41  ;;  %3749 = vrot.lane.b32.xlu0 %v13584_v60, %s10483_s0  ;;  %3751 = vrot.lane.b32.xlu1 %v13588_v18, %s10483_s0  ;;  %v13602_v43 = vmax.f32 %v16513_v62, %v16512_v54  ;;  %v16516_v48 = vld [vmem:[#allocation88_spill] sm:$0xff]  ;;  %v16519_v62 = vld [vmem:[#allocation314_spill] sm:$0xff] }
 0x3d3   :  { %v5162_v31 = vsel %vm4926_vm6, %v5159_v59, %v5161_v16  ;;  %v4842_v53 = vpack.c.bf16 %v4665_v3, %v4664_v44  ;;  %v4442_v26 = vadd.f32 %v13327_v32, %v4211_v30  ;;  %v13606_v55 = vmax.f32 %v16516_v48, %v16515_v21  ;;  %v16518_v44 = vld [vmem:[#allocation91_spill] sm:$0xff]  ;;  %v16522_v21 = vld [vmem:[#allocation98_spill] sm:$0xff] }
 0x3d4   :  { %16514 = vst [vmem:[#allocation129_spill] sm:$0xff] %v13602_v43  ;;  %5201 = vst.msk [vmem:[#allocation2 + $0x1b8] sm:$0xff] %vm4908_vm3, %v5162_v31  ;;  %v4443_v58 = vadd.f32 %v13327_v32, %v4212_v10  ;;  %v3638_v41 = vpop.permute.xlu0 %3637  ;;  %v3640_v24 = vpop.permute.xlu1 %3639 }
 0x3d5   :  { %16517 = vst [vmem:[#allocation135_spill] sm:$0xff] %v13606_v55  ;;  %v5163_v29 = vrot.slane %v4842_v53, 4  ;;  %v4666_v18 = vmax.f32 %v4442_v26, 0.0  ;;  %v4213_v59 = vmax.f32 %v13076_v61, %v3638_v41  ;;  %v4214_v3 = vmax.f32 %v16518_v44, %v3640_v24  ;;  %v16520_v53 = vld [vmem:[#allocation94_spill] sm:$0xff]  ;;  %v16521_v61 = vld [vmem:[#allocation315_spill] sm:$0xff] }
 0x3d6   :  { %v4667_v30 = vmax.f32 %v4443_v58, 0.0  ;;  %3753 = vrot.lane.b32.xlu0 %v13602_v43, %s10483_s0  ;;  %3755 = vrot.lane.b32.xlu1 %v13606_v55, %s10483_s0  ;;  %v13621_v26 = vmax.f32 %v16520_v53, %v16519_v62  ;;  %v13625_v48 = vmax.f32 %v16522_v21, %v16521_v61  ;;  %v16528_v61 = vld [vmem:[#allocation96_spill] sm:$0xff] }
 0x3d7   :  { %v5164_v54 = vsel %vm4926_vm6, %v5161_v16, %v5163_v29  ;;  %v4444_v31 = vadd.f32 %v13327_v32, %v4213_v59  ;;  %v4445_v10 = vadd.f32 %v13327_v32, %v4214_v3  ;;  %v16523_v16 = vld [vmem:[#allocation305_spill] sm:$0xff]  ;;  %v16524_v59 = vld [vmem:[#allocation95_spill] sm:$0xff] }
 0x3d8   :  { %5202 = vst.msk [vmem:[#allocation2 + $0x1c0] sm:$0xff] %vm4908_vm3, %v5164_v54  ;;  %v4843_v58 = vpack.c.bf16 %v4667_v30, %v4666_v18  ;;  %v3642_v41 = vpop.permute.xlu0 %3641  ;;  %v3644_v24 = vpop.permute.xlu1 %3643  ;;  %v16525_v30 = vld [vmem:[#allocation307_spill] sm:$0xff]  ;;  %v16526_v54 = vld [vmem:[#allocation92_spill] sm:$0xff] }
 0x3d9   :  { %v4668_v44 = vmax.f32 %v4444_v31, 0.0  ;;  %v4669_v55 = vmax.f32 %v4445_v10, 0.0  ;;  %v4215_v43 = vmax.f32 %v16523_v16, %v3642_v41  ;;  %v4216_v60 = vmax.f32 %v16524_v59, %v3644_v24  ;;  %v16527_v10 = vld [vmem:[#allocation308_spill] sm:$0xff] }
 0x3da   :  { %v5165_v3 = vrot.slane %v4843_v58, 4  ;;  %3757 = vrot.lane.b32.xlu0 %v13621_v26, %s10483_s0  ;;  %3759 = vrot.lane.b32.xlu1 %v13625_v48, %s10483_s0  ;;  %v13638_v31 = vmax.f32 %v16526_v54, %v16525_v30  ;;  %v13642_v21 = vmax.f32 %v16528_v61, %v16527_v10  ;;  %v16531_v10 = vld [vmem:[#allocation324_spill] sm:$0xff]  ;;  %v16532_v61 = vld [vmem:[#allocation102_spill] sm:$0xff] }
 0x3db   :  { %v4844_v62 = vpack.c.bf16 %v4669_v55, %v4668_v44  ;;  %v4446_v53 = vadd.f32 %v13327_v32, %v4215_v43  ;;  %v4447_v18 = vadd.f32 %v13327_v32, %v4216_v60  ;;  %v16530_v60 = vld [vmem:[#allocation101_spill] sm:$0xff] }
 0x3dc   :  { %16529 = vst [vmem:[#allocation127_spill] sm:$0xff] %v13642_v21  ;;  %v5166_v58 = vsel %vm4926_vm6, %v5163_v29, %v5165_v3  ;;  %v3646_v41 = vpop.permute.xlu0 %3645  ;;  %v3648_v24 = vpop.permute.xlu1 %3647 }
 0x3dd   :  { %5203 = vst.msk [vmem:[#allocation2 + $0x1c8] sm:$0xff] %vm4908_vm3, %v5166_v58  ;;  %v5167_v16 = vrot.slane %v4844_v62, 4  ;;  %v4670_v55 = vmax.f32 %v4446_v53, 0.0  ;;  %v4671_v44 = vmax.f32 %v4447_v18, 0.0  ;;  %v4217_v43 = vmax.f32 %v13111_v7, %v3646_v41  ;;  %v16533_v53 = vld [vmem:[#allocation325_spill] sm:$0xff]  ;;  %v16534_v18 = vld [vmem:[#allocation106_spill] sm:$0xff] }
 0x3de   :  { %v4218_v59 = vmax.f32 %v16530_v60, %v3648_v24  ;;  %3761 = vrot.lane.b32.xlu0 %v13638_v31, %s10483_s0  ;;  %3763 = vrot.lane.b32.xlu1 %v13642_v21, %s10483_s0  ;;  %v13656_v62 = vmax.f32 %v16532_v61, %v16531_v10  ;;  %v13660_v7 = vmax.f32 %v16534_v18, %v16533_v53  ;;  %v16536_v10 = vld [vmem:[#allocation322_spill] sm:$0xff]  ;;  %v16539_v61 = vld [vmem:[#allocation104_spill] sm:$0xff] }
 0x3df   :  { %v5168_v30 = vsel %vm4926_vm6, %v5165_v3, %v5167_v16  ;;  %v4845_v29 = vpack.c.bf16 %v4671_v44, %v4670_v55  ;;  %v4448_v54 = vadd.f32 %v13327_v32, %v4217_v43 }
 0x3e0   :  { %16535 = vst [vmem:[#allocation131_spill] sm:$0xff] %v13660_v7  ;;  %5204 = vst.msk [vmem:[#allocation2 + $0x1d0] sm:$0xff] %vm4908_vm3, %v5168_v30  ;;  %v4449_v58 = vadd.f32 %v13327_v32, %v4218_v59  ;;  %v3650_v41 = vpop.permute.xlu0 %3649  ;;  %v3652_v24 = vpop.permute.xlu1 %3651 }
 0x3e1   :  { %v5169_v60 = vrot.slane %v4845_v29, 4  ;;  %v4672_v21 = vmax.f32 %v4448_v54, 0.0  ;;  %v4219_v3 = vmax.f32 %v13130_v39, %v3650_v41  ;;  %v4220_v55 = vmax.f32 %v13134_v13, %v3652_v24  ;;  %v16537_v29 = vld [vmem:[#allocation100_spill] sm:$0xff]  ;;  %v16538_v39 = vld [vmem:[#allocation323_spill] sm:$0xff] }
 0x3e2   :  { %v4673_v44 = vmax.f32 %v4449_v58, 0.0  ;;  %3765 = vrot.lane.b32.xlu0 %v13656_v62, %s10483_s0  ;;  %3767 = vrot.lane.b32.xlu1 %v13660_v7, %s10483_s0  ;;  %v13675_v54 = vmax.f32 %v16537_v29, %v16536_v10  ;;  %v13679_v13 = vmax.f32 %v16539_v61, %v16538_v39 }
 0x3e3   :  { %v5170_v43 = vsel %vm4926_vm6, %v5167_v16, %v5169_v60  ;;  %v4450_v30 = vadd.f32 %v13327_v32, %v4219_v3  ;;  %v4451_v59 = vadd.f32 %v13327_v32, %v4220_v55  ;;  %v16540_v3 = vld [vmem:[#allocation105_spill] sm:$0xff] }
 0x3e4   :  { %5205 = vst.msk [vmem:[#allocation2 + $0x1d8] sm:$0xff] %vm4908_vm3, %v5170_v43  ;;  %v4846_v53 = vpack.c.bf16 %v4673_v44, %v4672_v21  ;;  %v3654_v18 = vpop.permute.xlu0 %3653  ;;  %v3656_v58 = vpop.permute.xlu1 %3655  ;;  %v16541_v44 = vld [vmem:[#allocation328_spill] sm:$0xff]  ;;  %v16542_v43 = vld [vmem:[#allocation110_spill] sm:$0xff] }
 0x3e5   :  { %v4674_v41 = vmax.f32 %v4450_v30, 0.0  ;;  %v4675_v24 = vmax.f32 %v4451_v59, 0.0  ;;  %v4221_v16 = vmax.f32 %v13147_v35, %v3654_v18  ;;  %v4222_v7 = vmax.f32 %v16540_v3, %v3656_v58  ;;  %v16543_v59 = vld [vmem:[#allocation329_spill] sm:$0xff]  ;;  %v16544_v35 = vld [vmem:[#allocation114_spill] sm:$0xff] }
 0x3e6   :  { %v5171_v55 = vrot.slane %v4846_v53, 4  ;;  %3769 = vrot.lane.b32.xlu0 %v13675_v54, %s10483_s0  ;;  %3771 = vrot.lane.b32.xlu1 %v13679_v13, %s10483_s0  ;;  %v13692_v30 = vmax.f32 %v16542_v43, %v16541_v44  ;;  %v13696_v39 = vmax.f32 %v16544_v35, %v16543_v59  ;;  %v16545_v43 = vld [vmem:[#allocation326_spill] sm:$0xff]  ;;  %v16546_v59 = vld [vmem:[#allocation108_spill] sm:$0xff] }
 0x3e7   :  { %v4847_v10 = vpack.c.bf16 %v4675_v24, %v4674_v41  ;;  %v4452_v29 = vadd.f32 %v13327_v32, %v4221_v16  ;;  %v4453_v21 = vadd.f32 %v13327_v32, %v4222_v7 }
 0x3e8   :  { %v5172_v61 = vsel %vm4926_vm6, %v5169_v60, %v5171_v55  ;;  %v3658_v53 = vpop.permute.xlu0 %3657  ;;  %v3660_v18 = vpop.permute.xlu1 %3659 }
 0x3e9   :  { %5206 = vst.msk [vmem:[#allocation2 + $0x1e0] sm:$0xff] %vm4908_vm3, %v5172_v61  ;;  %v5173_v58 = vrot.slane %v4847_v10, 4  ;;  %v4676_v41 = vmax.f32 %v4452_v29, 0.0  ;;  %v4677_v24 = vmax.f32 %v4453_v21, 0.0  ;;  %v4223_v16 = vmax.f32 %v13165_v57, %v3658_v53  ;;  %v16547_v29 = vld [vmem:[#allocation327_spill] sm:$0xff]  ;;  %v16548_v21 = vld [vmem:[#allocation112_spill] sm:$0xff] }
 0x3ea   :  { %v4224_v7 = vmax.f32 %v13169_v50, %v3660_v18  ;;  %3773 = vrot.lane.b32.xlu0 %v13692_v30, %s10483_s0  ;;  %3775 = vrot.lane.b32.xlu1 %v13696_v39, %s10483_s0  ;;  %v13710_v10 = vmax.f32 %v16546_v59, %v16545_v43  ;;  %v13714_v57 = vmax.f32 %v16548_v21, %v16547_v29  ;;  %v16550_v43 = vld [vmem:[#allocation332_spill] sm:$0xff] }
 0x3eb   :  { %v5174_v3 = vsel %vm4926_vm6, %v5171_v55, %v5173_v58  ;;  %v4848_v60 = vpack.c.bf16 %v4677_v24, %v4676_v41  ;;  %v4454_v44 = vadd.f32 %v13327_v32, %v4223_v16  ;;  %v16553_v59 = vld [vmem:[#allocation124_spill] sm:$0xff] }
 0x3ec   :  { %16549 = vst [vmem:[#allocation141_spill] sm:$0xff] %v13714_v57  ;;  %5207 = vst.msk [vmem:[#allocation2 + $0x1e8] sm:$0xff] %vm4908_vm3, %v5174_v3  ;;  %v4455_v50 = vadd.f32 %v13327_v32, %v4224_v7  ;;  %v3662_v35 = vpop.permute.xlu0 %3661  ;;  %v3664_v61 = vpop.permute.xlu1 %3663 }
 0x3ed   :  { %v5175_v53 = vrot.slane %v4848_v60, 4  ;;  %v4678_v18 = vmax.f32 %v4454_v44, 0.0  ;;  %v4225_v55 = vmax.f32 %v13184_v37, %v3662_v35  ;;  %v4226_v41 = vmax.f32 %v13188_v42, %v3664_v61  ;;  %v16551_v60 = vld [vmem:[#allocation118_spill] sm:$0xff]  ;;  %v16552_v37 = vld [vmem:[#allocation333_spill] sm:$0xff] }
 0x3ee   :  { %v4679_v24 = vmax.f32 %v4455_v50, 0.0  ;;  %3777 = vrot.lane.b32.xlu0 %v13710_v10, %s10483_s0  ;;  %3779 = vrot.lane.b32.xlu1 %v13714_v57, %s10483_s0  ;;  %v13729_v44 = vmax.f32 %v16551_v60, %v16550_v43  ;;  %v13733_v42 = vmax.f32 %v16553_v59, %v16552_v37 }
 0x3ef   :  { %v5176_v16 = vsel %vm4926_vm6, %v5173_v58, %v5175_v53  ;;  %v4456_v3 = vadd.f32 %v13327_v32, %v4225_v55  ;;  %v4457_v7 = vadd.f32 %v13327_v32, %v4226_v41  ;;  %v16555_v55 = vld [vmem:[#allocation99_spill] sm:$0xff] }
 0x3f0   :  { %16554 = vst [vmem:[#allocation147_spill] sm:$0xff] %v13733_v42  ;;  %5208 = vst.msk [vmem:[#allocation2 + $0x1f0] sm:$0xff] %vm4908_vm3, %v5176_v16  ;;  %v4849_v29 = vpack.c.bf16 %v4679_v24, %v4678_v18  ;;  %v3666_v21 = vpop.permute.xlu0 %3665  ;;  %v3668_v50 = vpop.permute.xlu1 %3667  ;;  %v16556_v24 = vld [vmem:[#allocation330_spill] sm:$0xff]  ;;  %v16557_v16 = vld [vmem:[#allocation116_spill] sm:$0xff] }
 0x3f1   :  { %v4680_v35 = vmax.f32 %v4456_v3, 0.0  ;;  %v4681_v61 = vmax.f32 %v4457_v7, 0.0  ;;  %v4227_v58 = vmax.f32 %v13201_v15, %v3666_v21  ;;  %v4228_v57 = vmax.f32 %v16555_v55, %v3668_v50  ;;  %v16558_v7 = vld [vmem:[#allocation331_spill] sm:$0xff]  ;;  %v16559_v15 = vld [vmem:[#allocation120_spill] sm:$0xff] }
 0x3f2   :  { %v5177_v41 = vrot.slane %v4849_v29, 4  ;;  %3781 = vrot.lane.b32.xlu0 %v13729_v44, %s10483_s0  ;;  %3783 = vrot.lane.b32.xlu1 %v13733_v42, %s10483_s0  ;;  %v13746_v3 = vmax.f32 %v16557_v16, %v16556_v24  ;;  %v13750_v37 = vmax.f32 %v16559_v15, %v16558_v7  ;;  %v16563_v7 = vld [vmem:[#allocation336_spill] sm:$0xff]  ;;  %v16564_v15 = vld [vmem:[#allocation130_spill] sm:$0xff] }
 0x3f3   :  { %v4850_v43 = vpack.c.bf16 %v4681_v61, %v4680_v35  ;;  %v4458_v60 = vadd.f32 %v13327_v32, %v4227_v58  ;;  %v4459_v18 = vadd.f32 %v13327_v32, %v4228_v57  ;;  %v16561_v58 = vld [vmem:[#allocation320_spill] sm:$0xff]  ;;  %v16562_v57 = vld [vmem:[#allocation103_spill] sm:$0xff] }
 0x3f4   :  { %16560 = vst [vmem:[#allocation139_spill] sm:$0xff] %v13750_v37  ;;  %v5178_v59 = vsel %vm4926_vm6, %v5175_v53, %v5177_v41  ;;  %v3670_v29 = vpop.permute.xlu0 %3669  ;;  %v3672_v21 = vpop.permute.xlu1 %3671 }
 0x3f5   :  { %5209 = vst.msk [vmem:[#allocation2 + $0x1f8] sm:$0xff] %vm4908_vm3, %v5178_v59  ;;  %v5179_v50 = vrot.slane %v4850_v43, 4  ;;  %v4682_v35 = vmax.f32 %v4458_v60, 0.0  ;;  %v4683_v61 = vmax.f32 %v4459_v18, 0.0  ;;  %v4229_v55 = vmax.f32 %v16561_v58, %v3670_v29  ;;  %v16565_v60 = vld [vmem:[#allocation337_spill] sm:$0xff]  ;;  %v16566_v18 = vld [vmem:[#allocation136_spill] sm:$0xff] }
 0x3f6   :  { %v4230_v42 = vmax.f32 %v16562_v57, %v3672_v21  ;;  %3785 = vrot.lane.b32.xlu0 %v13746_v3, %s10483_s0  ;;  %3787 = vrot.lane.b32.xlu1 %v13750_v37, %s10483_s0  ;;  %v13764_v43 = vmax.f32 %v16564_v15, %v16563_v7  ;;  %v13768_v59 = vmax.f32 %v16566_v18, %v16565_v60  ;;  %v16570_v15 = vld [vmem:[#allocation335_spill] sm:$0xff]  ;;  %v16571_v60 = vld [vmem:[#allocation132_spill] sm:$0xff] }
 0x3f7   :  { %v5180_v24 = vsel %vm4926_vm6, %v5177_v41, %v5179_v50  ;;  %v4851_v53 = vpack.c.bf16 %v4683_v61, %v4682_v35  ;;  %v4460_v16 = vadd.f32 %v13327_v32, %v4229_v55  ;;  %v16567_v35 = vld [vmem:[#allocation109_spill] sm:$0xff]  ;;  %v13788_v18 = vmax.f32 %v16571_v60, %v16570_v15 }
 0x3f8   :  { %5210 = vst.msk [vmem:[#allocation2 + $0x200] sm:$0xff] %vm4908_vm3, %v5180_v24  ;;  %v4461_v29 = vadd.f32 %v13327_v32, %v4230_v42  ;;  %v3674_v21 = vpop.permute.xlu0 %3673  ;;  %v3676_v58 = vpop.permute.xlu1 %3675 }
 0x3f9   :  { %v5181_v57 = vrot.slane %v4851_v53, 4  ;;  %v4684_v37 = vmax.f32 %v4460_v16, 0.0  ;;  %v4231_v41 = vmax.f32 %v13238_v4, %v3674_v21  ;;  %v4232_v61 = vmax.f32 %v16567_v35, %v3676_v58  ;;  %v16568_v53 = vld [vmem:[#allocation334_spill] sm:$0xff]  ;;  %v16569_v16 = vld [vmem:[#allocation128_spill] sm:$0xff]  ;;  %16572 = vst [vmem:[#allocation143_spill] sm:$0xff] %v13788_v18 }
 0x3fa   :  { %v4685_v55 = vmax.f32 %v4461_v29, 0.0  ;;  %3789 = vrot.lane.b32.xlu0 %v13764_v43, %s10483_s0  ;;  %3791 = vrot.lane.b32.xlu1 %v13768_v59, %s10483_s0  ;;  %v13784_v4 = vmax.f32 %v16569_v16, %v16568_v53 }
 0x3fb   :  { %v5182_v7 = vsel %vm4926_vm6, %v5179_v50, %v5181_v57  ;;  %5212 = vst.msk [vmem:[#allocation2 + $0x210] sm:$0xf] %vm4910_vm5, %v5181_v57  ;;  %v4462_v42 = vadd.f32 %v13327_v32, %v4231_v41  ;;  %v4463_v24 = vadd.f32 %v13327_v32, %v4232_v61 }
 0x3fc   :  { %5211 = vst.msk [vmem:[#allocation2 + $0x208] sm:$0xff] %vm4908_vm3, %v5182_v7  ;;  %v4852_v29 = vpack.c.bf16 %v4685_v55, %v4684_v37  ;;  %v3678_v21 = vpop.permute.xlu0 %3677  ;;  %v3680_v58 = vpop.permute.xlu1 %3679  ;;  %v16573_v55 = vld [vmem:[#allocation340_spill] sm:$0xff]  ;;  %v16574_v7 = vld [vmem:[#allocation142_spill] sm:$0xff] }
 0x3fd   :  { %v4686_v50 = vmax.f32 %v4462_v42, 0.0  ;;  %v4687_v35 = vmax.f32 %v4463_v24, 0.0  ;;  %v4233_v57 = vmax.f32 %v13255_v9, %v3678_v21  ;;  %v4234_v41 = vmax.f32 %v13259_v47, %v3680_v58  ;;  %v16576_v24 = vld [vmem:[#allocation341_spill] sm:$0xff]  ;;  %v16577_v9 = vld [vmem:[#allocation148_spill] sm:$0xff] }
 0x3fe   :  { %v5232_v61 = vrot.slane %v4852_v29, 4  ;;  %3793 = vrot.lane.b32.xlu0 %v13784_v4, %s10483_s0  ;;  %3795 = vrot.lane.b32.xlu1 %v13788_v18, %s10483_s0  ;;  %v13801_v42 = vmax.f32 %v16574_v7, %v16573_v55  ;;  %v13805_v15 = vmax.f32 %v16577_v9, %v16576_v24  ;;  %v16581_v24 = vld [vmem:[#allocation338_spill] sm:$0xff]  ;;  %v16582_v9 = vld [vmem:[#allocation140_spill] sm:$0xff] }
 0x3ff   :  { %v4853_v53 = vpack.c.bf16 %v4687_v35, %v4686_v50  ;;  %v4464_v16 = vadd.f32 %v13327_v32, %v4233_v57  ;;  %v4465_v37 = vadd.f32 %v13327_v32, %v4234_v41  ;;  %v16579_v50 = vld [vmem:[#allocation113_spill] sm:$0xff]  ;;  %v16580_v57 = vld [vmem:[#allocation107_spill] sm:$0xff] }
 0x400   :  { %16575 = vst [vmem:[#allocation154_spill] sm:$0xff] %v13801_v42  ;;  %16578 = vst [vmem:[#allocation158_spill] sm:$0xff] %v13805_v15  ;;  %v3682_v47 = vpop.permute.xlu0 %3681  ;;  %v3684_v60 = vpop.permute.xlu1 %3683 }
 0x401   :  { %5274 = vst.msk [vmem:[#allocation2 + $0x228] sm:$0xf0] %vm4969_vm4, %v5232_v61  ;;  %v5233_v29 = vrot.slane %v4853_v53, 4  ;;  %v4688_v21 = vmax.f32 %v4464_v16, 0.0  ;;  %v4689_v58 = vmax.f32 %v4465_v37, 0.0  ;;  %v4235_v35 = vmax.f32 %v16579_v50, %v3682_v47  ;;  %v16583_v16 = vld [vmem:[#allocation339_spill] sm:$0xff] }
 0x402   :  { %v4236_v18 = vmax.f32 %v16580_v57, %v3684_v60  ;;  %3797 = vrot.lane.b32.xlu0 %v13801_v42, %s10483_s0  ;;  %3799 = vrot.lane.b32.xlu1 %v13805_v15, %s10483_s0  ;;  %v13818_v53 = vmax.f32 %v16582_v9, %v16581_v24  ;;  %v16584_v37 = vld [vmem:[#allocation144_spill] sm:$0xff] }
 0x403   :  { %v5234_v41 = vsel %vm4926_vm6, %v5232_v61, %v5233_v29  ;;  %v4854_v55 = vpack.c.bf16 %v4689_v58, %v4688_v21  ;;  %v4466_v7 = vadd.f32 %v13327_v32, %v4235_v35  ;;  %v13822_v47 = vmax.f32 %v16584_v37, %v16583_v16  ;;  %v16585_v24 = vld [vmem:[#allocation344_spill] sm:$0xff] }
 0x404   :  { %5275 = vst.msk [vmem:[#allocation2 + $0x230] sm:$0xff] %vm4908_vm3, %v5234_v41  ;;  %v4467_v60 = vadd.f32 %v13327_v32, %v4236_v18  ;;  %v3686_v50 = vpop.permute.xlu0 %3685  ;;  %v3688_v57 = vpop.permute.xlu1 %3687  ;;  %v16588_v9 = vld [vmem:[#allocation164_spill] sm:$0xff] }
 0x405   :  { %v5235_v15 = vrot.slane %v4854_v55, 4  ;;  %v4690_v42 = vmax.f32 %v4466_v7, 0.0  ;;  %v4237_v61 = vmax.f32 %v13293_v46, %v3686_v50  ;;  %v4238_v21 = vmax.f32 %v13297_v5, %v3688_v57  ;;  %v16586_v55 = vld [vmem:[#allocation160_spill] sm:$0xff]  ;;  %v16587_v46 = vld [vmem:[#allocation345_spill] sm:$0xff] }
 0x406   :  { %v4691_v58 = vmax.f32 %v4467_v60, 0.0  ;;  %3801 = vrot.lane.b32.xlu0 %v13818_v53, %s10483_s0  ;;  %3803 = vrot.lane.b32.xlu1 %v13822_v47, %s10483_s0  ;;  %v13837_v7 = vmax.f32 %v16586_v55, %v16585_v24  ;;  %v13841_v5 = vmax.f32 %v16588_v9, %v16587_v46 }
 0x407   :  { %v5236_v35 = vsel %vm4926_vm6, %v5233_v29, %v5235_v15  ;;  %v4468_v41 = vadd.f32 %v13327_v32, %v4237_v61  ;;  %v4469_v18 = vadd.f32 %v13327_v32, %v4238_v21 }
 0x408   :  { %5276 = vst.msk [vmem:[#allocation2 + $0x238] sm:$0xff] %vm4908_vm3, %v5236_v35  ;;  %v4855_v16 = vpack.c.bf16 %v4691_v58, %v4690_v42  ;;  %v3690_v37 = vpop.permute.xlu0 %3689  ;;  %v3692_v60 = vpop.permute.xlu1 %3691  ;;  %v16589_v58 = vld [vmem:[#allocation342_spill] sm:$0xff]  ;;  %v16590_v35 = vld [vmem:[#allocation159_spill] sm:$0xff] }
 0x409   :  { %v4692_v50 = vmax.f32 %v4468_v41, 0.0  ;;  %v4693_v57 = vmax.f32 %v4469_v18, 0.0  ;;  %v4239_v29 = vmax.f32 %v13309_v17, %v3690_v37  ;;  %v4240_v61 = vmax.f32 %v13313_v23, %v3692_v60  ;;  %v16591_v18 = vld [vmem:[#allocation343_spill] sm:$0xff]  ;;  %v16592_v17 = vld [vmem:[#allocation161_spill] sm:$0xff] }
 0x40a   :  { %v5237_v21 = vrot.slane %v4855_v16, 4  ;;  %3805 = vrot.lane.b32.xlu0 %v13837_v7, %s10483_s0  ;;  %3807 = vrot.lane.b32.xlu1 %v13841_v5, %s10483_s0  ;;  %v13854_v41 = vmax.f32 %v16590_v35, %v16589_v58  ;;  %v13858_v46 = vmax.f32 %v16592_v17, %v16591_v18  ;;  %v16593_v35 = vld [vmem:[#allocation348_spill] sm:$0xff] }
 0x40b   :  { %v4856_v24 = vpack.c.bf16 %v4693_v57, %v4692_v50  ;;  %v4470_v55 = vadd.f32 %v13327_v32, %v4239_v29  ;;  %v4471_v42 = vadd.f32 %v13327_v32, %v4240_v61  ;;  %v16594_v18 = vld [vmem:[#allocation176_spill] sm:$0xff] }
 0x40c   :  { %v5238_v23 = vsel %vm4926_vm6, %v5235_v15, %v5237_v21  ;;  %v3694_v9 = vpop.permute.xlu0 %3693  ;;  %v3696_v16 = vpop.permute.xlu1 %3695 }
 0x40d   :  { %5277 = vst.msk [vmem:[#allocation2 + $0x240] sm:$0xff] %vm4908_vm3, %v5238_v23  ;;  %v5239_v37 = vrot.slane %v4856_v24, 4  ;;  %v4694_v60 = vmax.f32 %v4470_v55, 0.0  ;;  %v4695_v50 = vmax.f32 %v4471_v42, 0.0  ;;  %v4241_v57 = vmax.f32 %v13332_v34, %v3694_v9  ;;  %v16595_v55 = vld [vmem:[#allocation349_spill] sm:$0xff]  ;;  %v16596_v42 = vld [vmem:[#allocation180_spill] sm:$0xff] }
 0x40e   :  { %v4242_v29 = vmax.f32 %v13336_v36, %v3696_v16  ;;  %3809 = vrot.lane.b32.xlu0 %v13854_v41, %s10483_s0  ;;  %3811 = vrot.lane.b32.xlu1 %v13858_v46, %s10483_s0  ;;  %v13872_v24 = vmax.f32 %v16594_v18, %v16593_v35  ;;  %v13876_v34 = vmax.f32 %v16596_v42, %v16595_v55  ;;  %v16597_v35 = vld [vmem:[#allocation346_spill] sm:$0xff]  ;;  %v16600_v18 = vld [vmem:[#allocation177_spill] sm:$0xff] }
 0x40f   :  { %v5240_v61 = vsel %vm4926_vm6, %v5237_v21, %v5239_v37  ;;  %v4857_v15 = vpack.c.bf16 %v4695_v50, %v4694_v60  ;;  %v4472_v58 = vadd.f32 %v13327_v32, %v4241_v57 }
 0x410   :  { %5278 = vst.msk [vmem:[#allocation2 + $0x248] sm:$0xff] %vm4908_vm3, %v5240_v61  ;;  %v4473_v36 = vadd.f32 %v13327_v32, %v4242_v29  ;;  %v3698_v17 = vpop.permute.xlu0 %3697  ;;  %v3700_v23 = vpop.permute.xlu1 %3699 }
 0x411   :  { %v5241_v9 = vrot.slane %v4857_v15, 4  ;;  %v4696_v16 = vmax.f32 %v4472_v58, 0.0  ;;  %v4243_v21 = vmax.f32 %v13351_v63, %v3698_v17  ;;  %v4244_v60 = vmax.f32 %v13355_v45, %v3700_v23  ;;  %v16598_v15 = vld [vmem:[#allocation175_spill] sm:$0xff] }
 0x412   :  { %v4697_v50 = vmax.f32 %v4473_v36, 0.0  ;;  %3813 = vrot.lane.b32.xlu0 %v13872_v24, %s10483_s0  ;;  %3815 = vrot.lane.b32.xlu1 %v13876_v34, %s10483_s0  ;;  %v13891_v58 = vmax.f32 %v16598_v15, %v16597_v35  ;;  %v16599_v63 = vld [vmem:[#allocation347_spill] sm:$0xff] }
 0x413   :  { %v5242_v57 = vsel %vm4926_vm6, %v5239_v37, %v5241_v9  ;;  %v4474_v61 = vadd.f32 %v13327_v32, %v4243_v21  ;;  %v4475_v29 = vadd.f32 %v13327_v32, %v4244_v60  ;;  %v13895_v45 = vmax.f32 %v16600_v18, %v16599_v63 }
 0x414   :  { %5279 = vst.msk [vmem:[#allocation2 + $0x250] sm:$0xff] %vm4908_vm3, %v5242_v57  ;;  %v4858_v55 = vpack.c.bf16 %v4697_v50, %v4696_v16  ;;  %v3702_v42 = vpop.permute.xlu0 %3701  ;;  %v3704_v36 = vpop.permute.xlu1 %3703  ;;  %v13908_v16 = vld [vmem:[%s15399_s2] ss:$0 sm:$0xff]  ;;  %v16602_v57 = vld [vmem:[#allocation190_spill] sm:$0xff] }
 0x415   :  { %v4698_v17 = vmax.f32 %v4474_v61, 0.0  ;;  %v4699_v23 = vmax.f32 %v4475_v29, 0.0  ;;  %v4245_v37 = vmax.f32 %v13368_v6, %v3702_v42  ;;  %v4246_v21 = vmax.f32 %v13372_v38, %v3704_v36  ;;  %v16601_v6 = vld [vmem:[#allocation353_spill] sm:$0xff]  ;;  %v16603_v61 = vld [vmem:[#allocation354_spill] sm:$0xff] }
 0x416   :  { %v5243_v60 = vrot.slane %v4858_v55, 4  ;;  %3817 = vrot.lane.b32.xlu0 %v13891_v58, %s10483_s0  ;;  %3819 = vrot.lane.b32.xlu1 %v13895_v45, %s10483_s0  ;;  %v13913_v38 = vmax.f32 %v16602_v57, %v16601_v6  ;;  %v16604_v29 = vld [vmem:[#allocation194_spill] sm:$0xff]  ;;  %v16605_v57 = vld [vmem:[#allocation351_spill] sm:$0xff] }
 0x417   :  { %v4859_v35 = vpack.c.bf16 %v4699_v23, %v4698_v17  ;;  %v4476_v15 = vadd.f32 %v13327_v32, %v4245_v37  ;;  %v4477_v50 = vadd.f32 %v13908_v16, %v4246_v21  ;;  %v13917_v63 = vmax.f32 %v16604_v29, %v16603_v61  ;;  %v16606_v61 = vld [vmem:[#allocation189_spill] sm:$0xff] }
 0x418   :  { %v5244_v18 = vsel %vm4926_vm6, %v5241_v9, %v5243_v60  ;;  %v3706_v55 = vpop.permute.xlu0 %3705  ;;  %v3708_v42 = vpop.permute.xlu1 %3707 }
 0x419   :  { %5280 = vst.msk [vmem:[#allocation2 + $0x258] sm:$0xff] %vm4908_vm3, %v5244_v18  ;;  %v5245_v32 = vrot.slane %v4859_v35, 4  ;;  %v4700_v36 = vmax.f32 %v4476_v15, 0.0  ;;  %v4701_v17 = vmax.f32 %v4477_v50, 0.0  ;;  %v4247_v23 = vmax.f32 %v13386_v8, %v3706_v55  ;;  %v16607_v15 = vld [vmem:[#allocation352_spill] sm:$0xff]  ;;  %v16608_v50 = vld [vmem:[#allocation191_spill] sm:$0xff] }
 0x41a   :  { %v4248_v37 = vmax.f32 %v13390_v2, %v3708_v42  ;;  %3821 = vrot.lane.b32.xlu0 %v13913_v38, %s10483_s0  ;;  %3823 = vrot.lane.b32.xlu1 %v13917_v63, %s10483_s0  ;;  %v13931_v35 = vmax.f32 %v16606_v61, %v16605_v57  ;;  %v13935_v8 = vmax.f32 %v16608_v50, %v16607_v15  ;;  %v16609_v57 = vld [vmem:[#allocation125_spill] sm:$0xff]  ;;  %v16612_v61 = vld [vmem:[#allocation210_spill] sm:$0xff] }
 0x41b   :  { %v5246_v21 = vsel %vm4926_vm6, %v5243_v60, %v5245_v32  ;;  %v4860_v9 = vpack.c.bf16 %v4701_v17, %v4700_v36  ;;  %v4478_v6 = vadd.f32 %v13908_v16, %v4247_v23 }
 0x41c   :  { %5281 = vst.msk [vmem:[#allocation2 + $0x260] sm:$0xff] %vm4908_vm3, %v5246_v21  ;;  %v4479_v2 = vadd.f32 %v13908_v16, %v4248_v37  ;;  %v3710_v29 = vpop.permute.xlu0 %3709  ;;  %v3712_v18 = vpop.permute.xlu1 %3711 }
 0x41d   :  { %v5247_v55 = vrot.slane %v4860_v9, 4  ;;  %v4702_v42 = vmax.f32 %v4478_v6, 0.0  ;;  %v4249_v60 = vmax.f32 %v13405_v14, %v3710_v29  ;;  %v4250_v36 = vmax.f32 %v13409_v20, %v3712_v18  ;;  %v16610_v9 = vld [vmem:[#allocation206_spill] sm:$0xff] }
 0x41e   :  { %v4703_v17 = vmax.f32 %v4479_v2, 0.0  ;;  %3825 = vrot.lane.b32.xlu0 %v13931_v35, %s10483_s0  ;;  %3827 = vrot.lane.b32.xlu1 %v13935_v8, %s10483_s0  ;;  %v13950_v6 = vmax.f32 %v16610_v9, %v16609_v57  ;;  %v16611_v14 = vld [vmem:[#allocation6_spill] sm:$0xff] }
 0x41f   :  { %v5248_v23 = vsel %vm4926_vm6, %v5245_v32, %v5247_v55  ;;  %v4480_v21 = vadd.f32 %v13908_v16, %v4249_v60  ;;  %v4481_v37 = vadd.f32 %v13908_v16, %v4250_v36  ;;  %v13954_v20 = vmax.f32 %v16612_v61, %v16611_v14 }
 0x420   :  { %5282 = vst.msk [vmem:[#allocation2 + $0x268] sm:$0xff] %vm4908_vm3, %v5248_v23  ;;  %v4861_v15 = vpack.c.bf16 %v4703_v17, %v4702_v42  ;;  %v3714_v50 = vpop.permute.xlu0 %3713  ;;  %v3716_v2 = vpop.permute.xlu1 %3715  ;;  %v16613_v17 = vld [vmem:[#allocation357_spill] sm:$0xff] }
 0x421   :  { %v4704_v29 = vmax.f32 %v4480_v21, 0.0  ;;  %v4705_v18 = vmax.f32 %v4481_v37, 0.0  ;;  %v4251_v32 = vmax.f32 %v13422_v52, %v3714_v50  ;;  %v4252_v60 = vmax.f32 %v13426_v51, %v3716_v2  ;;  %v16614_v23 = vld [vmem:[#allocation205_spill] sm:$0xff]  ;;  %v16615_v37 = vld [vmem:[#allocation358_spill] sm:$0xff]  ;;  %v16616_v52 = vld [vmem:[#allocation207_spill] sm:$0xff] }
 0x422   :  { %v5249_v36 = vrot.slane %v4861_v15, 4  ;;  %3829 = vrot.lane.b32.xlu0 %v13950_v6, %s10483_s0  ;;  %3831 = vrot.lane.b32.xlu1 %v13954_v20, %s10483_s0  ;;  %v13967_v21 = vmax.f32 %v16614_v23, %v16613_v17  ;;  %v13971_v14 = vmax.f32 %v16616_v52, %v16615_v37  ;;  %v16617_v23 = vld [vmem:[#allocation151_spill] sm:$0xff]  ;;  %v16618_v37 = vld [vmem:[#allocation222_spill] sm:$0xff] }
 0x423   :  { %v4862_v57 = vpack.c.bf16 %v4705_v18, %v4704_v29  ;;  %v4482_v9 = vadd.f32 %v13908_v16, %v4251_v32  ;;  %v4483_v42 = vadd.f32 %v13908_v16, %v4252_v60 }
 0x424   :  { %v5250_v51 = vsel %vm4926_vm6, %v5247_v55, %v5249_v36  ;;  %v3718_v61 = vpop.permute.xlu0 %3717  ;;  %v3720_v15 = vpop.permute.xlu1 %3719 }
 0x425   :  { %5283 = vst.msk [vmem:[#allocation2 + $0x270] sm:$0xff] %vm4908_vm3, %v5250_v51  ;;  %v5251_v50 = vrot.slane %v4862_v57, 4  ;;  %v4706_v2 = vmax.f32 %v4482_v9, 0.0  ;;  %v4707_v29 = vmax.f32 %v4483_v42, 0.0  ;;  %v4253_v18 = vmax.f32 %v13440_v28, %v3718_v61  ;;  %v16619_v9 = vld [vmem:[#allocation13_spill] sm:$0xff]  ;;  %v16620_v42 = vld [vmem:[#allocation226_spill] sm:$0xff] }
 0x426   :  { %v4254_v32 = vmax.f32 %v13444_v25, %v3720_v15  ;;  %3833 = vrot.lane.b32.xlu0 %v13967_v21, %s10483_s0  ;;  %3835 = vrot.lane.b32.xlu1 %v13971_v14, %s10483_s0  ;;  %v13985_v57 = vmax.f32 %v16618_v37, %v16617_v23  ;;  %v13989_v28 = vmax.f32 %v16620_v42, %v16619_v9  ;;  %v16621_v23 = vld [vmem:[#allocation122_spill] sm:$0xff]  ;;  %v16624_v37 = vld [vmem:[#allocation223_spill] sm:$0xff] }
 0x427   :  { %v5252_v60 = vsel %vm4926_vm6, %v5249_v36, %v5251_v50  ;;  %v4863_v55 = vpack.c.bf16 %v4707_v29, %v4706_v2  ;;  %v4484_v17 = vadd.f32 %v13908_v16, %v4253_v18 }
 0x428   :  { %5284 = vst.msk [vmem:[#allocation2 + $0x278] sm:$0xff] %vm4908_vm3, %v5252_v60  ;;  %v4485_v25 = vadd.f32 %v13908_v16, %v4254_v32  ;;  %v3722_v52 = vpop.permute.xlu0 %3721  ;;  %v3724_v51 = vpop.permute.xlu1 %3723 }
 0x429   :  { %v5253_v61 = vrot.slane %v4863_v55, 4  ;;  %v4708_v15 = vmax.f32 %v4484_v17, 0.0  ;;  %v4255_v36 = vmax.f32 %v13459_v33, %v3722_v52  ;;  %v4256_v2 = vmax.f32 %v13463_v19, %v3724_v51  ;;  %v16622_v55 = vld [vmem:[#allocation221_spill] sm:$0xff]  ;;  %v16623_v33 = vld [vmem:[#allocation3_spill] sm:$0xff] }
 0x42a   :  { %v4709_v29 = vmax.f32 %v4485_v25, 0.0  ;;  %3837 = vrot.lane.b32.xlu0 %v13985_v57, %s10483_s0  ;;  %3839 = vrot.lane.b32.xlu1 %v13989_v28, %s10483_s0  ;;  %v14004_v17 = vmax.f32 %v16622_v55, %v16621_v23  ;;  %v14008_v19 = vmax.f32 %v16624_v37, %v16623_v33 }
 0x42b   :  { %v5254_v18 = vsel %vm4926_vm6, %v5251_v50, %v5253_v61  ;;  %v4486_v60 = vadd.f32 %v13908_v16, %v4255_v36  ;;  %v4487_v32 = vadd.f32 %v13908_v16, %v4256_v2 }
 0x42c   :  { %5285 = vst.msk [vmem:[#allocation2 + $0x280] sm:$0xff] %vm4908_vm3, %v5254_v18  ;;  %v4864_v9 = vpack.c.bf16 %v4709_v29, %v4708_v15  ;;  %v3726_v42 = vpop.permute.xlu0 %3725  ;;  %v3728_v25 = vpop.permute.xlu1 %3727  ;;  %v16625_v29 = vld [vmem:[#allocation167_spill] sm:$0xff]  ;;  %v16626_v18 = vld [vmem:[#allocation238_spill] sm:$0xff] }
 0x42d   :  { %v4710_v52 = vmax.f32 %v4486_v60, 0.0  ;;  %v4711_v51 = vmax.f32 %v4487_v32, 0.0  ;;  %v4257_v50 = vmax.f32 %v13476_v49, %v3726_v42  ;;  %v4258_v36 = vmax.f32 %v13480_v56, %v3728_v25  ;;  %v16627_v32 = vld [vmem:[#allocation21_spill] sm:$0xff]  ;;  %v16628_v49 = vld [vmem:[#allocation242_spill] sm:$0xff] }
 0x42e   :  { %v5255_v2 = vrot.slane %v4864_v9, 4  ;;  %3841 = vrot.lane.b32.xlu0 %v14004_v17, %s10483_s0  ;;  %3843 = vrot.lane.b32.xlu1 %v14008_v19, %s10483_s0  ;;  %v14021_v60 = vmax.f32 %v16626_v18, %v16625_v29  ;;  %v14025_v33 = vmax.f32 %v16628_v49, %v16627_v32  ;;  %v16632_v18 = vld [vmem:[#allocation239_spill] sm:$0xff] }
 0x42f   :  { %v4865_v23 = vpack.c.bf16 %v4711_v51, %v4710_v52  ;;  %v4488_v55 = vadd.f32 %v13908_v16, %v4257_v50  ;;  %v4489_v15 = vadd.f32 %v13908_v16, %v4258_v36 }
 0x430   :  { %v5256_v56 = vsel %vm4926_vm6, %v5253_v61, %v5255_v2  ;;  %v3730_v37 = vpop.permute.xlu0 %3729  ;;  %v3732_v9 = vpop.permute.xlu1 %3731 }
 0x431   :  { %5286 = vst.msk [vmem:[#allocation2 + $0x288] sm:$0xff] %vm4908_vm3, %v5256_v56  ;;  %v5257_v42 = vrot.slane %v4865_v23, 4  ;;  %v4712_v25 = vmax.f32 %v4488_v55, 0.0  ;;  %v4713_v52 = vmax.f32 %v4489_v15, 0.0  ;;  %v4259_v51 = vmax.f32 %v13494_v1, %v3730_v37  ;;  %v16629_v23 = vld [vmem:[#allocation145_spill] sm:$0xff]  ;;  %v16631_v1 = vld [vmem:[#allocation11_spill] sm:$0xff] }
 0x432   :  { %v4260_v50 = vmax.f32 %v13498_v22, %v3732_v9  ;;  %3845 = vrot.lane.b32.xlu0 %v14021_v60, %s10483_s0  ;;  %3847 = vrot.lane.b32.xlu1 %v14025_v33, %s10483_s0  ;;  %v16630_v55 = vld [vmem:[#allocation237_spill] sm:$0xff]  ;;  %v14044_v22 = vmax.f32 %v16632_v18, %v16631_v1 }
 0x433   :  { %v5258_v36 = vsel %vm4926_vm6, %v5255_v2, %v5257_v42  ;;  %5288 = vst.msk [vmem:[#allocation2 + $0x298] sm:$0xf] %vm4910_vm5, %v5257_v42  ;;  %v4866_v61 = vpack.c.bf16 %v4713_v52, %v4712_v25  ;;  %v4490_v29 = vadd.f32 %v13908_v16, %v4259_v51  ;;  %v14040_v15 = vmax.f32 %v16630_v55, %v16629_v23 }
 0x434   :  { %5287 = vst.msk [vmem:[#allocation2 + $0x290] sm:$0xff] %vm4908_vm3, %v5258_v36  ;;  %v4491_v32 = vadd.f32 %v13908_v16, %v4260_v50  ;;  %v3734_v49 = vpop.permute.xlu0 %3733  ;;  %v3736_v56 = vpop.permute.xlu1 %3735  ;;  %v16633_v50 = vld [vmem:[#allocation179_spill] sm:$0xff]  ;;  %v16634_v36 = vld [vmem:[#allocation254_spill] sm:$0xff] }
 0x435   :  { %v5308_v2 = vrot.slane %v4866_v61, 4  ;;  %v4714_v37 = vmax.f32 %v4490_v29, 0.0  ;;  %v4261_v9 = vmax.f32 %v13513_v11, %v3734_v49  ;;  %v4262_v42 = vmax.f32 %v13517_v27, %v3736_v56  ;;  %v16635_v11 = vld [vmem:[#allocation31_spill] sm:$0xff]  ;;  %v16636_v29 = vld [vmem:[#allocation258_spill] sm:$0xff] }
 0x436   :  { %v4715_v25 = vmax.f32 %v4491_v32, 0.0  ;;  %3849 = vrot.lane.b32.xlu0 %v14040_v15, %s10483_s0  ;;  %3851 = vrot.lane.b32.xlu1 %v14044_v22, %s10483_s0  ;;  %v14059_v61 = vmax.f32 %v16634_v36, %v16633_v50  ;;  %v14063_v27 = vmax.f32 %v16636_v29, %v16635_v11  ;;  %v16639_v36 = vld [vmem:[#allocation253_spill] sm:$0xff] }
 0x437   :  { %5350 = vst.msk [vmem:[#allocation2 + $0x2b0] sm:$0xf0] %vm4969_vm4, %v5308_v2  ;;  %v4492_v52 = vadd.f32 %v13908_v16, %v4261_v9  ;;  %v4493_v51 = vadd.f32 %v13908_v16, %v4262_v42 }
 0x438   :  { %16637 = vst [vmem:[#allocation153_spill] sm:$0xff] %v14063_v27  ;;  %v4867_v23 = vpack.c.bf16 %v4715_v25, %v4714_v37  ;;  %v3738_v55 = vpop.permute.xlu0 %3737  ;;  %v3740_v1 = vpop.permute.xlu1 %3739  ;;  %v16638_v25 = vld [vmem:[#allocation163_spill] sm:$0xff] }
 0x439   :  { %v4716_v18 = vmax.f32 %v4492_v52, 0.0  ;;  %v4717_v32 = vmax.f32 %v4493_v51, 0.0  ;;  %v4263_v49 = vmax.f32 %v13530_v0, %v3738_v55  ;;  %v4264_v56 = vmax.f32 %v13534_v40, %v3740_v1  ;;  %v16641_v51 = vld [vmem:[#allocation23_spill] sm:$0xff] }
 0x43a   :  { %v5309_v9 = vrot.slane %v4867_v23, 4  ;;  %3853 = vrot.lane.b32.xlu0 %v14059_v61, %s10483_s0  ;;  %3855 = vrot.lane.b32.xlu1 %v14063_v27, %s10483_s0  ;;  %v14075_v52 = vmax.f32 %v16639_v36, %v16638_v25  ;;  %v16642_v0 = vld [vmem:[#allocation255_spill] sm:$0xff] }
 0x43b   :  { %v4868_v42 = vpack.c.bf16 %v4717_v32, %v4716_v18  ;;  %v4494_v50 = vadd.f32 %v13908_v16, %v4263_v49  ;;  %v4495_v37 = vadd.f32 %v13908_v16, %v4264_v56  ;;  %v14079_v11 = vmax.f32 %v16642_v0, %v16641_v51  ;;  %v16644_v32 = vld [vmem:[#allocation111_spill] sm:$0xff]  ;;  %v16645_v56 = vld [vmem:[#allocation117_spill] sm:$0xff]  ;;  %v16647_v0 = vld [vmem:[#allocation270_spill] sm:$0xff] }
 0x43c   :  { %16640 = vst [vmem:[#allocation155_spill] sm:$0xff] %v14075_v52  ;;  %v5310_v40 = vsel %vm4926_vm6, %v5308_v2, %v5309_v9  ;;  %v3742_v29 = vpop.permute.xlu0 %3741  ;;  %v3744_v23 = vpop.permute.xlu1 %3743  ;;  %v16646_v51 = vld [vmem:[#allocation209_spill] sm:$0xff] }
 0x43d   :  { %16643 = vst [vmem:[#allocation170_spill] sm:$0xff] %v14079_v11  ;;  %5351 = vst.msk [vmem:[#allocation2 + $0x2b8] sm:$0xff] %vm4908_vm3, %v5310_v40  ;;  %v5311_v55 = vrot.slane %v4868_v42, 4  ;;  %v4718_v1 = vmax.f32 %v4494_v50, 0.0  ;;  %v4719_v18 = vmax.f32 %v4495_v37, 0.0  ;;  %v4265_v49 = vmax.f32 %v16644_v32, %v3742_v29  ;;  %v16649_v50 = vld [vmem:[#allocation47_spill] sm:$0xff] }
 0x43e   :  { %v4266_v27 = vmax.f32 %v16645_v56, %v3744_v23  ;;  %3857 = vrot.lane.b32.xlu0 %v14075_v52, %s10483_s0  ;;  %3859 = vrot.lane.b32.xlu1 %v14079_v11, %s10483_s0  ;;  %v14093_v42 = vmax.f32 %v16647_v0, %v16646_v51  ;;  %v16650_v37 = vld [vmem:[#allocation274_spill] sm:$0xff]  ;;  %v16653_v0 = vld [vmem:[#allocation193_spill] sm:$0xff] }
 0x43f   :  { %v5312_v25 = vsel %vm4926_vm6, %v5309_v9, %v5311_v55  ;;  %v4869_v2 = vpack.c.bf16 %v4719_v18, %v4718_v1  ;;  %v4496_v36 = vadd.f32 %v13908_v16, %v4265_v49  ;;  %v14097_v40 = vmax.f32 %v16650_v37, %v16649_v50  ;;  %v16652_v1 = vld [vmem:[#allocation123_spill] sm:$0xff] }
 0x440   :  { %16648 = vst [vmem:[#allocation174_spill] sm:$0xff] %v14093_v42  ;;  %5352 = vst.msk [vmem:[#allocation2 + $0x2c0] sm:$0xff] %vm4908_vm3, %v5312_v25  ;;  %v4497_v29 = vadd.f32 %v13908_v16, %v4266_v27  ;;  %v3746_v23 = vpop.permute.xlu0 %3745  ;;  %v3748_v32 = vpop.permute.xlu1 %3747  ;;  %v16656_v50 = vld [vmem:[#allocation271_spill] sm:$0xff] }
 0x441   :  { %16651 = vst [vmem:[#allocation169_spill] sm:$0xff] %v14097_v40  ;;  %v5313_v56 = vrot.slane %v4869_v2, 4  ;;  %v4720_v11 = vmax.f32 %v4496_v36, 0.0  ;;  %v4267_v9 = vmax.f32 %v13567_v12, %v3746_v23  ;;  %v4268_v18 = vmax.f32 %v16652_v1, %v3748_v32  ;;  %v16654_v2 = vld [vmem:[#allocation269_spill] sm:$0xff]  ;;  %v16655_v12 = vld [vmem:[#allocation39_spill] sm:$0xff] }
 0x442   :  { %v4721_v49 = vmax.f32 %v4497_v29, 0.0  ;;  %3861 = vrot.lane.b32.xlu0 %v14093_v42, %s10483_s0  ;;  %3863 = vrot.lane.b32.xlu1 %v14097_v40, %s10483_s0  ;;  %v14112_v36 = vmax.f32 %v16654_v2, %v16653_v0  ;;  %v14116_v37 = vmax.f32 %v16656_v50, %v16655_v12  ;;  %v16663_v12 = vld [vmem:[#allocation290_spill] sm:$0xff] }
 0x443   :  { %v5314_v51 = vsel %vm4926_vm6, %v5311_v55, %v5313_v56  ;;  %v4498_v25 = vadd.f32 %v13908_v16, %v4267_v9  ;;  %v4499_v27 = vadd.f32 %v13908_v16, %v4268_v18  ;;  %v16658_v55 = vld [vmem:[#allocation115_spill] sm:$0xff] }
 0x444   :  { %16657 = vst [vmem:[#allocation171_spill] sm:$0xff] %v14116_v37  ;;  %5353 = vst.msk [vmem:[#allocation2 + $0x2c8] sm:$0xff] %vm4908_vm3, %v5314_v51  ;;  %v4870_v29 = vpack.c.bf16 %v4721_v49, %v4720_v11  ;;  %v3750_v23 = vpop.permute.xlu0 %3749  ;;  %v3752_v32 = vpop.permute.xlu1 %3751  ;;  %v16659_v9 = vld [vmem:[#allocation119_spill] sm:$0xff]  ;;  %v16660_v49 = vld [vmem:[#allocation241_spill] sm:$0xff] }
 0x445   :  { %v4722_v1 = vmax.f32 %v4498_v25, 0.0  ;;  %v4723_v40 = vmax.f32 %v4499_v27, 0.0  ;;  %v4269_v42 = vmax.f32 %v16658_v55, %v3750_v23  ;;  %v4270_v52 = vmax.f32 %v16659_v9, %v3752_v32  ;;  %v16661_v51 = vld [vmem:[#allocation286_spill] sm:$0xff]  ;;  %v16662_v27 = vld [vmem:[#allocation63_spill] sm:$0xff] }
 0x446   :  { %v5315_v18 = vrot.slane %v4870_v29, 4  ;;  %3865 = vrot.lane.b32.xlu0 %v14112_v36, %s10483_s0  ;;  %3867 = vrot.lane.b32.xlu1 %v14116_v37, %s10483_s0  ;;  %v14129_v25 = vmax.f32 %v16661_v51, %v16660_v49  ;;  %v14133_v50 = vmax.f32 %v16663_v12, %v16662_v27  ;;  %v16667_v27 = vld [vmem:[#allocation225_spill] sm:$0xff] }
 0x447   :  { %v4871_v0 = vpack.c.bf16 %v4723_v40, %v4722_v1  ;;  %v4500_v2 = vadd.f32 %v13908_v16, %v4269_v42  ;;  %v4501_v11 = vadd.f32 %v13908_v16, %v4270_v52  ;;  %v16665_v42 = vld [vmem:[#allocation129_spill] sm:$0xff]  ;;  %v16666_v52 = vld [vmem:[#allocation135_spill] sm:$0xff] }
 0x448   :  { %16664 = vst [vmem:[#allocation185_spill] sm:$0xff] %v14133_v50  ;;  %v5316_v29 = vsel %vm4926_vm6, %v5313_v56, %v5315_v18  ;;  %v3754_v23 = vpop.permute.xlu0 %3753  ;;  %v3756_v32 = vpop.permute.xlu1 %3755  ;;  %v16668_v12 = vld [vmem:[#allocation285_spill] sm:$0xff] }
 0x449   :  { %5354 = vst.msk [vmem:[#allocation2 + $0x2d0] sm:$0xff] %vm4908_vm3, %v5316_v29  ;;  %v5317_v55 = vrot.slane %v4871_v0, 4  ;;  %v4724_v40 = vmax.f32 %v4500_v2, 0.0  ;;  %v4725_v1 = vmax.f32 %v4501_v11, 0.0  ;;  %v4271_v9 = vmax.f32 %v16665_v42, %v3754_v23  ;;  %v16669_v2 = vld [vmem:[#allocation55_spill] sm:$0xff] }
 0x44a   :  { %v4272_v37 = vmax.f32 %v16666_v52, %v3756_v32  ;;  %3869 = vrot.lane.b32.xlu0 %v14129_v25, %s10483_s0  ;;  %3871 = vrot.lane.b32.xlu1 %v14133_v50, %s10483_s0  ;;  %v14147_v0 = vmax.f32 %v16668_v12, %v16667_v27  ;;  %v16670_v11 = vld [vmem:[#allocation287_spill] sm:$0xff]  ;;  %v16672_v27 = vld [vmem:[#allocation77_spill] sm:$0xff]  ;;  %v16675_v12 = vld [vmem:[#allocation306_spill] sm:$0xff] }
 0x44b   :  { %v5318_v49 = vsel %vm4926_vm6, %v5315_v18, %v5317_v55  ;;  %v4872_v56 = vpack.c.bf16 %v4725_v1, %v4724_v40  ;;  %v4502_v51 = vadd.f32 %v13908_v16, %v4271_v9  ;;  %v14151_v29 = vmax.f32 %v16670_v11, %v16669_v2 }
 0x44c   :  { %5355 = vst.msk [vmem:[#allocation2 + $0x2d8] sm:$0xff] %vm4908_vm3, %v5318_v49  ;;  %v4503_v23 = vadd.f32 %v13908_v16, %v4272_v37  ;;  %v3758_v32 = vpop.permute.xlu0 %3757  ;;  %v3760_v42 = vpop.permute.xlu1 %3759 }
 0x44d   :  { %16671 = vst [vmem:[#allocation350_spill] sm:$0xff] %v14151_v29  ;;  %v5319_v52 = vrot.slane %v4872_v56, 4  ;;  %v4726_v50 = vmax.f32 %v4502_v51, 0.0  ;;  %v4273_v18 = vmax.f32 %v13621_v26, %v3758_v32  ;;  %v4274_v40 = vmax.f32 %v13625_v48, %v3760_v42  ;;  %v16673_v56 = vld [vmem:[#allocation302_spill] sm:$0xff] }
 0x44e   :  { %v4727_v1 = vmax.f32 %v4503_v23, 0.0  ;;  %3873 = vrot.lane.b32.xlu0 %v14147_v0, %s10483_s0  ;;  %3875 = vrot.lane.b32.xlu1 %v14151_v29, %s10483_s0  ;;  %v14166_v51 = vmax.f32 %v16673_v56, %v16672_v27  ;;  %v16674_v26 = vld [vmem:[#allocation278_spill] sm:$0xff] }
 0x44f   :  { %v5320_v9 = vsel %vm4926_vm6, %v5317_v55, %v5319_v52  ;;  %v4504_v49 = vadd.f32 %v13908_v16, %v4273_v18  ;;  %v4505_v37 = vadd.f32 %v13908_v16, %v4274_v40  ;;  %v14170_v48 = vmax.f32 %v16675_v12, %v16674_v26  ;;  %v16676_v18 = vld [vmem:[#allocation127_spill] sm:$0xff] }
 0x450   :  { %5356 = vst.msk [vmem:[#allocation2 + $0x2e0] sm:$0xff] %vm4908_vm3, %v5320_v9  ;;  %v4873_v2 = vpack.c.bf16 %v4727_v1, %v4726_v50  ;;  %v3762_v11 = vpop.permute.xlu0 %3761  ;;  %v3764_v23 = vpop.permute.xlu1 %3763  ;;  %v16677_v1 = vld [vmem:[#allocation256_spill] sm:$0xff]  ;;  %v16678_v9 = vld [vmem:[#allocation301_spill] sm:$0xff] }
 0x451   :  { %v4728_v32 = vmax.f32 %v4504_v49, 0.0  ;;  %v4729_v42 = vmax.f32 %v4505_v37, 0.0  ;;  %v4275_v55 = vmax.f32 %v13638_v31, %v3762_v11  ;;  %v4276_v29 = vmax.f32 %v16676_v18, %v3764_v23  ;;  %v16679_v37 = vld [vmem:[#allocation67_spill] sm:$0xff] }
 0x452   :  { %v5321_v40 = vrot.slane %v4873_v2, 4  ;;  %3877 = vrot.lane.b32.xlu0 %v14166_v51, %s10483_s0  ;;  %3879 = vrot.lane.b32.xlu1 %v14170_v48, %s10483_s0  ;;  %v14183_v49 = vmax.f32 %v16678_v9, %v16677_v1  ;;  %v16680_v31 = vld [vmem:[#allocation303_spill] sm:$0xff] }
 0x453   :  { %v4874_v27 = vpack.c.bf16 %v4729_v42, %v4728_v32  ;;  %v4506_v56 = vadd.f32 %v13908_v16, %v4275_v55  ;;  %v4507_v50 = vadd.f32 %v13908_v16, %v4276_v29  ;;  %v14187_v26 = vmax.f32 %v16680_v31, %v16679_v37  ;;  %v16682_v29 = vld [vmem:[#allocation131_spill] sm:$0xff]  ;;  %v16683_v37 = vld [vmem:[#allocation288_spill] sm:$0xff]  ;;  %v16684_v31 = vld [vmem:[#allocation318_spill] sm:$0xff] }
 0x454   :  { %v5322_v12 = vsel %vm4926_vm6, %v5319_v52, %v5321_v40  ;;  %v3766_v2 = vpop.permute.xlu0 %3765  ;;  %v3768_v11 = vpop.permute.xlu1 %3767 }
 0x455   :  { %16681 = vst [vmem:[#allocation186_spill] sm:$0xff] %v14187_v26  ;;  %5357 = vst.msk [vmem:[#allocation2 + $0x2e8] sm:$0xff] %vm4908_vm3, %v5322_v12  ;;  %v5323_v23 = vrot.slane %v4874_v27, 4  ;;  %v4730_v32 = vmax.f32 %v4506_v56, 0.0  ;;  %v4731_v42 = vmax.f32 %v4507_v50, 0.0  ;;  %v4277_v55 = vmax.f32 %v13656_v62, %v3766_v2  ;;  %v16685_v56 = vld [vmem:[#allocation83_spill] sm:$0xff] }
 0x456   :  { %v4278_v18 = vmax.f32 %v16682_v29, %v3768_v11  ;;  %3881 = vrot.lane.b32.xlu0 %v14183_v49, %s10483_s0  ;;  %3883 = vrot.lane.b32.xlu1 %v14187_v26, %s10483_s0  ;;  %v14201_v27 = vmax.f32 %v16684_v31, %v16683_v37  ;;  %v16686_v50 = vld [vmem:[#allocation321_spill] sm:$0xff]  ;;  %v16690_v31 = vld [vmem:[#allocation319_spill] sm:$0xff] }
 0x457   :  { %v5324_v1 = vsel %vm4926_vm6, %v5321_v40, %v5323_v23  ;;  %v4875_v52 = vpack.c.bf16 %v4731_v42, %v4730_v32  ;;  %v4508_v9 = vadd.f32 %v13908_v16, %v4277_v55  ;;  %v14205_v62 = vmax.f32 %v16686_v50, %v16685_v56  ;;  %v16687_v37 = vld [vmem:[#allocation273_spill] sm:$0xff] }
 0x458   :  { %5358 = vst.msk [vmem:[#allocation2 + $0x2f0] sm:$0xff] %vm4908_vm3, %v5324_v1  ;;  %v4509_v12 = vadd.f32 %v13908_v16, %v4278_v18  ;;  %v3770_v2 = vpop.permute.xlu0 %3769  ;;  %v3772_v11 = vpop.permute.xlu1 %3771 }
 0x459   :  { %v5325_v29 = vrot.slane %v4875_v52, 4  ;;  %v4732_v26 = vmax.f32 %v4508_v9, 0.0  ;;  %v4279_v40 = vmax.f32 %v13675_v54, %v3770_v2  ;;  %v4280_v32 = vmax.f32 %v13679_v13, %v3772_v11  ;;  %v16688_v52 = vld [vmem:[#allocation317_spill] sm:$0xff]  ;;  %v16689_v54 = vld [vmem:[#allocation79_spill] sm:$0xff] }
 0x45a   :  { %v4733_v42 = vmax.f32 %v4509_v12, 0.0  ;;  %3885 = vrot.lane.b32.xlu0 %v14201_v27, %s10483_s0  ;;  %3887 = vrot.lane.b32.xlu1 %v14205_v62, %s10483_s0  ;;  %v14220_v9 = vmax.f32 %v16688_v52, %v16687_v37  ;;  %v14224_v13 = vmax.f32 %v16690_v31, %v16689_v54  ;;  %v16691_v31 = vld [vmem:[#allocation141_spill] sm:$0xff] }
 0x45b   :  { %v5326_v55 = vsel %vm4926_vm6, %v5323_v23, %v5325_v29  ;;  %v4510_v1 = vadd.f32 %v13908_v16, %v4279_v40  ;;  %v4511_v18 = vadd.f32 %v13908_v16, %v4280_v32 }
 0x45c   :  { %5359 = vst.msk [vmem:[#allocation2 + $0x2f8] sm:$0xff] %vm4908_vm3, %v5326_v55  ;;  %v4876_v56 = vpack.c.bf16 %v4733_v42, %v4732_v26  ;;  %v3774_v50 = vpop.permute.xlu0 %3773  ;;  %v3776_v12 = vpop.permute.xlu1 %3775 }
 0x45d   :  { %v4734_v2 = vmax.f32 %v4510_v1, 0.0  ;;  %v4735_v11 = vmax.f32 %v4511_v18, 0.0  ;;  %v4281_v23 = vmax.f32 %v13692_v30, %v3774_v50  ;;  %v4282_v40 = vmax.f32 %v13696_v39, %v3776_v12 }
 0x45e   :  { %v5327_v32 = vrot.slane %v4876_v56, 4  ;;  %3889 = vrot.lane.b32.xlu0 %v14220_v9, %s10483_s0  ;;  %3891 = vrot.lane.b32.xlu1 %v14224_v13, %s10483_s0 }
 0x45f   :  { %v4877_v37 = vpack.c.bf16 %v4735_v11, %v4734_v2  ;;  %v4512_v52 = vadd.f32 %v13908_v16, %v4281_v23  ;;  %v4513_v26 = vadd.f32 %v13908_v16, %v4282_v40 }
 0x460   :  { %v5328_v42 = vsel %vm4926_vm6, %v5325_v29, %v5327_v32  ;;  %v3778_v55 = vpop.permute.xlu0 %3777  ;;  %v3780_v1 = vpop.permute.xlu1 %3779 }
 0x461   :  { %5360 = vst.msk [vmem:[#allocation2 + $0x300] sm:$0xff] %vm4908_vm3, %v5328_v42  ;;  %v5329_v30 = vrot.slane %v4877_v37, 4  ;;  %v4736_v39 = vmax.f32 %v4512_v52, 0.0  ;;  %v4737_v18 = vmax.f32 %v4513_v26, 0.0  ;;  %v4283_v54 = vmax.f32 %v13710_v10, %v3778_v55  ;;  %v16692_v52 = vld [vmem:[#allocation147_spill] sm:$0xff] }
 0x462   :  { %v4284_v56 = vmax.f32 %v16691_v31, %v3780_v1 }
 0x463   :  { %v5330_v50 = vsel %vm4926_vm6, %v5327_v32, %v5329_v30  ;;  %v4878_v12 = vpack.c.bf16 %v4737_v18, %v4736_v39  ;;  %v4514_v2 = vadd.f32 %v13908_v16, %v4283_v54 }
 0x464   :  { %5361 = vst.msk [vmem:[#allocation2 + $0x308] sm:$0xff] %vm4908_vm3, %v5330_v50  ;;  %v4515_v29 = vadd.f32 %v13908_v16, %v4284_v56  ;;  %v3782_v11 = vpop.permute.xlu0 %3781  ;;  %v3784_v23 = vpop.permute.xlu1 %3783 }
 0x465   :  { %v5331_v40 = vrot.slane %v4878_v12, 4  ;;  %v4738_v42 = vmax.f32 %v4514_v2, 0.0  ;;  %v4285_v37 = vmax.f32 %v13729_v44, %v3782_v11  ;;  %v4286_v26 = vmax.f32 %v16692_v52, %v3784_v23  ;;  %v16693_v12 = vld [vmem:[#allocation139_spill] sm:$0xff] }
 0x466   :  { %v4739_v10 = vmax.f32 %v4515_v29, 0.0 }
 0x467   :  { %v5332_v55 = vsel %vm4926_vm6, %v5329_v30, %v5331_v40  ;;  %v4516_v32 = vadd.f32 %v13908_v16, %v4285_v37  ;;  %v4517_v1 = vadd.f32 %v13908_v16, %v4286_v26 }
 0x468   :  { %5362 = vst.msk [vmem:[#allocation2 + $0x310] sm:$0xff] %vm4908_vm3, %v5332_v55  ;;  %v4879_v39 = vpack.c.bf16 %v4739_v10, %v4738_v42  ;;  %v3786_v18 = vpop.permute.xlu0 %3785  ;;  %v3788_v54 = vpop.permute.xlu1 %3787 }
 0x469   :  { %v4740_v31 = vmax.f32 %v4516_v32, 0.0  ;;  %v4741_v56 = vmax.f32 %v4517_v1, 0.0  ;;  %v4287_v50 = vmax.f32 %v13746_v3, %v3786_v18  ;;  %v4288_v44 = vmax.f32 %v16693_v12, %v3788_v54 }
 0x46a   :  { %v5333_v2 = vrot.slane %v4879_v39, 4 }
 0x46b   :  { %v4880_v11 = vpack.c.bf16 %v4741_v56, %v4740_v31  ;;  %v4518_v29 = vadd.f32 %v13908_v16, %v4287_v50  ;;  %v4519_v30 = vadd.f32 %v13908_v16, %v4288_v44  ;;  %v16694_v50 = vld [vmem:[#allocation143_spill] sm:$0xff] }
 0x46c   :  { %v5334_v23 = vsel %vm4926_vm6, %v5331_v40, %v5333_v2  ;;  %5364 = vst.msk [vmem:[#allocation2 + $0x320] sm:$0xf] %vm4910_vm5, %v5333_v2  ;;  %v3790_v37 = vpop.permute.xlu0 %3789  ;;  %v3792_v42 = vpop.permute.xlu1 %3791 }
 0x46d   :  { %5363 = vst.msk [vmem:[#allocation2 + $0x318] sm:$0xff] %vm4908_vm3, %v5334_v23  ;;  %v5384_v52 = vrot.slane %v4880_v11, 4  ;;  %v4742_v26 = vmax.f32 %v4518_v29, 0.0  ;;  %v4743_v10 = vmax.f32 %v4519_v30, 0.0  ;;  %v4289_v3 = vmax.f32 %v13764_v43, %v3790_v37 }
 0x46e   :  { %v4290_v55 = vmax.f32 %v13768_v59, %v3792_v42  ;;  %v16695_v42 = vld [vmem:[#allocation154_spill] sm:$0xff] }
 0x46f   :  { %5426 = vst.msk [vmem:[#allocation2 + $0x338] sm:$0xf0] %vm4969_vm4, %v5384_v52  ;;  %v4881_v32 = vpack.c.bf16 %v4743_v10, %v4742_v26  ;;  %v4520_v1 = vadd.f32 %v13908_v16, %v4289_v3  ;;  %v16696_v10 = vld [vmem:[#allocation158_spill] sm:$0xff] }
 0x470   :  { %v4521_v40 = vadd.f32 %v13908_v16, %v4290_v55  ;;  %v3794_v39 = vpop.permute.xlu0 %3793  ;;  %v3796_v18 = vpop.permute.xlu1 %3795 }
 0x471   :  { %v5385_v54 = vrot.slane %v4881_v32, 4  ;;  %v4744_v31 = vmax.f32 %v4520_v1, 0.0  ;;  %v4291_v56 = vmax.f32 %v13784_v4, %v3794_v39  ;;  %v4292_v12 = vmax.f32 %v16694_v50, %v3796_v18 }
 0x472   :  { %v4745_v44 = vmax.f32 %v4521_v40, 0.0 }
 0x473   :  { %v5386_v43 = vsel %vm4926_vm6, %v5384_v52, %v5385_v54  ;;  %v4522_v59 = vadd.f32 %v13908_v16, %v4291_v56  ;;  %v4523_v2 = vadd.f32 %v13908_v16, %v4292_v12 }
 0x474   :  { %5427 = vst.msk [vmem:[#allocation2 + $0x340] sm:$0xff] %vm4908_vm3, %v5386_v43  ;;  %v4882_v11 = vpack.c.bf16 %v4745_v44, %v4744_v31  ;;  %v3798_v29 = vpop.permute.xlu0 %3797  ;;  %v3800_v30 = vpop.permute.xlu1 %3799 }
 0x475   :  { %v4746_v23 = vmax.f32 %v4522_v59, 0.0  ;;  %v4747_v37 = vmax.f32 %v4523_v2, 0.0  ;;  %v4293_v26 = vmax.f32 %v16695_v42, %v3798_v29  ;;  %v4294_v4 = vmax.f32 %v16696_v10, %v3800_v30 }
 0x476   :  { %v5387_v3 = vrot.slane %v4882_v11, 4 }
 0x477   :  { %v4883_v55 = vpack.c.bf16 %v4747_v37, %v4746_v23  ;;  %v4524_v32 = vadd.f32 %v13908_v16, %v4293_v26  ;;  %v4525_v52 = vadd.f32 %v13908_v16, %v4294_v4 }
 0x478   :  { %v5388_v1 = vsel %vm4926_vm6, %v5385_v54, %v5387_v3  ;;  %v3802_v40 = vpop.permute.xlu0 %3801  ;;  %v3804_v39 = vpop.permute.xlu1 %3803 }
 0x479   :  { %5428 = vst.msk [vmem:[#allocation2 + $0x348] sm:$0xff] %vm4908_vm3, %v5388_v1  ;;  %v5389_v18 = vrot.slane %v4883_v55, 4  ;;  %v4748_v31 = vmax.f32 %v4524_v32, 0.0  ;;  %v4749_v56 = vmax.f32 %v4525_v52, 0.0  ;;  %v4295_v50 = vmax.f32 %v13818_v53, %v3802_v40 }
 0x47a   :  { %v4296_v12 = vmax.f32 %v13822_v47, %v3804_v39 }
 0x47b   :  { %v5390_v44 = vsel %vm4926_vm6, %v5387_v3, %v5389_v18  ;;  %v4884_v43 = vpack.c.bf16 %v4749_v56, %v4748_v31  ;;  %v4526_v59 = vadd.f32 %v13908_v16, %v4295_v50 }
 0x47c   :  { %5429 = vst.msk [vmem:[#allocation2 + $0x350] sm:$0xff] %vm4908_vm3, %v5390_v44  ;;  %v4527_v54 = vadd.f32 %v13908_v16, %v4296_v12  ;;  %v3806_v2 = vpop.permute.xlu0 %3805  ;;  %v3808_v11 = vpop.permute.xlu1 %3807 }
 0x47d   :  { %v5391_v29 = vrot.slane %v4884_v43, 4  ;;  %v4750_v30 = vmax.f32 %v4526_v59, 0.0  ;;  %v4297_v23 = vmax.f32 %v13837_v7, %v3806_v2  ;;  %v4298_v37 = vmax.f32 %v13841_v5, %v3808_v11 }
 0x47e   :  { %v4751_v53 = vmax.f32 %v4527_v54, 0.0 }
 0x47f   :  { %v5392_v47 = vsel %vm4926_vm6, %v5389_v18, %v5391_v29  ;;  %v4528_v42 = vadd.f32 %v13908_v16, %v4297_v23  ;;  %v4529_v26 = vadd.f32 %v13908_v16, %v4298_v37 }
 0x480   :  { %5430 = vst.msk [vmem:[#allocation2 + $0x358] sm:$0xff] %vm4908_vm3, %v5392_v47  ;;  %v4885_v10 = vpack.c.bf16 %v4751_v53, %v4750_v30  ;;  %v3810_v4 = vpop.permute.xlu0 %3809  ;;  %v3812_v3 = vpop.permute.xlu1 %3811 }
 0x481   :  { %v4752_v55 = vmax.f32 %v4528_v42, 0.0  ;;  %v4753_v32 = vmax.f32 %v4529_v26, 0.0  ;;  %v4299_v52 = vmax.f32 %v13854_v41, %v3810_v4  ;;  %v4300_v7 = vmax.f32 %v13858_v46, %v3812_v3 }
 0x482   :  { %v5393_v1 = vrot.slane %v4885_v10, 4 }
 0x483   :  { %v4886_v5 = vpack.c.bf16 %v4753_v32, %v4752_v55  ;;  %v4530_v40 = vadd.f32 %v13908_v16, %v4299_v52  ;;  %v4531_v39 = vadd.f32 %v13908_v16, %v4300_v7 }
 0x484   :  { %v5394_v18 = vsel %vm4926_vm6, %v5391_v29, %v5393_v1  ;;  %v3814_v31 = vpop.permute.xlu0 %3813  ;;  %v3816_v56 = vpop.permute.xlu1 %3815 }
 0x485   :  { %5431 = vst.msk [vmem:[#allocation2 + $0x360] sm:$0xff] %vm4908_vm3, %v5394_v18  ;;  %v5395_v50 = vrot.slane %v4886_v5, 4  ;;  %v4754_v12 = vmax.f32 %v4530_v40, 0.0  ;;  %v4755_v44 = vmax.f32 %v4531_v39, 0.0  ;;  %v4301_v43 = vmax.f32 %v13872_v24, %v3814_v31 }
 0x486   :  { %v4302_v41 = vmax.f32 %v13876_v34, %v3816_v56 }
 0x487   :  { %v5396_v46 = vsel %vm4926_vm6, %v5393_v1, %v5395_v50  ;;  %v4887_v59 = vpack.c.bf16 %v4755_v44, %v4754_v12  ;;  %v4532_v54 = vadd.f32 %v13908_v16, %v4301_v43 }
 0x488   :  { %5432 = vst.msk [vmem:[#allocation2 + $0x368] sm:$0xff] %vm4908_vm3, %v5396_v46  ;;  %v4533_v2 = vadd.f32 %v13908_v16, %v4302_v41  ;;  %v3818_v11 = vpop.permute.xlu0 %3817  ;;  %v3820_v29 = vpop.permute.xlu1 %3819 }
 0x489   :  { %v5397_v30 = vrot.slane %v4887_v59, 4  ;;  %v4756_v23 = vmax.f32 %v4532_v54, 0.0  ;;  %v4303_v37 = vmax.f32 %v13891_v58, %v3818_v11  ;;  %v4304_v53 = vmax.f32 %v13895_v45, %v3820_v29 }
 0x48a   :  { %v4757_v24 = vmax.f32 %v4533_v2, 0.0 }
 0x48b   :  { %v5398_v34 = vsel %vm4926_vm6, %v5395_v50, %v5397_v30  ;;  %v4534_v47 = vadd.f32 %v13908_v16, %v4303_v37  ;;  %v4535_v42 = vadd.f32 %v13908_v16, %v4304_v53 }
 0x48c   :  { %5433 = vst.msk [vmem:[#allocation2 + $0x370] sm:$0xff] %vm4908_vm3, %v5398_v34  ;;  %v4888_v26 = vpack.c.bf16 %v4757_v24, %v4756_v23  ;;  %v3822_v10 = vpop.permute.xlu0 %3821  ;;  %v3824_v4 = vpop.permute.xlu1 %3823 }
 0x48d   :  { %v4758_v3 = vmax.f32 %v4534_v47, 0.0  ;;  %v4759_v55 = vmax.f32 %v4535_v42, 0.0  ;;  %v4305_v32 = vmax.f32 %v13913_v38, %v3822_v10  ;;  %v4306_v58 = vmax.f32 %v13917_v63, %v3824_v4 }
 0x48e   :  { %v5399_v52 = vrot.slane %v4888_v26, 4 }
 0x48f   :  { %v4889_v45 = vpack.c.bf16 %v4759_v55, %v4758_v3  ;;  %v4536_v7 = vadd.f32 %v13908_v16, %v4305_v32  ;;  %v4537_v1 = vadd.f32 %v13908_v16, %v4306_v58 }
 0x490   :  { %v5400_v5 = vsel %vm4926_vm6, %v5397_v30, %v5399_v52  ;;  %v3826_v40 = vpop.permute.xlu0 %3825  ;;  %v3828_v39 = vpop.permute.xlu1 %3827 }
 0x491   :  { %5434 = vst.msk [vmem:[#allocation2 + $0x378] sm:$0xff] %vm4908_vm3, %v5400_v5  ;;  %v5401_v18 = vrot.slane %v4889_v45, 4  ;;  %v4760_v31 = vmax.f32 %v4536_v7, 0.0  ;;  %v4761_v56 = vmax.f32 %v4537_v1, 0.0  ;;  %v4307_v50 = vmax.f32 %v13931_v35, %v3826_v40 }
 0x492   :  { %v4308_v38 = vmax.f32 %v13935_v8, %v3828_v39 }
 0x493   :  { %v5402_v63 = vsel %vm4926_vm6, %v5399_v52, %v5401_v18  ;;  %v4890_v12 = vpack.c.bf16 %v4761_v56, %v4760_v31  ;;  %v4538_v44 = vadd.f32 %v13908_v16, %v4307_v50 }
 0x494   :  { %5435 = vst.msk [vmem:[#allocation2 + $0x380] sm:$0xff] %vm4908_vm3, %v5402_v63  ;;  %v4539_v43 = vadd.f32 %v13908_v16, %v4308_v38  ;;  %v3830_v41 = vpop.permute.xlu0 %3829  ;;  %v3832_v46 = vpop.permute.xlu1 %3831 }
 0x495   :  { %v5403_v59 = vrot.slane %v4890_v12, 4  ;;  %v4762_v54 = vmax.f32 %v4538_v44, 0.0  ;;  %v4309_v2 = vmax.f32 %v13950_v6, %v3830_v41  ;;  %v4310_v11 = vmax.f32 %v13954_v20, %v3832_v46 }
 0x496   :  { %v4763_v35 = vmax.f32 %v4539_v43, 0.0 }
 0x497   :  { %v5404_v8 = vsel %vm4926_vm6, %v5401_v18, %v5403_v59  ;;  %v4540_v29 = vadd.f32 %v13908_v16, %v4309_v2  ;;  %v4541_v30 = vadd.f32 %v13908_v16, %v4310_v11 }
 0x498   :  { %5436 = vst.msk [vmem:[#allocation2 + $0x388] sm:$0xff] %vm4908_vm3, %v5404_v8  ;;  %v4891_v23 = vpack.c.bf16 %v4763_v35, %v4762_v54  ;;  %v3834_v37 = vpop.permute.xlu0 %3833  ;;  %v3836_v53 = vpop.permute.xlu1 %3835 }
 0x499   :  { %v4764_v24 = vmax.f32 %v4540_v29, 0.0  ;;  %v4765_v34 = vmax.f32 %v4541_v30, 0.0  ;;  %v4311_v47 = vmax.f32 %v13967_v21, %v3834_v37  ;;  %v4312_v6 = vmax.f32 %v13971_v14, %v3836_v53 }
 0x49a   :  { %v5405_v42 = vrot.slane %v4891_v23, 4 }
 0x49b   :  { %v4892_v20 = vpack.c.bf16 %v4765_v34, %v4764_v24  ;;  %v4542_v26 = vadd.f32 %v13908_v16, %v4311_v47  ;;  %v4543_v10 = vadd.f32 %v13908_v16, %v4312_v6  ;;  %v14351_v24 = vld [vmem:[%s15399_s2] ss:$0 sm:$0xff]  ;;  %s14421_s2 = smov 0  }
 0x49c   :  { %v5406_v4 = vsel %vm4926_vm6, %v5403_v59, %v5405_v42  ;;  %v3838_v3 = vpop.permute.xlu0 %3837  ;;  %v3840_v55 = vpop.permute.xlu1 %3839 }
 0x49d   :  { %5437 = vst.msk [vmem:[#allocation2 + $0x390] sm:$0xff] %vm4908_vm3, %v5406_v4  ;;  %v5407_v32 = vrot.slane %v4892_v20, 4  ;;  %v4766_v58 = vmax.f32 %v4542_v26, 0.0  ;;  %v4767_v52 = vmax.f32 %v4543_v10, 0.0  ;;  %v4313_v45 = vmax.f32 %v13985_v57, %v3838_v3  ;;  %v16697_v20 = vld [vmem:[#allocation153_spill] sm:$0xff] }
 0x49e   :  { %v4314_v21 = vmax.f32 %v13989_v28, %v3840_v55 }
 0x49f   :  { %v5408_v14 = vsel %vm4926_vm6, %v5405_v42, %v5407_v32  ;;  %v4893_v7 = vpack.c.bf16 %v4767_v52, %v4766_v58  ;;  %v4544_v1 = vadd.f32 %v13908_v16, %v4313_v45 }
 0x4a0   :  { %5438 = vst.msk [vmem:[#allocation2 + $0x398] sm:$0xff] %vm4908_vm3, %v5408_v14  ;;  %v4545_v5 = vadd.f32 %v13908_v16, %v4314_v21  ;;  %v3842_v40 = vpop.permute.xlu0 %3841  ;;  %v3844_v39 = vpop.permute.xlu1 %3843  ;;  %v16698_v14 = vld [vmem:[#allocation155_spill] sm:$0xff] }
 0x4a1   :  { %v5409_v18 = vrot.slane %v4893_v7, 4  ;;  %v4768_v31 = vmax.f32 %v4544_v1, 0.0  ;;  %v4315_v56 = vmax.f32 %v14004_v17, %v3842_v40  ;;  %v4316_v50 = vmax.f32 %v14008_v19, %v3844_v39  ;;  %v16699_v1 = vld [vmem:[#allocation170_spill] sm:$0xff] }
 0x4a2   :  { %v4769_v57 = vmax.f32 %v4545_v5, 0.0 }
 0x4a3   :  { %v5410_v28 = vsel %vm4926_vm6, %v5407_v32, %v5409_v18  ;;  %5440 = vst.msk [vmem:[#allocation2 + $0x3a8] sm:$0xf] %vm4910_vm5, %v5409_v18  ;;  %v4546_v38 = vadd.f32 %v13908_v16, %v4315_v56  ;;  %v4547_v63 = vadd.f32 %v13908_v16, %v4316_v50 }
 0x4a4   :  { %5439 = vst.msk [vmem:[#allocation2 + $0x3a0] sm:$0xff] %vm4908_vm3, %v5410_v28  ;;  %v4894_v12 = vpack.c.bf16 %v4769_v57, %v4768_v31  ;;  %v3846_v44 = vpop.permute.xlu0 %3845  ;;  %v3848_v43 = vpop.permute.xlu1 %3847 }
 0x4a5   :  { %v4770_v41 = vmax.f32 %v4546_v38, 0.0  ;;  %v4771_v46 = vmax.f32 %v4547_v63, 0.0  ;;  %v4317_v17 = vmax.f32 %v14021_v60, %v3846_v44  ;;  %v4318_v19 = vmax.f32 %v14025_v33, %v3848_v43  ;;  %v16700_v63 = vld [vmem:[#allocation174_spill] sm:$0xff]  ;;  %v16701_v44 = vld [vmem:[#allocation169_spill] sm:$0xff] }
 0x4a6   :  { %v5460_v59 = vrot.slane %v4894_v12, 4 }
 0x4a7   :  { %v4895_v54 = vpack.c.bf16 %v4771_v46, %v4770_v41  ;;  %v4548_v2 = vadd.f32 %v13908_v16, %v4317_v17  ;;  %v4549_v11 = vadd.f32 %v13908_v16, %v4318_v19 }
 0x4a8   :  { %5502 = vst.msk [vmem:[#allocation2 + $0x3c0] sm:$0xf0] %vm4969_vm4, %v5460_v59  ;;  %v3850_v35 = vpop.permute.xlu0 %3849  ;;  %v3852_v8 = vpop.permute.xlu1 %3851 }
 0x4a9   :  { %v5461_v29 = vrot.slane %v4895_v54, 4  ;;  %v4772_v30 = vmax.f32 %v4548_v2, 0.0  ;;  %v4773_v23 = vmax.f32 %v4549_v11, 0.0  ;;  %v4319_v37 = vmax.f32 %v14040_v15, %v3850_v35 }
 0x4aa   :  { %v4320_v53 = vmax.f32 %v14044_v22, %v3852_v8  ;;  %v16702_v8 = vld [vmem:[#allocation171_spill] sm:$0xff] }
 0x4ab   :  { %v5462_v60 = vsel %vm4926_vm6, %v5460_v59, %v5461_v29  ;;  %v4896_v33 = vpack.c.bf16 %v4773_v23, %v4772_v30  ;;  %v4550_v16 = vadd.f32 %v14351_v24, %v4319_v37 }
 0x4ac   :  { %5503 = vst.msk [vmem:[#allocation2 + $0x3c8] sm:$0xff] %vm4908_vm3, %v5462_v60  ;;  %v4551_v34 = vadd.f32 %v14351_v24, %v4320_v53  ;;  %v3854_v47 = vpop.permute.xlu0 %3853  ;;  %v3856_v6 = vpop.permute.xlu1 %3855 }
 0x4ad   :  { %v5463_v42 = vrot.slane %v4896_v33, 4  ;;  %v4774_v15 = vmax.f32 %v4550_v16, 0.0  ;;  %v4321_v22 = vmax.f32 %v14059_v61, %v3854_v47  ;;  %v4322_v26 = vmax.f32 %v16697_v20, %v3856_v6 }
 0x4ae   :  { %v4775_v10 = vmax.f32 %v4551_v34, 0.0 }
 0x4af   :  { %v5464_v4 = vsel %vm4926_vm6, %v5461_v29, %v5463_v42  ;;  %v4552_v3 = vadd.f32 %v14351_v24, %v4321_v22  ;;  %v4553_v55 = vadd.f32 %v14351_v24, %v4322_v26 }
 0x4b0   :  { %5504 = vst.msk [vmem:[#allocation2 + $0x3d0] sm:$0xff] %vm4908_vm3, %v5464_v4  ;;  %v4897_v32 = vpack.c.bf16 %v4775_v10, %v4774_v15  ;;  %v3858_v58 = vpop.permute.xlu0 %3857  ;;  %v3860_v52 = vpop.permute.xlu1 %3859 }
 0x4b1   :  { %v4776_v45 = vmax.f32 %v4552_v3, 0.0  ;;  %v4777_v21 = vmax.f32 %v4553_v55, 0.0  ;;  %v4323_v7 = vmax.f32 %v16698_v14, %v3858_v58  ;;  %v4324_v61 = vmax.f32 %v16699_v1, %v3860_v52 }
 0x4b2   :  { %v5465_v5 = vrot.slane %v4897_v32, 4 }
 0x4b3   :  { %v4898_v40 = vpack.c.bf16 %v4777_v21, %v4776_v45  ;;  %v4554_v39 = vadd.f32 %v14351_v24, %v4323_v7  ;;  %v4555_v18 = vadd.f32 %v14351_v24, %v4324_v61 }
 0x4b4   :  { %v5466_v31 = vsel %vm4926_vm6, %v5463_v42, %v5465_v5  ;;  %v3862_v56 = vpop.permute.xlu0 %3861  ;;  %v3864_v50 = vpop.permute.xlu1 %3863  ;;  %v16703_v42 = vld [vmem:[#allocation185_spill] sm:$0xff] }
 0x4b5   :  { %5505 = vst.msk [vmem:[#allocation2 + $0x3d8] sm:$0xff] %vm4908_vm3, %v5466_v31  ;;  %v5467_v57 = vrot.slane %v4898_v40, 4  ;;  %v4778_v28 = vmax.f32 %v4554_v39, 0.0  ;;  %v4779_v38 = vmax.f32 %v4555_v18, 0.0  ;;  %v4325_v12 = vmax.f32 %v16700_v63, %v3862_v56 }
 0x4b6   :  { %v4326_v43 = vmax.f32 %v16701_v44, %v3864_v50 }
 0x4b7   :  { %v5468_v41 = vsel %vm4926_vm6, %v5465_v5, %v5467_v57  ;;  %v4899_v46 = vpack.c.bf16 %v4779_v38, %v4778_v28  ;;  %v4556_v17 = vadd.f32 %v14351_v24, %v4325_v12 }
 0x4b8   :  { %5506 = vst.msk [vmem:[#allocation2 + $0x3e0] sm:$0xff] %vm4908_vm3, %v5468_v41  ;;  %v4557_v19 = vadd.f32 %v14351_v24, %v4326_v43  ;;  %v3866_v59 = vpop.permute.xlu0 %3865  ;;  %v3868_v54 = vpop.permute.xlu1 %3867  ;;  %v16705_v41 = vld [vmem:[#allocation186_spill] sm:$0xff] }
 0x4b9   :  { %v5469_v2 = vrot.slane %v4899_v46, 4  ;;  %v4780_v11 = vmax.f32 %v4556_v17, 0.0  ;;  %v4327_v35 = vmax.f32 %v14112_v36, %v3866_v59  ;;  %v4328_v29 = vmax.f32 %v16702_v8, %v3868_v54 }
 0x4ba   :  { %v4781_v30 = vmax.f32 %v4557_v19, 0.0 }
 0x4bb   :  { %v5470_v23 = vsel %vm4926_vm6, %v5467_v57, %v5469_v2  ;;  %v4558_v37 = vadd.f32 %v14351_v24, %v4327_v35  ;;  %v4559_v53 = vadd.f32 %v14351_v24, %v4328_v29 }
 0x4bc   :  { %5507 = vst.msk [vmem:[#allocation2 + $0x3e8] sm:$0xff] %vm4908_vm3, %v5470_v23  ;;  %v4900_v60 = vpack.c.bf16 %v4781_v30, %v4780_v11  ;;  %v3870_v33 = vpop.permute.xlu0 %3869  ;;  %v3872_v16 = vpop.permute.xlu1 %3871 }
 0x4bd   :  { %v4782_v34 = vmax.f32 %v4558_v37, 0.0  ;;  %v4783_v47 = vmax.f32 %v4559_v53, 0.0  ;;  %v4329_v6 = vmax.f32 %v14129_v25, %v3870_v33  ;;  %v4330_v36 = vmax.f32 %v16703_v42, %v3872_v16  ;;  %v16704_v25 = vld [vmem:[#allocation350_spill] sm:$0xff] }
 0x4be   :  { %v5471_v15 = vrot.slane %v4900_v60, 4 }
 0x4bf   :  { %v4901_v22 = vpack.c.bf16 %v4783_v47, %v4782_v34  ;;  %v4560_v20 = vadd.f32 %v14351_v24, %v4329_v6  ;;  %v4561_v26 = vadd.f32 %v14351_v24, %v4330_v36 }
 0x4c0   :  { %v5472_v10 = vsel %vm4926_vm6, %v5469_v2, %v5471_v15  ;;  %v3874_v4 = vpop.permute.xlu0 %3873  ;;  %v3876_v3 = vpop.permute.xlu1 %3875 }
 0x4c1   :  { %5508 = vst.msk [vmem:[#allocation2 + $0x3f0] sm:$0xff] %vm4908_vm3, %v5472_v10  ;;  %v5473_v55 = vrot.slane %v4901_v22, 4  ;;  %v4784_v32 = vmax.f32 %v4560_v20, 0.0  ;;  %v4785_v58 = vmax.f32 %v4561_v26, 0.0  ;;  %v4331_v52 = vmax.f32 %v14147_v0, %v3874_v4 }
 0x4c2   :  { %v4332_v45 = vmax.f32 %v16704_v25, %v3876_v3 }
 0x4c3   :  { %v5474_v21 = vsel %vm4926_vm6, %v5471_v15, %v5473_v55  ;;  %v4902_v14 = vpack.c.bf16 %v4785_v58, %v4784_v32  ;;  %v4562_v7 = vadd.f32 %v14351_v24, %v4331_v52 }
 0x4c4   :  { %5509 = vst.msk [vmem:[#allocation2 + $0x3f8] sm:$0xff] %vm4908_vm3, %v5474_v21  ;;  %v4563_v1 = vadd.f32 %v14351_v24, %v4332_v45  ;;  %v3878_v61 = vpop.permute.xlu0 %3877  ;;  %v3880_v5 = vpop.permute.xlu1 %3879 }
 0x4c5   :  { %v5475_v40 = vrot.slane %v4902_v14, 4  ;;  %v4786_v39 = vmax.f32 %v4562_v7, 0.0  ;;  %v4333_v18 = vmax.f32 %v14166_v51, %v3878_v61  ;;  %v4334_v31 = vmax.f32 %v14170_v48, %v3880_v5 }
 0x4c6   :  { %v4787_v0 = vmax.f32 %v4563_v1, 0.0 }
 0x4c7   :  { %v5476_v56 = vsel %vm4926_vm6, %v5473_v55, %v5475_v40  ;;  %v4564_v50 = vadd.f32 %v14351_v24, %v4333_v18  ;;  %v4565_v57 = vadd.f32 %v14351_v24, %v4334_v31 }
 0x4c8   :  { %5510 = vst.msk [vmem:[#allocation2 + $0x400] sm:$0xff] %vm4908_vm3, %v5476_v56  ;;  %v4903_v28 = vpack.c.bf16 %v4787_v0, %v4786_v39  ;;  %v3882_v38 = vpop.permute.xlu0 %3881  ;;  %v3884_v63 = vpop.permute.xlu1 %3883 }
 0x4c9   :  { %v4788_v12 = vmax.f32 %v4564_v50, 0.0  ;;  %v4789_v44 = vmax.f32 %v4565_v57, 0.0  ;;  %v4335_v43 = vmax.f32 %v14183_v49, %v3882_v38  ;;  %v4336_v51 = vmax.f32 %v16705_v41, %v3884_v63 }
 0x4ca   :  { %v5477_v46 = vrot.slane %v4903_v28, 4 }
 0x4cb   :  { %v4904_v48 = vpack.c.bf16 %v4789_v44, %v4788_v12  ;;  %v4566_v17 = vadd.f32 %v14351_v24, %v4335_v43  ;;  %v4567_v19 = vadd.f32 %v14351_v24, %v4336_v51 }
 0x4cc   :  { %v5478_v59 = vsel %vm4926_vm6, %v5475_v40, %v5477_v46  ;;  %v3886_v54 = vpop.permute.xlu0 %3885  ;;  %v3888_v2 = vpop.permute.xlu1 %3887 }
 0x4cd   :  { %5511 = vst.msk [vmem:[#allocation2 + $0x408] sm:$0xff] %vm4908_vm3, %v5478_v59  ;;  %v5479_v11 = vrot.slane %v4904_v48, 4  ;;  %v4790_v35 = vmax.f32 %v4566_v17, 0.0  ;;  %v4791_v8 = vmax.f32 %v4567_v19, 0.0  ;;  %v4337_v29 = vmax.f32 %v14201_v27, %v3886_v54 }
 0x4ce   :  { %v4338_v49 = vmax.f32 %v14205_v62, %v3888_v2 }
 0x4cf   :  { %v5480_v30 = vsel %vm4926_vm6, %v5477_v46, %v5479_v11  ;;  %v4905_v23 = vpack.c.bf16 %v4791_v8, %v4790_v35  ;;  %v4568_v37 = vadd.f32 %v14351_v24, %v4337_v29 }
 0x4d0   :  { %5512 = vst.msk [vmem:[#allocation2 + $0x410] sm:$0xff] %vm4908_vm3, %v5480_v30  ;;  %v4569_v53 = vadd.f32 %v14351_v24, %v4338_v49  ;;  %v3890_v60 = vpop.permute.xlu0 %3889  ;;  %v3892_v33 = vpop.permute.xlu1 %3891 }
 0x4d1   :  { %v5481_v16 = vrot.slane %v4905_v23, 4  ;;  %v4792_v34 = vmax.f32 %v4568_v37, 0.0  ;;  %v4339_v47 = vmax.f32 %v14220_v9, %v3890_v60  ;;  %v4340_v6 = vmax.f32 %v14224_v13, %v3892_v33 }
 0x4d2   :  { %v4793_v27 = vmax.f32 %v4569_v53, 0.0 }
 0x4d3   :  { %v5482_v62 = vsel %vm4926_vm6, %v5479_v11, %v5481_v16  ;;  %v4570_v42 = vadd.f32 %v14351_v24, %v4339_v47  ;;  %v4571_v36 = vadd.f32 %v14351_v24, %v4340_v6 }
 0x4d4   :  { %5513 = vst.msk [vmem:[#allocation2 + $0x418] sm:$0xff] %vm4908_vm3, %v5482_v62  ;;  %v4906_v15 = vpack.c.bf16 %v4793_v27, %v4792_v34 }
 0x4d5   :  { %v4794_v22 = vmax.f32 %v4570_v42, 0.0  ;;  %v4795_v20 = vmax.f32 %v4571_v36, 0.0 }
 0x4d6   :  { %v5483_v26 = vrot.slane %v4906_v15, 4 }
 0x4d7   :  { %v4907_v10 = vpack.c.bf16 %v4795_v20, %v4794_v22 }
 0x4d8   :  { %v5484_v4 = vsel %vm4926_vm6, %v5481_v16, %v5483_v26 }
 0x4d9   :  { %5514 = vst.msk [vmem:[#allocation2 + $0x420] sm:$0xff] %vm4908_vm3, %v5484_v4  ;;  %v5485_v9 = vrot.slane %v4907_v10, 4 }
 0x4db   :  { %v5486_v13 = vsel %vm4926_vm6, %v5483_v26, %v5485_v9  ;;  %5516 = vst.msk [vmem:[#allocation2 + $0x430] sm:$0xf] %vm4910_vm5, %v5485_v9 }
 0x4dc   :  { %5515 = vst.msk [vmem:[#allocation2 + $0x428] sm:$0xff] %vm4908_vm3, %v5486_v13 }
 0x4dd LB: > { %v10412_v24 = vld [vmem:[%s15394_s3 + $0x30] sm:$0xff]   ;;  %v10413_v3 = vld [vmem:[%s15394_s3 + $0x38] sm:$0xff]   ;;  %s9265_s15 = smul.u32 136, %s10478_s2  ;;  %v10414_v55 = vld [vmem:[%s15394_s3 + $0x40] sm:$0xff]   ;;  %vm5796_vm7 = vsmask.f32 4352  ;;  %s10478_s2 = sphi %s14421_s2, %s5524_s2  }
 0x4de   : > { %9859 = vmatprep.subr.bf16.mxu0 %v10412_v24  ;;  %v10416_v51 = vld [vmem:[%s15394_s3 + $0x10] sm:$0xff]   ;;  %v10417_v59 = vld [vmem:[%s15394_s3 + $0x18] sm:$0xff]   ;;  %v10415_v8 = vld [vmem:[%s15394_s3 + $0x48] sm:$0xff]   ;;  %vm6136_vm8 = vsmask.f32 3328  ;;  %vm8521_vm9 = vcmask 785408  }
 0x4df   : > { %9860 = vmatpush3.bf16.msra.mxu0 %v10412_v24  ;;  %s14436_s18 = scalar_lea.vmem [#allocation2], %s9265_s15  ;;  %9763 = vmatprep.subr.bf16.mxu1 %v10416_v51  ;;  %v14526_v6 = vld [vmem:[%s15394_s3 + $0x50] sm:$0xff]   ;;  %v10420_v27 = vld [vmem:[%s15394_s3] sm:$0xff]   ;;  %s9273_s28 = smul.u32 28, %s10478_s2  ;;  %vm8783_vm10 = vcmask 519168   ;;  %vm8790_vm11 = vcmask 516096  }
 0x4e0   : > { %9861 = vmatprep.subr.bf16.mxu0 %v10413_v3  ;;  %9764 = vmatpush3.bf16.msra.mxu1 %v10416_v51  ;;  %vm8791_vm12 = vsmask.f32 256  ;;  %s5524_s2 = sadd.s32 1, %s10478_s2  }
 0x4e1   : > { %9765 = vmatprep.subr.bf16.mxu1 %v10417_v59  ;;  %s15368_s1 = scalar_lea.vmem %s15397_s6, %s9273_s28  ;;  %vm8792_vm13 = vmand %vm8790_vm11, %vm8791_vm12  ;;  %p5521_p0 = scmp.ge.s32.totalorder %s5524_s2, 8  }
 0x4e3   : > { %v6433_v32 = vld [vmem:[%s14436_s18 + $0x8] sm:$0xf8]  ;;  %v14440_v58 = vld [vmem:[%s14436_s18 + $0x10] sm:$0xff]  ;;  %v14443_v52 = vld [vmem:[%s14436_s18 + $0x18] sm:$0xff]  ;;  %9862 = vmatpush3.bf16.msra.mxu0 %v10413_v3 }
 0x4e4   : > { %v6454_v25 = vshrl.u32 %v6433_v32, 16  ;;  %v6457_v45 = vshll.u32 %v6433_v32, 16  ;;  %v6462_v21 = vshrl.u32 %v14440_v58, 16  ;;  %v6465_v14 = vshll.u32 %v14440_v58, 16  ;;  %v14448_v7 = vld [vmem:[%s14436_s18 + $0x20] sm:$0xff]  ;;  %v14455_v39 = vld [vmem:[%s14436_s18 + $0x28] sm:$0xff]  ;;  %9891 = vmatprep.subr.bf16.mxu0 %v10414_v55  ;;  %9766 = vmatpush3.bf16.msra.mxu1 %v10417_v59 }
 0x4e5   : > { %v6471_v1 = vshrl.u32 %v14443_v52, 16  ;;  %v6474_v61 = vshll.u32 %v14443_v52, 16  ;;  %v6480_v5 = vshrl.u32 %v14448_v7, 16  ;;  %v6483_v40 = vshll.u32 %v14448_v7, 16  ;;  %v14462_v50 = vld [vmem:[%s14436_s18 + $0x30] sm:$0xff]  ;;  %v14493_v35 = vld [vmem:[%s14436_s18 + $0x38] sm:$0xff]  ;;  %9795 = vmatprep.subr.bf16.mxu1 %v10420_v27 }
 0x4e6   : > { %v6456_v18 = vrot.slane %v6454_v25, 3  ;;  %v6459_v31 = vrot.slane %v6457_v45, 4  ;;  %v6464_v0 = vrot.slane %v6462_v21, 3  ;;  %v6467_v56 = vrot.slane %v6465_v14, 4  ;;  %v14513_v37 = vld [vmem:[%s14436_s18 + $0x40] sm:$0xff]  ;;  %v14532_v62 = vld [vmem:[%s14436_s18 + $0x48] sm:$0xff] }
 0x4e7   : > { %v6473_v57 = vrot.slane %v6471_v1, 3  ;;  %v6476_v28 = vrot.slane %v6474_v61, 4  ;;  %v6482_v38 = vrot.slane %v6480_v5, 3  ;;  %v6485_v63 = vrot.slane %v6483_v40, 4  ;;  %v14535_v42 = vld [vmem:[%s14436_s18 + $0x50] sm:$0xff]  ;;  %v14558_v24 = vld [vmem:[%s14436_s18 + $0x58] sm:$0xff] }
 0x4e8   : > { %v6460_v12 = vor.u32 %v6459_v31, %v6456_v18  ;;  %v14472_v44 = vor.u32 %v6467_v56, %v6464_v0  ;;  %v6489_v43 = vshrl.u32 %v14455_v39, 16  ;;  %v6492_v41 = vshll.u32 %v14455_v39, 16  ;;  %v14561_v3 = vld [vmem:[%s14436_s18 + $0x60] sm:$0xff]  ;;  %v14566_v32 = vld [vmem:[%s14436_s18 + $0x68] sm:$0xff] }
 0x4e9   : > { %v14479_v46 = vor.u32 %v6476_v28, %v6473_v57  ;;  %v6486_v48 = vor.u32 %v6485_v63, %v6482_v38  ;;  %v6498_v17 = vshrl.u32 %v14462_v50, 16  ;;  %v6501_v19 = vshll.u32 %v14462_v50, 16  ;;  %v14569_v25 = vld [vmem:[%s14436_s18] sm:$0xf0]  ;;  %v14573_v31 = vld [vmem:[%s14436_s18 + $0x8] sm:$0xff]  ;;  %v14583_v38 = vld [vmem:[%s14436_s18 + $0x70] sm:$0xff] }
 0x4ea   : > { %v6469_v54 = vsel %vm5796_vm7, %v6460_v12, %v14472_v44  ;;  %v6491_v2 = vrot.slane %v6489_v43, 3  ;;  %v6494_v11 = vrot.slane %v6492_v41, 4  ;;  %v6507_v60 = vshrl.u32 %v14493_v35, 16 }
 0x4eb   : > { %9863 = vmatprep.mubr.msk.bf16.mxu0 %vm4908_vm3, %v6469_v54  ;;  %v14502_v29 = vsel %vm5796_vm7, %v14472_v44, %v14479_v46  ;;  %v14506_v49 = vsel %vm5796_vm7, %v14479_v46, %v6486_v48  ;;  %v6500_v30 = vrot.slane %v6498_v17, 3  ;;  %v6503_v23 = vrot.slane %v6501_v19, 4 }
 0x4ec   : > { %9864 = vmatmul.mubr.msk.bf16.vlgmr.msra.gmra.mrb[0].mxu0 %vm4908_vm3, %v14502_v29  ;;  %v6495_v53 = vor.u32 %v6494_v11, %v6491_v2  ;;  %v6510_v33 = vshll.u32 %v14493_v35, 16  ;;  %v6516_v34 = vshrl.u32 %v14513_v37, 16  ;;  %v15709_v47 = vshll.u32 %v14513_v37, 16 }
 0x4ed   : > { %9892 = vmatpush3.bf16.msra.mxu0 %v10414_v55  ;;  %9867 = vmatprep.mubr.msk.bf16.mxu0 %vm4908_vm3, %v14506_v49  ;;  %v6504_v16 = vor.u32 %v6503_v23, %v6500_v30  ;;  %v6509_v15 = vrot.slane %v6507_v60, 3  ;;  %v15708_v4 = vshrl.u32 %v14532_v62, 16  ;;  %v15705_v9 = vshll.u32 %v14532_v62, 16 }
 0x4ee   : > { %9893 = vmatprep.subr.bf16.mxu0 %v10415_v8  ;;  %v14538_v36 = vsel %vm5796_vm7, %v6486_v48, %v6495_v53  ;;  %v6512_v22 = vrot.slane %v6510_v33, 4  ;;  %v6518_v26 = vrot.slane %v6516_v34, 3  ;;  %v6521_v10 = vrot.slane %v15709_v47, 4 }
 0x4ef   : > { %v14545_v20 = vsel %vm5796_vm7, %v6495_v53, %v6504_v16  ;;  %v15704_v13 = vshrl.u32 %v14535_v42, 16  ;;  %v15699_v18 = vshll.u32 %v14535_v42, 16  ;;  %v6527_v0 = vrot.slane %v15708_v4, 3 }
 0x4f0   : > { %v6513_v55 = vor.u32 %v6512_v22, %v6509_v15  ;;  %v6522_v45 = vor.u32 %v6521_v10, %v6518_v26  ;;  %v6530_v56 = vrot.slane %v15705_v9, 4  ;;  %v15697_v28 = vshrl.u32 %v14558_v24, 16  ;;  %v10421_v22 = vld [vmem:[%s15394_s3 + $0x8] sm:$0xff]  }
 0x4f1   : > { %9894 = vmatpush3.bf16.msra.mxu0 %v10415_v8  ;;  %v6536_v57 = vrot.slane %v15704_v13, 3  ;;  %v5568_v63 = vrot.slane %v14569_v25, 4  ;;  %v15698_v51 = vshll.u32 %v14558_v24, 16  ;;  %v15703_v48 = vshrl.u32 %v14561_v3, 16 }
 0x4f2   : > { %9923 = vmatprep.subr.bf16.mxu0 %v14526_v6  ;;  %v14587_v12 = vsel %vm5796_vm7, %v6504_v16, %v6513_v55  ;;  %v5569_v59 = vrot.slane %v14573_v31, 4  ;;  %v14593_v54 = vsel %vm5796_vm7, %v6513_v55, %v6522_v45  ;;  %v6539_v2 = vrot.slane %v15699_v18, 4 }
 0x4f3   : > { %v15700_v11 = vshll.u32 %v14561_v3, 16  ;;  %v15701_v8 = vshrl.u32 %v14566_v32, 16  ;;  %v15702_v30 = vshll.u32 %v14566_v32, 16  ;;  %v14602_v53 = vrot.slane %v14440_v58, 4 }
 0x4f4   : > { %9868 = vmatmul.mubr.msk.bf16.gmra.mrb[4].mxu0 %vm4908_vm3, %v14538_v36  ;;  %v5570_v23 = vsel %vm4926_vm6, %v5568_v63, %v5569_v59  ;;  %v6531_v16 = vor.u32 %v6530_v56, %v6527_v0  ;;  %v6545_v15 = vrot.slane %v15697_v28, 3  ;;  %v6548_v26 = vrot.slane %v15698_v51, 4  ;;  %v14625_v28 = vld [vmem:[%s14436_s18 + $0x78] sm:$0xf] }
 0x4f5   : > { %9871 = vmatprep.mubr.msk.bf16.mxu0 %vm4908_vm3, %v14545_v20  ;;  %9767 = vmatprep.mubr.msk.bf16.mxu1 %vm4908_vm3, %v5570_v23  ;;  %v15706_v10 = vshrl.u32 %v14583_v38, 16  ;;  %v15707_v55 = vshll.u32 %v14583_v38, 16  ;;  %v5572_v0 = vsel %vm4926_vm6, %v5569_v59, %v14602_v53  ;;  %v6540_v56 = vor.u32 %v6539_v2, %v6536_v57 }
 0x4f6   : > { %v6554_v63 = vrot.slane %v15703_v48, 3  ;;  %v6557_v23 = vrot.slane %v15700_v11, 4  ;;  %9768 = vmatmul.mubr.msk.bf16.vlgmr.msra.gmra.mrb[0].mxu1 %vm4908_vm3, %v5572_v0  ;;  %v14629_v51 = vrot.slane %v14443_v52, 4  ;;  %v6563_v18 = vrot.slane %v15701_v8, 3 }
 0x4f7   : > { %v6566_v59 = vrot.slane %v15702_v30, 4  ;;  %v5575_v57 = vrot.slane %v14448_v7, 4  ;;  %9796 = vmatpush3.bf16.msra.mxu1 %v10420_v27  ;;  %v14642_v0 = vsel %vm5796_vm7, %v6522_v45, %v6531_v16  ;;  %v6572_v11 = vrot.slane %v15706_v10, 3 }
 0x4f8   : > { %16706 = vst [vmem:[#allocation361_spill] sm:$0xff] %v14629_v51  ;;  %v14639_v2 = vsel %vm4926_vm6, %v14602_v53, %v14629_v51  ;;  %9797 = vmatprep.subr.bf16.mxu1 %v10421_v22  ;;  %v6575_v8 = vrot.slane %v15707_v55, 4  ;;  %v14651_v27 = vsel %vm5796_vm7, %v6531_v16, %v6540_v56  ;;  %v6549_v30 = vor.u32 %v6548_v26, %v6545_v15  ;;  %v14669_v15 = vld [vmem:[%s15394_s3 + $0x20] sm:$0xff]  }
 0x4f9   : > { %9771 = vmatprep.mubr.msk.bf16.mxu1 %vm4908_vm3, %v14639_v2  ;;  %v6842_v48 = vrot.slane %v14455_v39, 4  ;;  %v14654_v13 = vor.u32 %v6557_v23, %v6554_v63  ;;  %v14656_v9 = vor.u32 %v6566_v59, %v6563_v18  ;;  %v6579_v45 = vshrl.u32 %v14625_v28, 16 }
 0x4fa   : > { %v14661_v10 = vsel %vm4926_vm6, %v14629_v51, %v5575_v57  ;;  %v6582_v16 = vshll.u32 %v14625_v28, 16  ;;  %v14673_v18 = vor.u32 %v6575_v8, %v6572_v11  ;;  %v14676_v26 = vsel %vm5796_vm7, %v6540_v56, %v6549_v30  ;;  %v14786_v51 = vld [vmem:[%s14436_s18 + $0x8] sm:$0xf0] }
 0x4fb   : > { %9798 = vmatpush3.bf16.msra.mxu1 %v10421_v22  ;;  %v14681_v22 = vsel %vm4926_vm6, %v5575_v57, %v6842_v48  ;;  %v14686_v63 = vsel %vm5796_vm7, %v6549_v30, %v14654_v13  ;;  %v14691_v11 = vsel %vm5796_vm7, %v14654_v13, %v14656_v9  ;;  %v14693_v8 = vrot.slane %v6579_v45, 3 }
 0x4fc   : > { %9872 = vmatmul.mubr.msk.bf16.gmra.mrb[8].mxu0 %vm4908_vm3, %v14587_v12  ;;  %9827 = vmatprep.subr.bf16.mxu1 %v14669_v15  ;;  %v5579_v56 = vrot.slane %v14462_v50, 4  ;;  %v14698_v23 = vrot.slane %v6582_v16, 4  ;;  %v7105_v59 = vrot.slane %v6462_v21, 4  ;;  %v7106_v30 = vrot.slane %v6465_v14, 5 }
 0x4fd   : > { %9875 = vmatprep.mubr.msk.bf16.mxu0 %vm4908_vm3, %v14593_v54  ;;  %v7109_v57 = vrot.slane %v6471_v1, 4  ;;  %v6577_v45 = vsel %vm5796_vm7, %v14656_v9, %v14673_v18  ;;  %v7110_v55 = vrot.slane %v6474_v61, 5  ;;  %v7113_v16 = vrot.slane %v6480_v5, 4 }
 0x4fe   : > { %9772 = vmatmul.mubr.msk.bf16.gmra.mrb[4].mxu1 %vm4908_vm3, %v14661_v10  ;;  %v6846_v4 = vrot.slane %v14493_v35, 4  ;;  %v14714_v47 = vor.u32 %v7106_v30, %v7105_v59  ;;  %v7114_v58 = vrot.slane %v6483_v40, 5  ;;  %v7117_v21 = vrot.slane %v6489_v43, 4 }
 0x4ff   : > { %9775 = vmatprep.mubr.msk.bf16.mxu1 %vm4908_vm3, %v14681_v22  ;;  %v14721_v14 = vsel %vm4926_vm6, %v6842_v48, %v5579_v56  ;;  %v14723_v1 = vor.u32 %v7110_v55, %v7109_v57  ;;  %v7118_v52 = vrot.slane %v6492_v41, 5  ;;  %v7121_v61 = vrot.slane %v6498_v17, 4 }
 0x500   : > { %v5583_v7 = vrot.slane %v14513_v37, 4  ;;  %v14732_v5 = vor.u32 %v7114_v58, %v7113_v16  ;;  %v7122_v40 = vrot.slane %v6501_v19, 5  ;;  %v7125_v43 = vrot.slane %v6507_v60, 4 }
 0x501   : > { %v6850_v39 = vrot.slane %v14532_v62, 4  ;;  %v7119_v41 = vor.u32 %v7118_v52, %v7117_v21  ;;  %v7126_v17 = vrot.slane %v6510_v33, 5  ;;  %v7129_v48 = vrot.slane %v6516_v34, 4 }
 0x502   : > { %v14748_v50 = vsel %vm4926_vm6, %v5579_v56, %v6846_v4  ;;  %v7123_v19 = vor.u32 %v7122_v40, %v7121_v61  ;;  %v16707_v60 = vshll.u32 %v14513_v37, 16  ;;  %v16708_v59 = vshrl.u32 %v14532_v62, 16 }
 0x503   : > { %v14758_v35 = vsel %vm6136_vm8, %v14732_v5, %v7119_v41  ;;  %v7127_v33 = vor.u32 %v7126_v17, %v7125_v43  ;;  %v16709_v34 = vshll.u32 %v14532_v62, 16  ;;  %v16710_v57 = vshrl.u32 %v14535_v42, 16 }
 0x504   : > { %9876 = vmatmul.mubr.msk.bf16.gmra.mrb[12].mxu0 %vm4908_vm3, %v14642_v0  ;;  %v7130_v55 = vrot.slane %v16707_v60, 5  ;;  %v7133_v30 = vrot.slane %v16708_v59, 4  ;;  %v14765_v37 = vsel %vm6136_vm8, %v7119_v41, %v7123_v19  ;;  %v16711_v21 = vshll.u32 %v14535_v42, 16 }
 0x505   : > { %9879 = vmatprep.mubr.msk.bf16.mxu0 %vm4908_vm3, %v14651_v27  ;;  %v7134_v56 = vrot.slane %v16709_v34, 5  ;;  %v7137_v16 = vrot.slane %v16710_v57, 4  ;;  %v16712_v61 = vshrl.u32 %v14558_v24, 16  ;;  %v14772_v60 = vsel %vm6136_vm8, %v7123_v19, %v7127_v33 }
 0x506   : > { %9776 = vmatmul.mubr.msk.bf16.gmra.mrb[8].mxu1 %vm4908_vm3, %v14721_v14  ;;  %v7131_v58 = vor.u32 %v7130_v55, %v7129_v48  ;;  %v7138_v52 = vrot.slane %v16711_v21, 5  ;;  %v16713_v62 = vshll.u32 %v14558_v24, 16  ;;  %v16714_v59 = vshrl.u32 %v14561_v3, 16 }
 0x507   : > { %9779 = vmatprep.mubr.msk.bf16.mxu1 %vm4908_vm3, %v14748_v50  ;;  %v7141_v40 = vrot.slane %v16712_v61, 4  ;;  %v7135_v43 = vor.u32 %v7134_v56, %v7133_v30  ;;  %v16715_v55 = vshll.u32 %v14561_v3, 16  ;;  %v16716_v21 = vshrl.u32 %v14566_v32, 16 }
 0x508   : > { %v7142_v17 = vrot.slane %v16713_v62, 5  ;;  %v7145_v34 = vrot.slane %v16714_v59, 4  ;;  %v14779_v41 = vsel %vm6136_vm8, %v7127_v33, %v7131_v58  ;;  %v7139_v48 = vor.u32 %v7138_v52, %v7137_v16 }
 0x509   : > { %v7146_v57 = vrot.slane %v16715_v55, 5  ;;  %v7149_v61 = vrot.slane %v16716_v21, 4  ;;  %v14789_v19 = vsel %vm4926_vm6, %v6846_v4, %v5583_v7  ;;  %v14792_v30 = vsel %vm6136_vm8, %v7131_v58, %v7135_v43 }
 0x50a   : > { %v14794_v56 = vor.u32 %v7142_v17, %v7141_v40  ;;  %v16717_v33 = vshll.u32 %v14566_v32, 16  ;;  %v14801_v16 = vsel %vm6136_vm8, %v7135_v43, %v7139_v48  ;;  %v16718_v59 = vshrl.u32 %v14583_v38, 16 }
 0x50b   : > { %v14803_v52 = vor.u32 %v7146_v57, %v7145_v34  ;;  %v6585_v58 = vor.u32 %v14698_v23, %v14693_v8  ;;  %v16719_v43 = vshll.u32 %v14583_v38, 16  ;;  %v6835_v34 = vrot.slane %v14786_v51, 4 }
 0x50c   : > { %9880 = vmatmul.mubr.msk.bf16.gmra.mrb[16].mxu0 %vm4908_vm3, %v14676_v26  ;;  %v7150_v62 = vrot.slane %v16717_v33, 5  ;;  %v7153_v4 = vrot.slane %v16718_v59, 4  ;;  %v14812_v40 = vsel %vm6136_vm8, %v7139_v48, %v14794_v56  ;;  %v5587_v8 = vrot.slane %v14535_v42, 4  ;;  %v5528_v42 = vld [vmem:[%s14436_s18] sm:$0xf8]  ;;  %v10419_v59 = vld [vmem:[%s15394_s3 + $0x58] sm:$0xff]  }
 0x50d   : > { %9883 = vmatprep.mubr.msk.bf16.mxu0 %vm4908_vm3, %v14686_v63  ;;  %v7154_v55 = vrot.slane %v16719_v43, 5  ;;  %v6586_v48 = vsel %vm5796_vm7, %v14673_v18, %v6585_v58  ;;  %v6837_v21 = vsel %vm4926_vm6, %v6835_v34, %v14602_v53  ;;  %v5806_v53 = vshrl.u32 %v14573_v31, 16 }
 0x50e   : > { %v14814_v17 = vor.u32 %v7150_v62, %v7149_v61  ;;  %9780 = vmatmul.mubr.msk.bf16.gmra.mrb[12].mxu1 %vm4908_vm3, %v14789_v19  ;;  %v14840_v61 = vsel %vm4926_vm6, %v6850_v39, %v5587_v8  ;;  %v5798_v33 = vshrl.u32 %v5528_v42, 16  ;;  %v5801_v62 = vshll.u32 %v5528_v42, 16 }
 0x50f   : > { %v14827_v23 = vor.u32 %v7154_v55, %v7153_v4  ;;  %v6858_v4 = vrot.slane %v14566_v32, 4  ;;  %v5808_v34 = vrot.slane %v5806_v53, 3 }
 0x510   : > { %v5800_v43 = vrot.slane %v5798_v33, 3  ;;  %v5803_v55 = vrot.slane %v5801_v62, 4  ;;  %v10425_v62 = vld [vmem:[%s15394_s3 + $0x28] sm:$0xff]  }
 0x511   : > { %v14834_v57 = vsel %vm6136_vm8, %v14814_v17, %v14827_v23 }
 0x514   : > { %9884 = vmatmul.mubr.msk.bf16.gmra.mrb[20].mxu0 %vm4908_vm3, %v14691_v11 }
 0x515   : > { %9887 = vmatprep.mubr.msk.bf16.mxu0 %vm4908_vm3, %v6577_v45  ;;  %v14822_v45 = vsel %vm4926_vm6, %v5583_v7, %v6850_v39  ;;  %v6854_v7 = vrot.slane %v14558_v24, 4  ;;  %v14853_v24 = vrot.slane %v14561_v3, 4  ;;  %v5809_v39 = vshll.u32 %v14573_v31, 16  ;;  %v14868_v3 = vld [vmem:[%s14436_s18 + $0x70] sm:$0xf] }
 0x516   : > { %9783 = vmatprep.mubr.msk.bf16.mxu1 %vm4908_vm3, %v14822_v45 }
 0x517   : > { %9784 = vmatmul.mubr.msk.bf16.gmra.mrb[16].mxu1 %vm4908_vm3, %v14840_v61  ;;  %v14848_v18 = vsel %vm4926_vm6, %v5587_v8, %v6854_v7  ;;  %v14863_v58 = vsel %vm4926_vm6, %v6854_v7, %v14853_v24  ;;  %v5811_v8 = vrot.slane %v5809_v39, 4  ;;  %v6859_v32 = vsel %vm4926_vm6, %v14853_v24, %v6858_v4 }
 0x518   : > { %9787 = vmatprep.mubr.msk.bf16.mxu1 %vm4908_vm3, %v14848_v18 }
 0x51c   : > { %9888 = vmatmul.mubr.msk.bf16.gmra.mrb[24].mxu0 %vm4908_vm3, %v6586_v48  ;;  %v5595_v48 = vrot.slane %v14868_v3, 4 }
 0x51d   : > { %9895 = vmatprep.mubr.msk.bf16.mxu0 %vm4908_vm3, %v6837_v21  ;;  %v5804_v21 = vor.u32 %v5803_v55, %v5800_v43 }
 0x51e   : > { %v5596_v7 = vsel %vm4926_vm6, %v6858_v4, %v5595_v48  ;;  %v6141_v48 = vshll.u32 %v14569_v25, 16 }
 0x51f   : > { %9788 = vmatmul.mubr.msk.bf16.gmra.mrb[20].mxu1 %vm4908_vm3, %v14863_v58 }
 0x520   : > { %9791 = vmatprep.mubr.msk.bf16.mxu1 %vm4908_vm3, %v6859_v32 }
 0x524   : > { %9896 = vmatmul.mubr.msk.bf16.vlgmr.msra.gmra.mrb[0].mxu0 %vm4908_vm3, %v14639_v2  ;;  %v10422_v2 = vld [vmem:[%s15394_s3 + $0x60] sm:$0xff]  }
 0x525   : > { %9924 = vmatpush3.bf16.msra.mxu0 %v14526_v6  ;;  %9899 = vmatprep.mubr.msk.bf16.mxu0 %vm4908_vm3, %v14661_v10  ;;  %v5812_v6 = vor.u32 %v5811_v8, %v5808_v34  ;;  %v6862_v34 = vrot.slane %v14625_v28, 4  ;;  %v5923_v28 = vshrl.u32 %v14868_v3, 16 }
 0x526   : > { %9925 = vmatprep.subr.bf16.mxu0 %v10419_v59 }
 0x527   : > { %v5813_v42 = vsel %vm5796_vm7, %v5804_v21, %v5812_v6  ;;  %9792 = vmatmul.mubr.msk.bf16.gmra.mrb[24].mxu1 %vm4908_vm3, %v5596_v7  ;;  %v5822_v33 = vsel %vm5796_vm7, %v5812_v6, %v14472_v44  ;;  %v7098_v44 = vshrl.u32 %v14786_v51, 16  ;;  %v7112_v21 = vsel %vm6136_vm8, %v14714_v47, %v14723_v1 }
 0x528   : > { %9799 = vmatprep.mubr.msk.bf16.mxu1 %vm4908_vm3, %v5813_v42  ;;  %v14953_v6 = vsel %vm6136_vm8, %v14723_v1, %v14732_v5  ;;  %v5925_v7 = vrot.slane %v5923_v28, 3  ;;  %v10426_v5 = vld [vmem:[%s15394_s3 + $0x70] sm:$0xff]  }
 0x529   : > { %9926 = vmatpush3.bf16.msra.mxu0 %v10419_v59  ;;  %v7100_v43 = vrot.slane %v7098_v44, 4  ;;  %v6146_v44 = vrot.slane %v5809_v39, 5 }
 0x52a   : > { %9955 = vmatprep.subr.bf16.mxu0 %v10422_v2 }
 0x52c   : > { %9900 = vmatmul.mubr.msk.bf16.gmra.mrb[4].mxu0 %vm4908_vm3, %v14681_v22 }
 0x52d   : > { %9903 = vmatprep.mubr.msk.bf16.mxu0 %vm4908_vm3, %v14721_v14 }
 0x52f   : > { %9800 = vmatmul.mubr.msk.bf16.vlgmr.msra.gmra.mrb[0].mxu1 %vm4908_vm3, %v5822_v33 }
 0x530   : > { %9803 = vmatprep.mubr.msk.bf16.mxu1 %vm4908_vm3, %v14502_v29  ;;  %9828 = vmatpush3.bf16.msra.mxu1 %v14669_v15  ;;  %v7101_v29 = vshll.u32 %v14786_v51, 16  ;;  %v6860_v15 = vrot.slane %v14583_v38, 4 }
 0x531   : > { %9829 = vmatprep.subr.bf16.mxu1 %v10425_v62 }
 0x532   : > { %v6861_v59 = vsel %vm4926_vm6, %v6858_v4, %v6860_v15  ;;  %v7103_v55 = vrot.slane %v7101_v29, 5  ;;  %v6863_v38 = vsel %vm4926_vm6, %v6860_v15, %v6862_v34  ;;  %v5926_v4 = vshll.u32 %v14868_v3, 16  ;;  %v10423_v3 = vld [vmem:[%s15394_s3 + $0x68] sm:$0xff]  }
 0x534   : > { %9904 = vmatmul.mubr.msk.bf16.gmra.mrb[8].mxu0 %vm4908_vm3, %v14748_v50  ;;  %9830 = vmatpush3.bf16.msra.mxu1 %v10425_v62  ;;  %v7104_v8 = vor.u32 %v7103_v55, %v7100_v43  ;;  %v5928_v42 = vrot.slane %v5926_v4, 4  ;;  %v6143_v62 = vrot.slane %v6141_v48, 5 }
 0x535   : > { %9907 = vmatprep.mubr.msk.bf16.mxu0 %vm4908_vm3, %v14789_v19 }
 0x536   : > { %v7108_v51 = vsel %vm6136_vm8, %v7104_v8, %v14714_v47  ;;  %v5929_v29 = vor.u32 %v5928_v42, %v5925_v7 }
 0x537   : > { %9804 = vmatmul.mubr.msk.bf16.gmra.mrb[4].mxu1 %vm4908_vm3, %v14506_v49 }
 0x538   : > { %9807 = vmatprep.mubr.msk.bf16.mxu1 %vm4908_vm3, %v14538_v36  ;;  %v5930_v31 = vsel %vm5796_vm7, %v14656_v9, %v5929_v29  ;;  %v7091_v9 = vld [vmem:[%s14436_s18 + $0x78] sm:$0x1f] }
 0x539   : > { %v7161_v43 = vshll.u32 %v7091_v9, 16 }
 0x53c   : > { %9908 = vmatmul.mubr.msk.bf16.gmra.mrb[12].mxu0 %vm4908_vm3, %v14822_v45 }
 0x53d   : > { %9911 = vmatprep.mubr.msk.bf16.mxu0 %vm4908_vm3, %v14840_v61 }
 0x53f   : > { %9808 = vmatmul.mubr.msk.bf16.gmra.mrb[8].mxu1 %vm4908_vm3, %v14545_v20 }
 0x540   : > { %9811 = vmatprep.mubr.msk.bf16.mxu1 %vm4908_vm3, %v14587_v12 }
 0x544   : > { %9912 = vmatmul.mubr.msk.bf16.gmra.mrb[16].mxu0 %vm4908_vm3, %v14848_v18 }
 0x545   : > { %9915 = vmatprep.mubr.msk.bf16.mxu0 %vm4908_vm3, %v14863_v58 }
 0x547   : > { %9812 = vmatmul.mubr.msk.bf16.gmra.mrb[12].mxu1 %vm4908_vm3, %v14593_v54 }
 0x548   : > { %9815 = vmatprep.mubr.msk.bf16.mxu1 %vm4908_vm3, %v14642_v0 }
 0x54c   : > { %9916 = vmatmul.mubr.msk.bf16.gmra.mrb[20].mxu0 %vm4908_vm3, %v6859_v32  ;;  %v6138_v32 = vshrl.u32 %v14569_v25, 16  ;;  %v6145_v25 = vrot.slane %v5806_v53, 4 }
 0x54d   : > { %9919 = vmatprep.mubr.msk.bf16.mxu0 %vm4908_vm3, %v6861_v59  ;;  %v7158_v59 = vshrl.u32 %v7091_v9, 16  ;;  %v7407_v9 = vld [vmem:[%s14436_s18 + $0x80] sm:$0xf] }
 0x54e   : > { %v6140_v33 = vrot.slane %v6138_v32, 4  ;;  %v6147_v15 = vor.u32 %v6146_v44, %v6145_v25  ;;  %v15067_v44 = vld [vmem:[%s14436_s18 + $0x70] sm:$0xff] }
 0x54f   : > { %9816 = vmatmul.mubr.msk.bf16.gmra.mrb[16].mxu1 %vm4908_vm3, %v14651_v27  ;;  %v7160_v8 = vrot.slane %v7158_v59, 4  ;;  %v7539_v59 = vshrl.u32 %v7407_v9, 16 }
 0x550   : > { %9819 = vmatprep.mubr.msk.bf16.mxu1 %vm4908_vm3, %v14676_v26  ;;  %v6144_v53 = vor.u32 %v6143_v62, %v6140_v33  ;;  %v10428_v33 = vld [vmem:[%s15394_s3 + $0x80] sm:$0xff]  }
 0x552   : > { %v6148_v39 = vsel %vm6136_vm8, %v6144_v53, %v6147_v15 }
 0x554   : > { %9920 = vmatmul.mubr.msk.bf16.gmra.mrb[24].mxu0 %vm4908_vm3, %v6863_v38  ;;  %v7163_v38 = vrot.slane %v7161_v43, 5  ;;  %v7542_v43 = vshll.u32 %v7407_v9, 16 }
 0x555   : > { %9927 = vmatprep.mubr.msk.bf16.mxu0 %vm4908_vm3, %v7108_v51 }
 0x556   : > { %v7164_v4 = vor.u32 %v7163_v38, %v7160_v8  ;;  %v7774_v38 = vld [vmem:[%s14436_s18 + $0x10] sm:$0xf0] }
 0x557   : > { %9820 = vmatmul.mubr.msk.bf16.gmra.mrb[20].mxu1 %vm4908_vm3, %v14686_v63 }
 0x558   : > { %9823 = vmatprep.mubr.msk.bf16.mxu1 %vm4908_vm3, %v14691_v11  ;;  %v6152_v11 = vsel %vm6136_vm8, %v6147_v15, %v14714_v47  ;;  %v15000_v47 = vsel %vm6136_vm8, %v14794_v56, %v14803_v52  ;;  %v7152_v56 = vsel %vm6136_vm8, %v14803_v52, %v14814_v17  ;;  %v7165_v48 = vsel %vm6136_vm8, %v14827_v23, %v7164_v4  ;;  %v10427_v23 = vld [vmem:[%s15394_s3 + $0x78] sm:$0xff]   ;;  %v16720_v4 = vld [vmem:[#allocation361_spill] sm:$0xff] }
 0x55c   : > { %9928 = vmatmul.mubr.msk.bf16.vlgmr.msra.gmra.mrb[0].mxu0 %vm4908_vm3, %v7112_v21 }
 0x55d   : > { %9956 = vmatpush3.bf16.msra.mxu0 %v10422_v2  ;;  %9931 = vmatprep.mubr.msk.bf16.mxu0 %vm4908_vm3, %v14953_v6  ;;  %v7393_v2 = vld [vmem:[%s14436_s18 + $0x10] sm:$0xf8] }
 0x55e   : > { %9957 = vmatprep.subr.bf16.mxu0 %v10423_v3  ;;  %v7414_v55 = vshrl.u32 %v7393_v2, 16  ;;  %v7417_v34 = vshll.u32 %v7393_v2, 16 }
 0x55f   : > { %9824 = vmatmul.mubr.msk.bf16.gmra.mrb[24].mxu1 %vm4908_vm3, %v5930_v31 }
 0x560   : > { %9831 = vmatprep.mubr.msk.bf16.mxu1 %vm4908_vm3, %v6148_v39  ;;  %v7416_v51 = vrot.slane %v7414_v55, 3  ;;  %v7419_v28 = vrot.slane %v7417_v34, 4 }
 0x561   : > { %9958 = vmatpush3.bf16.msra.mxu0 %v10423_v3  ;;  %v6130_v3 = vld [vmem:[%s14436_s18 + $0x70] sm:$0x1f] }
 0x562   : > { %9987 = vmatprep.subr.bf16.mxu0 %v10426_v5  ;;  %v7420_v32 = vor.u32 %v7419_v28, %v7416_v51  ;;  %v6201_v7 = vshll.u32 %v6130_v3, 16  ;;  %v7795_v28 = vrot.slane %v7774_v38, 4 }
 0x564   : > { %9932 = vmatmul.mubr.msk.bf16.gmra.mrb[4].mxu0 %vm4908_vm3, %v14758_v35 }
 0x565   : > { %9935 = vmatprep.mubr.msk.bf16.mxu0 %vm4908_vm3, %v14765_v37 }
 0x567   : > { %9832 = vmatmul.mubr.msk.bf16.vlgmr.msra.gmra.mrb[0].mxu1 %vm4908_vm3, %v6152_v11 }
 0x568   : > { %9835 = vmatprep.mubr.msk.bf16.mxu1 %vm4908_vm3, %v7112_v21  ;;  %v7429_v21 = vsel %vm5796_vm7, %v7420_v32, %v14479_v46  ;;  %v6203_v46 = vrot.slane %v6201_v7, 5  ;;  %v7797_v32 = vsel %vm4926_vm6, %v7795_v28, %v16720_v4 }
 0x56c   : > { %9936 = vmatmul.mubr.msk.bf16.gmra.mrb[8].mxu0 %vm4908_vm3, %v14772_v60 }
 0x56d   : > { %9939 = vmatprep.mubr.msk.bf16.mxu0 %vm4908_vm3, %v14779_v41 }
 0x56f   : > { %9836 = vmatmul.mubr.msk.bf16.gmra.mrb[4].mxu1 %vm4908_vm3, %v14953_v6 }
 0x570   : > { %9839 = vmatprep.mubr.msk.bf16.mxu1 %vm4908_vm3, %v14758_v35 }
 0x574   : > { %9940 = vmatmul.mubr.msk.bf16.gmra.mrb[12].mxu0 %vm4908_vm3, %v14792_v30 }
 0x575   : > { %9943 = vmatprep.mubr.msk.bf16.mxu0 %vm4908_vm3, %v14801_v16 }
 0x577   : > { %9840 = vmatmul.mubr.msk.bf16.gmra.mrb[8].mxu1 %vm4908_vm3, %v14765_v37 }
 0x578   : > { %9843 = vmatprep.mubr.msk.bf16.mxu1 %vm4908_vm3, %v14772_v60 }
 0x57c   : > { %9944 = vmatmul.mubr.msk.bf16.gmra.mrb[16].mxu0 %vm4908_vm3, %v14812_v40 }
 0x57d   : > { %9947 = vmatprep.mubr.msk.bf16.mxu0 %vm4908_vm3, %v15000_v47 }
 0x57f   : > { %9844 = vmatmul.mubr.msk.bf16.gmra.mrb[12].mxu1 %vm4908_vm3, %v14779_v41 }
 0x580   : > { %9847 = vmatprep.mubr.msk.bf16.mxu1 %vm4908_vm3, %v14792_v30 }
 0x584   : > { %9948 = vmatmul.mubr.msk.bf16.gmra.mrb[20].mxu0 %vm4908_vm3, %v7152_v56 }
 0x585   : > { %9951 = vmatprep.mubr.msk.bf16.mxu0 %vm4908_vm3, %v14834_v57  ;;  %v6198_v57 = vshrl.u32 %v6130_v3, 16 }
 0x587   : > { %9848 = vmatmul.mubr.msk.bf16.gmra.mrb[16].mxu1 %vm4908_vm3, %v14801_v16  ;;  %v6200_v42 = vrot.slane %v6198_v57, 4 }
 0x588   : > { %9851 = vmatprep.mubr.msk.bf16.mxu1 %vm4908_vm3, %v14812_v40 }
 0x589   : > { %v6204_v62 = vor.u32 %v6203_v46, %v6200_v42 }
 0x58c   : > { %9952 = vmatmul.mubr.msk.bf16.gmra.mrb[24].mxu0 %vm4908_vm3, %v7165_v48  ;;  %v10429_v48 = vld [vmem:[%s15394_s3 + $0x88] sm:$0xff]  }
 0x58d   : > { %9959 = vmatprep.mubr.msk.bf16.mxu0 %vm4908_vm3, %v7429_v21 }
 0x58f   : > { %9852 = vmatmul.mubr.msk.bf16.gmra.mrb[20].mxu1 %vm4908_vm3, %v15000_v47 }
 0x590   : > { %9855 = vmatprep.mubr.msk.bf16.mxu1 %vm4908_vm3, %v7152_v56  ;;  %v7541_v56 = vrot.slane %v7539_v59, 3 }
 0x594   : > { %9960 = vmatmul.mubr.msk.bf16.vlgmr.msra.gmra.mrb[0].mxu0 %vm4908_vm3, %v14506_v49  ;;  %v6205_v49 = vsel %vm6136_vm8, %v14814_v17, %v6204_v62 }
 0x595   : > { %9988 = vmatpush3.bf16.msra.mxu0 %v10426_v5  ;;  %9963 = vmatprep.mubr.msk.bf16.mxu0 %vm4908_vm3, %v14538_v36  ;;  %v15054_v36 = vld [vmem:[%s14436_s18 + $0x68] sm:$0xff]  ;;  %v15070_v5 = vld [vmem:[%s14436_s18 + $0x78] sm:$0xff] }
 0x596   : > { %9989 = vmatprep.subr.bf16.mxu0 %v10427_v23  ;;  %v7512_v25 = vshrl.u32 %v15054_v36, 16  ;;  %v7515_v17 = vshll.u32 %v15054_v36, 16  ;;  %v7530_v53 = vshrl.u32 %v15070_v5, 16  ;;  %v7533_v15 = vshll.u32 %v15070_v5, 16 }
 0x597   : > { %9856 = vmatmul.mubr.msk.bf16.gmra.mrb[24].mxu1 %vm4908_vm3, %v6205_v49 }
 0x598   : > { %v7535_v11 = vrot.slane %v7533_v15, 4 }
 0x599   : > { %9990 = vmatpush3.bf16.msra.mxu0 %v10427_v23  ;;  %v8114_v23 = vrot.slane %v7533_v15, 5 }
 0x59a   : > { %10019 = vmatprep.subr.bf16.mxu0 %v10428_v33 }
 0x59c   : > { %9964 = vmatmul.mubr.msk.bf16.gmra.mrb[4].mxu0 %vm4908_vm3, %v14545_v20  ;;  %v7514_v20 = vrot.slane %v7512_v25, 3 }
 0x59d   : > { %9967 = vmatprep.mubr.msk.bf16.mxu0 %vm4908_vm3, %v14587_v12  ;;  %v7517_v12 = vrot.slane %v7515_v17, 4 }
 0x59f   : > { %v7518_v29 = vor.u32 %v7517_v12, %v7514_v20 }
 0x5a4   : > { %9968 = vmatmul.mubr.msk.bf16.gmra.mrb[8].mxu0 %vm4908_vm3, %v14593_v54  ;;  %v7521_v54 = vshrl.u32 %v15067_v44, 16 }
 0x5a5   : > { %9971 = vmatprep.mubr.msk.bf16.mxu0 %vm4908_vm3, %v14642_v0  ;;  %v7524_v0 = vshll.u32 %v15067_v44, 16 }
 0x5a6   : > { %v7523_v31 = vrot.slane %v7521_v54, 3 }
 0x5a7   : > { %v7526_v39 = vrot.slane %v7524_v0, 4 }
 0x5a9   : > { %v7527_v2 = vor.u32 %v7526_v39, %v7523_v31 }
 0x5ab   : > { %v7528_v34 = vsel %vm5796_vm7, %v7518_v29, %v7527_v2 }
 0x5ac   : > { %9972 = vmatmul.mubr.msk.bf16.gmra.mrb[12].mxu0 %vm4908_vm3, %v14651_v27  ;;  %v7519_v27 = vsel %vm5796_vm7, %v14654_v13, %v7518_v29  ;;  %v7544_v13 = vrot.slane %v7542_v43, 4 }
 0x5ad   : > { %9975 = vmatprep.mubr.msk.bf16.mxu0 %vm4908_vm3, %v14676_v26  ;;  %v7532_v26 = vrot.slane %v7530_v53, 3 }
 0x5ae   : > { %v7545_v51 = vor.u32 %v7544_v13, %v7541_v56 }
 0x5af   : > { %v7536_v55 = vor.u32 %v7535_v11, %v7532_v26 }
 0x5b1   : > { %v7537_v8 = vsel %vm5796_vm7, %v7527_v2, %v7536_v55  ;;  %v10484_v2 = vmov 0  }
 0x5b2   : > { %8564 = vmatprep.subr.bf16.mxu1 %v10484_v2 }
 0x5b4   : > { %9976 = vmatmul.mubr.msk.bf16.gmra.mrb[16].mxu0 %vm4908_vm3, %v14686_v63  ;;  %v7546_v63 = vsel %vm5796_vm7, %v7536_v55, %v7545_v51 }
 0x5b5   : > { %9979 = vmatprep.mubr.msk.bf16.mxu0 %vm4908_vm3, %v7519_v27 }
 0x5bc   : > { %9980 = vmatmul.mubr.msk.bf16.gmra.mrb[20].mxu0 %vm4908_vm3, %v7528_v34 }
 0x5bd   : > { %9983 = vmatprep.mubr.msk.bf16.mxu0 %vm4908_vm3, %v7537_v8 }
 0x5c4   : > { %9984 = vmatmul.mubr.msk.bf16.gmra.mrb[24].mxu0 %vm4908_vm3, %v7546_v63 }
 0x5c5   : > { %9991 = vmatprep.mubr.msk.bf16.mxu0 %vm4908_vm3, %v7797_v32  ;;  %v10432_v32 = vld [vmem:[%s15396_s5 + $0x4] ss:$8 sps:$4 sm:$0xff]  }
 0x5c6   : > { %9242 = vmatprep.mubr.msk.bf16.mxu1 %vm8521_vm9, %v10432_v32 }
 0x5cc   : > { %9992 = vmatmul.mubr.msk.bf16.vlgmr.msra.gmra.mrb[0].mxu0 %vm4908_vm3, %v14661_v10  ;;  %v7816_v10 = vrot.slane %v15054_v36, 4 }
 0x5cd   : > { %10020 = vmatpush3.bf16.msra.mxu0 %v10428_v33  ;;  %9995 = vmatprep.mubr.msk.bf16.mxu0 %vm4908_vm3, %v14681_v22 }
 0x5ce   : > { %10021 = vmatprep.subr.bf16.mxu0 %v10429_v48  ;;  %v7817_v22 = vsel %vm4926_vm6, %v14853_v24, %v7816_v10  ;;  %v7822_v24 = vrot.slane %v7407_v9, 4 }
 0x5d1   : > { %10022 = vmatpush3.bf16.msra.mxu0 %v10429_v48 }
 0x5d4   : > { %9996 = vmatmul.mubr.msk.bf16.gmra.mrb[4].mxu0 %vm4908_vm3, %v14721_v14  ;;  %v7818_v14 = vrot.slane %v15067_v44, 4 }
 0x5d5   : > { %9999 = vmatprep.mubr.msk.bf16.mxu0 %vm4908_vm3, %v14748_v50  ;;  %v8058_v50 = vshrl.u32 %v7774_v38, 16 }
 0x5d7   : > { %v8060_v21 = vrot.slane %v8058_v50, 4 }
 0x5dc   : > { %10000 = vmatmul.mubr.msk.bf16.gmra.mrb[8].mxu0 %vm4908_vm3, %v14789_v19  ;;  %v8061_v19 = vshll.u32 %v7774_v38, 16 }
 0x5dd   : > { %10003 = vmatprep.mubr.msk.bf16.mxu0 %vm4908_vm3, %v14822_v45  ;;  %v7820_v45 = vrot.slane %v15070_v5, 4 }
 0x5de   : > { %v8063_v3 = vrot.slane %v8061_v19, 5 }
 0x5df   : > { %v7823_v57 = vsel %vm4926_vm6, %v7820_v45, %v7822_v24 }
 0x5e4   : > { %10004 = vmatmul.mubr.msk.bf16.gmra.mrb[12].mxu0 %vm4908_vm3, %v14840_v61  ;;  %v7819_v61 = vsel %vm4926_vm6, %v7816_v10, %v7818_v14 }
 0x5e5   : > { %10007 = vmatprep.mubr.msk.bf16.mxu0 %vm4908_vm3, %v14848_v18  ;;  %v7821_v18 = vsel %vm4926_vm6, %v7818_v14, %v7820_v45 }
 0x5ec   : > { %10008 = vmatmul.mubr.msk.bf16.gmra.mrb[16].mxu0 %vm4908_vm3, %v14863_v58  ;;  %v8064_v58 = vor.u32 %v8063_v3, %v8060_v21 }
 0x5ed   : > { %10011 = vmatprep.mubr.msk.bf16.mxu0 %vm4908_vm3, %v7817_v22 }
 0x5ee   : > { %v8068_v7 = vsel %vm6136_vm8, %v8064_v58, %v14723_v1  ;;  %v8105_v1 = vrot.slane %v7512_v25, 4 }
 0x5f4   : > { %10012 = vmatmul.mubr.msk.bf16.gmra.mrb[20].mxu0 %vm4908_vm3, %v7819_v61 }
 0x5f5   : > { %10015 = vmatprep.mubr.msk.bf16.mxu0 %vm4908_vm3, %v7821_v18 }
 0x5fc   : > { %10016 = vmatmul.mubr.msk.bf16.gmra.mrb[24].mxu0 %vm4908_vm3, %v7823_v57 }
 0x5fd   : > { %10023 = vmatprep.mubr.msk.bf16.mxu0 %vm4908_vm3, %v8068_v7 }
 0x604   : > { %10024 = vmatmul.mubr.msk.bf16.vlgmr.msra.gmra.mrb[0].mxu0 %vm4908_vm3, %v14953_v6  ;;  %v8106_v6 = vrot.slane %v7515_v17, 5 }
 0x605   : > { %10027 = vmatprep.mubr.msk.bf16.mxu0 %vm4908_vm3, %v14758_v35 }
 0x606   : > { %v8107_v35 = vor.u32 %v8106_v6, %v8105_v1 }
 0x60c   : > { %10028 = vmatmul.mubr.msk.bf16.gmra.mrb[4].mxu0 %vm4908_vm3, %v14765_v37  ;;  %v8109_v37 = vrot.slane %v7521_v54, 4 }
 0x60d   : > { %10031 = vmatprep.mubr.msk.bf16.mxu0 %vm4908_vm3, %v14772_v60  ;;  %v8110_v60 = vrot.slane %v7524_v0, 5 }
 0x614   : > { %10032 = vmatmul.mubr.msk.bf16.gmra.mrb[8].mxu0 %vm4908_vm3, %v14779_v41  ;;  %v8108_v41 = vsel %vm6136_vm8, %v14803_v52, %v8107_v35 }
 0x615   : > { %10035 = vmatprep.mubr.msk.bf16.mxu0 %vm4908_vm3, %v14792_v30  ;;  %v8113_v30 = vrot.slane %v7530_v53, 4 }
 0x617   : > { %v8115_v33 = vor.u32 %v8114_v23, %v8113_v30 }
 0x61c   : > { %10036 = vmatmul.mubr.msk.bf16.gmra.mrb[12].mxu0 %vm4908_vm3, %v14801_v16  ;;  %v8051_v16 = vld [vmem:[%s14436_s18 + $0x80] sm:$0x1f] }
 0x61d   : > { %10039 = vmatprep.mubr.msk.bf16.mxu0 %vm4908_vm3, %v14812_v40  ;;  %v8111_v40 = vor.u32 %v8110_v60, %v8109_v37  ;;  %v8118_v42 = vshrl.u32 %v8051_v16, 16  ;;  %v8121_v46 = vshll.u32 %v8051_v16, 16 }
 0x61f   : > { %v8112_v62 = vsel %vm6136_vm8, %v8107_v35, %v8111_v40  ;;  %v8120_v49 = vrot.slane %v8118_v42, 4  ;;  %v8123_v52 = vrot.slane %v8121_v46, 5  ;;  %v8116_v36 = vsel %vm6136_vm8, %v8111_v40, %v8115_v33 }
 0x621   : > { %v8124_v25 = vor.u32 %v8123_v52, %v8120_v49 }
 0x623   : > { %v8125_v17 = vsel %vm6136_vm8, %v8115_v33, %v8124_v25 }
 0x624   : > { %10040 = vmatmul.mubr.msk.bf16.gmra.mrb[16].mxu0 %vm4908_vm3, %v15000_v47 }
 0x625   : > { %10043 = vmatprep.mubr.msk.bf16.mxu0 %vm4908_vm3, %v8108_v41 }
 0x62c   : > { %10044 = vmatmul.mubr.msk.bf16.gmra.mrb[20].mxu0 %vm4908_vm3, %v8112_v62 }
 0x62d   : > { %10047 = vmatprep.mubr.msk.bf16.mxu0 %vm4908_vm3, %v8116_v36 }
 0x634   : > { %10048 = vmatmul.mubr.msk.bf16.gmra.mrb[24].mxu0 %vm4908_vm3, %v8125_v17 }
 0x63a   : > { %v9833_v47 = vpop.f32.mrb[0].mxu1 }
 0x63b   : > { %v6294_v20 = vpop.f32.mrb[1].mxu1 }
 0x63c   : > { %v9834_v12 = vpop.f32.mrb[2].mxu1 }
 0x63d   : > { %v6297_v44 = vpop.f32.mrb[3].mxu1 }
 0x642   : > { %v9837_v5 = vpop.f32.mrb[4].mxu1 }
 0x643   : > { %v6310_v54 = vpop.f32.mrb[5].mxu1 }
 0x644   : > { %v9838_v0 = vpop.f32.mrb[6].mxu1 }
 0x645   : > { %v6313_v29 = vpop.f32.mrb[7].mxu1 }
 0x64a   : > { %v9841_v53 = vpop.f32.mrb[8].mxu1 }
 0x64b   : > { %v6326_v15 = vpop.f32.mrb[9].mxu1 }
 0x64c   : > { %v9842_v31 = vpop.f32.mrb[10].mxu1 }
 0x64d   : > { %v6329_v39 = vpop.f32.mrb[11].mxu1 }
 0x652   : > { %v9845_v27 = vpop.f32.mrb[12].mxu1 }
 0x653   : > { %v15180_v26 = vpop.f32.mrb[13].mxu1 }
 0x654   : > { %v15182_v11 = vpop.f32.mrb[14].mxu1 }
 0x655   : > { %v15184_v9 = vpop.f32.mrb[15].mxu1 }
 0x65a   : > { %v15187_v59 = vpop.f32.mrb[16].mxu1 }
 0x65b   : > { %v15189_v43 = vpop.f32.mrb[17].mxu1 }
 0x65c   : > { %v15191_v55 = vpop.f32.mrb[18].mxu1 }
 0x65d   : > { %v15193_v34 = vpop.f32.mrb[19].mxu1 }
 0x662   : > { %v15195_v56 = vpop.f32.mrb[20].mxu1 }
 0x663   : > { %v15197_v13 = vpop.f32.mrb[21].mxu1 }
 0x664   : > { %v15199_v8 = vpop.f32.mrb[22].mxu1 }
 0x665   : > { %v15201_v38 = vpop.f32.mrb[23].mxu1 }
 0x66a   : > { %v15203_v51 = vpop.f32.mrb[24].mxu1 }
 0x66b   : > { %v15205_v28 = vpop.f32.mrb[25].mxu1 }
 0x66c   : > { %v15207_v63 = vpop.f32.mrb[26].mxu1 }
 0x66d   : > { %v15209_v4 = vpop.f32.mrb[27].mxu1 }
 0x6d7   : > { %v10025_v48 = vpop.f32.mrb[0].mxu0 }
 0x6d8   : > { %v10057_v10 = vadd.f32 %v10025_v48, %v9833_v47  ;;  %v8214_v22 = vpop.f32.mrb[1].mxu0 }
 0x6d9   : > { %v10058_v14 = vadd.f32 %v8214_v22, %v6294_v20  ;;  %v10026_v50 = vpop.f32.mrb[2].mxu0 }
 0x6da   : > { %v10059_v19 = vadd.f32 %v10026_v50, %v9834_v12  ;;  %v8217_v45 = vpop.f32.mrb[3].mxu0 }
 0x6db   : > { %v10060_v61 = vadd.f32 %v8217_v45, %v6297_v44 }
 0x6dc   : > { %v8382_v18 = vpack.c.bf16 %v10059_v19, %v10057_v10 }
 0x6dd   : > { %v8381_v21 = vpack.c.bf16 %v10060_v61, %v10058_v14 }
 0x6df   : > { %v10029_v3 = vpop.f32.mrb[4].mxu0  ;;  %8565 = vmatpush1.bf16.msra.mxu1 %v8381_v21 }
 0x6e0   : > { %v10061_v24 = vadd.f32 %v10029_v3, %v9837_v5  ;;  %v8230_v58 = vpop.f32.mrb[5].mxu0  ;;  %8566 = vmatprep.subr.bf16.mxu1 %v10484_v2 }
 0x6e1   : > { %v10062_v57 = vadd.f32 %v8230_v58, %v6310_v54  ;;  %v10030_v7 = vpop.f32.mrb[6].mxu0  ;;  %v10441_v58 = vld [vmem:[%s15396_s5 + $0x30] ss:$8 sps:$4 sm:$0xff]  }
 0x6e2   : > { %v10063_v1 = vadd.f32 %v10030_v7, %v9838_v0  ;;  %v8233_v6 = vpop.f32.mrb[7].mxu0  ;;  %v10444_v7 = vld [vmem:[%s15396_s5 + $0x40] ss:$8 sps:$4 sm:$0xff]  }
 0x6e3   : > { %v10064_v35 = vadd.f32 %v8233_v6, %v6313_v29  ;;  %8567 = vmatpush1.bf16.msra.mxu1 %v8382_v18  ;;  %v10447_v6 = vld [vmem:[%s15396_s5 + $0x50] ss:$8 sps:$4 sm:$0xff]  }
 0x6e4   : > { %v8384_v37 = vpack.c.bf16 %v10063_v1, %v10061_v24  ;;  %8568 = vmatprep.subr.bf16.mxu1 %v10484_v2  ;;  %v10439_v24 = vld [vmem:[%s15396_s5 + $0x34] ss:$8 sps:$4 sm:$0xff]  }
 0x6e5   : > { %v8383_v60 = vpack.c.bf16 %v10064_v35, %v10062_v57  ;;  %v10442_v57 = vld [vmem:[%s15396_s5 + $0x44] ss:$8 sps:$4 sm:$0xff]   ;;  %v10445_v1 = vld [vmem:[%s15396_s5 + $0x54] ss:$8 sps:$4 sm:$0xff]  }
 0x6e6   : > { %v10448_v35 = vld [vmem:[%s15396_s5 + $0x64] ss:$8 sps:$4 sm:$0xff]  }
 0x6e7   : > { %v10033_v41 = vpop.f32.mrb[8].mxu0  ;;  %8569 = vmatpush1.bf16.msra.mxu1 %v8383_v60  ;;  %v10451_v60 = vld [vmem:[%s15396_s5 + $0x74] ss:$8 sps:$4 sm:$0xff]  }
 0x6e8   : > { %v10065_v30 = vadd.f32 %v10033_v41, %v9841_v53  ;;  %v8246_v23 = vpop.f32.mrb[9].mxu0  ;;  %8570 = vmatprep.subr.bf16.mxu1 %v10484_v2  ;;  %v10453_v41 = vld [vmem:[%s15396_s5 + $0x70] ss:$8 sps:$4 sm:$0xff]  }
 0x6e9   : > { %v10066_v16 = vadd.f32 %v8246_v23, %v6326_v15  ;;  %v10034_v40 = vpop.f32.mrb[10].mxu0  ;;  %v10456_v23 = vld [vmem:[%s15396_s5 + $0x80] ss:$8 sps:$4 sm:$0xff]  }
 0x6ea   : > { %v10067_v42 = vadd.f32 %v10034_v40, %v9842_v31  ;;  %v8249_v46 = vpop.f32.mrb[11].mxu0  ;;  %v10459_v40 = vld [vmem:[%s15396_s5 + $0x90] ss:$8 sps:$4 sm:$0xff]  }
 0x6eb   : > { %v10068_v33 = vadd.f32 %v8249_v46, %v6329_v39  ;;  %8571 = vmatpush1.bf16.msra.mxu1 %v8384_v37  ;;  %v10450_v37 = vld [vmem:[%s15396_s5 + $0x60] ss:$8 sps:$4 sm:$0xff]  }
 0x6ec   : > { %v8386_v62 = vpack.c.bf16 %v10067_v42, %v10065_v30  ;;  %8572 = vmatprep.subr.bf16.mxu1 %v10484_v2  ;;  %v10454_v30 = vld [vmem:[%s15396_s5 + $0x84] ss:$8 sps:$4 sm:$0xff]   ;;  %v10462_v46 = vld [vmem:[%s15396_s5 + $0xa0] ss:$8 sps:$4 sm:$0xff]  }
 0x6ed   : > { %v8385_v49 = vpack.c.bf16 %v10068_v33, %v10066_v16  ;;  %v10457_v16 = vld [vmem:[%s15396_s5 + $0x94] ss:$8 sps:$4 sm:$0xff]   ;;  %v10460_v42 = vld [vmem:[%s15396_s5 + $0xa4] ss:$8 sps:$4 sm:$0xff]  }
 0x6ee   : > { %v10463_v33 = vld [vmem:[%s15396_s5 + $0xb4] ss:$8 sps:$4 sm:$0xff]  }
 0x6ef   : > { %v10037_v52 = vpop.f32.mrb[12].mxu0  ;;  %8573 = vmatpush1.bf16.msra.mxu1 %v8385_v49  ;;  %v10466_v49 = vld [vmem:[%s15396_s5 + $0xc4] ss:$8 sps:$4 sm:$0xff]  }
 0x6f0   : > { %v10069_v36 = vadd.f32 %v10037_v52, %v9845_v27  ;;  %v8262_v25 = vpop.f32.mrb[13].mxu0  ;;  %8574 = vmatprep.subr.bf16.mxu1 %v10484_v2  ;;  %v10468_v52 = vld [vmem:[%s15396_s5 + $0xc0] ss:$8 sps:$4 sm:$0xff]  }
 0x6f1   : > { %v10070_v17 = vadd.f32 %v8262_v25, %v15180_v26  ;;  %v10038_v47 = vpop.f32.mrb[14].mxu0  ;;  %v10471_v25 = vld [vmem:[%s15396_s5 + $0xd0] ss:$8 sps:$4 sm:$0xff]  }
 0x6f2   : > { %v10071_v20 = vadd.f32 %v10038_v47, %v15182_v11  ;;  %v8265_v12 = vpop.f32.mrb[15].mxu0 }
 0x6f3   : > { %v10072_v44 = vadd.f32 %v8265_v12, %v15184_v9  ;;  %8575 = vmatpush1.bf16.msra.mxu1 %v8386_v62  ;;  %v10465_v62 = vld [vmem:[%s15396_s5 + $0xb0] ss:$8 sps:$4 sm:$0xff]  }
 0x6f4   : > { %v8388_v5 = vpack.c.bf16 %v10071_v20, %v10069_v36  ;;  %8576 = vmatprep.subr.bf16.mxu1 %v10484_v2  ;;  %v10469_v36 = vld [vmem:[%s15396_s5 + $0xd4] ss:$8 sps:$4 sm:$0xff]  }
 0x6f5   : > { %v8387_v54 = vpack.c.bf16 %v10072_v44, %v10070_v17 }
 0x6f7   : > { %v10041_v0 = vpop.f32.mrb[16].mxu0  ;;  %8577 = vmatpush1.bf16.msra.mxu1 %v8387_v54 }
 0x6f8   : > { %v10073_v29 = vadd.f32 %v10041_v0, %v15187_v59  ;;  %v8278_v53 = vpop.f32.mrb[17].mxu0  ;;  %8578 = vmatprep.subr.bf16.mxu1 %v10484_v2 }
 0x6f9   : > { %v10074_v15 = vadd.f32 %v8278_v53, %v15189_v43  ;;  %v10042_v31 = vpop.f32.mrb[18].mxu0 }
 0x6fa   : > { %v10075_v39 = vadd.f32 %v10042_v31, %v15191_v55  ;;  %v8281_v27 = vpop.f32.mrb[19].mxu0 }
 0x6fb   : > { %v10076_v26 = vadd.f32 %v8281_v27, %v15193_v34  ;;  %8579 = vmatpush1.bf16.msra.mxu1 %v8388_v5 }
 0x6fc   : > { %v8390_v11 = vpack.c.bf16 %v10075_v39, %v10073_v29  ;;  %8580 = vmatprep.subr.bf16.mxu1 %v10484_v2 }
 0x6fd   : > { %v8389_v9 = vpack.c.bf16 %v10076_v26, %v10074_v15 }
 0x6ff   : > { %v10045_v32 = vpop.f32.mrb[20].mxu0  ;;  %8581 = vmatpush1.bf16.msra.mxu1 %v8389_v9 }
 0x700   : > { %v10077_v59 = vadd.f32 %v10045_v32, %v15195_v56  ;;  %v8294_v48 = vpop.f32.mrb[21].mxu0  ;;  %8582 = vmatprep.subr.bf16.mxu1 %v10484_v2 }
 0x701   : > { %v10078_v43 = vadd.f32 %v8294_v48, %v15197_v13  ;;  %v10046_v10 = vpop.f32.mrb[22].mxu0 }
 0x702   : > { %v10079_v55 = vadd.f32 %v10046_v10, %v15199_v8  ;;  %v8297_v22 = vpop.f32.mrb[23].mxu0 }
 0x703   : > { %v10080_v34 = vadd.f32 %v8297_v22, %v15201_v38  ;;  %8583 = vmatpush1.bf16.msra.mxu1 %v8390_v11 }
 0x704   : > { %v8392_v14 = vpack.c.bf16 %v10079_v55, %v10077_v59  ;;  %8584 = vmatprep.subr.bf16.mxu1 %v10484_v2 }
 0x705   : > { %v8391_v50 = vpack.c.bf16 %v10080_v34, %v10078_v43 }
 0x707   : > { %v10049_v19 = vpop.f32.mrb[24].mxu0  ;;  %8585 = vmatpush1.bf16.msra.mxu1 %v8391_v50 }
 0x708   : > { %v10081_v56 = vadd.f32 %v10049_v19, %v15203_v51  ;;  %v8310_v45 = vpop.f32.mrb[25].mxu0  ;;  %8586 = vmatprep.subr.bf16.mxu1 %v10484_v2  ;;  %v10430_v51 = vld [vmem:[%s15396_s5] ss:$8 sps:$4 sm:$0xff]  }
 0x709   : > { %v10082_v13 = vadd.f32 %v8310_v45, %v15205_v28  ;;  %v10050_v61 = vpop.f32.mrb[26].mxu0  ;;  %v10433_v28 = vld [vmem:[%s15396_s5 + $0x14] ss:$8 sps:$4 sm:$0xff]  }
 0x70a   : > { %v10083_v8 = vadd.f32 %v10050_v61, %v15207_v63  ;;  %v8313_v18 = vpop.f32.mrb[27].mxu0  ;;  %v10435_v63 = vld [vmem:[%s15396_s5 + $0x10] ss:$8 sps:$4 sm:$0xff]  }
 0x70b   : > { %v10084_v38 = vadd.f32 %v8313_v18, %v15209_v4  ;;  %8587 = vmatpush1.bf16.msra.mxu1 %v8392_v14  ;;  %v10438_v4 = vld [vmem:[%s15396_s5 + $0x20] ss:$8 sps:$4 sm:$0xff]  }
 0x70c   : > { %v8394_v21 = vpack.c.bf16 %v10083_v8, %v10081_v56  ;;  %8588 = vmatprep.subr.bf16.mxu1 %v10484_v2 }
 0x70d   : > { %v8393_v3 = vpack.c.bf16 %v10084_v38, %v10082_v13 }
 0x70f   : > { %8589 = vmatpush1.bf16.msra.mxu1 %v8393_v3 }
 0x710   : > { %8590 = vmatprep.subr.bf16.mxu1 %v10484_v2  ;;  %v10436_v2 = vld [vmem:[%s15396_s5 + $0x24] ss:$8 sps:$4 sm:$0xff]  }
 0x713   : > { %8591 = vmatpush1.bf16.msra.mxu1 %v8394_v21 }
 0x716   : > { %8597 = vmatmul.mubr.bf16.vlgmr.msra.gmra.mrb[28].mxu1 %v10430_v51 }
 0x717   : > { %9243 = vmatprep.mubr.msk.bf16.mxu1 %vm8521_vm9, %v10433_v28 }
 0x71e   : > { %8605 = vmatmul.mubr.bf16.gmra.mrb[32].mxu1 %v10435_v63 }
 0x71f   : > { %9244 = vmatprep.mubr.msk.bf16.mxu1 %vm8521_vm9, %v10436_v2 }
 0x726   : > { %8613 = vmatmul.mubr.bf16.gmra.mrb[36].mxu1 %v10438_v4 }
 0x727   : > { %9245 = vmatprep.mubr.msk.bf16.mxu1 %vm8521_vm9, %v10439_v24 }
 0x72e   : > { %8621 = vmatmul.mubr.bf16.gmra.mrb[40].mxu1 %v10441_v58 }
 0x72f   : > { %9246 = vmatprep.mubr.msk.bf16.mxu1 %vm8521_vm9, %v10442_v57 }
 0x736   : > { %8629 = vmatmul.mubr.bf16.gmra.mrb[44].mxu1 %v10444_v7 }
 0x737   : > { %9247 = vmatprep.mubr.msk.bf16.mxu1 %vm8521_vm9, %v10445_v1 }
 0x73e   : > { %8637 = vmatmul.mubr.bf16.gmra.mrb[48].mxu1 %v10447_v6 }
 0x73f   : > { %9248 = vmatprep.mubr.msk.bf16.mxu1 %vm8521_vm9, %v10448_v35 }
 0x746   : > { %8645 = vmatmul.mubr.bf16.gmra.mrb[52].mxu1 %v10450_v37 }
 0x747   : > { %9249 = vmatprep.mubr.msk.bf16.mxu1 %vm8521_vm9, %v10451_v60 }
 0x74e   : > { %8653 = vmatmul.mubr.bf16.gmra.mrb[56].mxu1 %v10453_v41 }
 0x74f   : > { %9250 = vmatprep.mubr.msk.bf16.mxu1 %vm8521_vm9, %v10454_v30  ;;  %v9256_v30 = vld [vmem:[%s15395_s4] ss:$0 sm:$0xff] }
 0x756   : > { %8661 = vmatmul.mubr.bf16.gmra.mrb[60].mxu1 %v10456_v23 }
 0x757   : > { %9251 = vmatprep.mubr.msk.bf16.mxu1 %vm8521_vm9, %v10457_v16 }
 0x75e   : > { %8669 = vmatmul.mubr.bf16.gmra.mrb[64].mxu1 %v10459_v40 }
 0x75f   : > { %9252 = vmatprep.mubr.msk.bf16.mxu1 %vm8521_vm9, %v10460_v42 }
 0x766   : > { %8677 = vmatmul.mubr.bf16.gmra.mrb[68].mxu1 %v10462_v46 }
 0x767   : > { %9253 = vmatprep.mubr.msk.bf16.mxu1 %vm8521_vm9, %v10463_v33 }
 0x76e   : > { %8685 = vmatmul.mubr.bf16.gmra.mrb[72].mxu1 %v10465_v62 }
 0x76f   : > { %9254 = vmatprep.mubr.msk.bf16.mxu1 %vm8521_vm9, %v10466_v49 }
 0x776   : > { %8693 = vmatmul.mubr.bf16.gmra.mrb[76].mxu1 %v10468_v52 }
 0x777   : > { %9255 = vmatprep.mubr.msk.bf16.mxu1 %vm8521_vm9, %v10469_v36 }
 0x77e   : > { %8701 = vmatmul.mubr.bf16.gmra.mrb[80].mxu1 %v10471_v25 }
 0x7e9   : > { %v8598_v17 = vpop.f32.mrb[28].mxu1 }
 0x7ea   : > { %v8600_v47 = vpop.f32.mrb[29].mxu1 }
 0x7eb   : > { %v15337_v20 = vpop.f32.mrb[30].mxu1 }
 0x7ec   : > { %v8603_v12 = vpop.f32.mrb[31].mxu1 }
 0x7f1   : > { %v15339_v44 = vpop.f32.mrb[32].mxu1 }
 0x7f2   : > { %v8608_v5 = vpop.f32.mrb[33].mxu1 }
 0x7f3   : > { %v15341_v54 = vpop.f32.mrb[34].mxu1 }
 0x7f4   : > { %v8611_v0 = vpop.f32.mrb[35].mxu1 }
 0x7f9   : > { %v15343_v29 = vpop.f32.mrb[36].mxu1 }
 0x7fa   : > { %v8616_v53 = vpop.f32.mrb[37].mxu1 }
 0x7fb   : > { %v15345_v15 = vpop.f32.mrb[38].mxu1 }
 0x7fc   : > { %v8619_v31 = vpop.f32.mrb[39].mxu1 }
 0x801   : > { %v15347_v39 = vpop.f32.mrb[40].mxu1 }
 0x802   : > { %v8624_v27 = vpop.f32.mrb[41].mxu1 }
 0x803   : > { %v8625_v26 = vpop.f32.mrb[42].mxu1 }
 0x804   : > { %v8709_v11 = vmax.f32 %v8598_v17, %v8625_v26  ;;  %v8627_v9 = vpop.f32.mrb[43].mxu1 }
 0x809   : > { %v8630_v32 = vpop.f32.mrb[44].mxu1 }
 0x80a   : > { %v8710_v59 = vmax.f32 %v15337_v20, %v8630_v32  ;;  %v8632_v48 = vpop.f32.mrb[45].mxu1 }
 0x80b   : > { %v8633_v43 = vpop.f32.mrb[46].mxu1 }
 0x80c   : > { %v8711_v10 = vmax.f32 %v15339_v44, %v8633_v43  ;;  %v8635_v55 = vpop.f32.mrb[47].mxu1 }
 0x811   : > { %v8638_v22 = vpop.f32.mrb[48].mxu1 }
 0x812   : > { %v8712_v34 = vmax.f32 %v15341_v54, %v8638_v22  ;;  %v8640_v14 = vpop.f32.mrb[49].mxu1 }
 0x813   : > { %v8641_v50 = vpop.f32.mrb[50].mxu1 }
 0x814   : > { %v8713_v19 = vmax.f32 %v15343_v29, %v8641_v50  ;;  %v8643_v56 = vpop.f32.mrb[51].mxu1 }
 0x819   : > { %v15353_v45 = vpop.f32.mrb[52].mxu1 }
 0x81a   : > { %v8714_v13 = vmax.f32 %v15345_v15, %v15353_v45  ;;  %v8648_v61 = vpop.f32.mrb[53].mxu1 }
 0x81b   : > { %v15357_v8 = vpop.f32.mrb[54].mxu1 }
 0x81c   : > { %v8715_v18 = vmax.f32 %v15347_v39, %v15357_v8  ;;  %v8651_v38 = vpop.f32.mrb[55].mxu1 }
 0x821   : > { %v8654_v21 = vpop.f32.mrb[56].mxu1 }
 0x822   : > { %v8656_v3 = vpop.f32.mrb[57].mxu1 }
 0x823   : > { %v8657_v51 = vpop.f32.mrb[58].mxu1 }
 0x824   : > { %v8659_v28 = vpop.f32.mrb[59].mxu1 }
 0x829   : > { %v8662_v63 = vpop.f32.mrb[60].mxu1 }
 0x82a   : > { %v8664_v2 = vpop.f32.mrb[61].mxu1 }
 0x82b   : > { %v8665_v4 = vpop.f32.mrb[62].mxu1  ;;  %v8793_v2 = vld [vmem:[%s15368_s1 + $0x18] sm:$0x1] }
 0x82c   : > { %v8667_v24 = vpop.f32.mrb[63].mxu1 }
 0x831   : > { %v8670_v58 = vpop.f32.mrb[64].mxu1 }
 0x832   : > { %v8672_v57 = vpop.f32.mrb[65].mxu1 }
 0x833   : > { %v8673_v7 = vpop.f32.mrb[66].mxu1 }
 0x834   : > { %v8675_v1 = vpop.f32.mrb[67].mxu1 }
 0x839   : > { %v8678_v6 = vpop.f32.mrb[68].mxu1 }
 0x83a   : > { %v8680_v35 = vpop.f32.mrb[69].mxu1 }
 0x83b   : > { %v8681_v37 = vpop.f32.mrb[70].mxu1 }
 0x83c   : > { %v8716_v60 = vmax.f32 %v8654_v21, %v8681_v37  ;;  %v8683_v41 = vpop.f32.mrb[71].mxu1 }
 0x83e   : > { %v8723_v23 = vmax.f32 %v8709_v11, %v8716_v60 }
 0x840   : > { %v8737_v16 = vadd.f32 %v9256_v30, %v8723_v23 }
 0x841   : > { %v8686_v40 = vpop.f32.mrb[72].mxu1 }
 0x842   : > { %v8744_v42 = vmax.f32 %v8737_v16, 0.0  ;;  %v8717_v46 = vmax.f32 %v8657_v51, %v8686_v40  ;;  %v8688_v33 = vpop.f32.mrb[73].mxu1 }
 0x843   : > { %v8689_v62 = vpop.f32.mrb[74].mxu1 }
 0x844   : > { %v9266_v49 = vpack.c.bf16 %v8744_v42, %v8744_v42  ;;  %v8724_v52 = vmax.f32 %v8710_v59, %v8717_v46  ;;  %v8718_v36 = vmax.f32 %v8662_v63, %v8689_v62  ;;  %v8691_v25 = vpop.f32.mrb[75].mxu1 }
 0x846   : > { %8784 = vst.msk [vmem:[%s15368_s1] sm:$0xf] %vm8783_vm10, %v9266_v49  ;;  %v8738_v17 = vadd.f32 %v9256_v30, %v8724_v52  ;;  %v8725_v47 = vmax.f32 %v8711_v10, %v8718_v36 }
 0x848   : > { %v8745_v20 = vmax.f32 %v8738_v17, 0.0  ;;  %v8739_v12 = vadd.f32 %v9256_v30, %v8725_v47 }
 0x849   : > { %v8694_v44 = vpop.f32.mrb[76].mxu1 }
 0x84a   : > { %v9267_v5 = vpack.c.bf16 %v8745_v20, %v8745_v20  ;;  %v8746_v54 = vmax.f32 %v8739_v12, 0.0  ;;  %v8719_v0 = vmax.f32 %v8665_v4, %v8694_v44  ;;  %v8696_v29 = vpop.f32.mrb[77].mxu1 }
 0x84b   : > { %v8697_v53 = vpop.f32.mrb[78].mxu1 }
 0x84c   : > { %8785 = vst.msk [vmem:[%s15368_s1 + $0x4] sm:$0xf] %vm8783_vm10, %v9267_v5  ;;  %v9268_v31 = vpack.c.bf16 %v8746_v54, %v8746_v54  ;;  %v8726_v27 = vmax.f32 %v8712_v34, %v8719_v0  ;;  %v8720_v26 = vmax.f32 %v8670_v58, %v8697_v53  ;;  %v8699_v11 = vpop.f32.mrb[79].mxu1 }
 0x84e   : > { %8786 = vst.msk [vmem:[%s15368_s1 + $0x8] sm:$0xf] %vm8783_vm10, %v9268_v31  ;;  %v8740_v9 = vadd.f32 %v9256_v30, %v8726_v27  ;;  %v8727_v32 = vmax.f32 %v8713_v19, %v8720_v26 }
 0x850   : > { %v8747_v59 = vmax.f32 %v8740_v9, 0.0  ;;  %v8741_v48 = vadd.f32 %v9256_v30, %v8727_v32 }
 0x851   : > { %v8702_v43 = vpop.f32.mrb[80].mxu1 }
 0x852   : > { %v9269_v10 = vpack.c.bf16 %v8747_v59, %v8747_v59  ;;  %v8748_v55 = vmax.f32 %v8741_v48, 0.0  ;;  %v8721_v22 = vmax.f32 %v8673_v7, %v8702_v43  ;;  %v8704_v14 = vpop.f32.mrb[81].mxu1 }
 0x853   : > { %v8705_v50 = vpop.f32.mrb[82].mxu1 }
 0x854   : > { %8787 = vst.msk [vmem:[%s15368_s1 + $0xc] sm:$0xf] %vm8783_vm10, %v9269_v10  ;;  %v9270_v34 = vpack.c.bf16 %v8748_v55, %v8748_v55  ;;  %v8728_v56 = vmax.f32 %v8714_v13, %v8721_v22  ;;  %v8722_v61 = vmax.f32 %v8678_v6, %v8705_v50  ;;  %v8707_v19 = vpop.f32.mrb[83].mxu1 }
 0x856   : > { %8788 = vst.msk [vmem:[%s15368_s1 + $0x10] sm:$0xf] %vm8783_vm10, %v9270_v34  ;;  %v8742_v38 = vadd.f32 %v9256_v30, %v8728_v56  ;;  %v8729_v21 = vmax.f32 %v8715_v18, %v8722_v61 }
 0x858   : > { %v8749_v3 = vmax.f32 %v8742_v38, 0.0  ;;  %v8743_v51 = vadd.f32 %v9256_v30, %v8729_v21 }
 0x859   :  { %5523 = sbr.rel (!%p5521_p0) target bundleno = 1245 (0x4dd), region = 68 }
 0x85a   : > { %v9271_v28 = vpack.c.bf16 %v8749_v3, %v8749_v3  ;;  %v8750_v63 = vmax.f32 %v8743_v51, 0.0 }
 0x85c   : > { %8789 = vst.msk [vmem:[%s15368_s1 + $0x14] sm:$0xf] %vm8783_vm10, %v9271_v28  ;;  %v9272_v15 = vpack.c.bf16 %v8750_v63, %v8750_v63 }
 0x85e   : > { %v8794_v45 = vsel %vm8792_vm13, %v9272_v15, %v8793_v2 }
 0x85f   : > { %8795 = vst [vmem:[%s15368_s1 + $0x18] sm:$0x1] %v8794_v45 }

</bundles_post_ra>
